<compile_context>
chip_gen: v7x
topology: tpu7x:2x2x1
jax: 0.10.0
libtpu: 0.0.40
codegen_flags: <defaults>
</compile_context>

<pallas_src>
import math

import numpy as np
import jax
import jax.numpy as jnp
from jax import lax
from jax.experimental import pallas as pl
from jax.experimental.pallas import tpu as pltpu

# ----------------------------- configuration ---------------------------------
N_SCALARS_IN = 16          # mul_in x 0e
MUL_IN = 16                # multiplicity of equivariant input irreps
EQ_LS = (1, 2)             # equivariant l's (1o, 2e)
N_SCALARS_OUT = 8          # mul_out x 0e
MUL_OUT = 8                # multiplicity of equivariant output irreps
HIDDEN = 32                # hidden width of the ScalarMLPFunction MLPs
TILE_N = 512               # rows per grid step (keep <= N/2 on v7x so both TCs get work)

D_TOT = sum(2 * l + 1 for l in EQ_LS)                 # 8
EQ_FLAT_IN = MUL_IN * D_TOT                           # 128
EQ_FLAT_OUT = MUL_OUT * D_TOT                         # 64
IN_DIM = N_SCALARS_IN + EQ_FLAT_IN                    # 144
OUT_DIM = N_SCALARS_OUT + EQ_FLAT_OUT                 # 72
WEIGHT_NUMEL = len(EQ_LS) * MUL_IN * MUL_OUT          # 256
W_EXP_DIM = MUL_OUT * EQ_FLAT_IN                      # 1024 (lane-dense expanded weights)
Z_DIM = W_EXP_DIM + N_SCALARS_OUT                     # 1032 (fused second-layer output)


def _round_up(x, m):
    return (x + m - 1) // m * m


# --------------------------------- kernel ------------------------------------
def _readout_kernel(s_ref, x_ref, w1_ref, w2_ref, red_ref, out_ref):
    s = s_ref[...]                                   # [TN, 16]  f32 (lane-aligned)
    x_eq = x_ref[...]                                # [TN, 128] f32 (lane-aligned)

    # Fused first layers of inv_readout + weights_emb MLPs (tiny: 16-deep contraction;
    # keep full f32 precision so only the big matmuls run in bf16).
    h = jax.nn.silu(jnp.dot(s, w1_ref[...],
                            preferred_element_type=jnp.float32,
                            precision=lax.Precision.HIGHEST))        # [TN, 64]

    # Fused, block-diagonal second layers: bf16 operands, f32 accumulation.
    #   z[:, :1024] = expanded eq-linear weights  Wexp[n, v*128 + (l,u,m)] = W_l[n,u,v]
    #   z[:, 1024:] = invariant readout out_s
    z = jnp.dot(h.astype(jnp.bfloat16), w2_ref[...],
                preferred_element_type=jnp.float32)                  # [TN, 1032]

    # Equivariant linear, fully lane-dense.  Elementwise multiply stays f32 (v5e has no
    # bf16 VPU); the 8 trailing "ones" lanes pass out_s through the reduce matmul so the
    # final store is a single dense dot (no lane splice of 8 + 64 lanes).
    ones = jnp.ones((x_eq.shape[0], N_SCALARS_OUT), jnp.float32)
    x_ext = jnp.concatenate([x_eq] * MUL_OUT + [ones], axis=-1)      # [TN, 1032]
    prod = (z * x_ext).astype(jnp.bfloat16)                          # single f32->bf16 cast

    # Constant reduce matrix (bf16-exact entries): sums over u with 1/sqrt(mul_in),
    # routes out_s via identity rows, and emits the final [scalars | l=1 | l=2] layout.
    out_ref[...] = jnp.dot(prod, red_ref[...],
                           preferred_element_type=jnp.float32).astype(out_ref.dtype)


# ---------------------------- parameter packing --------------------------------
def pack_params(params):
    """Fold scales, MLP fusion, irreps-reshape bookkeeping into static packed weights."""
    inv_sqrt_in = 1.0 / math.sqrt(N_SCALARS_IN)
    inv_sqrt_h = 1.0 / math.sqrt(HIDDEN)
    inv_sqrt_u = 1.0 / math.sqrt(MUL_IN)

    # Fused first layer: [16, 64] = [w1_inv | w1_w], input-scale folded.  Kept f32.
    w1_cat = jnp.concatenate([params["w1_inv"], params["w1_w"]], axis=1) * inv_sqrt_in
    w1_cat = w1_cat.astype(jnp.float32)

    # Column expansion for the eq-weight branch:
    #   Wexp column j = v*128 + xoff(l,u,m)  sources  W column l*U*V + u*V + v
    col_src = np.empty((W_EXP_DIM,), dtype=np.int32)
    for v in range(MUL_OUT):
        xoff = 0
        for li, l in enumerate(EQ_LS):
            d = 2 * l + 1
            for u in range(MUL_IN):
                for m in range(d):
                    col_src[v * EQ_FLAT_IN + xoff] = li * MUL_IN * MUL_OUT + u * MUL_OUT + v
                    xoff += 1
    w2w_exp = params["w2_w"][:, col_src]                              # [32, 1024]

    # Fused block-diagonal second layer: [64, 1032] -> [Wexp lanes (1024) | invariant lanes (8)].
    # Stored in bf16 (operand of the bf16 MXU matmul; halves its DMA/VMEM footprint).
    w2_cat = jnp.zeros((2 * HIDDEN, Z_DIM), jnp.float32)
    w2_cat = w2_cat.at[:HIDDEN, W_EXP_DIM:].set(params["w2_inv"])
    w2_cat = w2_cat.at[HIDDEN:, :W_EXP_DIM].set(w2w_exp)
    w2_cat = (w2_cat * inv_sqrt_h).astype(jnp.bfloat16)

    # Constant reduce matrix [1032, 72]:
    #   rows   0..1023 : sum over u, apply 1/sqrt(mul_in), output columns in
    #                    inverse_reshape_irreps order (per l, v-outer / m-inner), shifted by 8
    #   rows 1024..1031: identity into columns 0..7 (invariant out_s pass-through)
    # Entries are 0, 0.25, 1.0 -> exact in bf16.
    red = np.zeros((Z_DIM, OUT_DIM), dtype=np.float32)
    for i in range(N_SCALARS_OUT):
        red[W_EXP_DIM + i, i] = 1.0
    c_base = N_SCALARS_OUT
    xoff_l = 0
    for li, l in enumerate(EQ_LS):
        d = 2 * l + 1
        for v in range(MUL_OUT):
            for u in range(MUL_IN):
                for m in range(d):
                    red[v * EQ_FLAT_IN + xoff_l + u * d + m, c_base + v * d + m] = inv_sqrt_u
        c_base += MUL_OUT * d
        xoff_l += MUL_IN * d
    red_ext = jnp.asarray(red, dtype=jnp.bfloat16)

    return w1_cat, w2_cat, red_ext


# -------------------------------- wrapper -------------------------------------
def readout_forward(features, packed, *, tile_n=TILE_N):
    w1_cat, w2_cat, red_ext = packed
    n = features.shape[0]

    # Split into lane-aligned scalar / equivariant inputs so the kernel sees x_eq
    # starting at lane 0 (no cross-vreg realignment per tile).  In a real pipeline the
    # producer should emit these two arrays directly.
    s = features[:, :N_SCALARS_IN]
    x = features[:, N_SCALARS_IN:]

    tile = min(tile_n, _round_up(max(n, 1), 8))
    n_pad = _round_up(n, tile)
    if n_pad != n:
        # Zero rows yield zero outputs (bias-free MLPs, silu(0)=0) -> padding is safe.
        s = jnp.pad(s, ((0, n_pad - n), (0, 0)))
        x = jnp.pad(x, ((0, n_pad - n), (0, 0)))

    out = pl.pallas_call(
        _readout_kernel,
        grid=(n_pad // tile,),
        in_specs=[
            pl.BlockSpec((tile, N_SCALARS_IN), lambda i: (i, 0)),
            pl.BlockSpec((tile, EQ_FLAT_IN), lambda i: (i, 0)),
            # Constant operands: constant index_maps -> block index never changes, so the
            # pipeline does not re-issue their DMAs across grid steps (< 1 MiB VMEM total).
            pl.BlockSpec((N_SCALARS_IN, 2 * HIDDEN), lambda i: (0, 0)),
            pl.BlockSpec((2 * HIDDEN, Z_DIM), lambda i: (0, 0)),
            pl.BlockSpec((Z_DIM, OUT_DIM), lambda i: (0, 0)),
        ],
        out_specs=pl.BlockSpec((tile, OUT_DIM), lambda i: (i, 0)),
        out_shape=jax.ShapeDtypeStruct((n_pad, OUT_DIM), jnp.float32),
        compiler_params=pltpu.CompilerParams(
            dimension_semantics=("parallel",),
            vmem_limit_bytes=32 * 1024 * 1024),
    )(s, x, w1_cat, w2_cat, red_ext)

    return out[:n] if n_pad != n else out


# ---------------------------- pure-JAX reference ------------------------------
def readout_reference(features, params):
    P = lax.Precision.HIGHEST
    N = features.shape[0]
    s = features[:, :N_SCALARS_IN]
    h = jax.nn.silu(jnp.dot(s, params["w1_inv"], precision=P) / math.sqrt(N_SCALARS_IN))
    out_s = jnp.dot(h, params["w2_inv"], precision=P) / math.sqrt(HIDDEN)
    hw = jax.nn.silu(jnp.dot(s, params["w1_w"], precision=P) / math.sqrt(N_SCALARS_IN))
    W = jnp.dot(hw, params["w2_w"], precision=P) / math.sqrt(HIDDEN)
    off = N_SCALARS_IN
    parts = [out_s]
    for li, l in enumerate(EQ_LS):
        d = 2 * l + 1
        x_l = features[:, off:off + MUL_IN * d].reshape(N, MUL_IN, d)
        W_l = W[:, li * MUL_IN * MUL_OUT:(li + 1) * MUL_IN * MUL_OUT].reshape(N, MUL_IN, MUL_OUT)
        y_l = jnp.einsum("nud,nuv->nvd", x_l, W_l, precision=P) / math.sqrt(MUL_IN)
        parts.append(y_l.reshape(N, MUL_OUT * d))
        off += MUL_IN * d
    return jnp.concatenate(parts, axis=-1)


# ----------------------------------- main -------------------------------------
if __name__ == "__main__":
    key = jax.random.PRNGKey(0)
    kf, k1, k2, k3, k4 = jax.random.split(key, 5)

    N = 1000  # rows (edges); pads to 1024 -> 2 grid steps of TILE_N = 512
    features = jax.random.normal(kf, (N, IN_DIM), dtype=jnp.float32)
    params = {
        "w1_inv": jax.random.normal(k1, (N_SCALARS_IN, HIDDEN), dtype=jnp.float32),
        "w2_inv": jax.random.normal(k2, (HIDDEN, N_SCALARS_OUT), dtype=jnp.float32),
        "w1_w":   jax.random.normal(k3, (N_SCALARS_IN, HIDDEN), dtype=jnp.float32),
        "w2_w":   jax.random.normal(k4, (HIDDEN, WEIGHT_NUMEL), dtype=jnp.float32),
    }

    packed = pack_params(params)
    out = jax.block_until_ready(readout_forward(features, packed))
    assert out.shape == (N, OUT_DIM), out.shape

    ref = readout_reference(features, params)
    max_err = float(jnp.max(jnp.abs(out - ref)))
    assert bool(jnp.allclose(out, ref, rtol=2e-2, atol=2e-2)), f"max abs err {max_err}"

    print("KERNEL_OK")
</pallas_src>

<mosaic_0001>
module attributes {stable_mosaic.version = 11 : i64} {
  func.func @_readout_kernel(%arg0: i32, %arg1: memref<512x16xf32, #tpu.memory_space<vmem>>, %arg2: memref<512x128xf32, #tpu.memory_space<vmem>>, %arg3: memref<16x64xf32, #tpu.memory_space<vmem>>, %arg4: memref<64x1032xbf16, #tpu.memory_space<vmem>>, %arg5: memref<1032x72xbf16, #tpu.memory_space<vmem>>, %arg6: memref<512x72xf32, #tpu.memory_space<vmem>>) attributes {dimension_semantics = [#tpu.dimension_semantics<parallel>], iteration_bounds = array<i64: 2>, scalar_prefetch = 0 : i64, scratch_operands = 0 : i64, tpu.core_type = #tpu.core_type<tc>, window_params = [{transform_indices = @transform_0, window_bounds = array<i64: 512, 16>}, {transform_indices = @transform_1, window_bounds = array<i64: 512, 128>}, {pipeline_mode = #tpu.pipeline_mode<synchronous>, transform_indices = @transform_2, window_bounds = array<i64: 16, 64>}, {pipeline_mode = #tpu.pipeline_mode<synchronous>, transform_indices = @transform_3, window_bounds = array<i64: 64, 1032>}, {pipeline_mode = #tpu.pipeline_mode<synchronous>, transform_indices = @transform_4, window_bounds = array<i64: 1032, 72>}, {transform_indices = @transform_5, window_bounds = array<i64: 512, 72>}]} {
    %c0 = arith.constant 0 : index
    %c0_0 = arith.constant 0 : index
    %0 = vector.load %arg1[%c0, %c0_0] : memref<512x16xf32, #tpu.memory_space<vmem>>, vector<512x16xf32>
    %c0_1 = arith.constant 0 : index
    %c0_2 = arith.constant 0 : index
    %1 = vector.load %arg2[%c0_1, %c0_2] : memref<512x128xf32, #tpu.memory_space<vmem>>, vector<512x128xf32>
    %c0_3 = arith.constant 0 : index
    %c0_4 = arith.constant 0 : index
    %2 = vector.load %arg3[%c0_3, %c0_4] : memref<16x64xf32, #tpu.memory_space<vmem>>, vector<16x64xf32>
    %cst = arith.constant dense<0.000000e+00> : vector<512x64xf32>
    %3 = tpu.matmul %0, %2, %cst {dimension_numbers = #tpu.dot_dimension_numbers<[1], [0], [0], [1], [0, 0, 1, 1], [], []>, precision = #tpu.contract_precision<fp32>} : vector<512x16xf32>, vector<16x64xf32>, vector<512x64xf32> -> vector<512x64xf32>
    %4 = arith.negf %3 : vector<512x64xf32>
    %5 = math.exp %4 : vector<512x64xf32>
    %cst_5 = arith.constant 1.000000e+00 : f32
    %6 = vector.broadcast %cst_5 : f32 to vector<512x64xf32>
    %7 = arith.addf %6, %5 : vector<512x64xf32>
    %8 = arith.divf %6, %7 : vector<512x64xf32>
    %9 = arith.mulf %3, %8 : vector<512x64xf32>
    %10 = arith.truncf %9 : vector<512x64xf32> to vector<512x64xbf16>
    %c0_6 = arith.constant 0 : index
    %c0_7 = arith.constant 0 : index
    %11 = vector.load %arg4[%c0_6, %c0_7] : memref<64x1032xbf16, #tpu.memory_space<vmem>>, vector<64x1032xbf16>
    %cst_8 = arith.constant dense<0.000000e+00> : vector<512x1032xf32>
    %12 = tpu.matmul %10, %11, %cst_8 {dimension_numbers = #tpu.dot_dimension_numbers<[1], [0], [0], [1], [0, 0, 1, 1], [], []>} : vector<512x64xbf16>, vector<64x1032xbf16>, vector<512x1032xf32> -> vector<512x1032xf32>
    %cst_9 = arith.constant 1.000000e+00 : f32
    %13 = vector.broadcast %cst_9 : f32 to vector<512x8xf32>
    %14 = tpu.concatenate %1, %1, %1, %1, %1, %1, %1, %1, %13 in 1 : vector<512x128xf32>, vector<512x128xf32>, vector<512x128xf32>, vector<512x128xf32>, vector<512x128xf32>, vector<512x128xf32>, vector<512x128xf32>, vector<512x128xf32>, vector<512x8xf32> -> vector<512x1032xf32>
    %15 = arith.mulf %12, %14 : vector<512x1032xf32>
    %16 = arith.truncf %15 : vector<512x1032xf32> to vector<512x1032xbf16>
    %c0_10 = arith.constant 0 : index
    %c0_11 = arith.constant 0 : index
    %17 = vector.load %arg5[%c0_10, %c0_11] : memref<1032x72xbf16, #tpu.memory_space<vmem>>, vector<1032x72xbf16>
    %cst_12 = arith.constant dense<0.000000e+00> : vector<512x72xf32>
    %18 = tpu.matmul %16, %17, %cst_12 {dimension_numbers = #tpu.dot_dimension_numbers<[1], [0], [0], [1], [0, 0, 1, 1], [], []>} : vector<512x1032xbf16>, vector<1032x72xbf16>, vector<512x72xf32> -> vector<512x72xf32>
    %c0_13 = arith.constant 0 : index
    %c0_14 = arith.constant 0 : index
    %19 = vector.load %arg6[%c0_13, %c0_14] : memref<512x72xf32, #tpu.memory_space<vmem>>, vector<512x72xf32>
    tpu.vector_store %arg6[%c0_13, %c0_14], %18 {strides = array<i32>} : memref<512x72xf32, #tpu.memory_space<vmem>>, vector<512x72xf32>,
    return
  }
  func.func @transform_0(%arg0: i32) -> (i32, i32) {
    %c0_i32 = arith.constant 0 : i32
    %c0_i32_0 = arith.constant 0 : i32
    return %arg0, %c0_i32 : i32, i32
  }
  func.func @transform_1(%arg0: i32) -> (i32, i32) {
    %c0_i32 = arith.constant 0 : i32
    %c0_i32_0 = arith.constant 0 : i32
    return %arg0, %c0_i32 : i32, i32
  }
  func.func @transform_2(%arg0: i32) -> (i32, i32) {
    %c0_i32 = arith.constant 0 : i32
    %c0_i32_0 = arith.constant 0 : i32
    %c0_i32_1 = arith.constant 0 : i32
    return %c0_i32, %c0_i32_0 : i32, i32
  }
  func.func @transform_3(%arg0: i32) -> (i32, i32) {
    %c0_i32 = arith.constant 0 : i32
    %c0_i32_0 = arith.constant 0 : i32
    %c0_i32_1 = arith.constant 0 : i32
    return %c0_i32, %c0_i32_0 : i32, i32
  }
  func.func @transform_4(%arg0: i32) -> (i32, i32) {
    %c0_i32 = arith.constant 0 : i32
    %c0_i32_0 = arith.constant 0 : i32
    %c0_i32_1 = arith.constant 0 : i32
    return %c0_i32, %c0_i32_0 : i32, i32
  }
  func.func @transform_5(%arg0: i32) -> (i32, i32) {
    %c0_i32 = arith.constant 0 : i32
    %c0_i32_0 = arith.constant 0 : i32
    return %arg0, %c0_i32 : i32, i32
  }
}

</mosaic_0001>

<bundles_post_ra>
// kernel: tpu_custom_call.1
= control target key start
LH: loop header
LB: loop body
LE: loop exit
PB: predicated region body
PF: predicated region fallthrough
CT: control target
= control target key end

     0   :  { %s12086_s18 = smov 0   ;;  %s17731_s0 = inlined_call_operand.vmem [shape: f32[1024,16], index: 0, kind: input, shape index: {}]   ;;  %s17732_s1 = inlined_call_operand.vmem [shape: f32[1024,128], index: 1, kind: input, shape index: {}]   ;;  %s17733_s2 = inlined_call_operand.vmem [shape: f32[16,64], index: 2, kind: input, shape index: {}]   ;;  %s17734_s3 = inlined_call_operand.vmem [shape: bf16[64,1032], index: 3, kind: input, shape index: {}]   ;;  %s17735_s4 = inlined_call_operand.vmem [shape: bf16[1032,72], index: 4, kind: input, shape index: {}]   ;;  %s17736_s5 = inlined_call_operand.vmem [shape: f32[1024,72], index: 5, kind: output, shape index: {}]  }
   0x1 LB: > { %s9239_s19 = sadd.s32 4294967295, %s12053_s18   ;;  %p9243_p0 = scmp.ge.s32.totalorder %s12053_s18, 1  ;;  %s12053_s18 = sphi %s12086_s18, %s15_s18  }
   0x2   : > { %p199_p1 = scmp.lt.s32.totalorder %s12053_s18, 3 }
   0x4   : > { %p200_p2 = pnand %p9243_p0, %p199_p1 }
   0x6   : > { %203 = sbr.rel (%p200_p2) target bundleno = 2727 (0xaa7), region = 40 }
   0xd   : > { %v379_v0 = vld [vmem:[%s17733_s2] sm:$0xff]  ;;  %v380_v1 = vld [vmem:[%s17733_s2 + $0x8] sm:$0xff]  ;;  %s9244_s24 = sshll.u32 %s9239_s19, 6  ;;  %vm381_vm0 = vcmask 130048   ;;  %vm4446_vm1 = vcmask 523264   ;;  %vm7657_vm2 = vcmask 1043456  }
   0xe   : > { %v575_v2 = vand.u32 4294901760, %v379_v0  ;;  %v578_v3 = vand.u32 4294901760, %v380_v1  ;;  %p233_p3 = scmp.lt.s32.totalorder %s9244_s24, 127  ;;  %vm7560_vm3 = vcmask 64512   ;;  %vm9106_vm4 = vcmask 588800  }
  0x10   : > { %v12100_v4 = vpack.c.bf16 %v578_v3, %v575_v2  ;;  %s20108_s24 = smov (!%p233_p3, %s9244_s24), 127  ;;  %v12102_v5 = vsub.f32 %v379_v0, %v575_v2  ;;  %v12104_v6 = vsub.f32 %v380_v1, %v578_v3 }
  0x11   : > { %s12107_s25 = sshll.u32 %s20108_s24, 3 }
  0x12   : > { %10813 = vmatprep.subr.bf16.mxu0 %v12100_v4  ;;  %v17753_v7 = vand.u32 4294901760, %v12102_v5  ;;  %v17752_v8 = vand.u32 4294901760, %v12104_v6  ;;  %s12116_s28 = scalar_lea.vmem %s17731_s0, %s12107_s25  ;;  %s13820_s14 = scalar_lea.vmem %s17732_s1, %s12107_s25 }
  0x13   : > { %10815 = vmatpush3.bf16.msra.mxu0 %v12100_v4  ;;  %v251_v9 = vld [vmem:[%s12116_s28] sm:$0xff]  ;;  %v252_v12 = vld [vmem:[%s12116_s28 + $0x8] sm:$0xff]  ;;  %v253_v13 = vld [vmem:[%s12116_s28 + $0x10] sm:$0xff]  ;;  %s17507_s7 = scalar_lea.vmem %s17736_s5, %s12107_s25 }
  0x14   : > { %v1285_v10 = vsub.f32 %v12102_v5, %v17753_v7  ;;  %v1292_v11 = vsub.f32 %v12104_v6, %v17752_v8  ;;  %v383_v14 = vsel %vm381_vm0, %v251_v9, 0  ;;  %v386_v15 = vsel %vm381_vm0, %v252_v12, 0  ;;  %v254_v17 = vld [vmem:[%s12116_s28 + $0x18] sm:$0xff]  ;;  %v255_v18 = vld [vmem:[%s12116_s28 + $0x20] sm:$0xff]  ;;  %v256_v19 = vld [vmem:[%s12116_s28 + $0x28] sm:$0xff] }
  0x15   : > { %v389_v16 = vsel %vm381_vm0, %v253_v13, 0  ;;  %v12133_v20 = vand.u32 4294901760, %v383_v14  ;;  %v12135_v23 = vand.u32 4294901760, %v386_v15  ;;  %v257_v24 = vld [vmem:[%s12116_s28 + $0x30] sm:$0xff]  ;;  %v392_v26 = vsel %vm381_vm0, %v254_v17, 0  ;;  %v258_v33 = vld [vmem:[%s12116_s28 + $0x38] sm:$0xff] }
  0x16   : > { %v1286_v21 = vand.u32 4294901760, %v1285_v10  ;;  %v1293_v22 = vand.u32 4294901760, %v1292_v11  ;;  %v12138_v25 = vand.u32 4294901760, %v389_v16  ;;  %v395_v27 = vsel %vm381_vm0, %v255_v18, 0  ;;  %v259_v54 = vld [vmem:[%s12116_s28 + $0x40] sm:$0xff]  ;;  %v260_v55 = vld [vmem:[%s12116_s28 + $0x48] sm:$0xff] }
  0x17   : > { %18463 = vst [vmem:[#allocation2_spill] sm:$0xff] %v12133_v20  ;;  %18464 = vst [vmem:[#allocation3_spill] sm:$0xff] %v12135_v23  ;;  %v398_v28 = vsel %vm381_vm0, %v256_v19, 0  ;;  %v12144_v29 = vsub.f32 %v383_v14, %v12133_v20  ;;  %v12147_v31 = vsub.f32 %v386_v15, %v12135_v23  ;;  %v12149_v32 = vand.u32 4294901760, %v392_v26  ;;  %v261_v0 = vld [vmem:[%s12116_s28 + $0x50] sm:$0xff]  ;;  %v262_v1 = vld [vmem:[%s12116_s28 + $0x58] sm:$0xff] }
  0x18   : > { %18465 = vst [vmem:[#allocation4_spill] sm:$0xff] %v12138_v25  ;;  %v10816_v30 = vpack.c.bf16 %v1293_v22, %v1286_v21  ;;  %v12153_v34 = vsub.f32 %v389_v16, %v12138_v25  ;;  %v12155_v35 = vand.u32 4294901760, %v395_v27  ;;  %v12157_v36 = vand.u32 4294901760, %v398_v28  ;;  %v263_v10 = vld [vmem:[%s12116_s28 + $0x60] sm:$0xff]  ;;  %v264_v15 = vld [vmem:[%s12116_s28 + $0x68] sm:$0xff]  ;;  %v265_v16 = vld [vmem:[%s12116_s28 + $0x70] sm:$0xff] }
  0x19   : > { %18466 = vst [vmem:[#allocation5_spill] sm:$0xff] %v12144_v29  ;;  %18467 = vst [vmem:[#allocation6_spill] sm:$0xff] %v12147_v31  ;;  %v401_v37 = vsel %vm381_vm0, %v257_v24, 0  ;;  %v17750_v38 = vand.u32 4294901760, %v12144_v29  ;;  %v17749_v39 = vand.u32 4294901760, %v12147_v31  ;;  %v12163_v40 = vsub.f32 %v392_v26, %v12149_v32  ;;  %v277_v7 = vld [vmem:[%s12116_s28 + $0xd0] sm:$0xff] }
  0x1a   : > { %18468 = vst [vmem:[#allocation7_spill] sm:$0xff] %v12149_v32  ;;  %18469 = vst [vmem:[#allocation8_spill] sm:$0xff] %v12153_v34  ;;  %10817 = vmatprep.subr.bf16.mxu0 %v10816_v30  ;;  %v12165_v41 = vand.u32 4294901760, %v401_v37  ;;  %v17747_v42 = vand.u32 4294901760, %v12153_v34  ;;  %v12169_v43 = vsub.f32 %v395_v27, %v12155_v35  ;;  %v12172_v44 = vsub.f32 %v398_v28, %v12157_v36 }
  0x1b   : > { %18470 = vst [vmem:[#allocation9_spill] sm:$0xff] %v12155_v35  ;;  %18471 = vst [vmem:[#allocation10_spill] sm:$0xff] %v12157_v36  ;;  %v404_v45 = vsel %vm381_vm0, %v258_v33, 0  ;;  %v644_v46 = vsub.f32 %v12144_v29, %v17750_v38  ;;  %v654_v47 = vsub.f32 %v12147_v31, %v17749_v39  ;;  %v17745_v48 = vand.u32 4294901760, %v12163_v40 }
  0x1c   : > { %18472 = vst [vmem:[#allocation11_spill] sm:$0xff] %v12163_v40  ;;  %18473 = vst [vmem:[#allocation12_spill] sm:$0xff] %v12165_v41  ;;  %v12183_v49 = vsub.f32 %v401_v37, %v12165_v41  ;;  %v664_v50 = vsub.f32 %v12153_v34, %v17747_v42  ;;  %v17744_v51 = vand.u32 4294901760, %v12169_v43  ;;  %v17743_v52 = vand.u32 4294901760, %v12172_v44 }
  0x1d   : > { %18474 = vst [vmem:[#allocation13_spill] sm:$0xff] %v12169_v43  ;;  %18475 = vst [vmem:[#allocation14_spill] sm:$0xff] %v12172_v44  ;;  %v12190_v53 = vand.u32 4294901760, %v404_v45  ;;  %v645_v56 = vand.u32 4294901760, %v644_v46  ;;  %v655_v57 = vand.u32 4294901760, %v654_v47  ;;  %v674_v58 = vsub.f32 %v12163_v40, %v17745_v48  ;;  %v289_v40 = vld [vmem:[%s12116_s28 + $0x130] sm:$0xff] }
  0x1e   : > { %18476 = vst [vmem:[#allocation15_spill] sm:$0xff] %v12183_v49  ;;  %v17742_v59 = vand.u32 4294901760, %v12183_v49  ;;  %v665_v60 = vand.u32 4294901760, %v664_v50  ;;  %v684_v61 = vsub.f32 %v12169_v43, %v17744_v51  ;;  %v694_v62 = vsub.f32 %v12172_v44, %v17743_v52  ;;  %v286_v44 = vld [vmem:[%s12116_s28 + $0x118] sm:$0xff] }
  0x1f   : > { %18477 = vst [vmem:[#allocation16_spill] sm:$0xff] %v12190_v53  ;;  %v12205_v63 = vsub.f32 %v404_v45, %v12190_v53  ;;  %10078 = vmatprep.mubr.f32.mxu0 %v645_v56  ;;  %v407_v3 = vsel %vm381_vm0, %v259_v54, 0  ;;  %v410_v9 = vsel %vm381_vm0, %v260_v55, 0  ;;  %v675_v11 = vand.u32 4294901760, %v674_v58  ;;  %v266_v45 = vld [vmem:[%s12116_s28 + $0x78] sm:$0xff] }
  0x20   : > { %v704_v2 = vsub.f32 %v12183_v49, %v17742_v59  ;;  %10079 = vmatmul.mubr.f32.vlgmr.msra.gmra.mrb[0].mxu0 %v655_v57  ;;  %v685_v12 = vand.u32 4294901760, %v684_v61  ;;  %v12216_v14 = vand.u32 4294901760, %v407_v3  ;;  %v695_v17 = vand.u32 4294901760, %v694_v62 }
  0x21   : > { %18478 = vst [vmem:[#allocation17_spill] sm:$0xff] %v12205_v63  ;;  %v17741_v13 = vand.u32 4294901760, %v12205_v63  ;;  %10819 = vmatpush3.bf16.msra.mxu0 %v10816_v30  ;;  %10081 = vmatprep.mubr.f32.mxu0 %v665_v60  ;;  %v12220_v18 = vand.u32 4294901760, %v410_v9  ;;  %v413_v19 = vsel %vm381_vm0, %v261_v0, 0  ;;  %v416_v21 = vsel %vm381_vm0, %v262_v1, 0 }
  0x22   : > { %18479 = vst [vmem:[#allocation18_spill] sm:$0xff] %v12216_v14  ;;  %v705_v22 = vand.u32 4294901760, %v704_v2  ;;  %v12225_v24 = vsub.f32 %v407_v3, %v12216_v14  ;;  %v12227_v26 = vand.u32 4294901760, %v413_v19  ;;  %v12229_v27 = vand.u32 4294901760, %v416_v21 }
  0x23   : > { %18480 = vst [vmem:[#allocation19_spill] sm:$0xff] %v12220_v18  ;;  %v12232_v28 = vsub.f32 %v410_v9, %v12220_v18  ;;  %v419_v30 = vsel %vm381_vm0, %v263_v10, 0  ;;  %v422_v33 = vsel %vm381_vm0, %v264_v15, 0  ;;  %v425_v37 = vsel %vm381_vm0, %v265_v16, 0  ;;  %v267_v9 = vld [vmem:[%s12116_s28 + $0x80] sm:$0xff] }
  0x24   : > { %18481 = vst [vmem:[#allocation20_spill] sm:$0xff] %v12225_v24  ;;  %18482 = vst [vmem:[#allocation21_spill] sm:$0xff] %v12227_v26  ;;  %10082 = vmatmul.mubr.f32.gmra.mrb[2].mxu0 %v675_v11  ;;  %v714_v46 = vsub.f32 %v12205_v63, %v17741_v13  ;;  %v17740_v47 = vand.u32 4294901760, %v12225_v24  ;;  %v12243_v50 = vsub.f32 %v413_v19, %v12227_v26  ;;  %v12249_v56 = vand.u32 4294901760, %v419_v30 }
  0x25   : > { %18483 = vst [vmem:[#allocation22_spill] sm:$0xff] %v12229_v27  ;;  %18484 = vst [vmem:[#allocation23_spill] sm:$0xff] %v12232_v28  ;;  %v12246_v54 = vsub.f32 %v416_v21, %v12229_v27  ;;  %10084 = vmatprep.mubr.f32.mxu0 %v685_v12  ;;  %v17737_v55 = vand.u32 4294901760, %v12232_v28  ;;  %v12251_v57 = vand.u32 4294901760, %v422_v33  ;;  %v12253_v58 = vand.u32 4294901760, %v425_v37  ;;  %v268_v21 = vld [vmem:[%s12116_s28 + $0x88] sm:$0xff] }
  0x26   : > { %18485 = vst [vmem:[#allocation24_spill] sm:$0xff] %v12243_v50  ;;  %18487 = vst [vmem:[#allocation26_spill] sm:$0xff] %v12249_v56  ;;  %v724_v60 = vsub.f32 %v12225_v24, %v17740_v47  ;;  %v17738_v61 = vand.u32 4294901760, %v12243_v50  ;;  %v428_v0 = vsel %vm381_vm0, %v266_v45, 0  ;;  %v12265_v2 = vsub.f32 %v419_v30, %v12249_v56  ;;  %v269_v30 = vld [vmem:[%s12116_s28 + $0x90] sm:$0xff]  ;;  %v283_v24 = vld [vmem:[%s12116_s28 + $0x100] sm:$0xff] }
  0x27   : > { %18486 = vst [vmem:[#allocation25_spill] sm:$0xff] %v12246_v54  ;;  %18488 = vst [vmem:[#allocation27_spill] sm:$0xff] %v12251_v57  ;;  %v17739_v62 = vand.u32 4294901760, %v12246_v54  ;;  %v734_v1 = vsub.f32 %v12232_v28, %v17737_v55  ;;  %v12268_v3 = vsub.f32 %v422_v33, %v12251_v57  ;;  %v715_v10 = vand.u32 4294901760, %v714_v46  ;;  %v270_v33 = vld [vmem:[%s12116_s28 + $0x98] sm:$0xff]  ;;  %v271_v46 = vld [vmem:[%s12116_s28 + $0xa0] sm:$0xff] }
  0x28   : > { %18489 = vst [vmem:[#allocation28_spill] sm:$0xff] %v12253_v58  ;;  %18490 = vst [vmem:[#allocation29_spill] sm:$0xff] %v12265_v2  ;;  %10085 = vmatmul.mubr.f32.gmra.mrb[4].mxu0 %v695_v17  ;;  %v12272_v11 = vsub.f32 %v425_v37, %v12253_v58  ;;  %v12274_v12 = vand.u32 4294901760, %v428_v0  ;;  %v725_v15 = vand.u32 4294901760, %v724_v60  ;;  %v744_v16 = vsub.f32 %v12243_v50, %v17738_v61  ;;  %v272_v60 = vld [vmem:[%s12116_s28 + $0xa8] sm:$0xff]  ;;  %v273_v55 = vld [vmem:[%s12116_s28 + $0xb0] sm:$0xff] }
  0x29   : > { %18491 = vst [vmem:[#allocation30_spill] sm:$0xff] %v12268_v3  ;;  %10087 = vmatprep.mubr.f32.mxu0 %v705_v22  ;;  %v754_v19 = vsub.f32 %v12246_v54, %v17739_v62  ;;  %v17746_v17 = vand.u32 4294901760, %v12265_v2  ;;  %v17748_v37 = vand.u32 4294901760, %v12268_v3  ;;  %v431_v22 = vsel %vm381_vm0, %v267_v9, 0 }
  0x2a   : > { %18492 = vst [vmem:[#allocation31_spill] sm:$0xff] %v12272_v11  ;;  %18493 = vst [vmem:[#allocation32_spill] sm:$0xff] %v12274_v12  ;;  %v12288_v45 = vsub.f32 %v428_v0, %v12274_v12  ;;  %v735_v61 = vand.u32 4294901760, %v734_v1  ;;  %v12297_v47 = vand.u32 4294901760, %v431_v22  ;;  %v17751_v13 = vand.u32 4294901760, %v12272_v11 }
  0x2b   : > { %v764_v62 = vsub.f32 %v12265_v2, %v17746_v17  ;;  %v434_v59 = vsel %vm381_vm0, %v268_v21, 0  ;;  %v437_v0 = vsel %vm381_vm0, %v269_v30, 0  ;;  %v440_v9 = vsel %vm381_vm0, %v270_v33, 0  ;;  %v274_v30 = vld [vmem:[%s12116_s28 + $0xb8] sm:$0xff]  ;;  %v279_v2 = vld [vmem:[%s12116_s28 + $0xe0] sm:$0xff] }
  0x2c   : > { %18494 = vst [vmem:[#allocation33_spill] sm:$0xff] %v12288_v45  ;;  %18495 = vst [vmem:[#allocation34_spill] sm:$0xff] %v12297_v47  ;;  %10088 = vmatmul.mubr.f32.gmra.mrb[6].mxu0 %v715_v10  ;;  %v745_v52 = vand.u32 4294901760, %v744_v16  ;;  %v755_v51 = vand.u32 4294901760, %v754_v19  ;;  %v17756_v1 = vand.u32 4294901760, %v12288_v45  ;;  %v12305_v48 = vsub.f32 %v431_v22, %v12297_v47 }
  0x2d   : > { %10090 = vmatprep.mubr.f32.mxu0 %v725_v15  ;;  %v765_v17 = vand.u32 4294901760, %v764_v62  ;;  %v774_v10 = vsub.f32 %v12268_v3, %v17748_v37  ;;  %v12310_v42 = vand.u32 4294901760, %v434_v59  ;;  %v12312_v21 = vand.u32 4294901760, %v437_v0 }
  0x2e   : > { %18496 = vst [vmem:[#allocation35_spill] sm:$0xff] %v12305_v48  ;;  %v12315_v33 = vand.u32 4294901760, %v440_v9  ;;  %v443_v15 = vsel %vm381_vm0, %v271_v46, 0  ;;  %v446_v16 = vsel %vm381_vm0, %v272_v60, 0  ;;  %v449_v19 = vsel %vm381_vm0, %v273_v55, 0 }
  0x2f   : > { %18497 = vst [vmem:[#allocation36_spill] sm:$0xff] %v12310_v42  ;;  %18498 = vst [vmem:[#allocation37_spill] sm:$0xff] %v12312_v21  ;;  %v784_v62 = vsub.f32 %v12272_v11, %v17751_v13  ;;  %v17757_v22 = vand.u32 4294901760, %v12305_v48  ;;  %v12325_v37 = vsub.f32 %v434_v59, %v12310_v42  ;;  %v12328_v39 = vsub.f32 %v437_v0, %v12312_v21  ;;  %v278_v59 = vld [vmem:[%s12116_s28 + $0xd8] sm:$0xff] }
  0x30   : > { %18499 = vst [vmem:[#allocation38_spill] sm:$0xff] %v12315_v33  ;;  %10091 = vmatmul.mubr.f32.gmra.mrb[8].mxu0 %v735_v61  ;;  %v12330_v38 = vand.u32 4294901760, %v443_v15  ;;  %v12332_v46 = vand.u32 4294901760, %v446_v16  ;;  %v12334_v60 = vand.u32 4294901760, %v449_v19  ;;  %v775_v55 = vand.u32 4294901760, %v774_v10  ;;  %v275_v61 = vld [vmem:[%s12116_s28 + $0xc0] sm:$0xff] }
  0x31   : > { %18500 = vst [vmem:[#allocation39_spill] sm:$0xff] %v12325_v37  ;;  %18501 = vst [vmem:[#allocation40_spill] sm:$0xff] %v12328_v39  ;;  %10093 = vmatprep.mubr.f32.mxu0 %v745_v52  ;;  %v794_v13 = vsub.f32 %v12288_v45, %v17756_v1  ;;  %v452_v0 = vsel %vm381_vm0, %v274_v30, 0  ;;  %v785_v52 = vand.u32 4294901760, %v784_v62  ;;  %v804_v8 = vsub.f32 %v12305_v48, %v17757_v22  ;;  %v276_v62 = vld [vmem:[%s12116_s28 + $0xc8] sm:$0xff] }
  0x32   : > { %18502 = vst [vmem:[#allocation41_spill] sm:$0xff] %v12330_v38  ;;  %18503 = vst [vmem:[#allocation42_spill] sm:$0xff] %v12332_v46  ;;  %v12347_v10 = vsub.f32 %v440_v9, %v12315_v33  ;;  %v12350_v11 = vsub.f32 %v443_v15, %v12330_v38  ;;  %v12353_v1 = vsub.f32 %v446_v16, %v12332_v46  ;;  %v455_v30 = vsel %vm381_vm0, %v275_v61, 0 }
  0x33   : > { %18504 = vst [vmem:[#allocation43_spill] sm:$0xff] %v12334_v60  ;;  %v12360_v22 = vand.u32 4294901760, %v452_v0  ;;  %v795_v9 = vand.u32 4294901760, %v794_v13  ;;  %v12367_v48 = vand.u32 4294901760, %v455_v30  ;;  %v805_v16 = vand.u32 4294901760, %v804_v8  ;;  %v281_v13 = vld [vmem:[%s12116_s28 + $0xf0] sm:$0xff] }
  0x34   : > { %10094 = vmatmul.mubr.f32.gmra.mrb[10].mxu0 %v755_v51  ;;  %18505 = vst [vmem:[#allocation44_spill] sm:$0xff] %v12347_v10  ;;  %18506 = vst [vmem:[#allocation45_spill] sm:$0xff] %v12350_v11  ;;  %v12356_v51 = vsub.f32 %v449_v19, %v12334_v60  ;;  %v18512_v19 = vand.u32 4294901760, %v12328_v39  ;;  %v458_v3 = vsel %vm381_vm0, %v276_v62, 0 }
  0x35   : > { %10096 = vmatprep.mubr.f32.mxu0 %v765_v17  ;;  %18507 = vst [vmem:[#allocation46_spill] sm:$0xff] %v12353_v1  ;;  %18509 = vst [vmem:[#allocation48_spill] sm:$0xff] %v12360_v22  ;;  %v18510_v17 = vand.u32 4294901760, %v12325_v37  ;;  %v12380_v8 = vsub.f32 %v452_v0, %v12360_v22  ;;  %v12384_v45 = vsub.f32 %v455_v30, %v12367_v48  ;;  %v12386_v62 = vand.u32 4294901760, %v458_v3 }
  0x36   : > { %18508 = vst [vmem:[#allocation47_spill] sm:$0xff] %v12356_v51  ;;  %18511 = vst [vmem:[#allocation49_spill] sm:$0xff] %v12367_v48  ;;  %v824_v61 = vsub.f32 %v12328_v39, %v18512_v19  ;;  %v467_v0 = vsel %vm381_vm0, %v279_v2, 0  ;;  %v18518_v30 = vand.u32 4294901760, %v12350_v11  ;;  %v304_v48 = vld [vmem:[%s12116_s28 + $0x1a8] sm:$0xff] }
  0x37   : > { %v814_v15 = vsub.f32 %v12325_v37, %v18510_v17  ;;  %18513 = vst [vmem:[#allocation50_spill] sm:$0xff] %v12380_v8  ;;  %v280_v37 = vld [vmem:[%s12116_s28 + $0xe8] sm:$0xff]  ;;  %18514 = vst [vmem:[#allocation51_spill] sm:$0xff] %v12384_v45  ;;  %v18516_v17 = vand.u32 4294901760, %v12347_v10 }
  0x38   : > { %10097 = vmatmul.mubr.f32.gmra.mrb[12].mxu0 %v775_v55  ;;  %v461_v55 = vsel %vm381_vm0, %v277_v7, 0  ;;  %18515 = vst [vmem:[#allocation52_spill] sm:$0xff] %v12386_v62  ;;  %v844_v39 = vsub.f32 %v12350_v11, %v18518_v30  ;;  %v12413_v11 = vand.u32 4294901760, %v467_v0  ;;  %v285_v30 = vld [vmem:[%s12116_s28 + $0x110] sm:$0xff] }
  0x39   : > { %10099 = vmatprep.mubr.f32.mxu0 %v785_v52  ;;  %v815_v19 = vand.u32 4294901760, %v814_v15  ;;  %v464_v52 = vsel %vm381_vm0, %v278_v59, 0  ;;  %v834_v7 = vsub.f32 %v12347_v10, %v18516_v17  ;;  %v12393_v54 = vand.u32 4294901760, %v461_v55  ;;  %v282_v17 = vld [vmem:[%s12116_s28 + $0xf8] sm:$0xff] }
  0x3a   : > { %v825_v15 = vand.u32 4294901760, %v824_v61  ;;  %v18519_v59 = vand.u32 4294901760, %v12353_v1  ;;  %v12407_v2 = vand.u32 4294901760, %v464_v52  ;;  %v473_v61 = vsel %vm381_vm0, %v281_v13, 0  ;;  %18522 = vst [vmem:[#allocation55_spill] sm:$0xff] %v12413_v11 }
  0x3b   : > { %18517 = vst [vmem:[#allocation53_spill] sm:$0xff] %v12393_v54  ;;  %v12419_v10 = vsub.f32 %v461_v55, %v12393_v54  ;;  %v12424_v13 = vand.u32 4294901760, %v473_v61  ;;  %v18528_v55 = vand.u32 4294901760, %v12384_v45  ;;  %v12439_v43 = vsub.f32 %v467_v0, %v12413_v11 }
  0x3c   : > { %10100 = vmatmul.mubr.f32.gmra.mrb[14].mxu0 %v795_v9  ;;  %v854_v50 = vsub.f32 %v12353_v1, %v18519_v59  ;;  %v18520_v9 = vand.u32 4294901760, %v12356_v51  ;;  %18521 = vst [vmem:[#allocation54_spill] sm:$0xff] %v12407_v2  ;;  %v835_v59 = vand.u32 4294901760, %v834_v7 }
  0x3d   : > { %10102 = vmatprep.mubr.f32.mxu0 %v805_v16  ;;  %v470_v16 = vsel %vm381_vm0, %v280_v37, 0  ;;  %18524 = vst [vmem:[#allocation57_spill] sm:$0xff] %v12419_v10  ;;  %v845_v37 = vand.u32 4294901760, %v844_v39  ;;  %18526 = vst [vmem:[#allocation59_spill] sm:$0xff] %v12424_v13  ;;  %v12436_v39 = vsub.f32 %v464_v52, %v12407_v2  ;;  %v12451_v0 = vsub.f32 %v473_v61, %v12424_v13 }
  0x3e   : > { %v864_v28 = vsub.f32 %v12356_v51, %v18520_v9  ;;  %v12416_v9 = vsub.f32 %v458_v3, %v12386_v62  ;;  %v284_v51 = vld [vmem:[%s12116_s28 + $0x108] sm:$0xff]  ;;  %v12422_v1 = vand.u32 4294901760, %v470_v16  ;;  %v855_v63 = vand.u32 4294901760, %v854_v50  ;;  %18530 = vst [vmem:[#allocation61_spill] sm:$0xff] %v12439_v43  ;;  %v287_v50 = vld [vmem:[%s12116_s28 + $0x120] sm:$0xff] }
  0x3f   : > { %v476_v3 = vsel %vm381_vm0, %v282_v17, 0  ;;  %18529 = vst [vmem:[#allocation60_spill] sm:$0xff] %v12436_v39  ;;  %18532 = vst [vmem:[#allocation63_spill] sm:$0xff] %v12451_v0  ;;  %v18538_v29 = vand.u32 4294901760, %v12419_v10  ;;  %v491_v11 = vsel %vm381_vm0, %v287_v50, 0 }
  0x40   : > { %10103 = vmatmul.mubr.f32.gmra.mrb[16].mxu0 %v815_v19  ;;  %18523 = vst [vmem:[#allocation56_spill] sm:$0xff] %v12416_v9  ;;  %18525 = vst [vmem:[#allocation58_spill] sm:$0xff] %v12422_v1  ;;  %v865_v49 = vand.u32 4294901760, %v864_v28  ;;  %v18527_v19 = vand.u32 4294901760, %v12380_v8  ;;  %v479_v28 = vsel %vm381_vm0, %v283_v24, 0  ;;  %v12448_v52 = vsub.f32 %v470_v16, %v12422_v1 }
  0x41   : > { %10105 = vmatprep.mubr.f32.mxu0 %v825_v15  ;;  %v884_v15 = vsub.f32 %v12384_v45, %v18528_v55  ;;  %v485_v55 = vsel %vm381_vm0, %v285_v30, 0  ;;  %v12453_v45 = vand.u32 4294901760, %v476_v3  ;;  %v488_v24 = vsel %vm381_vm0, %v286_v44, 0  ;;  %v290_v30 = vld [vmem:[%s12116_s28 + $0x138] sm:$0xff] }
  0x42   : > { %v874_v7 = vsub.f32 %v12380_v8, %v18527_v19  ;;  %v482_v8 = vsel %vm381_vm0, %v284_v51, 0  ;;  %18531 = vst [vmem:[#allocation62_spill] sm:$0xff] %v12448_v52  ;;  %v12458_v17 = vand.u32 4294901760, %v479_v28  ;;  %v12462_v51 = vand.u32 4294901760, %v485_v55 }
  0x43   : > { %18533 = vst [vmem:[#allocation64_spill] sm:$0xff] %v12453_v45  ;;  %v12460_v19 = vand.u32 4294901760, %v482_v8  ;;  %v885_v34 = vand.u32 4294901760, %v884_v15  ;;  %v18537_v31 = vand.u32 4294901760, %v12416_v9  ;;  %v904_v13 = vsub.f32 %v12419_v10, %v18538_v29 }
  0x44   : > { %10106 = vmatmul.mubr.f32.gmra.mrb[18].mxu0 %v835_v59  ;;  %v288_v59 = vld [vmem:[%s12116_s28 + $0x128] sm:$0xff]  ;;  %18534 = vst [vmem:[#allocation65_spill] sm:$0xff] %v12458_v17  ;;  %18536 = vst [vmem:[#allocation67_spill] sm:$0xff] %v12462_v51  ;;  %v12473_v1 = vand.u32 4294901760, %v488_v24  ;;  %v12479_v61 = vsub.f32 %v476_v3, %v12453_v45  ;;  %v12489_v16 = vsub.f32 %v485_v55, %v12462_v51  ;;  %v12492_v50 = vand.u32 4294901760, %v491_v11 }
  0x45   : > { %10108 = vmatprep.mubr.f32.mxu0 %v845_v37  ;;  %18535 = vst [vmem:[#allocation66_spill] sm:$0xff] %v12460_v19  ;;  %v875_v37 = vand.u32 4294901760, %v874_v7  ;;  %v894_v44 = vsub.f32 %v12416_v9, %v18537_v31  ;;  %v12483_v31 = vsub.f32 %v479_v28, %v12458_v17  ;;  %v12486_v29 = vsub.f32 %v482_v8, %v12460_v19 }
  0x46   : > { %18539 = vst [vmem:[#allocation68_spill] sm:$0xff] %v12473_v1  ;;  %18540 = vst [vmem:[#allocation69_spill] sm:$0xff] %v12479_v61  ;;  %v500_v15 = vsel %vm381_vm0, %v290_v30, 0  ;;  %v12499_v7 = vsub.f32 %v488_v24, %v12473_v1  ;;  %v905_v55 = vand.u32 4294901760, %v904_v13  ;;  %v18548_v10 = vand.u32 4294901760, %v12439_v43 }
  0x47   : > { %18541 = vst [vmem:[#allocation70_spill] sm:$0xff] %v12483_v31  ;;  %18542 = vst [vmem:[#allocation71_spill] sm:$0xff] %v12486_v29  ;;  %v895_v3 = vand.u32 4294901760, %v894_v44 }
  0x48   : > { %10109 = vmatmul.mubr.f32.gmra.mrb[20].mxu0 %v855_v63  ;;  %v494_v63 = vsel %vm381_vm0, %v288_v59, 0  ;;  %18543 = vst [vmem:[#allocation72_spill] sm:$0xff] %v12489_v16  ;;  %18544 = vst [vmem:[#allocation73_spill] sm:$0xff] %v12492_v50  ;;  %v18545_v59 = vand.u32 4294901760, %v12436_v39 }
  0x49   : > { %10111 = vmatprep.mubr.f32.mxu0 %v865_v49  ;;  %v497_v49 = vsel %vm381_vm0, %v289_v40, 0  ;;  %18546 = vst [vmem:[#allocation74_spill] sm:$0xff] %v12499_v7  ;;  %v12501_v8 = vand.u32 4294901760, %v494_v63  ;;  %v924_v40 = vsub.f32 %v12439_v43, %v18548_v10  ;;  %v12519_v10 = vsub.f32 %v491_v11, %v12492_v50 }
  0x4a   : > { %v914_v28 = vsub.f32 %v12436_v39, %v18545_v59  ;;  %v12507_v30 = vand.u32 4294901760, %v497_v49  ;;  %v12513_v39 = vand.u32 4294901760, %v500_v15  ;;  %v18553_v43 = vand.u32 4294901760, %v12451_v0 }
  0x4b   : > { %18547 = vst [vmem:[#allocation75_spill] sm:$0xff] %v12501_v8  ;;  %18552 = vst [vmem:[#allocation78_spill] sm:$0xff] %v12519_v10  ;;  %v12526_v59 = vsub.f32 %v494_v63, %v12501_v8  ;;  %v925_v1 = vand.u32 4294901760, %v924_v40  ;;  %v18558_v63 = vand.u32 4294901760, %v12486_v29  ;;  %v18559_v40 = vand.u32 4294901760, %v12489_v16  ;;  %v298_v8 = vld [vmem:[%s12116_s28 + $0x178] sm:$0xff] }
  0x4c   : > { %10112 = vmatmul.mubr.f32.gmra.mrb[22].mxu0 %v875_v37  ;;  %18549 = vst [vmem:[#allocation76_spill] sm:$0xff] %v12507_v30  ;;  %v291_v37 = vld [vmem:[%s12116_s28 + $0x140] sm:$0xff]  ;;  %18550 = vst [vmem:[#allocation77_spill] sm:$0xff] %v12513_v39  ;;  %v915_v9 = vand.u32 4294901760, %v914_v28  ;;  %v944_v44 = vsub.f32 %v12451_v0, %v18553_v43  ;;  %v18557_v43 = vand.u32 4294901760, %v12483_v31 }
  0x4d   : > { %10114 = vmatprep.mubr.f32.mxu0 %v885_v34  ;;  %v18551_v34 = vand.u32 4294901760, %v12448_v52  ;;  %18554 = vst [vmem:[#allocation79_spill] sm:$0xff] %v12526_v59  ;;  %v503_v28 = vsel %vm381_vm0, %v291_v37, 0 }
  0x4e   : > { %v964_v24 = vsub.f32 %v12483_v31, %v18557_v43  ;;  %v293_v43 = vld [vmem:[%s12116_s28 + $0x150] sm:$0xff]  ;;  %v294_v31 = vld [vmem:[%s12116_s28 + $0x158] sm:$0xff] }
  0x4f   : > { %v934_v13 = vsub.f32 %v12448_v52, %v18551_v34  ;;  %v18555_v34 = vand.u32 4294901760, %v12479_v61  ;;  %v296_v52 = vld [vmem:[%s12116_s28 + $0x168] sm:$0xff] }
  0x50   : > { %10115 = vmatmul.mubr.f32.gmra.mrb[24].mxu0 %v895_v3  ;;  %v12532_v3 = vsub.f32 %v497_v49, %v12507_v30  ;;  %v12549_v49 = vsub.f32 %v500_v15, %v12513_v39  ;;  %v295_v15 = vld [vmem:[%s12116_s28 + $0x160] sm:$0xff]  ;;  %v297_v39 = vld [vmem:[%s12116_s28 + $0x170] sm:$0xff]  ;;  %v965_v50 = vand.u32 4294901760, %v964_v24 }
  0x51   : > { %10117 = vmatprep.mubr.f32.mxu0 %v905_v55  ;;  %v954_v11 = vsub.f32 %v12479_v61, %v18555_v34  ;;  %v12541_v55 = vsub.f32 %v12486_v29, %v18558_v63  ;;  %v12546_v34 = vsub.f32 %v12489_v16, %v18559_v40  ;;  %v292_v61 = vld [vmem:[%s12116_s28 + $0x148] sm:$0xff]  ;;  %v935_v37 = vand.u32 4294901760, %v934_v13 }
  0x52   : > { %18556 = vst [vmem:[#allocation80_spill] sm:$0xff] %v12532_v3  ;;  %18560 = vst [vmem:[#allocation81_spill] sm:$0xff] %v12549_v49  ;;  %v18561_v63 = vand.u32 4294901760, %v12499_v7  ;;  %v12561_v16 = vand.u32 4294901760, %v503_v28  ;;  %v945_v13 = vand.u32 4294901760, %v944_v44  ;;  %v17854_v0 = vand.u32 4294901760, %v12532_v3 }
  0x53   : > { %v955_v30 = vand.u32 4294901760, %v954_v11  ;;  %v975_v51 = vand.u32 4294901760, %v12541_v55  ;;  %v509_v44 = vsel %vm381_vm0, %v293_v43, 0  ;;  %v18564_v11 = vand.u32 4294901760, %v12526_v59  ;;  %v300_v40 = vld [vmem:[%s12116_s28 + $0x188] sm:$0xff] }
  0x54   : > { %10118 = vmatmul.mubr.f32.gmra.mrb[26].mxu0 %v915_v9  ;;  %v12558_v29 = vsub.f32 %v12499_v7, %v18561_v63  ;;  %18562 = vst [vmem:[#allocation82_spill] sm:$0xff] %v12561_v16  ;;  %v299_v9 = vld [vmem:[%s12116_s28 + $0x180] sm:$0xff]  ;;  %v985_v63 = vand.u32 4294901760, %v12546_v34  ;;  %v18563_v7 = vand.u32 4294901760, %v12519_v10  ;;  %v12586_v34 = vsub.f32 %v503_v28, %v12561_v16 }
  0x55   : > { %10120 = vmatprep.mubr.f32.mxu0 %v925_v1  ;;  %v506_v1 = vsel %vm381_vm0, %v292_v61, 0  ;;  %v12583_v55 = vsub.f32 %v12526_v59, %v18564_v11  ;;  %v12593_v61 = vsub.f32 %v12532_v3, %v17854_v0  ;;  %v521_v43 = vsel %vm381_vm0, %v297_v39, 0  ;;  %v301_v11 = vld [vmem:[%s12116_s28 + $0x190] sm:$0xff]  ;;  %v303_v16 = vld [vmem:[%s12116_s28 + $0x1a0] sm:$0xff] }
  0x56   : > { %v12575_v19 = vsub.f32 %v12519_v10, %v18563_v7  ;;  %v995_v24 = vand.u32 4294901760, %v12558_v29  ;;  %18565 = vst [vmem:[#allocation83_spill] sm:$0xff] %v12586_v34  ;;  %v512_v7 = vsel %vm381_vm0, %v294_v31, 0  ;;  %v515_v29 = vsel %vm381_vm0, %v295_v15, 0  ;;  %v302_v10 = vld [vmem:[%s12116_s28 + $0x198] sm:$0xff] }
  0x57   : > { %v12599_v59 = vand.u32 4294901760, %v506_v1  ;;  %v12601_v28 = vand.u32 4294901760, %v509_v44  ;;  %v524_v31 = vsel %vm381_vm0, %v298_v8, 0  ;;  %v18568_v3 = vand.u32 4294901760, %v12549_v49 }
  0x58   : > { %10121 = vmatmul.mubr.f32.gmra.mrb[28].mxu0 %v935_v37  ;;  %v518_v37 = vsel %vm381_vm0, %v296_v52, 0  ;;  %v1005_v0 = vand.u32 4294901760, %v12575_v19  ;;  %v12613_v52 = vand.u32 4294901760, %v512_v7  ;;  %v12616_v17 = vand.u32 4294901760, %v515_v29 }
  0x59   : > { %10123 = vmatprep.mubr.f32.mxu0 %v945_v13  ;;  %18566 = vst [vmem:[#allocation84_spill] sm:$0xff] %v12599_v59  ;;  %18567 = vst [vmem:[#allocation85_spill] sm:$0xff] %v12601_v28  ;;  %v527_v13 = vsel %vm381_vm0, %v299_v9, 0  ;;  %v12611_v15 = vsub.f32 %v12549_v49, %v18568_v3  ;;  %v12618_v8 = vand.u32 4294901760, %v518_v37  ;;  %v12620_v9 = vand.u32 4294901760, %v521_v43 }
  0x5a   : > { %18569 = vst [vmem:[#allocation86_spill] sm:$0xff] %v12613_v52  ;;  %18570 = vst [vmem:[#allocation87_spill] sm:$0xff] %v12616_v17  ;;  %v12622_v45 = vand.u32 4294901760, %v524_v31  ;;  %v12624_v19 = vand.u32 4294901760, %v527_v13  ;;  %v530_v3 = vsel %vm381_vm0, %v300_v40, 0  ;;  %v533_v49 = vsel %vm381_vm0, %v301_v11, 0 }
  0x5b   : > { %18571 = vst [vmem:[#allocation88_spill] sm:$0xff] %v12618_v8  ;;  %18572 = vst [vmem:[#allocation89_spill] sm:$0xff] %v12620_v9  ;;  %v1025_v39 = vand.u32 4294901760, %v12593_v61  ;;  %v12631_v2 = vsub.f32 %v506_v1, %v12599_v59  ;;  %v12634_v54 = vsub.f32 %v509_v44, %v12601_v28  ;;  %v12638_v62 = vsub.f32 %v512_v7, %v12613_v52 }
  0x5c   : > { %10124 = vmatmul.mubr.f32.gmra.mrb[30].mxu0 %v955_v30  ;;  %18573 = vst [vmem:[#allocation90_spill] sm:$0xff] %v12622_v45  ;;  %18574 = vst [vmem:[#allocation91_spill] sm:$0xff] %v12624_v19  ;;  %v1015_v30 = vand.u32 4294901760, %v12583_v55  ;;  %v536_v40 = vsel %vm381_vm0, %v302_v10, 0  ;;  %v539_v11 = vsel %vm381_vm0, %v303_v16, 0  ;;  %v18578_v55 = vand.u32 4294901760, %v12586_v34 }
  0x5d   : > { %10126 = vmatprep.mubr.f32.mxu0 %v965_v50  ;;  %18575 = vst [vmem:[#allocation92_spill] sm:$0xff] %v12631_v2  ;;  %18576 = vst [vmem:[#allocation93_spill] sm:$0xff] %v12634_v54  ;;  %v1035_v50 = vand.u32 4294901760, %v12611_v15  ;;  %v12647_v44 = vsub.f32 %v515_v29, %v12616_v17  ;;  %v12649_v61 = vand.u32 4294901760, %v530_v3  ;;  %v12651_v15 = vand.u32 4294901760, %v533_v49 }
  0x5e   : > { %18577 = vst [vmem:[#allocation94_spill] sm:$0xff] %v12638_v62  ;;  %v1044_v1 = vsub.f32 %v12586_v34, %v18578_v55  ;;  %v12654_v7 = vsub.f32 %v518_v37, %v12618_v8  ;;  %v12657_v16 = vsub.f32 %v521_v43, %v12620_v9  ;;  %v12663_v10 = vsub.f32 %v527_v13, %v12624_v19  ;;  %v305_v55 = vld [vmem:[%s12116_s28 + $0x1b0] sm:$0xff]  ;;  %v306_v37 = vld [vmem:[%s12116_s28 + $0x1b8] sm:$0xff] }
  0x5f   : > { %18579 = vst [vmem:[#allocation95_spill] sm:$0xff] %v12647_v44  ;;  %18580 = vst [vmem:[#allocation96_spill] sm:$0xff] %v12649_v61  ;;  %v12668_v17 = vand.u32 4294901760, %v536_v40  ;;  %v542_v43 = vsel %vm381_vm0, %v304_v48, 0  ;;  %v12677_v13 = vsub.f32 %v530_v3, %v12649_v61  ;;  %v12680_v29 = vsub.f32 %v533_v49, %v12651_v15 }
  0x60   : > { %10127 = vmatmul.mubr.f32.gmra.mrb[32].mxu0 %v975_v51  ;;  %18581 = vst [vmem:[#allocation97_spill] sm:$0xff] %v12651_v15  ;;  %18582 = vst [vmem:[#allocation98_spill] sm:$0xff] %v12654_v7  ;;  %v12660_v51 = vsub.f32 %v524_v31, %v12622_v45  ;;  %v545_v34 = vsel %vm381_vm0, %v305_v55, 0  ;;  %v12693_v49 = vand.u32 4294901760, %v542_v43  ;;  %v307_v15 = vld [vmem:[%s12116_s28 + $0x1c0] sm:$0xff]  ;;  %v18594_v45 = vand.u32 4294901760, %v12634_v54 }
  0x61   : > { %10129 = vmatprep.mubr.f32.mxu0 %v985_v63  ;;  %18583 = vst [vmem:[#allocation99_spill] sm:$0xff] %v12657_v16  ;;  %18585 = vst [vmem:[#allocation101_spill] sm:$0xff] %v12663_v10  ;;  %v12670_v63 = vand.u32 4294901760, %v539_v11  ;;  %v12688_v31 = vsub.f32 %v536_v40, %v12668_v17  ;;  %v12702_v19 = vand.u32 4294901760, %v545_v34  ;;  %v18596_v40 = vand.u32 4294901760, %v12638_v62 }
  0x62   : > { %18584 = vst [vmem:[#allocation100_spill] sm:$0xff] %v12660_v51  ;;  %18586 = vst [vmem:[#allocation102_spill] sm:$0xff] %v12668_v17  ;;  %v1064_v8 = vsub.f32 %v12634_v54, %v18594_v45  ;;  %v18597_v48 = vand.u32 4294901760, %v12647_v44  ;;  %v18598_v45 = vand.u32 4294901760, %v12654_v7 }
  0x63   : > { %18587 = vst [vmem:[#allocation103_spill] sm:$0xff] %v12670_v63  ;;  %18588 = vst [vmem:[#allocation104_spill] sm:$0xff] %v12677_v13  ;;  %v12691_v3 = vsub.f32 %v539_v11, %v12670_v63  ;;  %v1074_v11 = vsub.f32 %v12638_v62, %v18596_v40 }
  0x64   : > { %10130 = vmatmul.mubr.f32.gmra.mrb[34].mxu0 %v995_v24  ;;  %18589 = vst [vmem:[#allocation105_spill] sm:$0xff] %v12680_v29  ;;  %v1045_v24 = vand.u32 4294901760, %v1044_v1  ;;  %18590 = vst [vmem:[#allocation106_spill] sm:$0xff] %v12688_v31  ;;  %v548_v1 = vsel %vm381_vm0, %v306_v37, 0  ;;  %v1084_v63 = vsub.f32 %v12647_v44, %v18597_v48  ;;  %v1094_v54 = vsub.f32 %v12654_v7, %v18598_v45 }
  0x65   : > { %10132 = vmatprep.mubr.f32.mxu0 %v1005_v0  ;;  %18591 = vst [vmem:[#allocation107_spill] sm:$0xff] %v12691_v3  ;;  %18592 = vst [vmem:[#allocation108_spill] sm:$0xff] %v12693_v49  ;;  %v18593_v0 = vand.u32 4294901760, %v12631_v2  ;;  %v18599_v37 = vand.u32 4294901760, %v12657_v16  ;;  %v18601_v48 = vand.u32 4294901760, %v12663_v10  ;;  %v12727_v44 = vand.u32 4294901760, %v548_v1 }
  0x66   : > { %18595 = vst [vmem:[#allocation109_spill] sm:$0xff] %v12702_v19  ;;  %v551_v45 = vsel %vm381_vm0, %v307_v15, 0  ;;  %v1065_v62 = vand.u32 4294901760, %v1064_v8  ;;  %v308_v8 = vld [vmem:[%s12116_s28 + $0x1c8] sm:$0xff] }
  0x67   : > { %v1054_v55 = vsub.f32 %v12631_v2, %v18593_v0  ;;  %v18600_v2 = vand.u32 4294901760, %v12660_v51  ;;  %v1124_v17 = vsub.f32 %v12663_v10, %v18601_v48  ;;  %18602 = vst [vmem:[#allocation110_spill] sm:$0xff] %v12727_v44  ;;  %v1085_v48 = vand.u32 4294901760, %v1084_v63 }
  0x68   : > { %10133 = vmatmul.mubr.f32.gmra.mrb[36].mxu0 %v1015_v30  ;;  %v1104_v30 = vsub.f32 %v12657_v16, %v18599_v37  ;;  %v12731_v37 = vsub.f32 %v542_v43, %v12693_v49  ;;  %v12734_v16 = vsub.f32 %v545_v34, %v12702_v19  ;;  %v18604_v0 = vand.u32 4294901760, %v12677_v13 }
  0x69   : > { %10135 = vmatprep.mubr.f32.mxu0 %v1025_v39  ;;  %v1114_v40 = vsub.f32 %v12660_v51, %v18600_v2  ;;  %v1055_v7 = vand.u32 4294901760, %v1054_v55  ;;  %v1075_v2 = vand.u32 4294901760, %v1074_v11  ;;  %v18605_v10 = vand.u32 4294901760, %v12680_v29 }
  0x6a   : > { %18603 = vst [vmem:[#allocation111_spill] sm:$0xff] %v12734_v16  ;;  %v1134_v39 = vsub.f32 %v12677_v13, %v18604_v0  ;;  %v1095_v43 = vand.u32 4294901760, %v1094_v54  ;;  %v1105_v55 = vand.u32 4294901760, %v1104_v30  ;;  %v12743_v34 = vand.u32 4294901760, %v551_v45  ;;  %v310_v54 = vld [vmem:[%s12116_s28 + $0x1d8] sm:$0xff] }
  0x6b   : > { %v1144_v15 = vsub.f32 %v12680_v29, %v18605_v10  ;;  %v1115_v51 = vand.u32 4294901760, %v1114_v40  ;;  %v18607_v11 = vand.u32 4294901760, %v12688_v31  ;;  %v18608_v0 = vand.u32 4294901760, %v12691_v3 }
  0x6c   : > { %10136 = vmatmul.mubr.f32.gmra.mrb[38].mxu0 %v1035_v50  ;;  %18606 = vst [vmem:[#allocation112_spill] sm:$0xff] %v12743_v34  ;;  %v1125_v50 = vand.u32 4294901760, %v1124_v17  ;;  %v12752_v10 = vsub.f32 %v548_v1, %v12727_v44  ;;  %v17915_v40 = vand.u32 4294901760, %v12734_v16  ;;  %v1135_v17 = vand.u32 4294901760, %v1134_v39  ;;  %v311_v1 = vld [vmem:[%s12116_s28 + $0x1e0] sm:$0xff] }
  0x6d   : > { %10138 = vmatprep.mubr.f32.mxu0 %v1045_v24  ;;  %v1154_v63 = vsub.f32 %v12688_v31, %v18607_v11  ;;  %v1164_v13 = vsub.f32 %v12691_v3, %v18608_v0  ;;  %v309_v24 = vld [vmem:[%s12116_s28 + $0x1d0] sm:$0xff]  ;;  %v1145_v29 = vand.u32 4294901760, %v1144_v15  ;;  %v12759_v11 = vsub.f32 %v551_v45, %v12743_v34  ;;  %v312_v3 = vld [vmem:[%s12116_s28 + $0x1e8] sm:$0xff] }
  0x6e   : > { %18609 = vst [vmem:[#allocation113_spill] sm:$0xff] %v12752_v10  ;;  %v554_v31 = vsel %vm381_vm0, %v308_v8, 0  ;;  %v557_v0 = vsel %vm381_vm0, %v309_v24, 0  ;;  %v12767_v44 = vpack.c.bf16 %v12104_v6, %v12102_v5  ;;  %v560_v39 = vsel %vm381_vm0, %v310_v54, 0 }
  0x6f   : > { %18610 = vst [vmem:[#allocation114_spill] sm:$0xff] %v12759_v11  ;;  %v1155_v30 = vand.u32 4294901760, %v1154_v63  ;;  %v1165_v19 = vand.u32 4294901760, %v1164_v13  ;;  %v12773_v45 = vand.u32 4294901760, %v554_v31  ;;  %v12775_v15 = vand.u32 4294901760, %v557_v0 }
  0x70   : > { %10139 = vmatmul.mubr.f32.gmra.mrb[40].mxu0 %v1055_v7  ;;  %10821 = vmatprep.subr.bf16.mxu0 %v12767_v44  ;;  %v12778_v24 = vand.u32 4294901760, %v560_v39  ;;  %v563_v13 = vsel %vm381_vm0, %v311_v1, 0  ;;  %v566_v63 = vsel %vm381_vm0, %v312_v3, 0  ;;  %v1184_v8 = vsub.f32 %v12734_v16, %v17915_v40  ;;  %v314_v3 = vld [vmem:[%s12116_s28 + $0x1f8] sm:$0xff] }
  0x71   : > { %10141 = vmatprep.mubr.f32.mxu0 %v1065_v62  ;;  %v313_v62 = vld [vmem:[%s12116_s28 + $0x1f0] sm:$0xff]  ;;  %18611 = vst [vmem:[#allocation115_spill] sm:$0xff] %v12773_v45  ;;  %18612 = vst [vmem:[#allocation116_spill] sm:$0xff] %v12775_v15  ;;  %v12782_v54 = vand.u32 4294901760, %v563_v13  ;;  %v12792_v1 = vsub.f32 %v554_v31, %v12773_v45 }
  0x72   : > { %18613 = vst [vmem:[#allocation117_spill] sm:$0xff] %v12778_v24  ;;  %v569_v7 = vsel %vm381_vm0, %v313_v62, 0  ;;  %v12806_v31 = vsub.f32 %v560_v39, %v12778_v24 }
  0x73   : > { %18614 = vst [vmem:[#allocation118_spill] sm:$0xff] %v12782_v54 }
  0x74   : > { %10142 = vmatmul.mubr.f32.gmra.mrb[42].mxu0 %v1075_v2  ;;  %v18615_v2 = vand.u32 4294901760, %v12731_v37  ;;  %18619 = vst [vmem:[#allocation120_spill] sm:$0xff] %v12806_v31  ;;  %v17922_v39 = vand.u32 4294901760, %v12806_v31 }
  0x75   : > { %10144 = vmatprep.mubr.f32.mxu0 %v1085_v48 }
  0x76   : > { %v1174_v48 = vsub.f32 %v12731_v37, %v18615_v2  ;;  %v18618_v2 = vand.u32 4294901760, %v12759_v11 }
  0x78   : > { %10145 = vmatmul.mubr.f32.gmra.mrb[44].mxu0 %v1095_v43  ;;  %v12796_v43 = vsub.f32 %v557_v0, %v12775_v15  ;;  %v1204_v40 = vsub.f32 %v12759_v11, %v18618_v2 }
  0x79   : > { %10147 = vmatprep.mubr.f32.mxu0 %v1105_v55  ;;  %v1175_v55 = vand.u32 4294901760, %v1174_v48  ;;  %v12814_v48 = vand.u32 4294901760, %v569_v7 }
  0x7a   : > { %18616 = vst [vmem:[#allocation119_spill] sm:$0xff] %v12796_v43  ;;  %v17921_v0 = vand.u32 4294901760, %v12796_v43 }
  0x7b   : > { %18622 = vst [vmem:[#allocation123_spill] sm:$0xff] %v12814_v48 }
  0x7c   : > { %10148 = vmatmul.mubr.f32.gmra.mrb[46].mxu0 %v1115_v51  ;;  %v1185_v51 = vand.u32 4294901760, %v1184_v8  ;;  %v12812_v8 = vsub.f32 %v563_v13, %v12782_v54  ;;  %v1205_v13 = vand.u32 4294901760, %v1204_v40 }
  0x7d   : > { %10150 = vmatprep.mubr.f32.mxu0 %v1125_v50  ;;  %v18617_v50 = vand.u32 4294901760, %v12752_v10 }
  0x7e   : > { %18621 = vst [vmem:[#allocation122_spill] sm:$0xff] %v12812_v8 }
  0x7f   : > { %v1194_v62 = vsub.f32 %v12752_v10, %v18617_v50  ;;  %v1224_v10 = vsub.f32 %v12796_v43, %v17921_v0 }
  0x80   : > { %10151 = vmatmul.mubr.f32.gmra.mrb[48].mxu0 %v1135_v17  ;;  %v17920_v17 = vand.u32 4294901760, %v12792_v1 }
  0x81   : > { %10153 = vmatprep.mubr.f32.mxu0 %v1145_v29  ;;  %v12808_v29 = vand.u32 4294901760, %v566_v63  ;;  %v1195_v50 = vand.u32 4294901760, %v1194_v62  ;;  %v1225_v40 = vand.u32 4294901760, %v1224_v10 }
  0x82   : > { %v1214_v2 = vsub.f32 %v12792_v1, %v17920_v17 }
  0x83   : > { %18620 = vst [vmem:[#allocation121_spill] sm:$0xff] %v12808_v29  ;;  %v12822_v11 = vsub.f32 %v566_v63, %v12808_v29  ;;  %v1234_v63 = vsub.f32 %v12806_v31, %v17922_v39 }
  0x84   : > { %10154 = vmatmul.mubr.f32.gmra.mrb[50].mxu0 %v1155_v30  ;;  %v572_v30 = vsel %vm381_vm0, %v314_v3, 0  ;;  %v17928_v3 = vand.u32 4294901760, %v12812_v8  ;;  %v1215_v62 = vand.u32 4294901760, %v1214_v2 }
  0x85   : > { %10156 = vmatprep.mubr.f32.mxu0 %v1165_v19  ;;  %v12824_v19 = vand.u32 4294901760, %v572_v30  ;;  %v17927_v17 = vand.u32 4294901760, %v12822_v11 }
  0x86   : > { %v1244_v0 = vsub.f32 %v12812_v8, %v17928_v3  ;;  %v18640_v3 = vld [vmem:[#allocation76_spill] sm:$0xff] }
  0x87   : > { %18623 = vst [vmem:[#allocation124_spill] sm:$0xff] %v12824_v19  ;;  %v1254_v2 = vsub.f32 %v12822_v11, %v17927_v17  ;;  %v18639_v17 = vld [vmem:[#allocation75_spill] sm:$0xff] }
  0x88   : > { %10157 = vmatmul.mubr.f32.gmra.mrb[52].mxu0 %v1175_v55  ;;  %v12831_v55 = vsub.f32 %v569_v7, %v12814_v48  ;;  %v1245_v31 = vand.u32 4294901760, %v1244_v0  ;;  %v18628_v0 = vld [vmem:[#allocation53_spill] sm:$0xff] }
  0x89   : > { %10159 = vmatprep.mubr.f32.mxu0 %v1185_v51  ;;  %v12838_v51 = vsub.f32 %v572_v30, %v12824_v19  ;;  %v1255_v30 = vand.u32 4294901760, %v1254_v2  ;;  %v18631_v2 = vld [vmem:[#allocation58_spill] sm:$0xff] }
  0x8a   : > { %18624 = vst [vmem:[#allocation125_spill] sm:$0xff] %v12831_v55  ;;  %v17926_v7 = vand.u32 4294901760, %v12831_v55 }
  0x8b   : > { %18625 = vst [vmem:[#allocation126_spill] sm:$0xff] %v12838_v51  ;;  %v17925_v39 = vand.u32 4294901760, %v12838_v51 }
  0x8c   : > { %10160 = vmatmul.mubr.f32.gmra.mrb[54].mxu0 %v1195_v50  ;;  %v1235_v50 = vand.u32 4294901760, %v1234_v63  ;;  %v1264_v10 = vsub.f32 %v12831_v55, %v17926_v7  ;;  %v18638_v7 = vld [vmem:[#allocation73_spill] sm:$0xff] }
  0x8d   : > { %10162 = vmatprep.mubr.f32.mxu0 %v1205_v13  ;;  %v1274_v13 = vsub.f32 %v12838_v51, %v17925_v39  ;;  %v18637_v39 = vld [vmem:[#allocation68_spill] sm:$0xff] }
  0x8f   : > { %v1275_v63 = vand.u32 4294901760, %v1274_v13  ;;  %v18634_v13 = vld [vmem:[#allocation65_spill] sm:$0xff] }
  0x90   : > { %10163 = vmatmul.mubr.f32.gmra.mrb[56].mxu0 %v1215_v62  ;;  %v1265_v62 = vand.u32 4294901760, %v1264_v10  ;;  %v18632_v10 = vld [vmem:[#allocation59_spill] sm:$0xff] }
  0x91   : > { %10165 = vmatprep.mubr.f32.mxu0 %v1225_v40  ;;  %v18629_v40 = vld [vmem:[#allocation54_spill] sm:$0xff] }
  0x94   : > { %10166 = vmatmul.mubr.f32.gmra.mrb[58].mxu0 %v1235_v50  ;;  %v18630_v50 = vld [vmem:[#allocation55_spill] sm:$0xff] }
  0x95   : > { %10168 = vmatprep.mubr.f32.mxu0 %v1245_v31  ;;  %v18627_v31 = vld [vmem:[#allocation52_spill] sm:$0xff] }
  0x98   : > { %10169 = vmatmul.mubr.f32.gmra.mrb[60].mxu0 %v1255_v30  ;;  %v18633_v30 = vld [vmem:[#allocation64_spill] sm:$0xff] }
  0x99   : > { %10171 = vmatprep.mubr.f32.mxu0 %v1265_v62  ;;  %v18635_v62 = vld [vmem:[#allocation66_spill] sm:$0xff] }
  0x9c   : > { %10172 = vmatmul.mubr.f32.gmra.mrb[62].mxu0 %v1275_v63  ;;  %v18636_v63 = vld [vmem:[#allocation67_spill] sm:$0xff] }
  0x9d   : > { %10178 = vmatprep.mubr.f32.mxu0 %v12133_v20  ;;  %v18707_v20 = vld [vmem:[#allocation113_spill] sm:$0xff] }
  0xa0   : > { %10179 = vmatmul.mubr.f32.vlgmr.msra.gmra.mrb[0].mxu0 %v12135_v23  ;;  %v18706_v23 = vld [vmem:[#allocation107_spill] sm:$0xff] }
  0xa1   : > { %10823 = vmatpush3.bf16.msra.mxu0 %v12767_v44  ;;  %10181 = vmatprep.mubr.f32.mxu0 %v12138_v25  ;;  %v18626_v44 = vld [vmem:[#allocation49_spill] sm:$0xff]  ;;  %v18705_v25 = vld [vmem:[#allocation106_spill] sm:$0xff] }
  0xa2   : > { %10825 = vmatprep.subr.bf16.mxu0 %v12100_v4 }
  0xa4   : > { %10182 = vmatmul.mubr.f32.gmra.mrb[2].mxu0 %v12149_v32  ;;  %v18704_v32 = vld [vmem:[#allocation105_spill] sm:$0xff] }
  0xa5   : > { %10184 = vmatprep.mubr.f32.mxu0 %v12155_v35  ;;  %v18703_v35 = vld [vmem:[#allocation104_spill] sm:$0xff] }
  0xa8   : > { %10185 = vmatmul.mubr.f32.gmra.mrb[4].mxu0 %v12157_v36  ;;  %v18702_v36 = vld [vmem:[#allocation101_spill] sm:$0xff] }
  0xa9   : > { %10187 = vmatprep.mubr.f32.mxu0 %v12165_v41  ;;  %v18701_v41 = vld [vmem:[#allocation100_spill] sm:$0xff] }
  0xac   : > { %10188 = vmatmul.mubr.f32.gmra.mrb[6].mxu0 %v12190_v53  ;;  %v18700_v53 = vld [vmem:[#allocation99_spill] sm:$0xff] }
  0xad   : > { %10190 = vmatprep.mubr.f32.mxu0 %v12216_v14  ;;  %v18699_v14 = vld [vmem:[#allocation98_spill] sm:$0xff] }
  0xb0   : > { %10191 = vmatmul.mubr.f32.gmra.mrb[8].mxu0 %v12220_v18  ;;  %v18698_v18 = vld [vmem:[#allocation95_spill] sm:$0xff] }
  0xb1   : > { %10193 = vmatprep.mubr.f32.mxu0 %v12227_v26  ;;  %v18697_v26 = vld [vmem:[#allocation94_spill] sm:$0xff] }
  0xb4   : > { %10194 = vmatmul.mubr.f32.gmra.mrb[10].mxu0 %v12229_v27  ;;  %v18696_v27 = vld [vmem:[#allocation93_spill] sm:$0xff] }
  0xb5   : > { %10196 = vmatprep.mubr.f32.mxu0 %v12249_v56  ;;  %v18695_v56 = vld [vmem:[#allocation92_spill] sm:$0xff] }
  0xb8   : > { %10197 = vmatmul.mubr.f32.gmra.mrb[12].mxu0 %v12251_v57  ;;  %v18694_v57 = vld [vmem:[#allocation83_spill] sm:$0xff] }
  0xb9   : > { %10199 = vmatprep.mubr.f32.mxu0 %v12253_v58  ;;  %v18693_v58 = vld [vmem:[#allocation81_spill] sm:$0xff] }
  0xbc   : > { %10200 = vmatmul.mubr.f32.gmra.mrb[14].mxu0 %v12274_v12  ;;  %v18692_v12 = vld [vmem:[#allocation80_spill] sm:$0xff] }
  0xbd   : > { %10202 = vmatprep.mubr.f32.mxu0 %v12297_v47  ;;  %v18691_v47 = vld [vmem:[#allocation79_spill] sm:$0xff] }
  0xc0   : > { %10203 = vmatmul.mubr.f32.gmra.mrb[16].mxu0 %v12310_v42  ;;  %v18690_v42 = vld [vmem:[#allocation78_spill] sm:$0xff] }
  0xc1   : > { %10205 = vmatprep.mubr.f32.mxu0 %v12312_v21  ;;  %v18689_v21 = vld [vmem:[#allocation74_spill] sm:$0xff] }
  0xc4   : > { %10206 = vmatmul.mubr.f32.gmra.mrb[18].mxu0 %v12315_v33  ;;  %v18688_v33 = vld [vmem:[#allocation72_spill] sm:$0xff] }
  0xc5   : > { %10208 = vmatprep.mubr.f32.mxu0 %v12330_v38  ;;  %v18687_v38 = vld [vmem:[#allocation71_spill] sm:$0xff] }
  0xc8   : > { %10209 = vmatmul.mubr.f32.gmra.mrb[20].mxu0 %v12332_v46  ;;  %v18686_v46 = vld [vmem:[#allocation70_spill] sm:$0xff] }
  0xc9   : > { %10211 = vmatprep.mubr.f32.mxu0 %v12334_v60  ;;  %v18685_v60 = vld [vmem:[#allocation69_spill] sm:$0xff] }
  0xcc   : > { %10212 = vmatmul.mubr.f32.gmra.mrb[22].mxu0 %v12360_v22  ;;  %v18684_v22 = vld [vmem:[#allocation63_spill] sm:$0xff] }
  0xcd   : > { %10214 = vmatprep.mubr.f32.mxu0 %v18626_v44  ;;  %v18683_v44 = vld [vmem:[#allocation62_spill] sm:$0xff] }
  0xd0   : > { %10215 = vmatmul.mubr.f32.gmra.mrb[24].mxu0 %v18627_v31  ;;  %v18682_v31 = vld [vmem:[#allocation61_spill] sm:$0xff] }
  0xd1   : > { %10217 = vmatprep.mubr.f32.mxu0 %v18628_v0  ;;  %v18681_v0 = vld [vmem:[#allocation60_spill] sm:$0xff] }
  0xd4   : > { %10218 = vmatmul.mubr.f32.gmra.mrb[26].mxu0 %v18629_v40  ;;  %v18680_v40 = vld [vmem:[#allocation57_spill] sm:$0xff] }
  0xd5   : > { %10220 = vmatprep.mubr.f32.mxu0 %v18630_v50  ;;  %v18641_v50 = vld [vmem:[#allocation77_spill] sm:$0xff] }
  0xd8   : > { %10221 = vmatmul.mubr.f32.gmra.mrb[28].mxu0 %v18631_v2  ;;  %v18642_v2 = vld [vmem:[#allocation82_spill] sm:$0xff] }
  0xd9   : > { %10223 = vmatprep.mubr.f32.mxu0 %v18632_v10  ;;  %v18679_v10 = vld [vmem:[#allocation56_spill] sm:$0xff] }
  0xdc   : > { %10224 = vmatmul.mubr.f32.gmra.mrb[30].mxu0 %v18633_v30  ;;  %v18678_v30 = vld [vmem:[#allocation51_spill] sm:$0xff] }
  0xdd   : > { %10226 = vmatprep.mubr.f32.mxu0 %v18634_v13  ;;  %v18677_v13 = vld [vmem:[#allocation50_spill] sm:$0xff] }
  0xe0   : > { %10227 = vmatmul.mubr.f32.gmra.mrb[32].mxu0 %v18635_v62  ;;  %v18643_v62 = vld [vmem:[#allocation87_spill] sm:$0xff] }
  0xe1   : > { %10229 = vmatprep.mubr.f32.mxu0 %v18636_v63  ;;  %v18644_v63 = vld [vmem:[#allocation88_spill] sm:$0xff] }
  0xe4   : > { %10230 = vmatmul.mubr.f32.gmra.mrb[34].mxu0 %v18637_v39  ;;  %v18676_v39 = vld [vmem:[#allocation47_spill] sm:$0xff] }
  0xe5   : > { %10232 = vmatprep.mubr.f32.mxu0 %v18638_v7  ;;  %v18645_v7 = vld [vmem:[#allocation90_spill] sm:$0xff] }
  0xe8   : > { %10233 = vmatmul.mubr.f32.gmra.mrb[36].mxu0 %v18639_v17  ;;  %v18646_v17 = vld [vmem:[#allocation91_spill] sm:$0xff] }
  0xe9   : > { %10235 = vmatprep.mubr.f32.mxu0 %v18640_v3  ;;  %v18675_v3 = vld [vmem:[#allocation46_spill] sm:$0xff] }
  0xec   : > { %10236 = vmatmul.mubr.f32.gmra.mrb[38].mxu0 %v18641_v50  ;;  %v18647_v50 = vld [vmem:[#allocation97_spill] sm:$0xff] }
  0xed   : > { %10238 = vmatprep.mubr.f32.mxu0 %v18642_v2  ;;  %v18648_v2 = vld [vmem:[#allocation102_spill] sm:$0xff] }
  0xf0   : > { %10239 = vmatmul.mubr.f32.gmra.mrb[40].mxu0 %v12599_v59  ;;  %v18649_v59 = vld [vmem:[#allocation103_spill] sm:$0xff] }
  0xf1   : > { %10241 = vmatprep.mubr.f32.mxu0 %v12601_v28  ;;  %v18674_v28 = vld [vmem:[#allocation45_spill] sm:$0xff] }
  0xf4   : > { %10242 = vmatmul.mubr.f32.gmra.mrb[42].mxu0 %v12613_v52  ;;  %v18650_v52 = vld [vmem:[#allocation109_spill] sm:$0xff] }
  0xf5   : > { %10244 = vmatprep.mubr.f32.mxu0 %v18643_v62  ;;  %v18651_v62 = vld [vmem:[#allocation110_spill] sm:$0xff] }
  0xf8   : > { %10245 = vmatmul.mubr.f32.gmra.mrb[44].mxu0 %v18644_v63  ;;  %v18673_v63 = vld [vmem:[#allocation44_spill] sm:$0xff] }
  0xf9   : > { %10247 = vmatprep.mubr.f32.mxu0 %v12620_v9  ;;  %v18672_v9 = vld [vmem:[#allocation40_spill] sm:$0xff] }
  0xfc   : > { %10248 = vmatmul.mubr.f32.gmra.mrb[46].mxu0 %v18645_v7  ;;  %v18671_v7 = vld [vmem:[#allocation39_spill] sm:$0xff] }
  0xfd   : > { %10250 = vmatprep.mubr.f32.mxu0 %v18646_v17  ;;  %v18670_v17 = vld [vmem:[#allocation35_spill] sm:$0xff] }
 0x100   : > { %10251 = vmatmul.mubr.f32.gmra.mrb[48].mxu0 %v12649_v61  ;;  %v18669_v61 = vld [vmem:[#allocation33_spill] sm:$0xff] }
 0x101   : > { %10253 = vmatprep.mubr.f32.mxu0 %v18647_v50  ;;  %v18668_v50 = vld [vmem:[#allocation31_spill] sm:$0xff] }
 0x104   : > { %10254 = vmatmul.mubr.f32.gmra.mrb[50].mxu0 %v18648_v2  ;;  %v18667_v2 = vld [vmem:[#allocation30_spill] sm:$0xff] }
 0x105   : > { %10256 = vmatprep.mubr.f32.mxu0 %v18649_v59  ;;  %v18666_v59 = vld [vmem:[#allocation29_spill] sm:$0xff] }
 0x108   : > { %10257 = vmatmul.mubr.f32.gmra.mrb[52].mxu0 %v12693_v49  ;;  %v18652_v49 = vld [vmem:[#allocation5_spill] sm:$0xff] }
 0x109   : > { %10259 = vmatprep.mubr.f32.mxu0 %v18650_v52 }
 0x10c   : > { %10260 = vmatmul.mubr.f32.gmra.mrb[54].mxu0 %v18651_v62  ;;  %v18653_v62 = vand.u32 4294901760, %v12102_v5  ;;  %v18661_v5 = vld [vmem:[#allocation17_spill] sm:$0xff] }
 0x10d   : > { %10262 = vmatprep.mubr.f32.mxu0 %v12743_v34  ;;  %v18654_v34 = vand.u32 4294901760, %v12104_v6  ;;  %v18662_v6 = vld [vmem:[#allocation20_spill] sm:$0xff] }
 0x10f   : > { %v12925_v52 = vpack.c.bf16 %v18654_v34, %v18653_v62  ;;  %v18663_v34 = vld [vmem:[#allocation23_spill] sm:$0xff]  ;;  %v18664_v62 = vld [vmem:[#allocation24_spill] sm:$0xff] }
 0x110   : > { %10263 = vmatmul.mubr.f32.gmra.mrb[56].mxu0 %v12773_v45  ;;  %v18655_v45 = vld [vmem:[#allocation6_spill] sm:$0xff] }
 0x111   : > { %10265 = vmatprep.mubr.f32.mxu0 %v12775_v15  ;;  %v18665_v15 = vld [vmem:[#allocation25_spill] sm:$0xff] }
 0x114   : > { %10266 = vmatmul.mubr.f32.gmra.mrb[58].mxu0 %v12778_v24  ;;  %v18656_v24 = vld [vmem:[#allocation8_spill] sm:$0xff] }
 0x115   : > { %10268 = vmatprep.mubr.f32.mxu0 %v12782_v54  ;;  %v18660_v54 = vld [vmem:[#allocation15_spill] sm:$0xff] }
 0x118   : > { %10269 = vmatmul.mubr.f32.gmra.mrb[60].mxu0 %v12808_v29  ;;  %v18657_v29 = vld [vmem:[#allocation11_spill] sm:$0xff] }
 0x119   : > { %10271 = vmatprep.mubr.f32.mxu0 %v12814_v48  ;;  %v18658_v48 = vld [vmem:[#allocation13_spill] sm:$0xff] }
 0x11c   : > { %10272 = vmatmul.mubr.f32.gmra.mrb[62].mxu0 %v12824_v19  ;;  %v18659_v19 = vld [vmem:[#allocation14_spill] sm:$0xff] }
 0x11d   : > { %10278 = vmatprep.mubr.f32.mxu0 %v18652_v49 }
 0x120   : > { %10279 = vmatmul.mubr.f32.vlgmr.msra.gmra.mrb[0].mxu0 %v18655_v45 }
 0x121   : > { %10827 = vmatpush3.bf16.msra.mxu0 %v12100_v4  ;;  %10281 = vmatprep.mubr.f32.mxu0 %v18656_v24 }
 0x122   : > { %10829 = vmatprep.subr.bf16.mxu0 %v12925_v52 }
 0x124   : > { %10282 = vmatmul.mubr.f32.gmra.mrb[2].mxu0 %v18657_v29 }
 0x125   : > { %10284 = vmatprep.mubr.f32.mxu0 %v18658_v48 }
 0x128   : > { %10285 = vmatmul.mubr.f32.gmra.mrb[4].mxu0 %v18659_v19 }
 0x129   : > { %10287 = vmatprep.mubr.f32.mxu0 %v18660_v54 }
 0x12c   : > { %10288 = vmatmul.mubr.f32.gmra.mrb[6].mxu0 %v18661_v5 }
 0x12d   : > { %10290 = vmatprep.mubr.f32.mxu0 %v18662_v6 }
 0x130   : > { %10291 = vmatmul.mubr.f32.gmra.mrb[8].mxu0 %v18663_v34 }
 0x131   : > { %10293 = vmatprep.mubr.f32.mxu0 %v18664_v62 }
 0x134   : > { %10294 = vmatmul.mubr.f32.gmra.mrb[10].mxu0 %v18665_v15 }
 0x135   : > { %10296 = vmatprep.mubr.f32.mxu0 %v18666_v59 }
 0x138   : > { %10297 = vmatmul.mubr.f32.gmra.mrb[12].mxu0 %v18667_v2 }
 0x139   : > { %10299 = vmatprep.mubr.f32.mxu0 %v18668_v50 }
 0x13c   : > { %10300 = vmatmul.mubr.f32.gmra.mrb[14].mxu0 %v18669_v61 }
 0x13d   : > { %10302 = vmatprep.mubr.f32.mxu0 %v18670_v17 }
 0x140   : > { %10303 = vmatmul.mubr.f32.gmra.mrb[16].mxu0 %v18671_v7 }
 0x141   : > { %10305 = vmatprep.mubr.f32.mxu0 %v18672_v9 }
 0x144   : > { %10306 = vmatmul.mubr.f32.gmra.mrb[18].mxu0 %v18673_v63 }
 0x145   : > { %10308 = vmatprep.mubr.f32.mxu0 %v18674_v28 }
 0x148   : > { %10309 = vmatmul.mubr.f32.gmra.mrb[20].mxu0 %v18675_v3 }
 0x149   : > { %10311 = vmatprep.mubr.f32.mxu0 %v18676_v39 }
 0x14c   : > { %10312 = vmatmul.mubr.f32.gmra.mrb[22].mxu0 %v18677_v13 }
 0x14d   : > { %10314 = vmatprep.mubr.f32.mxu0 %v18678_v30 }
 0x150   : > { %10315 = vmatmul.mubr.f32.gmra.mrb[24].mxu0 %v18679_v10 }
 0x151   : > { %10317 = vmatprep.mubr.f32.mxu0 %v18680_v40 }
 0x154   : > { %10318 = vmatmul.mubr.f32.gmra.mrb[26].mxu0 %v18681_v0 }
 0x155   : > { %10320 = vmatprep.mubr.f32.mxu0 %v18682_v31 }
 0x158   : > { %10321 = vmatmul.mubr.f32.gmra.mrb[28].mxu0 %v18683_v44 }
 0x159   : > { %10323 = vmatprep.mubr.f32.mxu0 %v18684_v22 }
 0x15c   : > { %10324 = vmatmul.mubr.f32.gmra.mrb[30].mxu0 %v18685_v60 }
 0x15d   : > { %10326 = vmatprep.mubr.f32.mxu0 %v18686_v46 }
 0x160   : > { %10327 = vmatmul.mubr.f32.gmra.mrb[32].mxu0 %v18687_v38 }
 0x161   : > { %10329 = vmatprep.mubr.f32.mxu0 %v18688_v33 }
 0x164   : > { %10330 = vmatmul.mubr.f32.gmra.mrb[34].mxu0 %v18689_v21 }
 0x165   : > { %10332 = vmatprep.mubr.f32.mxu0 %v18690_v42 }
 0x168   : > { %10333 = vmatmul.mubr.f32.gmra.mrb[36].mxu0 %v18691_v47 }
 0x169   : > { %10335 = vmatprep.mubr.f32.mxu0 %v18692_v12 }
 0x16c   : > { %10336 = vmatmul.mubr.f32.gmra.mrb[38].mxu0 %v18693_v58 }
 0x16d   : > { %10338 = vmatprep.mubr.f32.mxu0 %v18694_v57 }
 0x170   : > { %10339 = vmatmul.mubr.f32.gmra.mrb[40].mxu0 %v18695_v56 }
 0x171   : > { %10341 = vmatprep.mubr.f32.mxu0 %v18696_v27 }
 0x174   : > { %10342 = vmatmul.mubr.f32.gmra.mrb[42].mxu0 %v18697_v26 }
 0x175   : > { %10344 = vmatprep.mubr.f32.mxu0 %v18698_v18 }
 0x178   : > { %10345 = vmatmul.mubr.f32.gmra.mrb[44].mxu0 %v18699_v14  ;;  %v18708_v14 = vld [vmem:[#allocation114_spill] sm:$0xff] }
 0x179   : > { %10347 = vmatprep.mubr.f32.mxu0 %v18700_v53 }
 0x17c   : > { %10348 = vmatmul.mubr.f32.gmra.mrb[46].mxu0 %v18701_v41 }
 0x17d   : > { %10350 = vmatprep.mubr.f32.mxu0 %v18702_v36  ;;  %v18709_v36 = vld [vmem:[#allocation120_spill] sm:$0xff] }
 0x180   : > { %10351 = vmatmul.mubr.f32.gmra.mrb[48].mxu0 %v18703_v35 }
 0x181   : > { %10353 = vmatprep.mubr.f32.mxu0 %v18704_v32 }
 0x184   : > { %10354 = vmatmul.mubr.f32.gmra.mrb[50].mxu0 %v18705_v25 }
 0x185   : > { %10356 = vmatprep.mubr.f32.mxu0 %v18706_v23 }
 0x188   : > { %10357 = vmatmul.mubr.f32.gmra.mrb[52].mxu0 %v12731_v37 }
 0x189   : > { %10359 = vmatprep.mubr.f32.mxu0 %v12734_v16  ;;  %v18710_v16 = vand.u32 4294901760, %v18652_v49  ;;  %v18719_v49 = vand.u32 4294901760, %v18663_v34  ;;  %v18768_v34 = vld [vmem:[#allocation113_spill] sm:$0xff] }
 0x18c   : > { %10360 = vmatmul.mubr.f32.gmra.mrb[54].mxu0 %v18707_v20  ;;  %v18711_v20 = vand.u32 4294901760, %v18655_v45  ;;  %v18720_v45 = vand.u32 4294901760, %v18664_v62  ;;  %v18769_v62 = vand.u32 4294901760, %v18768_v34  ;;  %v18832_v34 = vld [vmem:[#allocation97_spill] sm:$0xff] }
 0x18d   : > { %10362 = vmatprep.mubr.f32.mxu0 %v18708_v14 }
 0x190   : > { %10363 = vmatmul.mubr.f32.gmra.mrb[56].mxu0 %v12792_v1 }
 0x191   : > { %10365 = vmatprep.mubr.f32.mxu0 %v12796_v43  ;;  %v18712_v43 = vand.u32 4294901760, %v18656_v24  ;;  %v18721_v24 = vand.u32 4294901760, %v18665_v15  ;;  %v18728_v15 = vand.u32 4294901760, %v18672_v9  ;;  %v18735_v9 = vand.u32 4294901760, %v18679_v10 }
 0x192   : > { %v18742_v10 = vand.u32 4294901760, %v18686_v46  ;;  %v18749_v46 = vand.u32 4294901760, %v18693_v58  ;;  %v18757_v58 = vand.u32 4294901760, %v18700_v53  ;;  %v18765_v53 = vand.u32 4294901760, %v12731_v37  ;;  %v18775_v37 = vld [vmem:[#allocation122_spill] sm:$0xff] }
 0x194   : > { %10366 = vmatmul.mubr.f32.gmra.mrb[58].mxu0 %v18709_v36 }
 0x195   : > { %10368 = vmatprep.mubr.f32.mxu0 %v12812_v8  ;;  %v18713_v8 = vand.u32 4294901760, %v18657_v29  ;;  %v18724_v29 = vand.u32 4294901760, %v18668_v50  ;;  %v18736_v50 = vand.u32 4294901760, %v18680_v40  ;;  %v18743_v40 = vand.u32 4294901760, %v18687_v38 }
 0x196   : > { %v18750_v38 = vand.u32 4294901760, %v18694_v57  ;;  %v18758_v57 = vand.u32 4294901760, %v18701_v41  ;;  %v18766_v41 = vld [vmem:[#allocation111_spill] sm:$0xff] }
 0x198   : > { %10369 = vmatmul.mubr.f32.gmra.mrb[60].mxu0 %v12822_v11 }
 0x199   : > { %10371 = vmatprep.mubr.f32.mxu0 %v12831_v55  ;;  %v18714_v55 = vand.u32 4294901760, %v18658_v48  ;;  %v18726_v48 = vand.u32 4294901760, %v18670_v17  ;;  %v18733_v17 = vand.u32 4294901760, %v18677_v13 }
 0x19c   : > { %10372 = vmatmul.mubr.f32.gmra.mrb[62].mxu0 %v12838_v51  ;;  %v18715_v51 = vand.u32 4294901760, %v18659_v19  ;;  %v18727_v19 = vand.u32 4294901760, %v18671_v7  ;;  %v18734_v7 = vand.u32 4294901760, %v18678_v30  ;;  %v18741_v30 = vand.u32 4294901760, %v18685_v60 }
 0x19d   : > { %10378 = vmatprep.mubr.f32.mxu0 %v18710_v16  ;;  %v18716_v16 = vand.u32 4294901760, %v18660_v54  ;;  %v18723_v54 = vand.u32 4294901760, %v18667_v2  ;;  %v18740_v2 = vand.u32 4294901760, %v18684_v22  ;;  %v18747_v22 = vand.u32 4294901760, %v18691_v47 }
 0x19e   : > { %v18748_v60 = vand.u32 4294901760, %v18692_v12  ;;  %v18754_v47 = vand.u32 4294901760, %v18698_v18  ;;  %v18755_v12 = vld [vmem:[#allocation98_spill] sm:$0xff]  ;;  %v18763_v18 = vand.u32 4294901760, %v18705_v25  ;;  %v18772_v25 = vld [vmem:[#allocation119_spill] sm:$0xff] }
 0x19f   : > { %v18756_v13 = vand.u32 4294901760, %v18755_v12  ;;  %v18819_v12 = vld [vmem:[#allocation75_spill] sm:$0xff] }
 0x1a0   : > { %10379 = vmatmul.mubr.f32.vlgmr.msra.gmra.mrb[0].mxu0 %v18711_v20  ;;  %v18717_v20 = vand.u32 4294901760, %v18661_v5  ;;  %v18764_v5 = vand.u32 4294901760, %v18706_v23  ;;  %v18774_v23 = vand.u32 4294901760, %v18709_v36  ;;  %v18784_v36 = vld [vmem:[#allocation4_spill] sm:$0xff] }
 0x1a1   : > { %10831 = vmatpush3.bf16.msra.mxu0 %v12925_v52  ;;  %10381 = vmatprep.mubr.f32.mxu0 %v18712_v43  ;;  %v18718_v52 = vand.u32 4294901760, %v18662_v6  ;;  %v18722_v43 = vand.u32 4294901760, %v18666_v59  ;;  %v18729_v59 = vand.u32 4294901760, %v18673_v63  ;;  %v18767_v6 = vand.u32 4294901760, %v18766_v41  ;;  %v18830_v41 = vld [vmem:[#allocation91_spill] sm:$0xff] }
 0x1a2   : > { %10833 = vmatprep.subr.bf16.mxu0 %v12100_v4 }
 0x1a4   : > { %10382 = vmatmul.mubr.f32.gmra.mrb[2].mxu0 %v18713_v8  ;;  %v18725_v8 = vand.u32 4294901760, %v18669_v61  ;;  %v18732_v61 = vand.u32 4294901760, %v18676_v39  ;;  %v18739_v39 = vand.u32 4294901760, %v18683_v44  ;;  %v18746_v44 = vand.u32 4294901760, %v18690_v42 }
 0x1a5   : > { %10384 = vmatprep.mubr.f32.mxu0 %v18714_v55  ;;  %v18730_v55 = vand.u32 4294901760, %v18674_v28  ;;  %v18737_v28 = vand.u32 4294901760, %v18681_v0  ;;  %v18744_v0 = vand.u32 4294901760, %v18688_v33  ;;  %v18751_v33 = vand.u32 4294901760, %v18695_v56  ;;  %v18759_v56 = vld [vmem:[#allocation101_spill] sm:$0xff] }
 0x1a6   : > { %v18753_v42 = vand.u32 4294901760, %v18697_v26  ;;  %v18760_v63 = vand.u32 4294901760, %v18759_v56  ;;  %v18762_v26 = vand.u32 4294901760, %v18704_v32  ;;  %v18771_v32 = vand.u32 4294901760, %v12792_v1  ;;  %v18782_v1 = vld [vmem:[#allocation2_spill] sm:$0xff]  ;;  %v18823_v56 = vld [vmem:[#allocation84_spill] sm:$0xff] }
 0x1a8   : > { %10385 = vmatmul.mubr.f32.gmra.mrb[4].mxu0 %v18715_v51  ;;  %v18731_v51 = vand.u32 4294901760, %v18675_v3  ;;  %v18738_v3 = vand.u32 4294901760, %v18682_v31  ;;  %v18745_v31 = vand.u32 4294901760, %v18689_v21  ;;  %v18752_v21 = vand.u32 4294901760, %v18696_v27 }
 0x1a9   : > { %10387 = vmatprep.mubr.f32.mxu0 %v18716_v16  ;;  %v18761_v27 = vand.u32 4294901760, %v18703_v35  ;;  %v18770_v35 = vand.u32 4294901760, %v18708_v14  ;;  %v18773_v16 = vand.u32 4294901760, %v18772_v25  ;;  %v18780_v14 = vld [vmem:[#allocation126_spill] sm:$0xff]  ;;  %v18836_v25 = vld [vmem:[#allocation109_spill] sm:$0xff] }
 0x1ac   : > { %10388 = vmatmul.mubr.f32.gmra.mrb[6].mxu0 %v18717_v20  ;;  %v18776_v20 = vand.u32 4294901760, %v18775_v37  ;;  %v18839_v37 = vld [vmem:[#allocation115_spill] sm:$0xff] }
 0x1ad   : > { %10390 = vmatprep.mubr.f32.mxu0 %v18718_v52  ;;  %v18777_v52 = vand.u32 4294901760, %v12822_v11  ;;  %v18787_v11 = vld [vmem:[#allocation10_spill] sm:$0xff] }
 0x1b0   : > { %10391 = vmatmul.mubr.f32.gmra.mrb[8].mxu0 %v18719_v49  ;;  %v18778_v49 = vld [vmem:[#allocation125_spill] sm:$0xff] }
 0x1b1   : > { %10393 = vmatprep.mubr.f32.mxu0 %v18720_v45  ;;  %v18779_v45 = vand.u32 4294901760, %v18778_v49  ;;  %v18842_v49 = vld [vmem:[#allocation118_spill] sm:$0xff] }
 0x1b4   : > { %10394 = vmatmul.mubr.f32.gmra.mrb[10].mxu0 %v18721_v24  ;;  %v18781_v24 = vand.u32 4294901760, %v18780_v14  ;;  %v18844_v14 = vld [vmem:[#allocation123_spill] sm:$0xff] }
 0x1b5   : > { %10396 = vmatprep.mubr.f32.mxu0 %v18722_v43  ;;  %v18783_v43 = vld [vmem:[#allocation3_spill] sm:$0xff] }
 0x1b8   : > { %10397 = vmatmul.mubr.f32.gmra.mrb[12].mxu0 %v18723_v54  ;;  %v18785_v54 = vld [vmem:[#allocation7_spill] sm:$0xff] }
 0x1b9   : > { %10399 = vmatprep.mubr.f32.mxu0 %v18724_v29  ;;  %v18786_v29 = vld [vmem:[#allocation9_spill] sm:$0xff] }
 0x1bc   : > { %10400 = vmatmul.mubr.f32.gmra.mrb[14].mxu0 %v18725_v8  ;;  %v18788_v8 = vld [vmem:[#allocation12_spill] sm:$0xff] }
 0x1bd   : > { %10402 = vmatprep.mubr.f32.mxu0 %v18726_v48  ;;  %v18789_v48 = vld [vmem:[#allocation16_spill] sm:$0xff] }
 0x1c0   : > { %10403 = vmatmul.mubr.f32.gmra.mrb[16].mxu0 %v18727_v19  ;;  %v18790_v19 = vld [vmem:[#allocation18_spill] sm:$0xff] }
 0x1c1   : > { %10405 = vmatprep.mubr.f32.mxu0 %v18728_v15  ;;  %v18791_v15 = vld [vmem:[#allocation19_spill] sm:$0xff] }
 0x1c4   : > { %10406 = vmatmul.mubr.f32.gmra.mrb[18].mxu0 %v18729_v59  ;;  %v18792_v59 = vld [vmem:[#allocation21_spill] sm:$0xff] }
 0x1c5   : > { %10408 = vmatprep.mubr.f32.mxu0 %v18730_v55  ;;  %v18793_v55 = vld [vmem:[#allocation22_spill] sm:$0xff] }
 0x1c8   : > { %10409 = vmatmul.mubr.f32.gmra.mrb[20].mxu0 %v18731_v51  ;;  %v18795_v51 = vld [vmem:[#allocation27_spill] sm:$0xff] }
 0x1c9   : > { %10411 = vmatprep.mubr.f32.mxu0 %v18732_v61  ;;  %v18796_v61 = vld [vmem:[#allocation28_spill] sm:$0xff] }
 0x1cc   : > { %10412 = vmatmul.mubr.f32.gmra.mrb[22].mxu0 %v18733_v17  ;;  %v18797_v17 = vld [vmem:[#allocation32_spill] sm:$0xff] }
 0x1cd   : > { %10414 = vmatprep.mubr.f32.mxu0 %v18734_v7  ;;  %v18798_v7 = vld [vmem:[#allocation34_spill] sm:$0xff] }
 0x1d0   : > { %10415 = vmatmul.mubr.f32.gmra.mrb[24].mxu0 %v18735_v9  ;;  %v18799_v9 = vld [vmem:[#allocation36_spill] sm:$0xff] }
 0x1d1   : > { %10417 = vmatprep.mubr.f32.mxu0 %v18736_v50  ;;  %v18800_v50 = vld [vmem:[#allocation37_spill] sm:$0xff] }
 0x1d4   : > { %10418 = vmatmul.mubr.f32.gmra.mrb[26].mxu0 %v18737_v28  ;;  %v18801_v28 = vld [vmem:[#allocation38_spill] sm:$0xff] }
 0x1d5   : > { %10420 = vmatprep.mubr.f32.mxu0 %v18738_v3  ;;  %v18802_v3 = vld [vmem:[#allocation41_spill] sm:$0xff] }
 0x1d8   : > { %10421 = vmatmul.mubr.f32.gmra.mrb[28].mxu0 %v18739_v39  ;;  %v18803_v39 = vld [vmem:[#allocation42_spill] sm:$0xff] }
 0x1d9   : > { %10423 = vmatprep.mubr.f32.mxu0 %v18740_v2  ;;  %v18804_v2 = vld [vmem:[#allocation43_spill] sm:$0xff] }
 0x1dc   : > { %10424 = vmatmul.mubr.f32.gmra.mrb[30].mxu0 %v18741_v30  ;;  %v18805_v30 = vld [vmem:[#allocation48_spill] sm:$0xff] }
 0x1dd   : > { %10426 = vmatprep.mubr.f32.mxu0 %v18742_v10  ;;  %v18806_v10 = vld [vmem:[#allocation49_spill] sm:$0xff] }
 0x1e0   : > { %10427 = vmatmul.mubr.f32.gmra.mrb[32].mxu0 %v18743_v40  ;;  %v18807_v40 = vld [vmem:[#allocation52_spill] sm:$0xff] }
 0x1e1   : > { %10429 = vmatprep.mubr.f32.mxu0 %v18744_v0  ;;  %v18808_v0 = vld [vmem:[#allocation53_spill] sm:$0xff] }
 0x1e4   : > { %10430 = vmatmul.mubr.f32.gmra.mrb[34].mxu0 %v18745_v31  ;;  %v18809_v31 = vld [vmem:[#allocation54_spill] sm:$0xff] }
 0x1e5   : > { %10432 = vmatprep.mubr.f32.mxu0 %v18746_v44  ;;  %v18810_v44 = vld [vmem:[#allocation55_spill] sm:$0xff] }
 0x1e8   : > { %10433 = vmatmul.mubr.f32.gmra.mrb[36].mxu0 %v18747_v22  ;;  %v18811_v22 = vld [vmem:[#allocation58_spill] sm:$0xff] }
 0x1e9   : > { %10435 = vmatprep.mubr.f32.mxu0 %v18748_v60  ;;  %v18812_v60 = vld [vmem:[#allocation59_spill] sm:$0xff] }
 0x1ec   : > { %10436 = vmatmul.mubr.f32.gmra.mrb[38].mxu0 %v18749_v46  ;;  %v18813_v46 = vld [vmem:[#allocation64_spill] sm:$0xff] }
 0x1ed   : > { %10438 = vmatprep.mubr.f32.mxu0 %v18750_v38  ;;  %v18814_v38 = vld [vmem:[#allocation65_spill] sm:$0xff] }
 0x1f0   : > { %10439 = vmatmul.mubr.f32.gmra.mrb[40].mxu0 %v18751_v33  ;;  %v18815_v33 = vld [vmem:[#allocation66_spill] sm:$0xff] }
 0x1f1   : > { %10441 = vmatprep.mubr.f32.mxu0 %v18752_v21  ;;  %v18816_v21 = vld [vmem:[#allocation67_spill] sm:$0xff] }
 0x1f4   : > { %10442 = vmatmul.mubr.f32.gmra.mrb[42].mxu0 %v18753_v42  ;;  %v18817_v42 = vld [vmem:[#allocation68_spill] sm:$0xff] }
 0x1f5   : > { %10444 = vmatprep.mubr.f32.mxu0 %v18754_v47  ;;  %v18818_v47 = vld [vmem:[#allocation73_spill] sm:$0xff] }
 0x1f8   : > { %10445 = vmatmul.mubr.f32.gmra.mrb[44].mxu0 %v18756_v13  ;;  %v18820_v13 = vld [vmem:[#allocation76_spill] sm:$0xff] }
 0x1f9   : > { %10447 = vmatprep.mubr.f32.mxu0 %v18757_v58  ;;  %v18821_v58 = vld [vmem:[#allocation77_spill] sm:$0xff] }
 0x1fc   : > { %10448 = vmatmul.mubr.f32.gmra.mrb[46].mxu0 %v18758_v57  ;;  %v18822_v57 = vld [vmem:[#allocation82_spill] sm:$0xff] }
 0x1fd   : > { %10450 = vmatprep.mubr.f32.mxu0 %v18760_v63  ;;  %v18824_v63 = vld [vmem:[#allocation85_spill] sm:$0xff] }
 0x200   : > { %10451 = vmatmul.mubr.f32.gmra.mrb[48].mxu0 %v18761_v27  ;;  %v18825_v27 = vld [vmem:[#allocation86_spill] sm:$0xff] }
 0x201   : > { %10453 = vmatprep.mubr.f32.mxu0 %v18762_v26  ;;  %v18826_v26 = vld [vmem:[#allocation87_spill] sm:$0xff] }
 0x204   : > { %10454 = vmatmul.mubr.f32.gmra.mrb[50].mxu0 %v18763_v18  ;;  %v18827_v18 = vld [vmem:[#allocation88_spill] sm:$0xff] }
 0x205   : > { %10456 = vmatprep.mubr.f32.mxu0 %v18764_v5  ;;  %v18828_v5 = vld [vmem:[#allocation89_spill] sm:$0xff] }
 0x208   : > { %10457 = vmatmul.mubr.f32.gmra.mrb[52].mxu0 %v18765_v53  ;;  %v18829_v53 = vld [vmem:[#allocation90_spill] sm:$0xff] }
 0x209   : > { %10459 = vmatprep.mubr.f32.mxu0 %v18767_v6  ;;  %v18831_v6 = vld [vmem:[#allocation96_spill] sm:$0xff] }
 0x20c   : > { %10460 = vmatmul.mubr.f32.gmra.mrb[54].mxu0 %v18769_v62  ;;  %v18833_v62 = vld [vmem:[#allocation102_spill] sm:$0xff] }
 0x20d   : > { %10462 = vmatprep.mubr.f32.mxu0 %v18770_v35  ;;  %v18834_v35 = vld [vmem:[#allocation103_spill] sm:$0xff] }
 0x210   : > { %10463 = vmatmul.mubr.f32.gmra.mrb[56].mxu0 %v18771_v32  ;;  %v18835_v32 = vld [vmem:[#allocation108_spill] sm:$0xff] }
 0x211   : > { %10465 = vmatprep.mubr.f32.mxu0 %v18773_v16  ;;  %v18837_v16 = vld [vmem:[#allocation110_spill] sm:$0xff] }
 0x214   : > { %10466 = vmatmul.mubr.f32.gmra.mrb[58].mxu0 %v18774_v23  ;;  %v18838_v23 = vld [vmem:[#allocation112_spill] sm:$0xff] }
 0x215   : > { %10468 = vmatprep.mubr.f32.mxu0 %v18776_v20  ;;  %v18840_v20 = vld [vmem:[#allocation116_spill] sm:$0xff] }
 0x218   : > { %10469 = vmatmul.mubr.f32.gmra.mrb[60].mxu0 %v18777_v52  ;;  %v18841_v52 = vld [vmem:[#allocation117_spill] sm:$0xff] }
 0x219   : > { %10471 = vmatprep.mubr.f32.mxu0 %v18779_v45  ;;  %v18843_v45 = vld [vmem:[#allocation121_spill] sm:$0xff] }
 0x21c   : > { %10472 = vmatmul.mubr.f32.gmra.mrb[62].mxu0 %v18781_v24  ;;  %v18845_v24 = vld [vmem:[#allocation124_spill] sm:$0xff] }
 0x21d   : > { %10478 = vmatprep.mubr.f32.mxu0 %v18782_v1 }
 0x220   : > { %10479 = vmatmul.mubr.f32.vlgmr.msra.gmra.mrb[0].mxu0 %v18783_v43 }
 0x221   : > { %10835 = vmatpush3.bf16.msra.mxu0 %v12100_v4  ;;  %10481 = vmatprep.mubr.f32.mxu0 %v18784_v36  ;;  %v18794_v4 = vld [vmem:[#allocation26_spill] sm:$0xff] }
 0x224   : > { %10482 = vmatmul.mubr.f32.gmra.mrb[2].mxu0 %v18785_v54 }
 0x225   : > { %10484 = vmatprep.mubr.f32.mxu0 %v18786_v29 }
 0x228   : > { %10485 = vmatmul.mubr.f32.gmra.mrb[4].mxu0 %v18787_v11 }
 0x229   : > { %10487 = vmatprep.mubr.f32.mxu0 %v18788_v8 }
 0x22c   : > { %10488 = vmatmul.mubr.f32.gmra.mrb[6].mxu0 %v18789_v48 }
 0x22d   : > { %10490 = vmatprep.mubr.f32.mxu0 %v18790_v19 }
 0x230   : > { %10491 = vmatmul.mubr.f32.gmra.mrb[8].mxu0 %v18791_v15 }
 0x231   : > { %10493 = vmatprep.mubr.f32.mxu0 %v18792_v59 }
 0x234   : > { %10494 = vmatmul.mubr.f32.gmra.mrb[10].mxu0 %v18793_v55 }
 0x235   : > { %10496 = vmatprep.mubr.f32.mxu0 %v18794_v4 }
 0x238   : > { %10497 = vmatmul.mubr.f32.gmra.mrb[12].mxu0 %v18795_v51 }
 0x239   : > { %10499 = vmatprep.mubr.f32.mxu0 %v18796_v61 }
 0x23c   : > { %10500 = vmatmul.mubr.f32.gmra.mrb[14].mxu0 %v18797_v17 }
 0x23d   : > { %10502 = vmatprep.mubr.f32.mxu0 %v18798_v7 }
 0x240   : > { %10503 = vmatmul.mubr.f32.gmra.mrb[16].mxu0 %v18799_v9 }
 0x241   : > { %10505 = vmatprep.mubr.f32.mxu0 %v18800_v50 }
 0x244   : > { %10506 = vmatmul.mubr.f32.gmra.mrb[18].mxu0 %v18801_v28 }
 0x245   : > { %10508 = vmatprep.mubr.f32.mxu0 %v18802_v3 }
 0x248   : > { %10509 = vmatmul.mubr.f32.gmra.mrb[20].mxu0 %v18803_v39 }
 0x249   : > { %10511 = vmatprep.mubr.f32.mxu0 %v18804_v2 }
 0x24c   : > { %10512 = vmatmul.mubr.f32.gmra.mrb[22].mxu0 %v18805_v30 }
 0x24d   : > { %10514 = vmatprep.mubr.f32.mxu0 %v18806_v10 }
 0x250   : > { %10515 = vmatmul.mubr.f32.gmra.mrb[24].mxu0 %v18807_v40 }
 0x251   : > { %10517 = vmatprep.mubr.f32.mxu0 %v18808_v0 }
 0x254   : > { %10518 = vmatmul.mubr.f32.gmra.mrb[26].mxu0 %v18809_v31 }
 0x255   : > { %10520 = vmatprep.mubr.f32.mxu0 %v18810_v44 }
 0x258   : > { %10521 = vmatmul.mubr.f32.gmra.mrb[28].mxu0 %v18811_v22 }
 0x259   : > { %10523 = vmatprep.mubr.f32.mxu0 %v18812_v60 }
 0x25c   : > { %10524 = vmatmul.mubr.f32.gmra.mrb[30].mxu0 %v18813_v46 }
 0x25d   : > { %10526 = vmatprep.mubr.f32.mxu0 %v18814_v38 }
 0x260   : > { %10527 = vmatmul.mubr.f32.gmra.mrb[32].mxu0 %v18815_v33 }
 0x261   : > { %10529 = vmatprep.mubr.f32.mxu0 %v18816_v21 }
 0x264   : > { %10530 = vmatmul.mubr.f32.gmra.mrb[34].mxu0 %v18817_v42 }
 0x265   : > { %10532 = vmatprep.mubr.f32.mxu0 %v18818_v47 }
 0x268   : > { %10533 = vmatmul.mubr.f32.gmra.mrb[36].mxu0 %v18819_v12 }
 0x269   : > { %10535 = vmatprep.mubr.f32.mxu0 %v18820_v13 }
 0x26c   : > { %10536 = vmatmul.mubr.f32.gmra.mrb[38].mxu0 %v18821_v58 }
 0x26d   : > { %10538 = vmatprep.mubr.f32.mxu0 %v18822_v57 }
 0x270   : > { %10539 = vmatmul.mubr.f32.gmra.mrb[40].mxu0 %v18823_v56 }
 0x271   : > { %10541 = vmatprep.mubr.f32.mxu0 %v18824_v63 }
 0x274   : > { %10542 = vmatmul.mubr.f32.gmra.mrb[42].mxu0 %v18825_v27 }
 0x275   : > { %10544 = vmatprep.mubr.f32.mxu0 %v18826_v26 }
 0x278   : > { %10545 = vmatmul.mubr.f32.gmra.mrb[44].mxu0 %v18827_v18 }
 0x279   : > { %10547 = vmatprep.mubr.f32.mxu0 %v18828_v5 }
 0x27c   : > { %10548 = vmatmul.mubr.f32.gmra.mrb[46].mxu0 %v18829_v53 }
 0x27d   : > { %10550 = vmatprep.mubr.f32.mxu0 %v18830_v41 }
 0x280   : > { %10551 = vmatmul.mubr.f32.gmra.mrb[48].mxu0 %v18831_v6 }
 0x281   : > { %10553 = vmatprep.mubr.f32.mxu0 %v18832_v34 }
 0x284   : > { %10554 = vmatmul.mubr.f32.gmra.mrb[50].mxu0 %v18833_v62 }
 0x285   : > { %10556 = vmatprep.mubr.f32.mxu0 %v18834_v35 }
 0x288   : > { %10557 = vmatmul.mubr.f32.gmra.mrb[52].mxu0 %v18835_v32 }
 0x289   : > { %10559 = vmatprep.mubr.f32.mxu0 %v18836_v25 }
 0x28c   : > { %10560 = vmatmul.mubr.f32.gmra.mrb[54].mxu0 %v18837_v16 }
 0x28d   : > { %10562 = vmatprep.mubr.f32.mxu0 %v18838_v23 }
 0x290   : > { %10563 = vmatmul.mubr.f32.gmra.mrb[56].mxu0 %v18839_v37 }
 0x291   : > { %10565 = vmatprep.mubr.f32.mxu0 %v18840_v20 }
 0x294   : > { %10566 = vmatmul.mubr.f32.gmra.mrb[58].mxu0 %v18841_v52 }
 0x295   : > { %10568 = vmatprep.mubr.f32.mxu0 %v18842_v49 }
 0x298   : > { %10569 = vmatmul.mubr.f32.gmra.mrb[60].mxu0 %v18843_v45 }
 0x299   : > { %10571 = vmatprep.mubr.f32.mxu0 %v18844_v14 }
 0x29c   : > { %10572 = vmatmul.mubr.f32.gmra.mrb[62].mxu0 %v18845_v24 }
 0x29d   : > { %10578 = vmatprep.mubr.f32.mxu0 %v18782_v1  ;;  %v11560_v1 = vld [vmem:[%s17734_s3 + $0x4] ss:$36 sps:$4 sm:$0xff]  }
 0x29e   : > { %4543 = vmatprep.subr.bf16.mxu0 %v11560_v1 }
 0x2a0   : > { %10579 = vmatmul.mubr.f32.vlgmr.msra.gmra.mrb[0].mxu0 %v18783_v43  ;;  %v11558_v43 = vld [vmem:[%s17734_s3] ss:$36 sps:$4 sm:$0xff]  }
 0x2a1   : > { %10581 = vmatprep.mubr.f32.mxu0 %v18784_v36  ;;  %4544 = vmatpush1.bf16.msra.mxu0 %v11558_v43  ;;  %v11563_v36 = vld [vmem:[%s17734_s3 + $0x4c] ss:$36 sps:$4 sm:$0xff]  }
 0x2a2   : > { %4545 = vmatprep.subr.bf16.mxu0 %v11563_v36 }
 0x2a4   : > { %10582 = vmatmul.mubr.f32.gmra.mrb[2].mxu0 %v18785_v54  ;;  %v11561_v54 = vld [vmem:[%s17734_s3 + $0x48] ss:$36 sps:$4 sm:$0xff]  }
 0x2a5   : > { %10584 = vmatprep.mubr.f32.mxu0 %v18786_v29  ;;  %4546 = vmatpush1.bf16.msra.mxu0 %v11561_v54  ;;  %v11566_v29 = vld [vmem:[%s17734_s3 + $0x94] ss:$36 sps:$4 sm:$0xff]  }
 0x2a6   : > { %4547 = vmatprep.subr.bf16.mxu0 %v11566_v29 }
 0x2a8   : > { %10585 = vmatmul.mubr.f32.gmra.mrb[4].mxu0 %v18787_v11  ;;  %v11564_v11 = vld [vmem:[%s17734_s3 + $0x90] ss:$36 sps:$4 sm:$0xff]  }
 0x2a9   : > { %10587 = vmatprep.mubr.f32.mxu0 %v18788_v8  ;;  %4548 = vmatpush1.bf16.msra.mxu0 %v11564_v11  ;;  %v11569_v8 = vld [vmem:[%s17734_s3 + $0xdc] ss:$36 sps:$4 sm:$0xff]  }
 0x2aa   : > { %4549 = vmatprep.subr.bf16.mxu0 %v11569_v8 }
 0x2ac   : > { %10588 = vmatmul.mubr.f32.gmra.mrb[6].mxu0 %v18789_v48  ;;  %v11567_v48 = vld [vmem:[%s17734_s3 + $0xd8] ss:$36 sps:$4 sm:$0xff]  }
 0x2ad   : > { %10590 = vmatprep.mubr.f32.mxu0 %v18790_v19  ;;  %4550 = vmatpush1.bf16.msra.mxu0 %v11567_v48  ;;  %v18010_v19 = vmov 0  }
 0x2ae   : > { %5088 = vmatprep.mubr.bf16.mxu1 %v18010_v19 }
 0x2b0   : > { %10591 = vmatmul.mubr.f32.gmra.mrb[8].mxu0 %v18791_v15  ;;  %v11570_v15 = vld [vmem:[%s17734_s3 + $0xc] ss:$36 sps:$4 sm:$0xff]  }
 0x2b1   : > { %10593 = vmatprep.mubr.f32.mxu0 %v18792_v59  ;;  %v13283_v59 = vld [vmem:[%s17734_s3 + $0x8] ss:$36 sps:$4 sm:$0xff]   ;;  %10836 = vmatprep.subr.bf16.mxu1 %v11570_v15 }
 0x2b2   : > { %4896 = vmatprep.subr.bf16.mxu0 %v11570_v15  ;;  %10840 = vmatpush1.bf16.msra.mxu1 %v13283_v59 }
 0x2b4   : > { %10594 = vmatmul.mubr.f32.gmra.mrb[10].mxu0 %v18793_v55  ;;  %v13289_v55 = vld [vmem:[%s17734_s3 + $0x54] ss:$36 sps:$4 sm:$0xff]  }
 0x2b5   : > { %10596 = vmatprep.mubr.f32.mxu0 %v18794_v4  ;;  %v13294_v4 = vld [vmem:[%s17734_s3 + $0x50] ss:$36 sps:$4 sm:$0xff]   ;;  %10837 = vmatprep.subr.bf16.mxu1 %v13289_v55 }
 0x2b6   : > { %10841 = vmatpush1.bf16.msra.mxu1 %v13294_v4 }
 0x2b8   : > { %10597 = vmatmul.mubr.f32.gmra.mrb[12].mxu0 %v18795_v51  ;;  %v13301_v51 = vld [vmem:[%s17734_s3 + $0x9c] ss:$36 sps:$4 sm:$0xff]  }
 0x2b9   : > { %10599 = vmatprep.mubr.f32.mxu0 %v18796_v61  ;;  %v13306_v61 = vld [vmem:[%s17734_s3 + $0x98] ss:$36 sps:$4 sm:$0xff]   ;;  %10838 = vmatprep.subr.bf16.mxu1 %v13301_v51 }
 0x2ba   : > { %10842 = vmatpush1.bf16.msra.mxu1 %v13306_v61 }
 0x2bc   : > { %10600 = vmatmul.mubr.f32.gmra.mrb[14].mxu0 %v18797_v17  ;;  %v13313_v17 = vld [vmem:[%s17734_s3 + $0xe4] ss:$36 sps:$4 sm:$0xff]  }
 0x2bd   : > { %10602 = vmatprep.mubr.f32.mxu0 %v18798_v7  ;;  %v13318_v7 = vld [vmem:[%s17734_s3 + $0xe0] ss:$36 sps:$4 sm:$0xff]   ;;  %10839 = vmatprep.subr.bf16.mxu1 %v13313_v17 }
 0x2be   : > { %10843 = vmatpush1.bf16.msra.mxu1 %v13318_v7 }
 0x2c0   : > { %10603 = vmatmul.mubr.f32.gmra.mrb[16].mxu0 %v18799_v9  ;;  %v11584_v9 = vld [vmem:[%s17734_s3 + $0x14] ss:$36 sps:$4 sm:$0xff]  }
 0x2c1   : > { %10605 = vmatprep.mubr.f32.mxu0 %v18800_v50  ;;  %5249 = vmatprep.subr.bf16.mxu1 %v11584_v9 }
 0x2c4   : > { %10606 = vmatmul.mubr.f32.gmra.mrb[18].mxu0 %v18801_v28 }
 0x2c5   : > { %10608 = vmatprep.mubr.f32.mxu0 %v18802_v3 }
 0x2c8   : > { %10609 = vmatmul.mubr.f32.gmra.mrb[20].mxu0 %v18803_v39 }
 0x2c9   : > { %10611 = vmatprep.mubr.f32.mxu0 %v18804_v2 }
 0x2cc   : > { %10612 = vmatmul.mubr.f32.gmra.mrb[22].mxu0 %v18805_v30 }
 0x2cd   : > { %10614 = vmatprep.mubr.f32.mxu0 %v18806_v10 }
 0x2d0   : > { %10615 = vmatmul.mubr.f32.gmra.mrb[24].mxu0 %v18807_v40 }
 0x2d1   : > { %10617 = vmatprep.mubr.f32.mxu0 %v18808_v0 }
 0x2d4   : > { %10618 = vmatmul.mubr.f32.gmra.mrb[26].mxu0 %v18809_v31 }
 0x2d5   : > { %10620 = vmatprep.mubr.f32.mxu0 %v18810_v44 }
 0x2d8   : > { %10621 = vmatmul.mubr.f32.gmra.mrb[28].mxu0 %v18811_v22 }
 0x2d9   : > { %10623 = vmatprep.mubr.f32.mxu0 %v18812_v60 }
 0x2dc   : > { %10624 = vmatmul.mubr.f32.gmra.mrb[30].mxu0 %v18813_v46 }
 0x2dd   : > { %10626 = vmatprep.mubr.f32.mxu0 %v18814_v38 }
 0x2e0   : > { %10627 = vmatmul.mubr.f32.gmra.mrb[32].mxu0 %v18815_v33 }
 0x2e1   : > { %10629 = vmatprep.mubr.f32.mxu0 %v18816_v21 }
 0x2e4   : > { %10630 = vmatmul.mubr.f32.gmra.mrb[34].mxu0 %v18817_v42 }
 0x2e5   : > { %10632 = vmatprep.mubr.f32.mxu0 %v18818_v47 }
 0x2e8   : > { %10633 = vmatmul.mubr.f32.gmra.mrb[36].mxu0 %v18819_v12 }
 0x2e9   : > { %10635 = vmatprep.mubr.f32.mxu0 %v18820_v13 }
 0x2ec   : > { %10636 = vmatmul.mubr.f32.gmra.mrb[38].mxu0 %v18821_v58 }
 0x2ed   : > { %10638 = vmatprep.mubr.f32.mxu0 %v18822_v57 }
 0x2f0   : > { %10639 = vmatmul.mubr.f32.gmra.mrb[40].mxu0 %v18823_v56 }
 0x2f1   : > { %10641 = vmatprep.mubr.f32.mxu0 %v18824_v63 }
 0x2f4   : > { %10642 = vmatmul.mubr.f32.gmra.mrb[42].mxu0 %v18825_v27 }
 0x2f5   : > { %10644 = vmatprep.mubr.f32.mxu0 %v18826_v26 }
 0x2f8   : > { %10645 = vmatmul.mubr.f32.gmra.mrb[44].mxu0 %v18827_v18 }
 0x2f9   : > { %10647 = vmatprep.mubr.f32.mxu0 %v18828_v5 }
 0x2fc   : > { %10648 = vmatmul.mubr.f32.gmra.mrb[46].mxu0 %v18829_v53 }
 0x2fd   : > { %10650 = vmatprep.mubr.f32.mxu0 %v18830_v41 }
 0x300   : > { %10651 = vmatmul.mubr.f32.gmra.mrb[48].mxu0 %v18831_v6 }
 0x301   : > { %10653 = vmatprep.mubr.f32.mxu0 %v18832_v34 }
 0x304   : > { %10654 = vmatmul.mubr.f32.gmra.mrb[50].mxu0 %v18833_v62 }
 0x305   : > { %10656 = vmatprep.mubr.f32.mxu0 %v18834_v35 }
 0x308   : > { %10657 = vmatmul.mubr.f32.gmra.mrb[52].mxu0 %v18835_v32 }
 0x309   : > { %10659 = vmatprep.mubr.f32.mxu0 %v18836_v25 }
 0x30c   : > { %10660 = vmatmul.mubr.f32.gmra.mrb[54].mxu0 %v18837_v16 }
 0x30d   : > { %10662 = vmatprep.mubr.f32.mxu0 %v18838_v23 }
 0x310   : > { %10663 = vmatmul.mubr.f32.gmra.mrb[56].mxu0 %v18839_v37 }
 0x311   : > { %10665 = vmatprep.mubr.f32.mxu0 %v18840_v20 }
 0x314   : > { %10666 = vmatmul.mubr.f32.gmra.mrb[58].mxu0 %v18841_v52 }
 0x315   : > { %10668 = vmatprep.mubr.f32.mxu0 %v18842_v49 }
 0x318   : > { %10669 = vmatmul.mubr.f32.gmra.mrb[60].mxu0 %v18843_v45 }
 0x319   : > { %10671 = vmatprep.mubr.f32.mxu0 %v18844_v14 }
 0x31c   : > { %10672 = vmatmul.mubr.f32.gmra.mrb[62].mxu0 %v18845_v24 }
 0x31d   : > { %4575 = vmatprep.mubr.bf16.mxu0 %v18010_v19 }
 0x373   : > { %v10580_v50 = vpop.f32.mrb[0].mxu0 }
 0x374   : > { %v9251_v28 = vmul.f32 -1.442695, %v10580_v50  ;;  %v13325_v3 = vpop.f32.mrb[1].mxu0 }
 0x375   : > { %v9250_v39 = vmul.f32 -1.442695, %v13325_v3 }
 0x376   : > { %11675 = vpow2.f32 %v9251_v28 }
 0x377   : > { %11677 = vpow2.f32 %v9250_v39  ;;  %v13328_v2 = vpop.f32.mrb[2].mxu0 }
 0x378   : > { %v9253_v30 = vmul.f32 -1.442695, %v13328_v2  ;;  %v13331_v10 = vpop.f32.mrb[3].mxu0 }
 0x379   : > { %v9252_v40 = vmul.f32 -1.442695, %v13331_v10 }
 0x37a   : > { %11679 = vpow2.f32 %v9253_v30 }
 0x37b   : > { %11681 = vpow2.f32 %v9252_v40  ;;  %v13334_v0 = vpop.f32.mrb[4].mxu0 }
 0x37c   : > { %v9255_v31 = vmul.f32 -1.442695, %v13334_v0  ;;  %v13337_v44 = vpop.f32.mrb[5].mxu0 }
 0x37d   : > { %v9254_v22 = vmul.f32 -1.442695, %v13337_v44 }
 0x37e   : > { %11683 = vpow2.f32 %v9255_v31 }
 0x37f   : > { %11685 = vpow2.f32 %v9254_v22  ;;  %v13340_v60 = vpop.f32.mrb[6].mxu0 }
 0x380   : > { %v11676_v46 = vpop.eup %11675  ;;  %v9257_v38 = vmul.f32 -1.442695, %v13340_v60  ;;  %v13343_v33 = vpop.f32.mrb[7].mxu0 }
 0x381   : > { %v11678_v21 = vpop.eup %11677  ;;  %v3935_v42 = vadd.f32 1.0, %v11676_v46  ;;  %v9256_v47 = vmul.f32 -1.442695, %v13343_v33 }
 0x382   : > { %v3934_v12 = vadd.f32 1.0, %v11678_v21  ;;  %11687 = vpow2.f32 %v9257_v38 }
 0x383   : > { %11689 = vrcp.f32 %v3935_v42  ;;  %v13346_v13 = vpop.f32.mrb[8].mxu0 }
 0x384   : > { %v11680_v58 = vpop.eup %11679  ;;  %11691 = vrcp.f32 %v3934_v12  ;;  %v9259_v57 = vmul.f32 -1.442695, %v13346_v13  ;;  %v13349_v56 = vpop.f32.mrb[9].mxu0 }
 0x385   : > { %v11682_v63 = vpop.eup %11681  ;;  %v3937_v27 = vadd.f32 1.0, %v11680_v58  ;;  %11693 = vpow2.f32 %v9256_v47  ;;  %v9258_v26 = vmul.f32 -1.442695, %v13349_v56 }
 0x386   : > { %v3936_v18 = vadd.f32 1.0, %v11682_v63  ;;  %11695 = vpow2.f32 %v9259_v57 }
 0x387   : > { %11697 = vrcp.f32 %v3937_v27  ;;  %v13352_v5 = vpop.f32.mrb[10].mxu0 }
 0x388   : > { %v11684_v53 = vpop.eup %11683  ;;  %11699 = vrcp.f32 %v3936_v18  ;;  %v9261_v41 = vmul.f32 -1.442695, %v13352_v5  ;;  %v13355_v6 = vpop.f32.mrb[11].mxu0 }
 0x389   : > { %v11686_v34 = vpop.eup %11685  ;;  %v3939_v62 = vadd.f32 1.0, %v11684_v53  ;;  %11701 = vpow2.f32 %v9258_v26  ;;  %v9260_v35 = vmul.f32 -1.442695, %v13355_v6 }
 0x38a   : > { %v3938_v32 = vadd.f32 1.0, %v11686_v34  ;;  %11703 = vpow2.f32 %v9261_v41 }
 0x38b   : > { %11705 = vrcp.f32 %v3939_v62  ;;  %v13358_v25 = vpop.f32.mrb[12].mxu0 }
 0x38c   : > { %v11688_v16 = vpop.eup %11687  ;;  %11707 = vrcp.f32 %v3938_v32  ;;  %v9263_v23 = vmul.f32 -1.442695, %v13358_v25  ;;  %v13361_v37 = vpop.f32.mrb[13].mxu0 }
 0x38d   : > { %v11690_v20 = vpop.eup %11689  ;;  %v3941_v52 = vadd.f32 1.0, %v11688_v16  ;;  %11709 = vpow2.f32 %v9260_v35  ;;  %v9262_v49 = vmul.f32 -1.442695, %v13361_v37 }
 0x38e   : > { %v11692_v45 = vpop.eup %11691  ;;  %v4127_v14 = vmul.f32 %v11690_v20, %v10580_v50  ;;  %11711 = vpow2.f32 %v9263_v23 }
 0x38f   : > { %v11694_v24 = vpop.eup %11693  ;;  %v4126_v1 = vmul.f32 %v11692_v45, %v13325_v3  ;;  %11713 = vrcp.f32 %v3941_v52  ;;  %v13365_v43 = vpop.f32.mrb[14].mxu0 }
 0x390   : > { %v11696_v36 = vpop.eup %11695  ;;  %v3940_v54 = vadd.f32 1.0, %v11694_v24  ;;  %11715 = vpow2.f32 %v9262_v49  ;;  %v9265_v29 = vmul.f32 -1.442695, %v13365_v43  ;;  %v13368_v11 = vpop.f32.mrb[15].mxu0 }
 0x391   : > { %v11698_v8 = vpop.eup %11697  ;;  %v13370_v48 = vpack.c.bf16 %v4127_v14, %v4126_v1  ;;  %v3943_v15 = vadd.f32 1.0, %v11696_v36  ;;  %v9264_v9 = vmul.f32 -1.442695, %v13368_v11 }
 0x392   : > { %v11700_v50 = vpop.eup %11699  ;;  %v4129_v28 = vmul.f32 %v11698_v8, %v13328_v2  ;;  %11717 = vrcp.f32 %v3940_v54 }
 0x393   : > { %v11702_v3 = vpop.eup %11701  ;;  %v4128_v39 = vmul.f32 %v11700_v50, %v13331_v10  ;;  %11719 = vrcp.f32 %v3943_v15  ;;  %v13375_v30 = vpop.f32.mrb[16].mxu0  ;;  %9350 = vmatmul.mubr.msk.bf16.vlgmr.msra.gmra.mrb[64].mxu0 %vm4446_vm1, %v13370_v48 }
 0x394   : > { %v11704_v40 = vpop.eup %11703  ;;  %v3942_v31 = vadd.f32 1.0, %v11702_v3  ;;  %11721 = vpow2.f32 %v9265_v29  ;;  %v9267_v22 = vmul.f32 -1.442695, %v13375_v30  ;;  %v13380_v46 = vpop.f32.mrb[17].mxu0  ;;  %4585 = vmatprep.mubr.bf16.mxu0 %v18010_v19  ;;  %4897 = vmatpush1.bf16.msra.mxu0 %v13283_v59 }
 0x395   : > { %v11706_v2 = vpop.eup %11705  ;;  %v13384_v38 = vpack.c.bf16 %v4129_v28, %v4128_v39  ;;  %v3945_v10 = vadd.f32 1.0, %v11704_v40  ;;  %11723 = vpow2.f32 %v9264_v9  ;;  %v9266_v21 = vmul.f32 -1.442695, %v13380_v46  ;;  %4898 = vmatprep.subr.bf16.mxu0 %v13289_v55 }
 0x396   : > { %v11708_v42 = vpop.eup %11707  ;;  %v4131_v47 = vmul.f32 %v11706_v2, %v13334_v0  ;;  %11725 = vrcp.f32 %v3942_v31 }
 0x397   : > { %v11710_v12 = vpop.eup %11709  ;;  %v4130_v58 = vmul.f32 %v11708_v42, %v13337_v44  ;;  %11727 = vrcp.f32 %v3945_v10  ;;  %v13390_v57 = vpop.f32.mrb[18].mxu0 }
 0x398   : > { %v11712_v59 = vpop.eup %11711  ;;  %v3944_v63 = vadd.f32 1.0, %v11710_v12  ;;  %11729 = vpow2.f32 %v9267_v22  ;;  %v9269_v27 = vmul.f32 -1.442695, %v13390_v57  ;;  %v13393_v26 = vpop.f32.mrb[19].mxu0  ;;  %4899 = vmatpush1.bf16.msra.mxu0 %v13294_v4 }
 0x399   : > { %v11714_v55 = vpop.eup %11713  ;;  %v13396_v18 = vpack.c.bf16 %v4131_v47, %v4130_v58  ;;  %v3947_v0 = vadd.f32 1.0, %v11712_v59  ;;  %11731 = vpow2.f32 %v9266_v21  ;;  %4900 = vmatprep.subr.bf16.mxu0 %v13301_v51  ;;  %v9268_v53 = vmul.f32 -1.442695, %v13393_v26 }
 0x39a   : > { %v11716_v44 = vpop.eup %11715  ;;  %11733 = vrcp.f32 %v3944_v63  ;;  %v4133_v41 = vmul.f32 %v11714_v55, %v13340_v60 }
 0x39b   : > { %11735 = vrcp.f32 %v3947_v0  ;;  %v3946_v34 = vadd.f32 1.0, %v11716_v44  ;;  %v13401_v62 = vpop.f32.mrb[20].mxu0  ;;  %9351 = vmatmul.mubr.msk.bf16.gmra.mrb[68].mxu0 %vm4446_vm1, %v13384_v38 }
 0x39c   : > { %v11718_v4 = vpop.eup %11717  ;;  %11737 = vpow2.f32 %v9269_v27  ;;  %v9271_v35 = vmul.f32 -1.442695, %v13401_v62  ;;  %v13406_v32 = vpop.f32.mrb[21].mxu0  ;;  %4595 = vmatprep.mubr.bf16.mxu0 %v18010_v19  ;;  %4901 = vmatpush1.bf16.msra.mxu0 %v13306_v61 }
 0x39d   : > { %v11720_v51 = vpop.eup %11719  ;;  %v4132_v60 = vmul.f32 %v11718_v4, %v13343_v33  ;;  %11739 = vrcp.f32 %v3946_v34  ;;  %v9270_v16 = vmul.f32 -1.442695, %v13406_v32  ;;  %4902 = vmatprep.subr.bf16.mxu0 %v13313_v17 }
 0x39e   : > { %v11722_v23 = vpop.eup %11721  ;;  %11741 = vpow2.f32 %v9268_v53  ;;  %v4135_v49 = vmul.f32 %v11720_v51, %v13346_v13 }
 0x39f   : > { %v11724_v20 = vpop.eup %11723  ;;  %v13413_v52 = vpack.c.bf16 %v4133_v41, %v4132_v60  ;;  %v3949_v45 = vadd.f32 1.0, %v11722_v23  ;;  %11743 = vpow2.f32 %v9271_v35  ;;  %v13416_v14 = vpop.f32.mrb[22].mxu0 }
 0x3a0   : > { %v11726_v61 = vpop.eup %11725  ;;  %v3948_v24 = vadd.f32 1.0, %v11724_v20  ;;  %11745 = vpow2.f32 %v9270_v16  ;;  %v9273_v33 = vmul.f32 -1.442695, %v13416_v14  ;;  %v13419_v1 = vpop.f32.mrb[23].mxu0  ;;  %4903 = vmatpush1.bf16.msra.mxu0 %v13318_v7 }
 0x3a1   : > { %v11728_v17 = vpop.eup %11727  ;;  %v4134_v36 = vmul.f32 %v11726_v61, %v13349_v56  ;;  %11747 = vrcp.f32 %v3949_v45  ;;  %v9272_v54 = vmul.f32 -1.442695, %v13419_v1 }
 0x3a2   : > { %v11730_v13 = vpop.eup %11729  ;;  %11749 = vrcp.f32 %v3948_v24  ;;  %v4137_v15 = vmul.f32 %v11728_v17, %v13352_v5 }
 0x3a3   : > { %v11732_v29 = vpop.eup %11731  ;;  %v13424_v8 = vpack.c.bf16 %v4135_v49, %v4134_v36  ;;  %v3951_v9 = vadd.f32 1.0, %v11730_v13  ;;  %11751 = vpow2.f32 %v9273_v33  ;;  %v13427_v50 = vpop.f32.mrb[24].mxu0  ;;  %9352 = vmatmul.mubr.msk.bf16.gmra.mrb[72].mxu0 %vm4446_vm1, %v13396_v18 }
 0x3a4   : > { %v11734_v7 = vpop.eup %11733  ;;  %v3950_v28 = vadd.f32 1.0, %v11732_v29  ;;  %11753 = vpow2.f32 %v9272_v54  ;;  %v9275_v56 = vmul.f32 -1.442695, %v13427_v50  ;;  %v13432_v3 = vpop.f32.mrb[25].mxu0  ;;  %4605 = vmatprep.mubr.bf16.mxu0 %v18010_v19 }
 0x3a5   : > { %v11736_v39 = vpop.eup %11735  ;;  %v4136_v40 = vmul.f32 %v11734_v7, %v13355_v6  ;;  %11755 = vrcp.f32 %v3951_v9  ;;  %v9274_v5 = vmul.f32 -1.442695, %v13432_v3 }
 0x3a6   : > { %v11738_v31 = vpop.eup %11737  ;;  %v4139_v22 = vmul.f32 %v11736_v39, %v13358_v25  ;;  %11757 = vrcp.f32 %v3950_v28 }
 0x3a7   : > { %v11740_v2 = vpop.eup %11739  ;;  %v13438_v10 = vpack.c.bf16 %v4137_v15, %v4136_v40  ;;  %v3953_v21 = vadd.f32 1.0, %v11738_v31  ;;  %11759 = vpow2.f32 %v9275_v56  ;;  %v13440_v42 = vpop.f32.mrb[26].mxu0 }
 0x3a8   : > { %v11742_v47 = vpop.eup %11741  ;;  %v4138_v12 = vmul.f32 %v11740_v2, %v13361_v37  ;;  %11761 = vpow2.f32 %v9274_v5  ;;  %v9277_v6 = vmul.f32 -1.442695, %v13440_v42  ;;  %v13444_v58 = vpop.f32.mrb[27].mxu0 }
 0x3a9   : > { %v11744_v59 = vpop.eup %11743  ;;  %11763 = vrcp.f32 %v3953_v21  ;;  %v3952_v63 = vadd.f32 1.0, %v11742_v47  ;;  %v9276_v0 = vmul.f32 -1.442695, %v13444_v58 }
 0x3aa   : > { %v11746_v25 = vpop.eup %11745  ;;  %v13446_v27 = vpack.c.bf16 %v4139_v22, %v4138_v12  ;;  %v3955_v55 = vadd.f32 1.0, %v11744_v59  ;;  %11765 = vpow2.f32 %v9277_v6 }
 0x3ab   : > { %v11748_v44 = vpop.eup %11747  ;;  %11767 = vrcp.f32 %v3952_v63  ;;  %v3954_v53 = vadd.f32 1.0, %v11746_v25  ;;  %v13449_v41 = vpop.f32.mrb[28].mxu0  ;;  %9353 = vmatmul.mubr.msk.bf16.gmra.mrb[76].mxu0 %vm4446_vm1, %v13413_v52 }
 0x3ac   : > { %v11750_v37 = vpop.eup %11749  ;;  %v4141_v34 = vmul.f32 %v11748_v44, %v13365_v43  ;;  %11769 = vrcp.f32 %v3955_v55  ;;  %v9279_v4 = vmul.f32 -1.442695, %v13449_v41  ;;  %v13455_v35 = vpop.f32.mrb[29].mxu0  ;;  %4615 = vmatprep.mubr.bf16.mxu0 %v18010_v19 }
 0x3ad   : > { %v11752_v51 = vpop.eup %11751  ;;  %v4140_v60 = vmul.f32 %v11750_v37, %v13368_v11  ;;  %11771 = vrcp.f32 %v3954_v53  ;;  %v9278_v20 = vmul.f32 -1.442695, %v13455_v35 }
 0x3ae   : > { %v11754_v16 = vpop.eup %11753  ;;  %v3957_v23 = vadd.f32 1.0, %v11752_v51  ;;  %11773 = vpow2.f32 %v9276_v0 }
 0x3af   : > { %v11756_v49 = vpop.eup %11755  ;;  %v13460_v45 = vpack.c.bf16 %v4141_v34, %v4140_v60  ;;  %v3956_v43 = vadd.f32 1.0, %v11754_v16  ;;  %11775 = vpow2.f32 %v9279_v4  ;;  %v13462_v61 = vpop.f32.mrb[30].mxu0 }
 0x3b0   : > { %v11758_v24 = vpop.eup %11757  ;;  %v4143_v33 = vmul.f32 %v11756_v49, %v13375_v30  ;;  %11777 = vrcp.f32 %v3957_v23  ;;  %v9281_v17 = vmul.f32 -1.442695, %v13462_v61  ;;  %v13466_v11 = vpop.f32.mrb[31].mxu0 }
 0x3b1   : > { %v11760_v36 = vpop.eup %11759  ;;  %v4142_v54 = vmul.f32 %v11758_v24, %v13380_v46  ;;  %11779 = vrcp.f32 %v3956_v43  ;;  %v9280_v15 = vmul.f32 -1.442695, %v13466_v11 }
 0x3b2   : > { %v11762_v13 = vpop.eup %11761  ;;  %v3959_v29 = vadd.f32 1.0, %v11760_v36  ;;  %11781 = vpow2.f32 %v9278_v20 }
 0x3b3   : > { %v11764_v9 = vpop.eup %11763  ;;  %v13470_v7 = vpack.c.bf16 %v4143_v33, %v4142_v54  ;;  %v3958_v28 = vadd.f32 1.0, %v11762_v13  ;;  %11783 = vpow2.f32 %v9281_v17  ;;  %v13472_v30 = vpop.f32.mrb[32].mxu0  ;;  %9354 = vmatmul.mubr.msk.bf16.gmra.mrb[80].mxu0 %vm4446_vm1, %v13424_v8 }
 0x3b4   : > { %v11766_v56 = vpop.eup %11765  ;;  %v4145_v39 = vmul.f32 %v11764_v9, %v13390_v57  ;;  %11785 = vrcp.f32 %v3959_v29  ;;  %v9283_v46 = vmul.f32 -1.442695, %v13472_v30  ;;  %v13478_v40 = vpop.f32.mrb[33].mxu0  ;;  %4625 = vmatprep.mubr.bf16.mxu0 %v18010_v19 }
 0x3b5   : > { %v11768_v5 = vpop.eup %11767  ;;  %11787 = vrcp.f32 %v3958_v28  ;;  %v3961_v31 = vadd.f32 1.0, %v11766_v56  ;;  %v9282_v22 = vmul.f32 -1.442695, %v13478_v40 }
 0x3b6   : > { %v11770_v2 = vpop.eup %11769  ;;  %v4144_v21 = vmul.f32 %v11768_v5, %v13393_v26  ;;  %11789 = vpow2.f32 %v9280_v15 }
 0x3b7   : > { %v11772_v47 = vpop.eup %11771  ;;  %v4147_v12 = vmul.f32 %v11770_v2, %v13401_v62  ;;  %11791 = vrcp.f32 %v3961_v31  ;;  %v13484_v57 = vpop.f32.mrb[34].mxu0 }
 0x3b8   : > { %v11774_v6 = vpop.eup %11773  ;;  %v13486_v59 = vpack.c.bf16 %v4145_v39, %v4144_v21  ;;  %v4146_v63 = vmul.f32 %v11772_v47, %v13406_v32  ;;  %11793 = vpow2.f32 %v9283_v46  ;;  %v9285_v25 = vmul.f32 -1.442695, %v13484_v57  ;;  %v13490_v55 = vpop.f32.mrb[35].mxu0 }
 0x3b9   : > { %v11776_v0 = vpop.eup %11775  ;;  %v3960_v44 = vadd.f32 1.0, %v11774_v6  ;;  %11795 = vpow2.f32 %v9282_v22  ;;  %v9284_v26 = vmul.f32 -1.442695, %v13490_v55 }
 0x3ba   : > { %v11778_v53 = vpop.eup %11777  ;;  %v13493_v62 = vpack.c.bf16 %v4147_v12, %v4146_v63  ;;  %v3963_v37 = vadd.f32 1.0, %v11776_v0  ;;  %11797 = vpow2.f32 %v9285_v25 }
 0x3bb   : > { %v11780_v34 = vpop.eup %11779  ;;  %v4149_v4 = vmul.f32 %v11778_v53, %v13416_v14  ;;  %11799 = vrcp.f32 %v3960_v44  ;;  %v13496_v32 = vpop.f32.mrb[36].mxu0  ;;  %9355 = vmatmul.mubr.msk.bf16.gmra.mrb[84].mxu0 %vm4446_vm1, %v13438_v10 }
 0x3bc   : > { %v11782_v51 = vpop.eup %11781  ;;  %v4148_v60 = vmul.f32 %v11780_v34, %v13419_v1  ;;  %11801 = vrcp.f32 %v3963_v37  ;;  %v9287_v16 = vmul.f32 -1.442695, %v13496_v32  ;;  %v13502_v23 = vpop.f32.mrb[37].mxu0  ;;  %4635 = vmatprep.mubr.bf16.mxu0 %v18010_v19 }
 0x3bd   : > { %v11784_v20 = vpop.eup %11783  ;;  %v3962_v49 = vadd.f32 1.0, %v11782_v51  ;;  %11803 = vpow2.f32 %v9284_v26  ;;  %v9286_v14 = vmul.f32 -1.442695, %v13502_v23 }
 0x3be   : > { %v11786_v43 = vpop.eup %11785  ;;  %v13506_v24 = vpack.c.bf16 %v4149_v4, %v4148_v60  ;;  %v3965_v33 = vadd.f32 1.0, %v11784_v20  ;;  %11805 = vpow2.f32 %v9287_v16 }
 0x3bf   : > { %v11788_v17 = vpop.eup %11787  ;;  %v4151_v1 = vmul.f32 %v11786_v43, %v13427_v50  ;;  %11807 = vrcp.f32 %v3962_v49  ;;  %v13509_v36 = vpop.f32.mrb[38].mxu0 }
 0x3c0   : > { %v11790_v54 = vpop.eup %11789  ;;  %v4150_v13 = vmul.f32 %v11788_v17, %v13432_v3  ;;  %11809 = vrcp.f32 %v3965_v33  ;;  %v9289_v29 = vmul.f32 -1.442695, %v13509_v36  ;;  %v13513_v15 = vpop.f32.mrb[39].mxu0 }
 0x3c1   : > { %v11792_v9 = vpop.eup %11791  ;;  %v3964_v28 = vadd.f32 1.0, %v11790_v54  ;;  %11811 = vpow2.f32 %v9286_v14  ;;  %v9288_v56 = vmul.f32 -1.442695, %v13513_v15 }
 0x3c2   : > { %v11794_v39 = vpop.eup %11793  ;;  %v13516_v46 = vpack.c.bf16 %v4151_v1, %v4150_v13  ;;  %11813 = vpow2.f32 %v9289_v29  ;;  %v4153_v22 = vmul.f32 %v11792_v9, %v13440_v42 }
 0x3c3   : > { %v11796_v50 = vpop.eup %11795  ;;  %11815 = vrcp.f32 %v3964_v28  ;;  %v3967_v5 = vadd.f32 1.0, %v11794_v39  ;;  %v13518_v31 = vpop.f32.mrb[40].mxu0  ;;  %9356 = vmatmul.mubr.msk.bf16.gmra.mrb[88].mxu0 %vm4446_vm1, %v13446_v27 }
 0x3c4   : > { %v11798_v3 = vpop.eup %11797  ;;  %v3966_v2 = vadd.f32 1.0, %v11796_v50  ;;  %11817 = vpow2.f32 %v9288_v56  ;;  %v9291_v21 = vmul.f32 -1.442695, %v13518_v31  ;;  %v13524_v47 = vpop.f32.mrb[41].mxu0  ;;  %4645 = vmatprep.mubr.bf16.mxu0 %v18010_v19 }
 0x3c5   : > { %v11800_v12 = vpop.eup %11799  ;;  %11819 = vrcp.f32 %v3967_v5  ;;  %v3969_v6 = vadd.f32 1.0, %v11798_v3  ;;  %v9290_v63 = vmul.f32 -1.442695, %v13524_v47 }
 0x3c6   : > { %v11802_v25 = vpop.eup %11801  ;;  %v4152_v0 = vmul.f32 %v11800_v12, %v13444_v58  ;;  %11821 = vrcp.f32 %v3966_v2 }
 0x3c7   : > { %v11804_v44 = vpop.eup %11803  ;;  %v4155_v42 = vmul.f32 %v11802_v25, %v13449_v41  ;;  %11823 = vrcp.f32 %v3969_v6  ;;  %v13530_v26 = vpop.f32.mrb[42].mxu0  ;;  %v11582_v25 = vld [vmem:[%s17734_s3 + $0x10] ss:$36 sps:$4 sm:$0xff]  }
 0x3c8   : > { %v11806_v53 = vpop.eup %11805  ;;  %v13532_v37 = vpack.c.bf16 %v4153_v22, %v4152_v0  ;;  %v3968_v34 = vadd.f32 1.0, %v11804_v44  ;;  %11825 = vpow2.f32 %v9291_v21  ;;  %v9293_v4 = vmul.f32 -1.442695, %v13530_v26  ;;  %v13535_v51 = vpop.f32.mrb[43].mxu0 }
 0x3c9   : > { %v11808_v60 = vpop.eup %11807  ;;  %v3971_v16 = vadd.f32 1.0, %v11806_v53  ;;  %11827 = vpow2.f32 %v9290_v63  ;;  %v9292_v58 = vmul.f32 -1.442695, %v13535_v51 }
 0x3ca   : > { %v11810_v20 = vpop.eup %11809  ;;  %v4154_v41 = vmul.f32 %v11808_v60, %v13455_v35  ;;  %11829 = vrcp.f32 %v3968_v34 }
 0x3cb   : > { %v11812_v49 = vpop.eup %11811  ;;  %v4157_v14 = vmul.f32 %v11810_v20, %v13462_v61  ;;  %11831 = vrcp.f32 %v3971_v16  ;;  %v13540_v43 = vpop.f32.mrb[44].mxu0  ;;  %9357 = vmatmul.mubr.msk.bf16.gmra.mrb[92].mxu0 %vm4446_vm1, %v13460_v45 }
 0x3cc   : > { %v11814_v33 = vpop.eup %11813  ;;  %v13544_v17 = vpack.c.bf16 %v4155_v42, %v4154_v41  ;;  %v3970_v1 = vadd.f32 1.0, %v11812_v49  ;;  %11833 = vpow2.f32 %v9293_v4  ;;  %v9295_v54 = vmul.f32 -1.442695, %v13540_v43  ;;  %v13547_v13 = vpop.f32.mrb[45].mxu0  ;;  %4655 = vmatprep.mubr.bf16.mxu0 %v18010_v19  ;;  %v11585_v49 = vld [vmem:[%s17734_s3 + $0x58] ss:$36 sps:$4 sm:$0xff]  }
 0x3cd   : > { %v11816_v35 = vpop.eup %11815  ;;  %v3973_v29 = vadd.f32 1.0, %v11814_v33  ;;  %11835 = vpow2.f32 %v9292_v58  ;;  %v9294_v28 = vmul.f32 -1.442695, %v13547_v13 }
 0x3ce   : > { %v11818_v61 = vpop.eup %11817  ;;  %v4156_v9 = vmul.f32 %v11816_v35, %v13466_v11  ;;  %11837 = vrcp.f32 %v3970_v1  ;;  %v11590_v35 = vld [vmem:[%s17734_s3 + $0xa4] ss:$36 sps:$4 sm:$0xff]  }
 0x3cf   : > { %v11820_v56 = vpop.eup %11819  ;;  %11839 = vrcp.f32 %v3973_v29  ;;  %v3972_v39 = vadd.f32 1.0, %v11818_v61  ;;  %v13552_v50 = vpop.f32.mrb[46].mxu0 }
 0x3d0   : > { %v11822_v5 = vpop.eup %11821  ;;  %v13554_v3 = vpack.c.bf16 %v4157_v14, %v4156_v9  ;;  %v4159_v22 = vmul.f32 %v11820_v56, %v13472_v30  ;;  %11841 = vpow2.f32 %v9295_v54  ;;  %v9297_v2 = vmul.f32 -1.442695, %v13552_v50  ;;  %v13558_v21 = vpop.f32.mrb[47].mxu0 }
 0x3d1   : > { %v11824_v12 = vpop.eup %11823  ;;  %v4158_v11 = vmul.f32 %v11822_v5, %v13478_v40  ;;  %11843 = vrcp.f32 %v3972_v39  ;;  %v9296_v6 = vmul.f32 -1.442695, %v13558_v21  ;;  %v11587_v40 = vld [vmem:[%s17734_s3 + $0x5c] ss:$36 sps:$4 sm:$0xff]  }
 0x3d2   : > { %v11826_v63 = vpop.eup %11825  ;;  %11845 = vpow2.f32 %v9294_v28  ;;  %v4161_v30 = vmul.f32 %v11824_v12, %v13484_v57 }
 0x3d3   : > { %v11828_v0 = vpop.eup %11827  ;;  %v13565_v44 = vpack.c.bf16 %v4159_v22, %v4158_v11  ;;  %v3975_v42 = vadd.f32 1.0, %v11826_v63  ;;  %11847 = vpow2.f32 %v9297_v2  ;;  %v13568_v53 = vpop.f32.mrb[48].mxu0  ;;  %9358 = vmatmul.mubr.msk.bf16.gmra.mrb[96].mxu0 %vm4446_vm1, %v13470_v7  ;;  %v11588_v2 = vld [vmem:[%s17734_s3 + $0xa0] ss:$36 sps:$4 sm:$0xff]  }
 0x3d4   : > { %v11830_v34 = vpop.eup %11829  ;;  %v3974_v4 = vadd.f32 1.0, %v11828_v0  ;;  %11849 = vpow2.f32 %v9296_v6  ;;  %v9299_v60 = vmul.f32 -1.442695, %v13568_v53  ;;  %v13576_v16 = vpop.f32.mrb[49].mxu0  ;;  %4665 = vmatprep.mubr.bf16.mxu0 %v18010_v19 }
 0x3d5   : > { %v11832_v57 = vpop.eup %11831  ;;  %v4160_v58 = vmul.f32 %v11830_v34, %v13490_v55  ;;  %11851 = vrcp.f32 %v3975_v42  ;;  %9398 = vmatmul.mubr.msk.bf16.vlgmr.msra.gmra.mrb[0].mxu1 %vm4446_vm1, %v13565_v44  ;;  %v9298_v20 = vmul.f32 -1.442695, %v13576_v16 }
 0x3d6   : > { %v11834_v41 = vpop.eup %11833  ;;  %11853 = vrcp.f32 %v3974_v4  ;;  %5250 = vmatpush1.bf16.msra.mxu1 %v11582_v25  ;;  %5098 = vmatprep.mubr.bf16.mxu1 %v18010_v19  ;;  %v4163_v55 = vmul.f32 %v11832_v57, %v13496_v32  ;;  %v11591_v57 = vld [vmem:[%s17734_s3 + $0xe8] ss:$36 sps:$4 sm:$0xff]  }
 0x3d7   : > { %v11836_v14 = vpop.eup %11835  ;;  %v13587_v33 = vpack.c.bf16 %v4161_v30, %v4160_v58  ;;  %v3977_v1 = vadd.f32 1.0, %v11834_v41  ;;  %11855 = vpow2.f32 %v9299_v60  ;;  %v13590_v54 = vpop.f32.mrb[50].mxu0  ;;  %5251 = vmatprep.subr.bf16.mxu1 %v11587_v40 }
 0x3d8   : > { %v11838_v29 = vpop.eup %11837  ;;  %v3976_v61 = vadd.f32 1.0, %v11836_v14  ;;  %11857 = vpow2.f32 %v9298_v20  ;;  %v9301_v9 = vmul.f32 -1.442695, %v13590_v54  ;;  %v13596_v28 = vpop.f32.mrb[51].mxu0 }
 0x3d9   : > { %18846 = vst [vmem:[#allocation5_spill] sm:$0xff] %v13587_v33  ;;  %v11840_v56 = vpop.eup %11839  ;;  %v4162_v39 = vmul.f32 %v11838_v29, %v13502_v23  ;;  %11859 = vrcp.f32 %v3977_v1  ;;  %v9300_v32 = vmul.f32 -1.442695, %v13596_v28  ;;  %v11593_v23 = vld [vmem:[%s17734_s3 + $0xec] ss:$36 sps:$4 sm:$0xff]  }
 0x3da   : > { %v11842_v5 = vpop.eup %11841  ;;  %v4165_v22 = vmul.f32 %v11840_v56, %v13509_v36  ;;  %11861 = vrcp.f32 %v3976_v61  ;;  %5252 = vmatpush1.bf16.msra.mxu1 %v11585_v49  ;;  %v13632_v49 = vld [vmem:[%s17734_s3 + $0x20] ss:$36 sps:$4 sm:$0xff]  }
 0x3db   : > { %v11844_v12 = vpop.eup %11843  ;;  %v13604_v11 = vpack.c.bf16 %v4163_v55, %v4162_v39  ;;  %v3979_v6 = vadd.f32 1.0, %v11842_v5  ;;  %11863 = vpow2.f32 %v9301_v9  ;;  %v13606_v63 = vpop.f32.mrb[52].mxu0  ;;  %9359 = vmatmul.mubr.msk.bf16.gmra.mrb[100].mxu0 %vm4446_vm1, %v13486_v59  ;;  %5253 = vmatprep.subr.bf16.mxu1 %v11590_v35 }
 0x3dc   : > { %v11846_v36 = vpop.eup %11845  ;;  %v4164_v25 = vmul.f32 %v11844_v12, %v13513_v15  ;;  %11865 = vpow2.f32 %v9300_v32  ;;  %v9303_v0 = vmul.f32 -1.442695, %v13606_v63  ;;  %v13615_v30 = vpop.f32.mrb[53].mxu0  ;;  %4675 = vmatprep.mubr.bf16.mxu0 %v18010_v19 }
 0x3dd   : > { %v11848_v42 = vpop.eup %11847  ;;  %11867 = vrcp.f32 %v3979_v6  ;;  %v3978_v40 = vadd.f32 1.0, %v11846_v36  ;;  %9399 = vmatmul.mubr.msk.bf16.gmra.mrb[4].mxu1 %vm4446_vm1, %v13587_v33  ;;  %v9302_v15 = vmul.f32 -1.442695, %v13615_v30 }
 0x3de   : > { %v11850_v34 = vpop.eup %11849  ;;  %v13620_v4 = vpack.c.bf16 %v4165_v22, %v4164_v25  ;;  %v3981_v60 = vadd.f32 1.0, %v11848_v42  ;;  %11869 = vpow2.f32 %v9303_v0  ;;  %5108 = vmatprep.mubr.bf16.mxu1 %v18010_v19  ;;  %5254 = vmatpush1.bf16.msra.mxu1 %v11588_v2 }
 0x3df   : > { %v11852_v58 = vpop.eup %11851  ;;  %11871 = vrcp.f32 %v3978_v40  ;;  %v3980_v20 = vadd.f32 1.0, %v11850_v34  ;;  %v13627_v41 = vpop.f32.mrb[54].mxu0  ;;  %5255 = vmatprep.subr.bf16.mxu1 %v11593_v23 }
 0x3e0   : > { %v11854_v14 = vpop.eup %11853  ;;  %v4167_v55 = vmul.f32 %v11852_v58, %v13518_v31  ;;  %11873 = vrcp.f32 %v3981_v60  ;;  %v9305_v1 = vmul.f32 -1.442695, %v13627_v41  ;;  %v13636_v35 = vpop.f32.mrb[55].mxu0 }
 0x3e1   : > { %v11856_v29 = vpop.eup %11855  ;;  %v4166_v61 = vmul.f32 %v11854_v14, %v13524_v47  ;;  %11875 = vrcp.f32 %v3980_v20  ;;  %v9304_v39 = vmul.f32 -1.442695, %v13636_v35 }
 0x3e2   : > { %v11858_v9 = vpop.eup %11857  ;;  %v3983_v56 = vadd.f32 1.0, %v11856_v29  ;;  %11877 = vpow2.f32 %v9302_v15  ;;  %5256 = vmatpush1.bf16.msra.mxu1 %v11591_v57 }
 0x3e3   : > { %v11860_v32 = vpop.eup %11859  ;;  %v13640_v5 = vpack.c.bf16 %v4167_v55, %v4166_v61  ;;  %v3982_v22 = vadd.f32 1.0, %v11858_v9  ;;  %11879 = vpow2.f32 %v9305_v1  ;;  %v13642_v31 = vpop.f32.mrb[56].mxu0  ;;  %9360 = vmatmul.mubr.msk.bf16.gmra.mrb[104].mxu0 %vm4446_vm1, %v13493_v62  ;;  %10674 = vmatprep.subr.bf16.mxu1 %v13632_v49 }
 0x3e4   : > { %v11862_v47 = vpop.eup %11861  ;;  %v4169_v2 = vmul.f32 %v11860_v32, %v13530_v26  ;;  %11881 = vrcp.f32 %v3983_v56  ;;  %v9307_v12 = vmul.f32 -1.442695, %v13642_v31  ;;  %v13649_v6 = vpop.f32.mrb[57].mxu0  ;;  %4685 = vmatprep.mubr.bf16.mxu0 %v18010_v19 }
 0x3e5   : > { %v11864_v23 = vpop.eup %11863  ;;  %v4168_v36 = vmul.f32 %v11862_v47, %v13535_v51  ;;  %11883 = vrcp.f32 %v3982_v22  ;;  %9400 = vmatmul.mubr.msk.bf16.gmra.mrb[8].mxu1 %vm4446_vm1, %v13604_v11  ;;  %v9306_v42 = vmul.f32 -1.442695, %v13649_v6 }
 0x3e6   : > { %v11866_v25 = vpop.eup %11865  ;;  %v3985_v0 = vadd.f32 1.0, %v11864_v23  ;;  %11885 = vpow2.f32 %v9304_v39  ;;  %5118 = vmatprep.mubr.bf16.mxu1 %v18010_v19 }
 0x3e7   : > { %v11868_v26 = vpop.eup %11867  ;;  %v13657_v40 = vpack.c.bf16 %v4169_v2, %v4168_v36  ;;  %v3984_v34 = vadd.f32 1.0, %v11866_v25  ;;  %11887 = vpow2.f32 %v9307_v12  ;;  %v13659_v60 = vpop.f32.mrb[58].mxu0 }
 0x3e8   : > { %v11870_v15 = vpop.eup %11869  ;;  %v4171_v51 = vmul.f32 %v11868_v26, %v13540_v43  ;;  %11889 = vrcp.f32 %v3985_v0  ;;  %v9309_v57 = vmul.f32 -1.442695, %v13659_v60  ;;  %v13663_v58 = vpop.f32.mrb[59].mxu0 }
 0x3e9   : > { %v11872_v20 = vpop.eup %11871  ;;  %11891 = vrcp.f32 %v3984_v34  ;;  %v3987_v14 = vadd.f32 1.0, %v11870_v15  ;;  %v9308_v55 = vmul.f32 -1.442695, %v13663_v58 }
 0x3ea   : > { %v11874_v1 = vpop.eup %11873  ;;  %v4170_v29 = vmul.f32 %v11872_v20, %v13547_v13  ;;  %11893 = vpow2.f32 %v9306_v42 }
 0x3eb   : > { %v11876_v61 = vpop.eup %11875  ;;  %v4173_v9 = vmul.f32 %v11874_v1, %v13552_v50  ;;  %11895 = vrcp.f32 %v3987_v14  ;;  %v13668_v56 = vpop.f32.mrb[60].mxu0  ;;  %9361 = vmatmul.mubr.msk.bf16.gmra.mrb[108].mxu0 %vm4446_vm1, %v13506_v24 }
 0x3ec   : > { %v11878_v43 = vpop.eup %11877  ;;  %v13672_v39 = vpack.c.bf16 %v4171_v51, %v4170_v29  ;;  %v4172_v32 = vmul.f32 %v11876_v61, %v13558_v21  ;;  %11897 = vpow2.f32 %v9309_v57  ;;  %v9311_v22 = vmul.f32 -1.442695, %v13668_v56  ;;  %v13676_v47 = vpop.f32.mrb[61].mxu0  ;;  %4695 = vmatprep.mubr.bf16.mxu0 %v18010_v19 }
 0x3ed   : > { %v11880_v13 = vpop.eup %11879  ;;  %v3986_v50 = vadd.f32 1.0, %v11878_v43  ;;  %11899 = vpow2.f32 %v9308_v55  ;;  %9401 = vmatmul.mubr.msk.bf16.gmra.mrb[12].mxu1 %vm4446_vm1, %v13620_v4  ;;  %v9310_v2 = vmul.f32 -1.442695, %v13676_v47 }
 0x3ee   : > { %v11882_v12 = vpop.eup %11881  ;;  %v13682_v23 = vpack.c.bf16 %v4173_v9, %v4172_v32  ;;  %v3989_v36 = vadd.f32 1.0, %v11880_v13  ;;  %11901 = vpow2.f32 %v9311_v22  ;;  %5128 = vmatprep.mubr.bf16.mxu1 %v18010_v19 }
 0x3ef   : > { %v11884_v21 = vpop.eup %11883  ;;  %v4175_v25 = vmul.f32 %v11882_v12, %v13568_v53  ;;  %11903 = vrcp.f32 %v3986_v50  ;;  %v13686_v0 = vpop.f32.mrb[62].mxu0 }
 0x3f0   : > { %v11886_v42 = vpop.eup %11885  ;;  %v4174_v26 = vmul.f32 %v11884_v21, %v13576_v16  ;;  %11905 = vrcp.f32 %v3989_v36  ;;  %v9313_v34 = vmul.f32 -1.442695, %v13686_v0  ;;  %v13690_v15 = vpop.f32.mrb[63].mxu0 }
 0x3f1   : > { %v11888_v51 = vpop.eup %11887  ;;  %v3988_v57 = vadd.f32 1.0, %v11886_v42  ;;  %11907 = vpow2.f32 %v9310_v2  ;;  %v9312_v20 = vmul.f32 -1.442695, %v13690_v15 }
 0x3f2   : > { %v11890_v14 = vpop.eup %11889  ;;  %v13693_v55 = vpack.c.bf16 %v4175_v25, %v4174_v26  ;;  %v3991_v53 = vadd.f32 1.0, %v11888_v51  ;;  %11909 = vpow2.f32 %v9313_v34 }
 0x3f3   : > { %v11892_v1 = vpop.eup %11891  ;;  %v4177_v29 = vmul.f32 %v11890_v14, %v13590_v54  ;;  %11911 = vrcp.f32 %v3988_v57  ;;  %9362 = vmatmul.mubr.msk.bf16.gmra.mrb[112].mxu0 %vm4446_vm1, %v13516_v46 }
 0x3f4   : > { %v11894_v16 = vpop.eup %11893  ;;  %v4176_v61 = vmul.f32 %v11892_v1, %v13596_v28  ;;  %11913 = vrcp.f32 %v3991_v53  ;;  %4705 = vmatprep.mubr.bf16.mxu0 %v18010_v19 }
 0x3f5   : > { %v11896_v9 = vpop.eup %11895  ;;  %v3990_v43 = vadd.f32 1.0, %v11894_v16  ;;  %11915 = vpow2.f32 %v9312_v20  ;;  %9402 = vmatmul.mubr.msk.bf16.gmra.mrb[16].mxu1 %vm4446_vm1, %v13640_v5 }
 0x3f6   : > { %v11898_v32 = vpop.eup %11897  ;;  %v13702_v22 = vpack.c.bf16 %v4177_v29, %v4176_v61  ;;  %5138 = vmatprep.mubr.bf16.mxu1 %v18010_v19  ;;  %v4179_v28 = vmul.f32 %v11896_v9, %v13606_v63 }
 0x3f7   : > { %v11900_v54 = vpop.eup %11899  ;;  %11917 = vrcp.f32 %v3990_v43  ;;  %v3993_v13 = vadd.f32 1.0, %v11898_v32 }
 0x3f8   : > { %v11902_v50 = vpop.eup %11901  ;;  %v3992_v2 = vadd.f32 1.0, %v11900_v54 }
 0x3f9   : > { %v11904_v12 = vpop.eup %11903  ;;  %11919 = vrcp.f32 %v3993_v13  ;;  %v3995_v36 = vadd.f32 1.0, %v11902_v50 }
 0x3fa   : > { %v11906_v21 = vpop.eup %11905  ;;  %v4178_v25 = vmul.f32 %v11904_v12, %v13615_v30  ;;  %11921 = vrcp.f32 %v3992_v2 }
 0x3fb   : > { %v11908_v42 = vpop.eup %11907  ;;  %11923 = vrcp.f32 %v3995_v36  ;;  %9363 = vmatmul.mubr.msk.bf16.gmra.mrb[116].mxu0 %vm4446_vm1, %v13532_v37  ;;  %v4181_v51 = vmul.f32 %v11906_v21, %v13627_v41  ;;  %v316_v21 = vld [vmem:[%s13820_s14 + $0x8] sm:$0xff] }
 0x3fc   : > { %v11910_v26 = vpop.eup %11909  ;;  %v13709_v34 = vpack.c.bf16 %v4179_v28, %v4178_v25  ;;  %v3994_v57 = vadd.f32 1.0, %v11908_v42  ;;  %4715 = vmatprep.mubr.bf16.mxu0 %v18010_v19 }
 0x3fd   : > { %v11912_v63 = vpop.eup %11911  ;;  %v3997_v20 = vadd.f32 1.0, %v11910_v26  ;;  %9403 = vmatmul.mubr.msk.bf16.gmra.mrb[20].mxu1 %vm4446_vm1, %v13657_v40 }
 0x3fe   : > { %v11914_v30 = vpop.eup %11913  ;;  %v4180_v14 = vmul.f32 %v11912_v63, %v13636_v35  ;;  %11925 = vrcp.f32 %v3994_v57  ;;  %5148 = vmatprep.mubr.bf16.mxu1 %v18010_v19 }
 0x3ff   : > { %v11916_v53 = vpop.eup %11915  ;;  %11927 = vrcp.f32 %v3997_v20  ;;  %v4183_v41 = vmul.f32 %v11914_v30, %v13642_v31  ;;  %v11602_v30 = vld [vmem:[%s17734_s3 + $0x64] ss:$36 sps:$4 sm:$0xff]  }
 0x400   : > { %v13717_v1 = vpack.c.bf16 %v4181_v51, %v4180_v14  ;;  %v3996_v29 = vadd.f32 1.0, %v11916_v53  ;;  %v317_v53 = vld [vmem:[%s13820_s14 + $0x10] sm:$0xff] }
 0x401   : > { %v11918_v16 = vpop.eup %11917 }
 0x402   : > { %v4182_v61 = vmul.f32 %v11918_v16, %v13649_v6  ;;  %11929 = vrcp.f32 %v3996_v29  ;;  %v318_v29 = vld [vmem:[%s13820_s14 + $0x18] sm:$0xff] }
 0x403   : > { %v11920_v9 = vpop.eup %11919  ;;  %9364 = vmatmul.mubr.msk.bf16.gmra.mrb[120].mxu0 %vm4446_vm1, %v13544_v17 }
 0x404   : > { %v11922_v43 = vpop.eup %11921  ;;  %v13723_v35 = vpack.c.bf16 %v4183_v41, %v4182_v61  ;;  %v4185_v32 = vmul.f32 %v11920_v9, %v13659_v60  ;;  %4725 = vmatprep.mubr.bf16.mxu0 %v18010_v19 }
 0x405   : > { %v11924_v54 = vpop.eup %11923  ;;  %v4184_v13 = vmul.f32 %v11922_v43, %v13663_v58  ;;  %9404 = vmatmul.mubr.msk.bf16.gmra.mrb[24].mxu1 %vm4446_vm1, %v13672_v39 }
 0x406   : > { %5158 = vmatprep.mubr.bf16.mxu1 %v18010_v19  ;;  %v4187_v6 = vmul.f32 %v11924_v54, %v13668_v56 }
 0x407   : > { %v13731_v31 = vpack.c.bf16 %v4185_v32, %v4184_v13 }
 0x408   : > { %v11926_v50 = vpop.eup %11925 }
 0x409   : > { %v11928_v28 = vpop.eup %11927  ;;  %v4186_v2 = vmul.f32 %v11926_v50, %v13676_v47  ;;  %v11595_v47 = vld [vmem:[%s17734_s3 + $0x68] ss:$36 sps:$4 sm:$0xff]  }
 0x40a   : > { %v4189_v60 = vmul.f32 %v11928_v28, %v13686_v0  ;;  %v11596_v0 = vld [vmem:[%s17734_s3 + $0xb0] ss:$36 sps:$4 sm:$0xff]   ;;  %v319_v28 = vld [vmem:[%s13820_s14 + $0x20] sm:$0xff] }
 0x40b   : > { %v13735_v12 = vpack.c.bf16 %v4187_v6, %v4186_v2  ;;  %9365 = vmatmul.mubr.msk.bf16.gmra.mrb[124].mxu0 %vm4446_vm1, %v13554_v3 }
 0x40c   : > { %v11930_v58 = vpop.eup %11929  ;;  %4735 = vmatprep.mubr.bf16.mxu0 %v18010_v19 }
 0x40d   : > { %v4188_v36 = vmul.f32 %v11930_v58, %v13690_v15  ;;  %9405 = vmatmul.mubr.msk.bf16.gmra.mrb[28].mxu1 %vm4446_vm1, %v13682_v23 }
 0x40e   : > { %5168 = vmatprep.mubr.bf16.mxu1 %v18010_v19 }
 0x40f   : > { %v13745_v56 = vpack.c.bf16 %v4189_v60, %v4188_v36  ;;  %v320_v60 = vld [vmem:[%s13820_s14 + $0x28] sm:$0xff] }
 0x413   : > { %9366 = vmatmul.mubr.msk.bf16.gmra.mrb[128].mxu0 %vm4446_vm1, %v13565_v44 }
 0x414   : > { %4745 = vmatprep.mubr.bf16.mxu0 %v18010_v19 }
 0x415   : > { %9406 = vmatmul.mubr.msk.bf16.gmra.mrb[32].mxu1 %vm4446_vm1, %v13693_v55 }
 0x416   : > { %5178 = vmatprep.mubr.bf16.mxu1 %v18010_v19 }
 0x41b   : > { %9367 = vmatmul.mubr.msk.bf16.gmra.mrb[132].mxu0 %vm4446_vm1, %v13587_v33 }
 0x41c   : > { %4755 = vmatprep.mubr.bf16.mxu0 %v18010_v19 }
 0x41d   : > { %9407 = vmatmul.mubr.msk.bf16.gmra.mrb[36].mxu1 %vm4446_vm1, %v13702_v22 }
 0x41e   : > { %5188 = vmatprep.mubr.bf16.mxu1 %v18010_v19 }
 0x423   : > { %9368 = vmatmul.mubr.msk.bf16.gmra.mrb[136].mxu0 %vm4446_vm1, %v13604_v11 }
 0x424   : > { %4765 = vmatprep.mubr.bf16.mxu0 %v18010_v19 }
 0x425   : > { %9408 = vmatmul.mubr.msk.bf16.gmra.mrb[40].mxu1 %vm4446_vm1, %v13709_v34 }
 0x426   : > { %5198 = vmatprep.mubr.bf16.mxu1 %v18010_v19 }
 0x42b   : > { %9369 = vmatmul.mubr.msk.bf16.gmra.mrb[140].mxu0 %vm4446_vm1, %v13620_v4 }
 0x42c   : > { %4775 = vmatprep.mubr.bf16.mxu0 %v18010_v19 }
 0x42d   : > { %9409 = vmatmul.mubr.msk.bf16.gmra.mrb[44].mxu1 %vm4446_vm1, %v13717_v1 }
 0x42e   : > { %5208 = vmatprep.mubr.bf16.mxu1 %v18010_v19 }
 0x433   : > { %9370 = vmatmul.mubr.msk.bf16.gmra.mrb[144].mxu0 %vm4446_vm1, %v13640_v5 }
 0x434   : > { %4785 = vmatprep.mubr.bf16.mxu0 %v18010_v19 }
 0x435   : > { %9410 = vmatmul.mubr.msk.bf16.gmra.mrb[48].mxu1 %vm4446_vm1, %v13723_v35 }
 0x436   : > { %5218 = vmatprep.mubr.bf16.mxu1 %v18010_v19 }
 0x43b   : > { %9371 = vmatmul.mubr.msk.bf16.gmra.mrb[148].mxu0 %vm4446_vm1, %v13657_v40 }
 0x43c   : > { %4795 = vmatprep.mubr.bf16.mxu0 %v18010_v19 }
 0x43d   : > { %9411 = vmatmul.mubr.msk.bf16.gmra.mrb[52].mxu1 %vm4446_vm1, %v13731_v31 }
 0x43e   : > { %5228 = vmatprep.mubr.bf16.mxu1 %v18010_v19 }
 0x443   : > { %9372 = vmatmul.mubr.msk.bf16.gmra.mrb[152].mxu0 %vm4446_vm1, %v13672_v39 }
 0x444   : > { %4805 = vmatprep.mubr.bf16.mxu0 %v18010_v19 }
 0x445   : > { %9412 = vmatmul.mubr.msk.bf16.gmra.mrb[56].mxu1 %vm4446_vm1, %v13735_v12 }
 0x446   : > { %5238 = vmatprep.mubr.bf16.mxu1 %v18010_v19 }
 0x44b   : > { %9373 = vmatmul.mubr.msk.bf16.gmra.mrb[156].mxu0 %vm4446_vm1, %v13682_v23 }
 0x44c   : > { %4815 = vmatprep.mubr.bf16.mxu0 %v18010_v19 }
 0x44d   : > { %9413 = vmatmul.mubr.msk.bf16.gmra.mrb[60].mxu1 %vm4446_vm1, %v13745_v56 }
 0x44e   : > { %5281 = vmatprep.mubr.bf16.mxu1 %v18010_v19 }
 0x453   : > { %9374 = vmatmul.mubr.msk.bf16.gmra.mrb[160].mxu0 %vm4446_vm1, %v13693_v55 }
 0x454   : > { %4825 = vmatprep.mubr.bf16.mxu0 %v18010_v19 }
 0x455   : > { %9414 = vmatmul.mubr.msk.bf16.vlgmr.msra.gmra.mrb[64].mxu1 %vm4446_vm1, %v13370_v48 }
 0x456   : > { %10675 = vmatpush3.bf16.msra.mxu1 %v13632_v49  ;;  %5291 = vmatprep.mubr.bf16.mxu1 %v18010_v19  ;;  %v315_v49 = vld [vmem:[%s13820_s14] sm:$0xff] }
 0x457   : > { %10676 = vmatprep.subr.bf16.mxu1 %v11595_v47 }
 0x45a   : > { %10677 = vmatpush3.bf16.msra.mxu1 %v11595_v47 }
 0x45b   : > { %9375 = vmatmul.mubr.msk.bf16.gmra.mrb[164].mxu0 %vm4446_vm1, %v13702_v22  ;;  %10678 = vmatprep.subr.bf16.mxu1 %v11596_v0 }
 0x45c   : > { %4835 = vmatprep.mubr.bf16.mxu0 %v18010_v19 }
 0x45d   : > { %9415 = vmatmul.mubr.msk.bf16.gmra.mrb[68].mxu1 %vm4446_vm1, %v13384_v38 }
 0x45e   : > { %5301 = vmatprep.mubr.bf16.mxu1 %v18010_v19  ;;  %10679 = vmatpush3.bf16.msra.mxu1 %v11596_v0 }
 0x463   : > { %9376 = vmatmul.mubr.msk.bf16.gmra.mrb[168].mxu0 %vm4446_vm1, %v13709_v34 }
 0x464   : > { %4845 = vmatprep.mubr.bf16.mxu0 %v18010_v19 }
 0x465   : > { %9416 = vmatmul.mubr.msk.bf16.gmra.mrb[72].mxu1 %vm4446_vm1, %v13396_v18 }
 0x466   : > { %v4577_v15 = vpop.f32.mrb[64].mxu0  ;;  %5311 = vmatprep.mubr.bf16.mxu1 %v18010_v19 }
 0x467   : > { %v4579_v25 = vpop.f32.mrb[65].mxu0  ;;  %v13828_v26 = vmul.f32 %v4577_v15, %v315_v49 }
 0x468   : > { %v4581_v42 = vpop.f32.mrb[66].mxu0  ;;  %v13832_v63 = vmul.f32 %v4579_v25, %v315_v49 }
 0x469   : > { %18847 = vst [vmem:[#allocation6_spill] sm:$0xff] %v13828_v26  ;;  %v13830_v51 = vmul.f32 %v4581_v42, %v316_v21  ;;  %v4583_v57 = vpop.f32.mrb[67].mxu0 }
 0x46a   : > { %18849 = vst [vmem:[#allocation11_spill] sm:$0xff] %v13832_v63  ;;  %v13834_v20 = vmul.f32 %v4583_v57, %v316_v21  ;;  %v321_v57 = vld [vmem:[%s13820_s14 + $0x30] sm:$0xff] }
 0x46b   : > { %18848 = vst [vmem:[#allocation8_spill] sm:$0xff] %v13830_v51  ;;  %9377 = vmatmul.mubr.msk.bf16.gmra.mrb[172].mxu0 %vm4446_vm1, %v13717_v1 }
 0x46c   : > { %18850 = vst [vmem:[#allocation13_spill] sm:$0xff] %v13834_v20  ;;  %4855 = vmatprep.mubr.bf16.mxu0 %v18010_v19 }
 0x46d   : > { %9417 = vmatmul.mubr.msk.bf16.gmra.mrb[76].mxu1 %vm4446_vm1, %v13413_v52 }
 0x46e   : > { %v4587_v41 = vpop.f32.mrb[68].mxu0  ;;  %5321 = vmatprep.mubr.bf16.mxu1 %v18010_v19 }
 0x46f   : > { %v4589_v16 = vpop.f32.mrb[69].mxu0  ;;  %v13848_v9 = vmul.f32 %v4587_v41, %v317_v53  ;;  %v322_v41 = vld [vmem:[%s13820_s14 + $0x38] sm:$0xff] }
 0x470   : > { %v4591_v61 = vpop.f32.mrb[70].mxu0  ;;  %v13852_v54 = vmul.f32 %v4589_v16, %v317_v53 }
 0x471   : > { %18851 = vst [vmem:[#allocation14_spill] sm:$0xff] %v13848_v9  ;;  %v13850_v43 = vmul.f32 %v4591_v61, %v318_v29  ;;  %v4593_v32 = vpop.f32.mrb[71].mxu0 }
 0x472   : > { %18853 = vst [vmem:[#allocation17_spill] sm:$0xff] %v13852_v54  ;;  %v13854_v13 = vmul.f32 %v4593_v32, %v318_v29 }
 0x473   : > { %18852 = vst [vmem:[#allocation15_spill] sm:$0xff] %v13850_v43  ;;  %9378 = vmatmul.mubr.msk.bf16.gmra.mrb[176].mxu0 %vm4446_vm1, %v13723_v35 }
 0x474   : > { %18854 = vst [vmem:[#allocation20_spill] sm:$0xff] %v13854_v13  ;;  %4865 = vmatprep.mubr.bf16.mxu0 %v18010_v19 }
 0x475   : > { %9418 = vmatmul.mubr.msk.bf16.gmra.mrb[80].mxu1 %vm4446_vm1, %v13424_v8 }
 0x476   : > { %v4597_v2 = vpop.f32.mrb[72].mxu0  ;;  %5331 = vmatprep.mubr.bf16.mxu1 %v18010_v19 }
 0x477   : > { %v4599_v58 = vpop.f32.mrb[73].mxu0  ;;  %v13868_v47 = vmul.f32 %v4597_v2, %v319_v28 }
 0x478   : > { %v4601_v36 = vpop.f32.mrb[74].mxu0  ;;  %v13872_v15 = vmul.f32 %v4599_v58, %v319_v28 }
 0x479   : > { %18855 = vst [vmem:[#allocation23_spill] sm:$0xff] %v13868_v47  ;;  %v13870_v0 = vmul.f32 %v4601_v36, %v320_v60  ;;  %v4603_v49 = vpop.f32.mrb[75].mxu0  ;;  %v11599_v36 = vld [vmem:[%s17734_s3 + $0x1c] ss:$36 sps:$4 sm:$0xff]  }
 0x47a   : > { %18857 = vst [vmem:[#allocation25_spill] sm:$0xff] %v13872_v15  ;;  %v13874_v21 = vmul.f32 %v4603_v49, %v320_v60  ;;  %5602 = vmatprep.subr.bf16.mxu0 %v11599_v36 }
 0x47b   : > { %18856 = vst [vmem:[#allocation24_spill] sm:$0xff] %v13870_v0  ;;  %9379 = vmatmul.mubr.msk.bf16.gmra.mrb[180].mxu0 %vm4446_vm1, %v13731_v31 }
 0x47c   : > { %18858 = vst [vmem:[#allocation29_spill] sm:$0xff] %v13874_v21  ;;  %4875 = vmatprep.mubr.bf16.mxu0 %v18010_v19 }
 0x47d   : > { %9419 = vmatmul.mubr.msk.bf16.gmra.mrb[84].mxu1 %vm4446_vm1, %v13438_v10 }
 0x47e   : > { %v4607_v53 = vpop.f32.mrb[76].mxu0  ;;  %5341 = vmatprep.mubr.bf16.mxu1 %v18010_v19 }
 0x47f   : > { %v4609_v29 = vpop.f32.mrb[77].mxu0  ;;  %v13888_v61 = vmul.f32 %v4607_v53, %v321_v57 }
 0x480   : > { %v4611_v16 = vpop.f32.mrb[78].mxu0  ;;  %v13892_v2 = vmul.f32 %v4609_v29, %v321_v57  ;;  %v323_v57 = vld [vmem:[%s13820_s14 + $0x40] sm:$0xff] }
 0x481   : > { %18859 = vst [vmem:[#allocation30_spill] sm:$0xff] %v13888_v61  ;;  %v13890_v32 = vmul.f32 %v4611_v16, %v322_v41  ;;  %v4613_v28 = vpop.f32.mrb[79].mxu0 }
 0x482   : > { %18861 = vst [vmem:[#allocation33_spill] sm:$0xff] %v13892_v2  ;;  %v13894_v60 = vmul.f32 %v4613_v28, %v322_v41  ;;  %v324_v41 = vld [vmem:[%s13820_s14 + $0x48] sm:$0xff] }
 0x483   : > { %18860 = vst [vmem:[#allocation31_spill] sm:$0xff] %v13890_v32  ;;  %9380 = vmatmul.mubr.msk.bf16.gmra.mrb[184].mxu0 %vm4446_vm1, %v13735_v12  ;;  %v334_v32 = vld [vmem:[%s13820_s14 + $0x98] sm:$0xff] }
 0x484   : > { %18862 = vst [vmem:[#allocation35_spill] sm:$0xff] %v13894_v60  ;;  %4885 = vmatprep.mubr.bf16.mxu0 %v18010_v19 }
 0x485   : > { %9420 = vmatmul.mubr.msk.bf16.gmra.mrb[88].mxu1 %vm4446_vm1, %v13446_v27 }
 0x486   : > { %v4617_v53 = vpop.f32.mrb[80].mxu0  ;;  %5351 = vmatprep.mubr.bf16.mxu1 %v18010_v19 }
 0x487   : > { %v4619_v29 = vpop.f32.mrb[81].mxu0  ;;  %v13911_v28 = vmul.f32 %v4617_v53, %v323_v57  ;;  %v325_v53 = vld [vmem:[%s13820_s14 + $0x50] sm:$0xff] }
 0x488   : > { %v4621_v16 = vpop.f32.mrb[82].mxu0  ;;  %v13915_v42 = vmul.f32 %v4619_v29, %v323_v57  ;;  %v326_v57 = vld [vmem:[%s13820_s14 + $0x58] sm:$0xff] }
 0x489   : > { %18863 = vst [vmem:[#allocation39_spill] sm:$0xff] %v13911_v28  ;;  %v13913_v58 = vmul.f32 %v4621_v16, %v324_v41  ;;  %v4623_v25 = vpop.f32.mrb[83].mxu0  ;;  %v11597_v29 = vld [vmem:[%s17734_s3 + $0x18] ss:$36 sps:$4 sm:$0xff]  }
 0x48a   : > { %18865 = vst [vmem:[#allocation44_spill] sm:$0xff] %v13915_v42  ;;  %v13917_v49 = vmul.f32 %v4623_v25, %v324_v41 }
 0x48b   : > { %18864 = vst [vmem:[#allocation40_spill] sm:$0xff] %v13913_v58  ;;  %9381 = vmatmul.mubr.msk.bf16.gmra.mrb[188].mxu0 %vm4446_vm1, %v13745_v56 }
 0x48c   : > { %18866 = vst [vmem:[#allocation45_spill] sm:$0xff] %v13917_v49  ;;  %4928 = vmatprep.mubr.bf16.mxu0 %v18010_v19 }
 0x48d   : > { %9421 = vmatmul.mubr.msk.bf16.gmra.mrb[92].mxu1 %vm4446_vm1, %v13460_v45 }
 0x48e   : > { %v4627_v16 = vpop.f32.mrb[84].mxu0  ;;  %5361 = vmatprep.mubr.bf16.mxu1 %v18010_v19 }
 0x48f   : > { %v4629_v25 = vpop.f32.mrb[85].mxu0  ;;  %v13934_v6 = vmul.f32 %v4627_v16, %v325_v53  ;;  %v18871_v16 = vmov 0  }
 0x490   : > { %v4631_v41 = vpop.f32.mrb[86].mxu0  ;;  %v13941_v14 = vmul.f32 %v4629_v25, %v325_v53  ;;  %v11609_v53 = vld [vmem:[%s17734_s3 + $0xf8] ss:$36 sps:$4 sm:$0xff]  }
 0x491   : > { %18867 = vst [vmem:[#allocation46_spill] sm:$0xff] %v13934_v6  ;;  %v13936_v50 = vmul.f32 %v4631_v41, %v326_v57  ;;  %v4633_v36 = vpop.f32.mrb[87].mxu0  ;;  %v11600_v41 = vld [vmem:[%s17734_s3 + $0x60] ss:$36 sps:$4 sm:$0xff]   ;;  %10680 = vmatprep.subr.bf16.mxu1 %v11609_v53 }
 0x492   : > { %18869 = vst [vmem:[#allocation50_spill] sm:$0xff] %v13941_v14  ;;  %v13943_v19 = vmul.f32 %v4633_v36, %v326_v57  ;;  %v11605_v36 = vld [vmem:[%s17734_s3 + $0xac] ss:$36 sps:$4 sm:$0xff]   ;;  %v327_v57 = vld [vmem:[%s13820_s14 + $0x60] sm:$0xff]  ;;  %10681 = vmatpush3.bf16.msra.mxu1 %v11609_v53 }
 0x493   : > { %18868 = vst [vmem:[#allocation47_spill] sm:$0xff] %v13936_v50  ;;  %9382 = vmatmul.mubr.msk.bf16.vlgmr.msra.gmra.mrb[192].mxu0 %vm4446_vm1, %v13370_v48  ;;  %7661 = vmatprep.subr.bf16.mxu1 %v18871_v16 }
 0x494   : > { %18870 = vst [vmem:[#allocation51_spill] sm:$0xff] %v13943_v19  ;;  %4938 = vmatprep.mubr.bf16.mxu0 %v18871_v16  ;;  %5603 = vmatpush1.bf16.msra.mxu0 %v11597_v29  ;;  %v328_v29 = vld [vmem:[%s13820_s14 + $0x68] sm:$0xff]  ;;  %v11608_v19 = vld [vmem:[%s17734_s3 + $0xf4] ss:$36 sps:$4 sm:$0xff]  }
 0x495   : > { %9422 = vmatmul.mubr.msk.bf16.gmra.mrb[96].mxu1 %vm4446_vm1, %v13470_v7  ;;  %5604 = vmatprep.subr.bf16.mxu0 %v11602_v30  ;;  %v11603_v30 = vld [vmem:[%s17734_s3 + $0xa8] ss:$36 sps:$4 sm:$0xff]  }
 0x496   : > { %v4637_v25 = vpop.f32.mrb[88].mxu0  ;;  %5371 = vmatprep.mubr.bf16.mxu1 %v18871_v16 }
 0x497   : > { %v4639_v28 = vpop.f32.mrb[89].mxu0  ;;  %v13969_v6 = vmul.f32 %v4637_v25, %v327_v57 }
 0x498   : > { %v4641_v58 = vpop.f32.mrb[90].mxu0  ;;  %5605 = vmatpush1.bf16.msra.mxu0 %v11600_v41  ;;  %v13977_v41 = vmul.f32 %v4639_v28, %v327_v57  ;;  %v330_v57 = vld [vmem:[%s13820_s14 + $0x78] sm:$0xff] }
 0x499   : > { %18872 = vst [vmem:[#allocation56_spill] sm:$0xff] %v13969_v6  ;;  %v13971_v50 = vmul.f32 %v4641_v58, %v328_v29  ;;  %v4643_v14 = vpop.f32.mrb[91].mxu0  ;;  %5606 = vmatprep.subr.bf16.mxu0 %v11605_v36  ;;  %v11606_v58 = vld [vmem:[%s17734_s3 + $0xf0] ss:$36 sps:$4 sm:$0xff]  }
 0x49a   : > { %18874 = vst [vmem:[#allocation60_spill] sm:$0xff] %v13977_v41  ;;  %v13979_v42 = vmul.f32 %v4643_v14, %v328_v29  ;;  %v329_v14 = vld [vmem:[%s13820_s14 + $0x70] sm:$0xff] }
 0x49b   : > { %18873 = vst [vmem:[#allocation57_spill] sm:$0xff] %v13971_v50  ;;  %9383 = vmatmul.mubr.msk.bf16.gmra.mrb[196].mxu0 %vm4446_vm1, %v13384_v38 }
 0x49c   : > { %18875 = vst [vmem:[#allocation61_spill] sm:$0xff] %v13979_v42  ;;  %4948 = vmatprep.mubr.bf16.mxu0 %v18871_v16  ;;  %5607 = vmatpush1.bf16.msra.mxu0 %v11603_v30 }
 0x49d   : > { %9423 = vmatmul.mubr.msk.bf16.gmra.mrb[100].mxu1 %vm4446_vm1, %v13486_v59  ;;  %5608 = vmatprep.subr.bf16.mxu0 %v11608_v19 }
 0x49e   : > { %v4647_v28 = vpop.f32.mrb[92].mxu0  ;;  %5381 = vmatprep.mubr.bf16.mxu1 %v18871_v16 }
 0x49f   : > { %v4649_v25 = vpop.f32.mrb[93].mxu0  ;;  %v13996_v30 = vmul.f32 %v4647_v28, %v329_v14  ;;  %v331_v28 = vld [vmem:[%s13820_s14 + $0x80] sm:$0xff] }
 0x4a0   : > { %v4651_v29 = vpop.f32.mrb[94].mxu0  ;;  %5609 = vmatpush1.bf16.msra.mxu0 %v11606_v58  ;;  %v14000_v6 = vmul.f32 %v4649_v25, %v329_v14  ;;  %v332_v14 = vld [vmem:[%s13820_s14 + $0x88] sm:$0xff] }
 0x4a1   : > { %18876 = vst [vmem:[#allocation62_spill] sm:$0xff] %v13996_v30  ;;  %v13998_v53 = vmul.f32 %v4651_v29, %v330_v57  ;;  %v4653_v36 = vpop.f32.mrb[95].mxu0  ;;  %v14020_v30 = vld [vmem:[%s13820_s14 + $0x108] sm:$0xff] }
 0x4a2   : > { %18878 = vst [vmem:[#allocation69_spill] sm:$0xff] %v14000_v6  ;;  %v14002_v19 = vmul.f32 %v4653_v36, %v330_v57  ;;  %v14017_v57 = vld [vmem:[%s13820_s14 + $0x100] sm:$0xff] }
 0x4a3   : > { %18877 = vst [vmem:[#allocation63_spill] sm:$0xff] %v13998_v53  ;;  %9384 = vmatmul.mubr.msk.bf16.gmra.mrb[200].mxu0 %vm4446_vm1, %v13396_v18 }
 0x4a4   : > { %18879 = vst [vmem:[#allocation70_spill] sm:$0xff] %v14002_v19  ;;  %4958 = vmatprep.mubr.bf16.mxu0 %v18871_v16 }
 0x4a5   : > { %9424 = vmatmul.mubr.msk.bf16.gmra.mrb[104].mxu1 %vm4446_vm1, %v13493_v62 }
 0x4a6   : > { %v4657_v29 = vpop.f32.mrb[96].mxu0  ;;  %5391 = vmatprep.mubr.bf16.mxu1 %v18871_v16 }
 0x4a7   : > { %v4659_v36 = vpop.f32.mrb[97].mxu0  ;;  %v14022_v53 = vmul.f32 %v4657_v29, %v331_v28 }
 0x4a8   : > { %v5090_v25 = vpop.f32.mrb[0].mxu1  ;;  %v4661_v50 = vpop.f32.mrb[98].mxu0  ;;  %v14026_v6 = vmul.f32 %v4659_v36, %v331_v28  ;;  %v333_v36 = vld [vmem:[%s13820_s14 + $0x90] sm:$0xff] }
 0x4a9   : > { %18880 = vst [vmem:[#allocation71_spill] sm:$0xff] %v14022_v53  ;;  %v5092_v41 = vpop.f32.mrb[1].mxu1  ;;  %v14024_v42 = vmul.f32 %v4661_v50, %v332_v14  ;;  %v4663_v58 = vpop.f32.mrb[99].mxu0  ;;  %v14031_v61 = vmul.f32 %v5090_v25, %v14017_v57 }
 0x4aa   : > { %18882 = vst [vmem:[#allocation74_spill] sm:$0xff] %v14026_v6  ;;  %v5094_v19 = vpop.f32.mrb[2].mxu1  ;;  %v14028_v49 = vmul.f32 %v4663_v58, %v332_v14  ;;  %v14044_v28 = vmul.f32 %v5092_v41, %v14017_v57  ;;  %v14059_v41 = vld [vmem:[%s13820_s14 + $0x110] sm:$0xff]  ;;  %v14062_v6 = vld [vmem:[%s13820_s14 + $0x118] sm:$0xff] }
 0x4ab   : > { %18881 = vst [vmem:[#allocation72_spill] sm:$0xff] %v14024_v42  ;;  %18884 = vst [vmem:[#allocation79_spill] sm:$0xff] %v14031_v61  ;;  %v14036_v29 = vmul.f32 %v5094_v19, %v14020_v30  ;;  %v5096_v50 = vpop.f32.mrb[3].mxu1  ;;  %9385 = vmatmul.mubr.msk.bf16.gmra.mrb[204].mxu0 %vm4446_vm1, %v13413_v52 }
 0x4ac   : > { %18883 = vst [vmem:[#allocation78_spill] sm:$0xff] %v14028_v49  ;;  %4968 = vmatprep.mubr.bf16.mxu0 %v18871_v16  ;;  %18886 = vst [vmem:[#allocation81_spill] sm:$0xff] %v14044_v28  ;;  %v14047_v14 = vmul.f32 %v5096_v50, %v14020_v30  ;;  %v336_v28 = vld [vmem:[%s13820_s14 + $0xa8] sm:$0xff] }
 0x4ad   : > { %18885 = vst [vmem:[#allocation80_spill] sm:$0xff] %v14036_v29  ;;  %9425 = vmatmul.mubr.msk.bf16.gmra.mrb[108].mxu1 %vm4446_vm1, %v13506_v24 }
 0x4ae   : > { %18887 = vst [vmem:[#allocation83_spill] sm:$0xff] %v14047_v14  ;;  %v4667_v25 = vpop.f32.mrb[100].mxu0  ;;  %5401 = vmatprep.mubr.bf16.mxu1 %v18871_v16 }
 0x4af   : > { %v4669_v53 = vpop.f32.mrb[101].mxu0  ;;  %v14064_v49 = vmul.f32 %v4667_v25, %v333_v36 }
 0x4b0   : > { %v5100_v42 = vpop.f32.mrb[4].mxu1  ;;  %v4671_v50 = vpop.f32.mrb[102].mxu0  ;;  %v14068_v2 = vmul.f32 %v4669_v53, %v333_v36 }
 0x4b1   : > { %18888 = vst [vmem:[#allocation92_spill] sm:$0xff] %v14064_v49  ;;  %v5102_v19 = vpop.f32.mrb[5].mxu1  ;;  %v14066_v61 = vmul.f32 %v4671_v50, %v334_v32  ;;  %v4673_v29 = vpop.f32.mrb[103].mxu0  ;;  %v14073_v58 = vmul.f32 %v5100_v42, %v14059_v41 }
 0x4b2   : > { %18890 = vst [vmem:[#allocation94_spill] sm:$0xff] %v14068_v2  ;;  %v5104_v60 = vpop.f32.mrb[6].mxu1  ;;  %v14070_v47 = vmul.f32 %v4673_v29, %v334_v32  ;;  %v14086_v42 = vmul.f32 %v5102_v19, %v14059_v41  ;;  %v335_v29 = vld [vmem:[%s13820_s14 + $0xa0] sm:$0xff] }
 0x4b3   : > { %18889 = vst [vmem:[#allocation93_spill] sm:$0xff] %v14066_v61  ;;  %18892 = vst [vmem:[#allocation99_spill] sm:$0xff] %v14073_v58  ;;  %v14078_v25 = vmul.f32 %v5104_v60, %v14062_v6  ;;  %v5106_v50 = vpop.f32.mrb[7].mxu1  ;;  %9386 = vmatmul.mubr.msk.bf16.gmra.mrb[208].mxu0 %vm4446_vm1, %v13424_v8  ;;  %v14101_v19 = vld [vmem:[%s13820_s14 + $0x120] sm:$0xff]  ;;  %v14104_v61 = vld [vmem:[%s13820_s14 + $0x128] sm:$0xff] }
 0x4b4   : > { %18891 = vst [vmem:[#allocation95_spill] sm:$0xff] %v14070_v47  ;;  %4978 = vmatprep.mubr.bf16.mxu0 %v18871_v16  ;;  %18894 = vst [vmem:[#allocation104_spill] sm:$0xff] %v14086_v42  ;;  %v14089_v53 = vmul.f32 %v5106_v50, %v14062_v6  ;;  %v338_v42 = vld [vmem:[%s13820_s14 + $0xb8] sm:$0xff] }
 0x4b5   : > { %18893 = vst [vmem:[#allocation100_spill] sm:$0xff] %v14078_v25  ;;  %9426 = vmatmul.mubr.msk.bf16.gmra.mrb[112].mxu1 %vm4446_vm1, %v13516_v46 }
 0x4b6   : > { %18895 = vst [vmem:[#allocation105_spill] sm:$0xff] %v14089_v53  ;;  %v4677_v36 = vpop.f32.mrb[104].mxu0  ;;  %5411 = vmatprep.mubr.bf16.mxu1 %v18871_v16 }
 0x4b7   : > { %v4679_v14 = vpop.f32.mrb[105].mxu0  ;;  %v14106_v2 = vmul.f32 %v4677_v36, %v335_v29 }
 0x4b8   : > { %v5110_v49 = vpop.f32.mrb[8].mxu1  ;;  %v4681_v50 = vpop.f32.mrb[106].mxu0  ;;  %v14110_v47 = vmul.f32 %v4679_v14, %v335_v29 }
 0x4b9   : > { %18896 = vst [vmem:[#allocation106_spill] sm:$0xff] %v14106_v2  ;;  %v5112_v60 = vpop.f32.mrb[9].mxu1  ;;  %v14108_v58 = vmul.f32 %v4681_v50, %v336_v28  ;;  %v4683_v25 = vpop.f32.mrb[107].mxu0  ;;  %v14115_v32 = vmul.f32 %v5110_v49, %v14101_v19 }
 0x4ba   : > { %18898 = vst [vmem:[#allocation114_spill] sm:$0xff] %v14110_v47  ;;  %v5114_v0 = vpop.f32.mrb[10].mxu1  ;;  %v14112_v15 = vmul.f32 %v4683_v25, %v336_v28  ;;  %v14128_v49 = vmul.f32 %v5112_v60, %v14101_v19  ;;  %v337_v25 = vld [vmem:[%s13820_s14 + $0xb0] sm:$0xff] }
 0x4bb   : > { %18897 = vst [vmem:[#allocation107_spill] sm:$0xff] %v14108_v58  ;;  %18900 = vst [vmem:[#allocation98_spill] sm:$0xff] %v14115_v32  ;;  %v14120_v36 = vmul.f32 %v5114_v0, %v14104_v61  ;;  %v5116_v50 = vpop.f32.mrb[11].mxu1  ;;  %9387 = vmatmul.mubr.msk.bf16.gmra.mrb[212].mxu0 %vm4446_vm1, %v13438_v10  ;;  %v14143_v60 = vld [vmem:[%s13820_s14 + $0x130] sm:$0xff]  ;;  %v14146_v58 = vld [vmem:[%s13820_s14 + $0x138] sm:$0xff] }
 0x4bc   : > { %18899 = vst [vmem:[#allocation120_spill] sm:$0xff] %v14112_v15  ;;  %4988 = vmatprep.mubr.bf16.mxu0 %v18871_v16  ;;  %18902 = vst [vmem:[#allocation111_spill] sm:$0xff] %v14128_v49  ;;  %v14131_v14 = vmul.f32 %v5116_v50, %v14104_v61  ;;  %v340_v49 = vld [vmem:[%s13820_s14 + $0xc8] sm:$0xff] }
 0x4bd   : > { %18901 = vst [vmem:[#allocation101_spill] sm:$0xff] %v14120_v36  ;;  %9427 = vmatmul.mubr.msk.bf16.gmra.mrb[116].mxu1 %vm4446_vm1, %v13532_v37 }
 0x4be   : > { %18903 = vst [vmem:[#allocation113_spill] sm:$0xff] %v14131_v14  ;;  %v4687_v29 = vpop.f32.mrb[108].mxu0  ;;  %5421 = vmatprep.mubr.bf16.mxu1 %v18871_v16 }
 0x4bf   : > { %v4689_v53 = vpop.f32.mrb[109].mxu0  ;;  %v14148_v47 = vmul.f32 %v4687_v29, %v337_v25 }
 0x4c0   : > { %v5120_v2 = vpop.f32.mrb[12].mxu1  ;;  %v4691_v50 = vpop.f32.mrb[110].mxu0  ;;  %v14152_v15 = vmul.f32 %v4689_v53, %v337_v25 }
 0x4c1   : > { %18904 = vst [vmem:[#allocation119_spill] sm:$0xff] %v14148_v47  ;;  %v5122_v0 = vpop.f32.mrb[13].mxu1  ;;  %v14150_v32 = vmul.f32 %v4691_v50, %v338_v42  ;;  %v4693_v36 = vpop.f32.mrb[111].mxu0  ;;  %v14157_v28 = vmul.f32 %v5120_v2, %v14143_v60 }
 0x4c2   : > { %18906 = vst [vmem:[#allocation125_spill] sm:$0xff] %v14152_v15  ;;  %v5124_v21 = vpop.f32.mrb[14].mxu1  ;;  %v14154_v9 = vmul.f32 %v4693_v36, %v338_v42  ;;  %v14170_v2 = vmul.f32 %v5122_v0, %v14143_v60  ;;  %v339_v36 = vld [vmem:[%s13820_s14 + $0xc0] sm:$0xff] }
 0x4c3   : > { %18905 = vst [vmem:[#allocation122_spill] sm:$0xff] %v14150_v32  ;;  %18908 = vst [vmem:[#allocation2_spill] sm:$0xff] %v14157_v28  ;;  %v14162_v29 = vmul.f32 %v5124_v21, %v14146_v58  ;;  %v5126_v50 = vpop.f32.mrb[15].mxu1  ;;  %9388 = vmatmul.mubr.msk.bf16.gmra.mrb[216].mxu0 %vm4446_vm1, %v13446_v27  ;;  %v14185_v0 = vld [vmem:[%s13820_s14 + $0x140] sm:$0xff]  ;;  %v14188_v32 = vld [vmem:[%s13820_s14 + $0x148] sm:$0xff] }
 0x4c4   : > { %18907 = vst [vmem:[#allocation126_spill] sm:$0xff] %v14154_v9  ;;  %4998 = vmatprep.mubr.bf16.mxu0 %v18871_v16  ;;  %18910 = vst [vmem:[#allocation4_spill] sm:$0xff] %v14170_v2  ;;  %v14173_v53 = vmul.f32 %v5126_v50, %v14146_v58  ;;  %v342_v2 = vld [vmem:[%s13820_s14 + $0xd8] sm:$0xff] }
 0x4c5   : > { %18909 = vst [vmem:[#allocation3_spill] sm:$0xff] %v14162_v29  ;;  %9428 = vmatmul.mubr.msk.bf16.gmra.mrb[120].mxu1 %vm4446_vm1, %v13544_v17 }
 0x4c6   : > { %18911 = vst [vmem:[#allocation7_spill] sm:$0xff] %v14173_v53  ;;  %v4697_v25 = vpop.f32.mrb[112].mxu0  ;;  %5431 = vmatprep.mubr.bf16.mxu1 %v18871_v16 }
 0x4c7   : > { %v4699_v14 = vpop.f32.mrb[113].mxu0  ;;  %v14190_v15 = vmul.f32 %v4697_v25, %v339_v36 }
 0x4c8   : > { %v5130_v47 = vpop.f32.mrb[16].mxu1  ;;  %v4701_v50 = vpop.f32.mrb[114].mxu0  ;;  %v14194_v9 = vmul.f32 %v4699_v14, %v339_v36 }
 0x4c9   : > { %18912 = vst [vmem:[#allocation9_spill] sm:$0xff] %v14190_v15  ;;  %v5132_v21 = vpop.f32.mrb[17].mxu1  ;;  %v14192_v28 = vmul.f32 %v4701_v50, %v340_v49  ;;  %v4703_v29 = vpop.f32.mrb[115].mxu0  ;;  %v14199_v42 = vmul.f32 %v5130_v47, %v14185_v0 }
 0x4ca   : > { %18914 = vst [vmem:[#allocation12_spill] sm:$0xff] %v14194_v9  ;;  %v5134_v43 = vpop.f32.mrb[18].mxu1  ;;  %v14196_v54 = vmul.f32 %v4703_v29, %v340_v49  ;;  %v14212_v47 = vmul.f32 %v5132_v21, %v14185_v0  ;;  %v341_v29 = vld [vmem:[%s13820_s14 + $0xd0] sm:$0xff] }
 0x4cb   : > { %18913 = vst [vmem:[#allocation10_spill] sm:$0xff] %v14192_v28  ;;  %18916 = vst [vmem:[#allocation18_spill] sm:$0xff] %v14199_v42  ;;  %v14204_v25 = vmul.f32 %v5134_v43, %v14188_v32  ;;  %v5136_v50 = vpop.f32.mrb[19].mxu1  ;;  %9389 = vmatmul.mubr.msk.bf16.gmra.mrb[220].mxu0 %vm4446_vm1, %v13460_v45  ;;  %v14227_v21 = vld [vmem:[%s13820_s14 + $0x150] sm:$0xff]  ;;  %v14230_v28 = vld [vmem:[%s13820_s14 + $0x158] sm:$0xff] }
 0x4cc   : > { %18915 = vst [vmem:[#allocation16_spill] sm:$0xff] %v14196_v54  ;;  %5008 = vmatprep.mubr.bf16.mxu0 %v18871_v16  ;;  %18918 = vst [vmem:[#allocation21_spill] sm:$0xff] %v14212_v47  ;;  %v14215_v14 = vmul.f32 %v5136_v50, %v14188_v32  ;;  %v344_v47 = vld [vmem:[%s13820_s14 + $0xe8] sm:$0xff] }
 0x4cd   : > { %18917 = vst [vmem:[#allocation19_spill] sm:$0xff] %v14204_v25  ;;  %9429 = vmatmul.mubr.msk.bf16.gmra.mrb[124].mxu1 %vm4446_vm1, %v13554_v3 }
 0x4ce   : > { %18919 = vst [vmem:[#allocation22_spill] sm:$0xff] %v14215_v14  ;;  %v4707_v36 = vpop.f32.mrb[116].mxu0  ;;  %5441 = vmatprep.mubr.bf16.mxu1 %v18871_v16 }
 0x4cf   : > { %v4709_v53 = vpop.f32.mrb[117].mxu0  ;;  %v14232_v9 = vmul.f32 %v4707_v36, %v341_v29 }
 0x4d0   : > { %v5140_v15 = vpop.f32.mrb[20].mxu1  ;;  %v4711_v50 = vpop.f32.mrb[118].mxu0  ;;  %v14236_v54 = vmul.f32 %v4709_v53, %v341_v29 }
 0x4d1   : > { %18920 = vst [vmem:[#allocation26_spill] sm:$0xff] %v14232_v9  ;;  %v5142_v43 = vpop.f32.mrb[21].mxu1  ;;  %v14234_v42 = vmul.f32 %v4711_v50, %v342_v2  ;;  %v4713_v25 = vpop.f32.mrb[119].mxu0  ;;  %v14241_v49 = vmul.f32 %v5140_v15, %v14227_v21 }
 0x4d2   : > { %18922 = vst [vmem:[#allocation28_spill] sm:$0xff] %v14236_v54  ;;  %v5144_v13 = vpop.f32.mrb[22].mxu1  ;;  %v14238_v26 = vmul.f32 %v4713_v25, %v342_v2  ;;  %v14254_v15 = vmul.f32 %v5142_v43, %v14227_v21  ;;  %v343_v25 = vld [vmem:[%s13820_s14 + $0xe0] sm:$0xff] }
 0x4d3   : > { %18921 = vst [vmem:[#allocation27_spill] sm:$0xff] %v14234_v42  ;;  %18924 = vst [vmem:[#allocation34_spill] sm:$0xff] %v14241_v49  ;;  %v14246_v36 = vmul.f32 %v5144_v13, %v14230_v28  ;;  %v5146_v50 = vpop.f32.mrb[23].mxu1  ;;  %9390 = vmatmul.mubr.msk.bf16.gmra.mrb[224].mxu0 %vm4446_vm1, %v13470_v7  ;;  %v14269_v43 = vld [vmem:[%s13820_s14 + $0x160] sm:$0xff]  ;;  %v14272_v42 = vld [vmem:[%s13820_s14 + $0x168] sm:$0xff] }
 0x4d4   : > { %18923 = vst [vmem:[#allocation32_spill] sm:$0xff] %v14238_v26  ;;  %5018 = vmatprep.mubr.bf16.mxu0 %v18871_v16  ;;  %18926 = vst [vmem:[#allocation37_spill] sm:$0xff] %v14254_v15  ;;  %v14257_v53 = vmul.f32 %v5146_v50, %v14230_v28  ;;  %v346_v15 = vld [vmem:[%s13820_s14 + $0xf8] sm:$0xff] }
 0x4d5   : > { %18925 = vst [vmem:[#allocation36_spill] sm:$0xff] %v14246_v36  ;;  %9430 = vmatmul.mubr.msk.bf16.gmra.mrb[128].mxu1 %vm4446_vm1, %v13565_v44 }
 0x4d6   : > { %18927 = vst [vmem:[#allocation38_spill] sm:$0xff] %v14257_v53  ;;  %v4717_v29 = vpop.f32.mrb[120].mxu0  ;;  %5451 = vmatprep.mubr.bf16.mxu1 %v18871_v16 }
 0x4d7   : > { %v4719_v14 = vpop.f32.mrb[121].mxu0  ;;  %v14274_v54 = vmul.f32 %v4717_v29, %v343_v25 }
 0x4d8   : > { %v5150_v9 = vpop.f32.mrb[24].mxu1  ;;  %v4721_v50 = vpop.f32.mrb[122].mxu0  ;;  %v14278_v26 = vmul.f32 %v4719_v14, %v343_v25 }
 0x4d9   : > { %18928 = vst [vmem:[#allocation41_spill] sm:$0xff] %v14274_v54  ;;  %v5152_v13 = vpop.f32.mrb[25].mxu1  ;;  %v14276_v49 = vmul.f32 %v4721_v50, %v344_v47  ;;  %v4723_v36 = vpop.f32.mrb[123].mxu0  ;;  %v14283_v2 = vmul.f32 %v5150_v9, %v14269_v43 }
 0x4da   : > { %18930 = vst [vmem:[#allocation43_spill] sm:$0xff] %v14278_v26  ;;  %v5154_v51 = vpop.f32.mrb[26].mxu1  ;;  %v14280_v63 = vmul.f32 %v4723_v36, %v344_v47  ;;  %v14296_v9 = vmul.f32 %v5152_v13, %v14269_v43  ;;  %v345_v36 = vld [vmem:[%s13820_s14 + $0xf0] sm:$0xff] }
 0x4db   : > { %18929 = vst [vmem:[#allocation42_spill] sm:$0xff] %v14276_v49  ;;  %18932 = vst [vmem:[#allocation49_spill] sm:$0xff] %v14283_v2  ;;  %v14288_v29 = vmul.f32 %v5154_v51, %v14272_v42  ;;  %v5156_v50 = vpop.f32.mrb[27].mxu1  ;;  %9391 = vmatmul.mubr.msk.bf16.gmra.mrb[228].mxu0 %vm4446_vm1, %v13486_v59  ;;  %v14311_v13 = vld [vmem:[%s13820_s14 + $0x170] sm:$0xff]  ;;  %v14314_v49 = vld [vmem:[%s13820_s14 + $0x178] sm:$0xff] }
 0x4dc   : > { %18931 = vst [vmem:[#allocation48_spill] sm:$0xff] %v14280_v63  ;;  %5028 = vmatprep.mubr.bf16.mxu0 %v18871_v16  ;;  %18934 = vst [vmem:[#allocation53_spill] sm:$0xff] %v14296_v9  ;;  %v14299_v14 = vmul.f32 %v5156_v50, %v14272_v42  ;;  %v14351_v9 = vld [vmem:[%s13820_s14 + $0x180] sm:$0xff] }
 0x4dd   : > { %18933 = vst [vmem:[#allocation52_spill] sm:$0xff] %v14288_v29  ;;  %9431 = vmatmul.mubr.msk.bf16.gmra.mrb[132].mxu1 %vm4446_vm1, %v13587_v33 }
 0x4de   : > { %18935 = vst [vmem:[#allocation54_spill] sm:$0xff] %v14299_v14  ;;  %v4727_v25 = vpop.f32.mrb[124].mxu0  ;;  %5461 = vmatprep.mubr.bf16.mxu1 %v18871_v16 }
 0x4df   : > { %v4729_v53 = vpop.f32.mrb[125].mxu0  ;;  %v14316_v26 = vmul.f32 %v4727_v25, %v345_v36 }
 0x4e0   : > { %v5160_v54 = vpop.f32.mrb[28].mxu1  ;;  %v4731_v50 = vpop.f32.mrb[126].mxu0  ;;  %v14320_v63 = vmul.f32 %v4729_v53, %v345_v36 }
 0x4e1   : > { %18936 = vst [vmem:[#allocation55_spill] sm:$0xff] %v14316_v26  ;;  %v5162_v51 = vpop.f32.mrb[29].mxu1  ;;  %v14318_v2 = vmul.f32 %v4731_v50, %v346_v15  ;;  %v4733_v29 = vpop.f32.mrb[127].mxu0  ;;  %v14325_v47 = vmul.f32 %v5160_v54, %v14311_v13  ;;  %v14354_v26 = vld [vmem:[%s13820_s14 + $0x188] sm:$0xff] }
 0x4e2   : > { %18938 = vst [vmem:[#allocation59_spill] sm:$0xff] %v14320_v63  ;;  %v5164_v20 = vpop.f32.mrb[30].mxu1  ;;  %v14322_v33 = vmul.f32 %v4733_v29, %v346_v15  ;;  %v14338_v53 = vmul.f32 %v5162_v51, %v14311_v13 }
 0x4e3   : > { %18937 = vst [vmem:[#allocation58_spill] sm:$0xff] %v14318_v2  ;;  %18940 = vst [vmem:[#allocation65_spill] sm:$0xff] %v14325_v47  ;;  %v14330_v14 = vmul.f32 %v5164_v20, %v14314_v49  ;;  %v5166_v25 = vpop.f32.mrb[31].mxu1  ;;  %9392 = vmatmul.mubr.msk.bf16.gmra.mrb[232].mxu0 %vm4446_vm1, %v13493_v62 }
 0x4e4   : > { %18939 = vst [vmem:[#allocation64_spill] sm:$0xff] %v14322_v33  ;;  %5038 = vmatprep.mubr.bf16.mxu0 %v18871_v16  ;;  %18942 = vst [vmem:[#allocation67_spill] sm:$0xff] %v14338_v53  ;;  %v14341_v54 = vmul.f32 %v5166_v25, %v14314_v49 }
 0x4e5   : > { %18941 = vst [vmem:[#allocation66_spill] sm:$0xff] %v14330_v14  ;;  %9432 = vmatmul.mubr.msk.bf16.gmra.mrb[136].mxu1 %vm4446_vm1, %v13604_v11 }
 0x4e6   : > { %18943 = vst [vmem:[#allocation68_spill] sm:$0xff] %v14341_v54  ;;  %v4737_v29 = vpop.f32.mrb[128].mxu0  ;;  %5471 = vmatprep.mubr.bf16.mxu1 %v18871_v16 }
 0x4e7   : > { %v4739_v50 = vpop.f32.mrb[129].mxu0  ;;  %v14357_v25 = vmul.f32 %v4737_v29, %v14017_v57 }
 0x4e8   : > { %v5170_v51 = vpop.f32.mrb[32].mxu1  ;;  %v4741_v15 = vpop.f32.mrb[130].mxu0  ;;  %v14363_v2 = vmul.f32 %v4739_v50, %v14017_v57 }
 0x4e9   : > { %18944 = vst [vmem:[#allocation73_spill] sm:$0xff] %v14357_v25  ;;  %v5172_v20 = vpop.f32.mrb[33].mxu1  ;;  %v14360_v47 = vmul.f32 %v4741_v15, %v14020_v30  ;;  %v4743_v14 = vpop.f32.mrb[131].mxu0  ;;  %v14369_v53 = vmul.f32 %v5170_v51, %v14351_v9 }
 0x4ea   : > { %18946 = vst [vmem:[#allocation76_spill] sm:$0xff] %v14363_v2  ;;  %v5174_v63 = vpop.f32.mrb[34].mxu1  ;;  %v14366_v36 = vmul.f32 %v4743_v14, %v14020_v30  ;;  %v14382_v57 = vmul.f32 %v5172_v20, %v14351_v9  ;;  %v14395_v30 = vld [vmem:[%s13820_s14 + $0x190] sm:$0xff] }
 0x4eb   : > { %18945 = vst [vmem:[#allocation75_spill] sm:$0xff] %v14360_v47  ;;  %18948 = vst [vmem:[#allocation82_spill] sm:$0xff] %v14369_v53  ;;  %v14374_v54 = vmul.f32 %v5174_v63, %v14354_v26  ;;  %v5176_v15 = vpop.f32.mrb[35].mxu1  ;;  %9393 = vmatmul.mubr.msk.bf16.gmra.mrb[236].mxu0 %vm4446_vm1, %v13506_v24  ;;  %v14398_v47 = vld [vmem:[%s13820_s14 + $0x198] sm:$0xff] }
 0x4ec   : > { %18947 = vst [vmem:[#allocation77_spill] sm:$0xff] %v14366_v36  ;;  %5048 = vmatprep.mubr.bf16.mxu0 %v18871_v16  ;;  %18950 = vst [vmem:[#allocation85_spill] sm:$0xff] %v14382_v57  ;;  %v14385_v14 = vmul.f32 %v5176_v15, %v14354_v26 }
 0x4ed   : > { %18949 = vst [vmem:[#allocation84_spill] sm:$0xff] %v14374_v54  ;;  %9433 = vmatmul.mubr.msk.bf16.gmra.mrb[140].mxu1 %vm4446_vm1, %v13620_v4 }
 0x4ee   : > { %18951 = vst [vmem:[#allocation86_spill] sm:$0xff] %v14385_v14  ;;  %v4747_v50 = vpop.f32.mrb[132].mxu0  ;;  %5481 = vmatprep.mubr.bf16.mxu1 %v18871_v16 }
 0x4ef   : > { %v4749_v29 = vpop.f32.mrb[133].mxu0  ;;  %v14401_v15 = vmul.f32 %v4747_v50, %v14059_v41 }
 0x4f0   : > { %v5180_v20 = vpop.f32.mrb[36].mxu1  ;;  %v4751_v25 = vpop.f32.mrb[134].mxu0  ;;  %v14407_v2 = vmul.f32 %v4749_v29, %v14059_v41 }
 0x4f1   : > { %18952 = vst [vmem:[#allocation87_spill] sm:$0xff] %v14401_v15  ;;  %v5182_v63 = vpop.f32.mrb[37].mxu1  ;;  %v14404_v53 = vmul.f32 %v4751_v25, %v14062_v6  ;;  %v4753_v54 = vpop.f32.mrb[135].mxu0  ;;  %v14413_v57 = vmul.f32 %v5180_v20, %v14395_v30 }
 0x4f2   : > { %18954 = vst [vmem:[#allocation89_spill] sm:$0xff] %v14407_v2  ;;  %v5184_v36 = vpop.f32.mrb[38].mxu1  ;;  %v14410_v51 = vmul.f32 %v4753_v54, %v14062_v6  ;;  %v14426_v41 = vmul.f32 %v5182_v63, %v14395_v30  ;;  %v14439_v6 = vld [vmem:[%s13820_s14 + $0x1a0] sm:$0xff] }
 0x4f3   : > { %18953 = vst [vmem:[#allocation88_spill] sm:$0xff] %v14404_v53  ;;  %18956 = vst [vmem:[#allocation91_spill] sm:$0xff] %v14413_v57  ;;  %v14418_v14 = vmul.f32 %v5184_v36, %v14398_v47  ;;  %v5186_v25 = vpop.f32.mrb[39].mxu1  ;;  %9394 = vmatmul.mubr.msk.bf16.gmra.mrb[240].mxu0 %vm4446_vm1, %v13516_v46  ;;  %v14442_v53 = vld [vmem:[%s13820_s14 + $0x1a8] sm:$0xff] }
 0x4f4   : > { %18955 = vst [vmem:[#allocation90_spill] sm:$0xff] %v14410_v51  ;;  %5058 = vmatprep.mubr.bf16.mxu0 %v18871_v16  ;;  %18958 = vst [vmem:[#allocation97_spill] sm:$0xff] %v14426_v41  ;;  %v14429_v54 = vmul.f32 %v5186_v25, %v14398_v47 }
 0x4f5   : > { %18957 = vst [vmem:[#allocation96_spill] sm:$0xff] %v14418_v14  ;;  %9434 = vmatmul.mubr.msk.bf16.gmra.mrb[144].mxu1 %vm4446_vm1, %v13640_v5 }
 0x4f6   : > { %18959 = vst [vmem:[#allocation102_spill] sm:$0xff] %v14429_v54  ;;  %v4757_v29 = vpop.f32.mrb[136].mxu0  ;;  %5491 = vmatprep.mubr.bf16.mxu1 %v18871_v16 }
 0x4f7   : > { %v4759_v50 = vpop.f32.mrb[137].mxu0  ;;  %v14445_v25 = vmul.f32 %v4757_v29, %v14101_v19 }
 0x4f8   : > { %v5190_v63 = vpop.f32.mrb[40].mxu1  ;;  %v4761_v15 = vpop.f32.mrb[138].mxu0  ;;  %v14451_v2 = vmul.f32 %v4759_v50, %v14101_v19 }
 0x4f9   : > { %18960 = vst [vmem:[#allocation103_spill] sm:$0xff] %v14445_v25  ;;  %v5192_v36 = vpop.f32.mrb[41].mxu1  ;;  %v14448_v57 = vmul.f32 %v4761_v15, %v14104_v61  ;;  %v4763_v14 = vpop.f32.mrb[139].mxu0  ;;  %v14457_v41 = vmul.f32 %v5190_v63, %v14439_v6 }
 0x4fa   : > { %18962 = vst [vmem:[#allocation109_spill] sm:$0xff] %v14451_v2  ;;  %v5194_v51 = vpop.f32.mrb[42].mxu1  ;;  %v14454_v20 = vmul.f32 %v4763_v14, %v14104_v61  ;;  %v14470_v19 = vmul.f32 %v5192_v36, %v14439_v6  ;;  %v14483_v61 = vld [vmem:[%s13820_s14 + $0x1b0] sm:$0xff] }
 0x4fb   : > { %18961 = vst [vmem:[#allocation108_spill] sm:$0xff] %v14448_v57  ;;  %18964 = vst [vmem:[#allocation112_spill] sm:$0xff] %v14457_v41  ;;  %v14462_v54 = vmul.f32 %v5194_v51, %v14442_v53  ;;  %v5196_v15 = vpop.f32.mrb[43].mxu1  ;;  %9395 = vmatmul.mubr.msk.bf16.gmra.mrb[244].mxu0 %vm4446_vm1, %v13532_v37  ;;  %v14486_v57 = vld [vmem:[%s13820_s14 + $0x1b8] sm:$0xff] }
 0x4fc   : > { %18963 = vst [vmem:[#allocation110_spill] sm:$0xff] %v14454_v20  ;;  %5068 = vmatprep.mubr.bf16.mxu0 %v18871_v16  ;;  %18966 = vst [vmem:[#allocation116_spill] sm:$0xff] %v14470_v19  ;;  %v14473_v14 = vmul.f32 %v5196_v15, %v14442_v53 }
 0x4fd   : > { %18965 = vst [vmem:[#allocation115_spill] sm:$0xff] %v14462_v54  ;;  %9435 = vmatmul.mubr.msk.bf16.gmra.mrb[148].mxu1 %vm4446_vm1, %v13657_v40 }
 0x4fe   : > { %18967 = vst [vmem:[#allocation117_spill] sm:$0xff] %v14473_v14  ;;  %v4767_v50 = vpop.f32.mrb[140].mxu0  ;;  %5501 = vmatprep.mubr.bf16.mxu1 %v18871_v16 }
 0x4ff   : > { %v4769_v29 = vpop.f32.mrb[141].mxu0  ;;  %v14489_v15 = vmul.f32 %v4767_v50, %v14143_v60 }
 0x500   : > { %v5200_v36 = vpop.f32.mrb[44].mxu1  ;;  %v4771_v25 = vpop.f32.mrb[142].mxu0  ;;  %v14495_v2 = vmul.f32 %v4769_v29, %v14143_v60 }
 0x501   : > { %18968 = vst [vmem:[#allocation118_spill] sm:$0xff] %v14489_v15  ;;  %v5202_v51 = vpop.f32.mrb[45].mxu1  ;;  %v14492_v41 = vmul.f32 %v4771_v25, %v14146_v58  ;;  %v4773_v54 = vpop.f32.mrb[143].mxu0  ;;  %v14501_v19 = vmul.f32 %v5200_v36, %v14483_v61 }
 0x502   : > { %18970 = vst [vmem:[#allocation123_spill] sm:$0xff] %v14495_v2  ;;  %v5204_v20 = vpop.f32.mrb[46].mxu1  ;;  %v14498_v63 = vmul.f32 %v4773_v54, %v14146_v58  ;;  %v14514_v60 = vmul.f32 %v5202_v51, %v14483_v61  ;;  %v14527_v58 = vld [vmem:[%s13820_s14 + $0x1c0] sm:$0xff] }
 0x503   : > { %18969 = vst [vmem:[#allocation121_spill] sm:$0xff] %v14492_v41  ;;  %18972 = vst [vmem:[#allocation127_spill] sm:$0xff] %v14501_v19  ;;  %v14506_v14 = vmul.f32 %v5204_v20, %v14486_v57  ;;  %v5206_v25 = vpop.f32.mrb[47].mxu1  ;;  %9396 = vmatmul.mubr.msk.bf16.gmra.mrb[248].mxu0 %vm4446_vm1, %v13544_v17  ;;  %v14530_v41 = vld [vmem:[%s13820_s14 + $0x1c8] sm:$0xff] }
 0x504   : > { %18971 = vst [vmem:[#allocation124_spill] sm:$0xff] %v14498_v63  ;;  %5078 = vmatprep.mubr.bf16.mxu0 %v18871_v16  ;;  %18974 = vst [vmem:[#allocation129_spill] sm:$0xff] %v14514_v60  ;;  %v14517_v54 = vmul.f32 %v5206_v25, %v14486_v57 }
 0x505   : > { %18973 = vst [vmem:[#allocation128_spill] sm:$0xff] %v14506_v14  ;;  %9436 = vmatmul.mubr.msk.bf16.gmra.mrb[152].mxu1 %vm4446_vm1, %v13672_v39 }
 0x506   : > { %18975 = vst [vmem:[#allocation130_spill] sm:$0xff] %v14517_v54  ;;  %v4777_v29 = vpop.f32.mrb[144].mxu0  ;;  %5511 = vmatprep.mubr.bf16.mxu1 %v18871_v16 }
 0x507   : > { %v4779_v50 = vpop.f32.mrb[145].mxu0  ;;  %v14533_v25 = vmul.f32 %v4777_v29, %v14185_v0 }
 0x508   : > { %v5210_v51 = vpop.f32.mrb[48].mxu1  ;;  %v4781_v15 = vpop.f32.mrb[146].mxu0  ;;  %v14539_v2 = vmul.f32 %v4779_v50, %v14185_v0 }
 0x509   : > { %18976 = vst [vmem:[#allocation131_spill] sm:$0xff] %v14533_v25  ;;  %v5212_v20 = vpop.f32.mrb[49].mxu1  ;;  %v14536_v19 = vmul.f32 %v4781_v15, %v14188_v32  ;;  %v4783_v14 = vpop.f32.mrb[147].mxu0  ;;  %v14545_v60 = vmul.f32 %v5210_v51, %v14527_v58 }
 0x50a   : > { %18978 = vst [vmem:[#allocation133_spill] sm:$0xff] %v14539_v2  ;;  %v5214_v63 = vpop.f32.mrb[50].mxu1  ;;  %v14542_v36 = vmul.f32 %v4783_v14, %v14188_v32  ;;  %v14558_v0 = vmul.f32 %v5212_v20, %v14527_v58  ;;  %v14571_v32 = vld [vmem:[%s13820_s14 + $0x1d0] sm:$0xff] }
 0x50b   : > { %18977 = vst [vmem:[#allocation132_spill] sm:$0xff] %v14536_v19  ;;  %18980 = vst [vmem:[#allocation135_spill] sm:$0xff] %v14545_v60  ;;  %v14550_v54 = vmul.f32 %v5214_v63, %v14530_v41  ;;  %v5216_v15 = vpop.f32.mrb[51].mxu1  ;;  %9397 = vmatmul.mubr.msk.bf16.gmra.mrb[252].mxu0 %vm4446_vm1, %v13554_v3  ;;  %v14574_v19 = vld [vmem:[%s13820_s14 + $0x1d8] sm:$0xff] }
 0x50c   : > { %18979 = vst [vmem:[#allocation134_spill] sm:$0xff] %v14542_v36  ;;  %5634 = vmatprep.mubr.bf16.mxu0 %v18871_v16  ;;  %18982 = vst [vmem:[#allocation137_spill] sm:$0xff] %v14558_v0  ;;  %v14561_v14 = vmul.f32 %v5216_v15, %v14530_v41 }
 0x50d   : > { %18981 = vst [vmem:[#allocation136_spill] sm:$0xff] %v14550_v54  ;;  %9437 = vmatmul.mubr.msk.bf16.gmra.mrb[156].mxu1 %vm4446_vm1, %v13682_v23 }
 0x50e   : > { %18983 = vst [vmem:[#allocation138_spill] sm:$0xff] %v14561_v14  ;;  %v4787_v50 = vpop.f32.mrb[148].mxu0  ;;  %5521 = vmatprep.mubr.bf16.mxu1 %v18871_v16 }
 0x50f   : > { %v4789_v29 = vpop.f32.mrb[149].mxu0  ;;  %v14577_v15 = vmul.f32 %v4787_v50, %v14227_v21 }
 0x510   : > { %v5220_v20 = vpop.f32.mrb[52].mxu1  ;;  %v4791_v25 = vpop.f32.mrb[150].mxu0  ;;  %v14583_v2 = vmul.f32 %v4789_v29, %v14227_v21 }
 0x511   : > { %18984 = vst [vmem:[#allocation139_spill] sm:$0xff] %v14577_v15  ;;  %v5222_v63 = vpop.f32.mrb[53].mxu1  ;;  %v14580_v60 = vmul.f32 %v4791_v25, %v14230_v28  ;;  %v4793_v54 = vpop.f32.mrb[151].mxu0  ;;  %v14589_v0 = vmul.f32 %v5220_v20, %v14571_v32 }
 0x512   : > { %18986 = vst [vmem:[#allocation141_spill] sm:$0xff] %v14583_v2  ;;  %v5224_v36 = vpop.f32.mrb[54].mxu1  ;;  %v14586_v51 = vmul.f32 %v4793_v54, %v14230_v28  ;;  %v14602_v21 = vmul.f32 %v5222_v63, %v14571_v32  ;;  %v14615_v28 = vld [vmem:[%s13820_s14 + $0x1e0] sm:$0xff] }
 0x513   : > { %18985 = vst [vmem:[#allocation140_spill] sm:$0xff] %v14580_v60  ;;  %18988 = vst [vmem:[#allocation143_spill] sm:$0xff] %v14589_v0  ;;  %v14594_v14 = vmul.f32 %v5224_v36, %v14574_v19  ;;  %v5226_v25 = vpop.f32.mrb[55].mxu1  ;;  %9446 = vmatmul.mubr.msk.bf16.vlgmr.msra.gmra.mrb[0].mxu0 %vm4446_vm1, %v13370_v48  ;;  %v14618_v60 = vld [vmem:[%s13820_s14 + $0x1e8] sm:$0xff] }
 0x514   : > { %18987 = vst [vmem:[#allocation142_spill] sm:$0xff] %v14586_v51  ;;  %5644 = vmatprep.mubr.bf16.mxu0 %v18871_v16  ;;  %18990 = vst [vmem:[#allocation145_spill] sm:$0xff] %v14602_v21  ;;  %v14605_v54 = vmul.f32 %v5226_v25, %v14574_v19 }
 0x515   : > { %18989 = vst [vmem:[#allocation144_spill] sm:$0xff] %v14594_v14  ;;  %9438 = vmatmul.mubr.msk.bf16.gmra.mrb[160].mxu1 %vm4446_vm1, %v13693_v55 }
 0x516   : > { %18991 = vst [vmem:[#allocation146_spill] sm:$0xff] %v14605_v54  ;;  %v4797_v29 = vpop.f32.mrb[152].mxu0  ;;  %5531 = vmatprep.mubr.bf16.mxu1 %v18871_v16 }
 0x517   : > { %v4799_v50 = vpop.f32.mrb[153].mxu0  ;;  %v14621_v25 = vmul.f32 %v4797_v29, %v14269_v43 }
 0x518   : > { %v5230_v63 = vpop.f32.mrb[56].mxu1  ;;  %v4801_v15 = vpop.f32.mrb[154].mxu0  ;;  %v14627_v2 = vmul.f32 %v4799_v50, %v14269_v43 }
 0x519   : > { %18992 = vst [vmem:[#allocation147_spill] sm:$0xff] %v14621_v25  ;;  %v5232_v36 = vpop.f32.mrb[57].mxu1  ;;  %v14624_v0 = vmul.f32 %v4801_v15, %v14272_v42  ;;  %v4803_v14 = vpop.f32.mrb[155].mxu0  ;;  %v14633_v21 = vmul.f32 %v5230_v63, %v14615_v28 }
 0x51a   : > { %18994 = vst [vmem:[#allocation149_spill] sm:$0xff] %v14627_v2  ;;  %v5234_v51 = vpop.f32.mrb[58].mxu1  ;;  %v14630_v20 = vmul.f32 %v4803_v14, %v14272_v42  ;;  %v14646_v43 = vmul.f32 %v5232_v36, %v14615_v28  ;;  %v14659_v42 = vld [vmem:[%s13820_s14 + $0x1f0] sm:$0xff] }
 0x51b   : > { %18993 = vst [vmem:[#allocation148_spill] sm:$0xff] %v14624_v0  ;;  %18996 = vst [vmem:[#allocation151_spill] sm:$0xff] %v14633_v21  ;;  %v14638_v54 = vmul.f32 %v5234_v51, %v14618_v60  ;;  %v5236_v15 = vpop.f32.mrb[59].mxu1  ;;  %9447 = vmatmul.mubr.msk.bf16.gmra.mrb[4].mxu0 %vm4446_vm1, %v13384_v38  ;;  %v14662_v0 = vld [vmem:[%s13820_s14 + $0x1f8] sm:$0xff] }
 0x51c   : > { %18995 = vst [vmem:[#allocation150_spill] sm:$0xff] %v14630_v20  ;;  %5654 = vmatprep.mubr.bf16.mxu0 %v18871_v16  ;;  %18998 = vst [vmem:[#allocation153_spill] sm:$0xff] %v14646_v43  ;;  %v14649_v14 = vmul.f32 %v5236_v15, %v14618_v60 }
 0x51d   : > { %18997 = vst [vmem:[#allocation152_spill] sm:$0xff] %v14638_v54  ;;  %9439 = vmatmul.mubr.msk.bf16.gmra.mrb[164].mxu1 %vm4446_vm1, %v13702_v22 }
 0x51e   : > { %18999 = vst [vmem:[#allocation154_spill] sm:$0xff] %v14649_v14  ;;  %v4807_v50 = vpop.f32.mrb[156].mxu0  ;;  %5541 = vmatprep.mubr.bf16.mxu1 %v18871_v16 }
 0x51f   : > { %v4809_v29 = vpop.f32.mrb[157].mxu0  ;;  %v14665_v15 = vmul.f32 %v4807_v50, %v14311_v13 }
 0x520   : > { %v5240_v36 = vpop.f32.mrb[60].mxu1  ;;  %v4811_v25 = vpop.f32.mrb[158].mxu0  ;;  %v14671_v2 = vmul.f32 %v4809_v29, %v14311_v13 }
 0x521   : > { %19000 = vst [vmem:[#allocation155_spill] sm:$0xff] %v14665_v15  ;;  %v5242_v51 = vpop.f32.mrb[61].mxu1  ;;  %v14668_v21 = vmul.f32 %v4811_v25, %v14314_v49  ;;  %v4813_v54 = vpop.f32.mrb[159].mxu0  ;;  %v14677_v43 = vmul.f32 %v5240_v36, %v14659_v42 }
 0x522   : > { %19002 = vst [vmem:[#allocation157_spill] sm:$0xff] %v14671_v2  ;;  %v5244_v20 = vpop.f32.mrb[62].mxu1  ;;  %v14674_v63 = vmul.f32 %v4813_v54, %v14314_v49  ;;  %v14690_v49 = vmul.f32 %v5242_v51, %v14659_v42  ;;  %v14715_v2 = vld [vmem:[%s13820_s14] sm:$0xff] }
 0x523   : > { %19001 = vst [vmem:[#allocation156_spill] sm:$0xff] %v14668_v21  ;;  %19003 = vst [vmem:[#allocation158_spill] sm:$0xff] %v14677_v43  ;;  %v14682_v50 = vmul.f32 %v5244_v20, %v14662_v0  ;;  %v5246_v33 = vpop.f32.mrb[63].mxu1  ;;  %9448 = vmatmul.mubr.msk.bf16.gmra.mrb[8].mxu0 %vm4446_vm1, %v13396_v18 }
 0x524   : > { %5664 = vmatprep.mubr.bf16.mxu0 %v18871_v16  ;;  %19005 = vst [vmem:[#allocation160_spill] sm:$0xff] %v14690_v49  ;;  %v14693_v54 = vmul.f32 %v5246_v33, %v14662_v0  ;;  %v14723_v49 = vld [vmem:[%s13820_s14 + $0x8] sm:$0xff] }
 0x525   : > { %19004 = vst [vmem:[#allocation159_spill] sm:$0xff] %v14682_v50  ;;  %9440 = vmatmul.mubr.msk.bf16.gmra.mrb[168].mxu1 %vm4446_vm1, %v13709_v34 }
 0x526   : > { %19006 = vst [vmem:[#allocation161_spill] sm:$0xff] %v14693_v54  ;;  %v4817_v25 = vpop.f32.mrb[160].mxu0  ;;  %5551 = vmatprep.mubr.bf16.mxu1 %v18871_v16 }
 0x527   : > { %v4819_v36 = vpop.f32.mrb[161].mxu0  ;;  %v14703_v33 = vmul.f32 %v4817_v25, %v14351_v9 }
 0x528   : > { %v5283_v51 = vpop.f32.mrb[64].mxu1  ;;  %v4821_v14 = vpop.f32.mrb[162].mxu0  ;;  %v14709_v43 = vmul.f32 %v4819_v36, %v14351_v9 }
 0x529   : > { %19007 = vst [vmem:[#allocation162_spill] sm:$0xff] %v14703_v33  ;;  %v5285_v13 = vpop.f32.mrb[65].mxu1  ;;  %v14706_v15 = vmul.f32 %v4821_v14, %v14354_v26  ;;  %v4823_v20 = vpop.f32.mrb[163].mxu0  ;;  %v14718_v29 = vmul.f32 %v14715_v2, %v5283_v51 }
 0x52a   : > { %19009 = vst [vmem:[#allocation164_spill] sm:$0xff] %v14709_v43  ;;  %v5287_v50 = vpop.f32.mrb[66].mxu1  ;;  %v14712_v21 = vmul.f32 %v4823_v20, %v14354_v26  ;;  %v14734_v9 = vmul.f32 %v14715_v2, %v5285_v13 }
 0x52b   : > { %19008 = vst [vmem:[#allocation163_spill] sm:$0xff] %v14706_v15  ;;  %19011 = vst [vmem:[#allocation166_spill] sm:$0xff] %v14718_v29  ;;  %v14726_v14 = vmul.f32 %v14723_v49, %v5287_v50  ;;  %v5289_v54 = vpop.f32.mrb[67].mxu1  ;;  %9449 = vmatmul.mubr.msk.bf16.gmra.mrb[12].mxu0 %vm4446_vm1, %v13413_v52 }
 0x52c   : > { %19010 = vst [vmem:[#allocation165_spill] sm:$0xff] %v14712_v21  ;;  %5674 = vmatprep.mubr.bf16.mxu0 %v18871_v16  ;;  %19013 = vst [vmem:[#allocation168_spill] sm:$0xff] %v14734_v9  ;;  %v14737_v20 = vmul.f32 %v14723_v49, %v5289_v54  ;;  %v14759_v21 = vld [vmem:[%s13820_s14 + $0x10] sm:$0xff]  ;;  %v14767_v9 = vld [vmem:[%s13820_s14 + $0x18] sm:$0xff] }
 0x52d   : > { %19012 = vst [vmem:[#allocation167_spill] sm:$0xff] %v14726_v14  ;;  %9441 = vmatmul.mubr.msk.bf16.gmra.mrb[172].mxu1 %vm4446_vm1, %v13717_v1 }
 0x52e   : > { %19014 = vst [vmem:[#allocation169_spill] sm:$0xff] %v14737_v20  ;;  %v4827_v36 = vpop.f32.mrb[164].mxu0  ;;  %5561 = vmatprep.mubr.bf16.mxu1 %v18871_v16 }
 0x52f   : > { %v4829_v25 = vpop.f32.mrb[165].mxu0  ;;  %v14747_v54 = vmul.f32 %v4827_v36, %v14395_v30 }
 0x530   : > { %v5293_v13 = vpop.f32.mrb[68].mxu1  ;;  %v4831_v26 = vpop.f32.mrb[166].mxu0  ;;  %v14753_v29 = vmul.f32 %v4829_v25, %v14395_v30 }
 0x531   : > { %19015 = vst [vmem:[#allocation170_spill] sm:$0xff] %v14747_v54  ;;  %v5295_v33 = vpop.f32.mrb[69].mxu1  ;;  %v14750_v15 = vmul.f32 %v4831_v26, %v14398_v47  ;;  %v4833_v50 = vpop.f32.mrb[167].mxu0  ;;  %v14762_v51 = vmul.f32 %v14759_v21, %v5293_v13 }
 0x532   : > { %19017 = vst [vmem:[#allocation172_spill] sm:$0xff] %v14753_v29  ;;  %v5297_v14 = vpop.f32.mrb[70].mxu1  ;;  %v14756_v43 = vmul.f32 %v4833_v50, %v14398_v47  ;;  %v14778_v30 = vmul.f32 %v14759_v21, %v5295_v33 }
 0x533   : > { %19016 = vst [vmem:[#allocation171_spill] sm:$0xff] %v14750_v15  ;;  %19019 = vst [vmem:[#allocation174_spill] sm:$0xff] %v14762_v51  ;;  %v14770_v26 = vmul.f32 %v14767_v9, %v5297_v14  ;;  %v5299_v20 = vpop.f32.mrb[71].mxu1  ;;  %9450 = vmatmul.mubr.msk.bf16.gmra.mrb[16].mxu0 %vm4446_vm1, %v13424_v8 }
 0x534   : > { %19018 = vst [vmem:[#allocation173_spill] sm:$0xff] %v14756_v43  ;;  %5684 = vmatprep.mubr.bf16.mxu0 %v18871_v16  ;;  %19021 = vst [vmem:[#allocation176_spill] sm:$0xff] %v14778_v30  ;;  %v14781_v25 = vmul.f32 %v14767_v9, %v5299_v20  ;;  %v14803_v43 = vld [vmem:[%s13820_s14 + $0x20] sm:$0xff]  ;;  %v14811_v30 = vld [vmem:[%s13820_s14 + $0x28] sm:$0xff] }
 0x535   : > { %19020 = vst [vmem:[#allocation175_spill] sm:$0xff] %v14770_v26  ;;  %9442 = vmatmul.mubr.msk.bf16.gmra.mrb[176].mxu1 %vm4446_vm1, %v13723_v35 }
 0x536   : > { %19022 = vst [vmem:[#allocation177_spill] sm:$0xff] %v14781_v25  ;;  %v4837_v50 = vpop.f32.mrb[168].mxu0  ;;  %5571 = vmatprep.mubr.bf16.mxu1 %v18871_v16 }
 0x537   : > { %v4839_v36 = vpop.f32.mrb[169].mxu0  ;;  %v14791_v20 = vmul.f32 %v4837_v50, %v14439_v6 }
 0x538   : > { %v5303_v33 = vpop.f32.mrb[72].mxu1  ;;  %v4841_v47 = vpop.f32.mrb[170].mxu0  ;;  %v14797_v51 = vmul.f32 %v4839_v36, %v14439_v6 }
 0x539   : > { %19023 = vst [vmem:[#allocation178_spill] sm:$0xff] %v14791_v20  ;;  %v5305_v54 = vpop.f32.mrb[73].mxu1  ;;  %v14794_v15 = vmul.f32 %v4841_v47, %v14442_v53  ;;  %v4843_v14 = vpop.f32.mrb[171].mxu0  ;;  %v14806_v13 = vmul.f32 %v14803_v43, %v5303_v33 }
 0x53a   : > { %19025 = vst [vmem:[#allocation180_spill] sm:$0xff] %v14797_v51  ;;  %v5307_v26 = vpop.f32.mrb[74].mxu1  ;;  %v14800_v29 = vmul.f32 %v4843_v14, %v14442_v53  ;;  %v14822_v6 = vmul.f32 %v14803_v43, %v5305_v54 }
 0x53b   : > { %19024 = vst [vmem:[#allocation179_spill] sm:$0xff] %v14794_v15  ;;  %19027 = vst [vmem:[#allocation182_spill] sm:$0xff] %v14806_v13  ;;  %v14814_v47 = vmul.f32 %v14811_v30, %v5307_v26  ;;  %v5309_v25 = vpop.f32.mrb[75].mxu1  ;;  %9451 = vmatmul.mubr.msk.bf16.gmra.mrb[20].mxu0 %vm4446_vm1, %v13438_v10 }
 0x53c   : > { %19026 = vst [vmem:[#allocation181_spill] sm:$0xff] %v14800_v29  ;;  %5694 = vmatprep.mubr.bf16.mxu0 %v18871_v16  ;;  %19029 = vst [vmem:[#allocation184_spill] sm:$0xff] %v14822_v6  ;;  %v14825_v36 = vmul.f32 %v14811_v30, %v5309_v25  ;;  %v14847_v29 = vld [vmem:[%s13820_s14 + $0x30] sm:$0xff]  ;;  %v14855_v6 = vld [vmem:[%s13820_s14 + $0x38] sm:$0xff] }
 0x53d   : > { %19028 = vst [vmem:[#allocation183_spill] sm:$0xff] %v14814_v47  ;;  %9443 = vmatmul.mubr.msk.bf16.gmra.mrb[180].mxu1 %vm4446_vm1, %v13731_v31 }
 0x53e   : > { %19030 = vst [vmem:[#allocation185_spill] sm:$0xff] %v14825_v36  ;;  %v4847_v14 = vpop.f32.mrb[172].mxu0  ;;  %5581 = vmatprep.mubr.bf16.mxu1 %v18871_v16 }
 0x53f   : > { %v4849_v50 = vpop.f32.mrb[173].mxu0  ;;  %v14835_v25 = vmul.f32 %v4847_v14, %v14483_v61 }
 0x540   : > { %v5313_v54 = vpop.f32.mrb[76].mxu1  ;;  %v4851_v53 = vpop.f32.mrb[174].mxu0  ;;  %v14841_v13 = vmul.f32 %v4849_v50, %v14483_v61 }
 0x541   : > { %19031 = vst [vmem:[#allocation186_spill] sm:$0xff] %v14835_v25  ;;  %v5315_v20 = vpop.f32.mrb[77].mxu1  ;;  %v14838_v15 = vmul.f32 %v4851_v53, %v14486_v57  ;;  %v4853_v26 = vpop.f32.mrb[175].mxu0  ;;  %v14850_v33 = vmul.f32 %v14847_v29, %v5313_v54 }
 0x542   : > { %19033 = vst [vmem:[#allocation188_spill] sm:$0xff] %v14841_v13  ;;  %v5317_v47 = vpop.f32.mrb[78].mxu1  ;;  %v14844_v51 = vmul.f32 %v4853_v26, %v14486_v57  ;;  %v14866_v61 = vmul.f32 %v14847_v29, %v5315_v20 }
 0x543   : > { %19032 = vst [vmem:[#allocation187_spill] sm:$0xff] %v14838_v15  ;;  %19035 = vst [vmem:[#allocation190_spill] sm:$0xff] %v14850_v33  ;;  %v14858_v53 = vmul.f32 %v14855_v6, %v5317_v47  ;;  %v5319_v36 = vpop.f32.mrb[79].mxu1  ;;  %9452 = vmatmul.mubr.msk.bf16.gmra.mrb[24].mxu0 %vm4446_vm1, %v13446_v27 }
 0x544   : > { %19034 = vst [vmem:[#allocation189_spill] sm:$0xff] %v14844_v51  ;;  %5704 = vmatprep.mubr.bf16.mxu0 %v18871_v16  ;;  %19037 = vst [vmem:[#allocation192_spill] sm:$0xff] %v14866_v61  ;;  %v14869_v50 = vmul.f32 %v14855_v6, %v5319_v36  ;;  %v14891_v51 = vld [vmem:[%s13820_s14 + $0x40] sm:$0xff]  ;;  %v14899_v61 = vld [vmem:[%s13820_s14 + $0x48] sm:$0xff] }
 0x545   : > { %19036 = vst [vmem:[#allocation191_spill] sm:$0xff] %v14858_v53  ;;  %9444 = vmatmul.mubr.msk.bf16.gmra.mrb[184].mxu1 %vm4446_vm1, %v13735_v12 }
 0x546   : > { %19038 = vst [vmem:[#allocation193_spill] sm:$0xff] %v14869_v50  ;;  %v4857_v26 = vpop.f32.mrb[176].mxu0  ;;  %5591 = vmatprep.mubr.bf16.mxu1 %v18871_v16 }
 0x547   : > { %v4859_v14 = vpop.f32.mrb[177].mxu0  ;;  %v14879_v36 = vmul.f32 %v4857_v26, %v14527_v58 }
 0x548   : > { %v5323_v20 = vpop.f32.mrb[80].mxu1  ;;  %v4861_v57 = vpop.f32.mrb[178].mxu0  ;;  %v14885_v33 = vmul.f32 %v4859_v14, %v14527_v58 }
 0x549   : > { %19039 = vst [vmem:[#allocation194_spill] sm:$0xff] %v14879_v36  ;;  %v5325_v25 = vpop.f32.mrb[81].mxu1  ;;  %v14882_v15 = vmul.f32 %v4861_v57, %v14530_v41  ;;  %v4863_v47 = vpop.f32.mrb[179].mxu0  ;;  %v14894_v54 = vmul.f32 %v14891_v51, %v5323_v20  ;;  %v11610_v20 = vld [vmem:[%s17735_s4] sm:$0xff]  }
 0x54a   : > { %v5327_v53 = vpop.f32.mrb[82].mxu1  ;;  %v14888_v13 = vmul.f32 %v4863_v47, %v14530_v41  ;;  %v14910_v58 = vmul.f32 %v14891_v51, %v5325_v25 }
 0x54b   : > { %19040 = vst [vmem:[#allocation195_spill] sm:$0xff] %v14882_v15  ;;  %19041 = vst [vmem:[#allocation196_spill] sm:$0xff] %v14894_v54  ;;  %v14902_v57 = vmul.f32 %v14899_v61, %v5327_v53  ;;  %v5329_v50 = vpop.f32.mrb[83].mxu1  ;;  %9453 = vmatmul.mubr.msk.bf16.gmra.mrb[28].mxu0 %vm4446_vm1, %v13460_v45 }
 0x54c   : > { %5714 = vmatprep.mubr.bf16.mxu0 %v18871_v16  ;;  %19043 = vst [vmem:[#allocation198_spill] sm:$0xff] %v14910_v58  ;;  %v14913_v14 = vmul.f32 %v14899_v61, %v5329_v50  ;;  %v14939_v58 = vld [vmem:[%s13820_s14 + $0x50] sm:$0xff] }
 0x54d   : > { %19042 = vst [vmem:[#allocation197_spill] sm:$0xff] %v14902_v57  ;;  %9445 = vmatmul.mubr.msk.bf16.gmra.mrb[188].mxu1 %vm4446_vm1, %v13745_v56 }
 0x54e   : > { %19044 = vst [vmem:[#allocation199_spill] sm:$0xff] %v14913_v14  ;;  %10682 = vmatprep.mubr.msk.bf16.mxu1 %vm4446_vm1, %v13370_v48  ;;  %v4867_v53 = vpop.f32.mrb[180].mxu0  ;;  %v14947_v14 = vld [vmem:[%s13820_s14 + $0x58] sm:$0xff] }
 0x54f   : > { %v4869_v25 = vpop.f32.mrb[181].mxu0  ;;  %v14924_v50 = vmul.f32 %v4867_v53, %v14571_v32 }
 0x550   : > { %v5333_v26 = vpop.f32.mrb[84].mxu1  ;;  %v4871_v41 = vpop.f32.mrb[182].mxu0  ;;  %v14930_v57 = vmul.f32 %v4869_v25, %v14571_v32 }
 0x551   : > { %19045 = vst [vmem:[#allocation200_spill] sm:$0xff] %v14924_v50  ;;  %v5335_v36 = vpop.f32.mrb[85].mxu1  ;;  %v14927_v47 = vmul.f32 %v4871_v41, %v14574_v19  ;;  %v4873_v54 = vpop.f32.mrb[183].mxu0  ;;  %v14942_v53 = vmul.f32 %v14939_v58, %v5333_v26 }
 0x552   : > { %19047 = vst [vmem:[#allocation202_spill] sm:$0xff] %v14930_v57  ;;  %v5337_v48 = vpop.f32.mrb[86].mxu1  ;;  %v14933_v15 = vmul.f32 %v4873_v54, %v14574_v19  ;;  %v14958_v54 = vmul.f32 %v14939_v58, %v5335_v36  ;;  %v11611_v36 = vld [vmem:[%s17735_s4 + $0x8] sm:$0xff]  }
 0x553   : > { %19046 = vst [vmem:[#allocation201_spill] sm:$0xff] %v14927_v47  ;;  %19048 = vst [vmem:[#allocation203_spill] sm:$0xff] %v14942_v53  ;;  %v14950_v32 = vmul.f32 %v14947_v14, %v5337_v48  ;;  %v5339_v25 = vpop.f32.mrb[87].mxu1  ;;  %9454 = vmatmul.mubr.msk.bf16.gmra.mrb[32].mxu0 %vm4446_vm1, %v13470_v7  ;;  %v14999_v57 = vld [vmem:[%s13820_s14 + $0x68] sm:$0xff] }
 0x554   : > { %5724 = vmatprep.mubr.bf16.mxu0 %v18871_v16  ;;  %19050 = vst [vmem:[#allocation205_spill] sm:$0xff] %v14958_v54  ;;  %v14961_v26 = vmul.f32 %v14947_v14, %v5339_v25  ;;  %v11612_v54 = vld [vmem:[%s17735_s4 + $0x10] sm:$0xff]  }
 0x555   : > { %19049 = vst [vmem:[#allocation204_spill] sm:$0xff] %v14950_v32  ;;  %10683 = vmatmul.mubr.msk.bf16.vlgmr.msra.gmra.mrb[192].mxu1 %vm4446_vm1, %v13384_v38 }
 0x556   : > { %19051 = vst [vmem:[#allocation206_spill] sm:$0xff] %v14961_v26  ;;  %7662 = vmatpush1.bf16.msra.mxu1 %v11610_v20  ;;  %10686 = vmatprep.mubr.msk.bf16.mxu1 %vm4446_vm1, %v13396_v18  ;;  %v4877_v48 = vpop.f32.mrb[184].mxu0  ;;  %v14991_v26 = vld [vmem:[%s13820_s14 + $0x60] sm:$0xff] }
 0x557   : > { %v4879_v19 = vpop.f32.mrb[185].mxu0  ;;  %7663 = vmatprep.subr.bf16.mxu1 %v18871_v16  ;;  %v14976_v38 = vmul.f32 %v4877_v48, %v14615_v28 }
 0x558   : > { %v5343_v41 = vpop.f32.mrb[88].mxu1  ;;  %v4881_v53 = vpop.f32.mrb[186].mxu0  ;;  %v14982_v50 = vmul.f32 %v4879_v19, %v14615_v28 }
 0x559   : > { %19052 = vst [vmem:[#allocation207_spill] sm:$0xff] %v14976_v38  ;;  %v5345_v20 = vpop.f32.mrb[89].mxu1  ;;  %v14979_v18 = vmul.f32 %v4881_v53, %v14618_v60  ;;  %v4883_v32 = vpop.f32.mrb[187].mxu0  ;;  %v14994_v48 = vmul.f32 %v14991_v26, %v5343_v41 }
 0x55a   : > { %v5347_v47 = vpop.f32.mrb[90].mxu1  ;;  %v14985_v25 = vmul.f32 %v4883_v32, %v14618_v60  ;;  %7664 = vmatpush1.bf16.msra.mxu1 %v11611_v36  ;;  %v15011_v32 = vmul.f32 %v14991_v26, %v5345_v20  ;;  %v11613_v20 = vld [vmem:[%s17735_s4 + $0x18] sm:$0xff]  }
 0x55b   : > { %19053 = vst [vmem:[#allocation208_spill] sm:$0xff] %v14979_v18  ;;  %19054 = vst [vmem:[#allocation209_spill] sm:$0xff] %v14994_v48  ;;  %v15002_v28 = vmul.f32 %v14999_v57, %v5347_v47  ;;  %v5349_v60 = vpop.f32.mrb[91].mxu1  ;;  %9455 = vmatmul.mubr.msk.bf16.gmra.mrb[36].mxu0 %vm4446_vm1, %v13486_v59  ;;  %7665 = vmatprep.subr.bf16.mxu1 %v18871_v16  ;;  %v15052_v18 = vld [vmem:[%s13820_s14 + $0x78] sm:$0xff] }
 0x55c   : > { %5734 = vmatprep.mubr.bf16.mxu0 %v18871_v16  ;;  %19056 = vst [vmem:[#allocation211_spill] sm:$0xff] %v15011_v32  ;;  %v15014_v19 = vmul.f32 %v14999_v57, %v5349_v60  ;;  %v11614_v32 = vld [vmem:[%s17735_s4 + $0x20] sm:$0xff]  }
 0x55d   : > { %19055 = vst [vmem:[#allocation210_spill] sm:$0xff] %v15002_v28  ;;  %10687 = vmatmul.mubr.msk.bf16.gmra.mrb[196].mxu1 %vm4446_vm1, %v13413_v52 }
 0x55e   : > { %19057 = vst [vmem:[#allocation212_spill] sm:$0xff] %v15014_v19  ;;  %10690 = vmatprep.mubr.msk.bf16.mxu1 %vm4446_vm1, %v13424_v8  ;;  %v4887_v36 = vpop.f32.mrb[188].mxu0  ;;  %7666 = vmatpush1.bf16.msra.mxu1 %v11612_v54  ;;  %v15044_v19 = vld [vmem:[%s13820_s14 + $0x70] sm:$0xff] }
 0x55f   : > { %v4889_v53 = vpop.f32.mrb[189].mxu0  ;;  %7667 = vmatprep.subr.bf16.mxu1 %v18871_v16  ;;  %v15029_v52 = vmul.f32 %v4887_v36, %v14659_v42 }
 0x560   : > { %v5353_v47 = vpop.f32.mrb[92].mxu1  ;;  %v4891_v41 = vpop.f32.mrb[190].mxu0  ;;  %v15035_v28 = vmul.f32 %v4889_v53, %v14659_v42 }
 0x561   : > { %19058 = vst [vmem:[#allocation213_spill] sm:$0xff] %v15029_v52  ;;  %v5355_v8 = vpop.f32.mrb[93].mxu1  ;;  %v15032_v54 = vmul.f32 %v4891_v41, %v14662_v0  ;;  %v4893_v48 = vpop.f32.mrb[191].mxu0  ;;  %v15047_v36 = vmul.f32 %v15044_v19, %v5353_v47 }
 0x562   : > { %v5357_v38 = vpop.f32.mrb[94].mxu1  ;;  %v15038_v60 = vmul.f32 %v4893_v48, %v14662_v0  ;;  %7668 = vmatpush1.bf16.msra.mxu1 %v11613_v20  ;;  %v15064_v53 = vmul.f32 %v15044_v19, %v5355_v8  ;;  %v11615_v8 = vld [vmem:[%s17735_s4 + $0x28] sm:$0xff]  }
 0x563   : > { %19059 = vst [vmem:[#allocation214_spill] sm:$0xff] %v15032_v54  ;;  %19060 = vst [vmem:[#allocation215_spill] sm:$0xff] %v15047_v36  ;;  %v15055_v42 = vmul.f32 %v15052_v18, %v5357_v38  ;;  %v5359_v0 = vpop.f32.mrb[95].mxu1  ;;  %9456 = vmatmul.mubr.msk.bf16.gmra.mrb[40].mxu0 %vm4446_vm1, %v13493_v62  ;;  %7669 = vmatprep.subr.bf16.mxu1 %v18871_v16  ;;  %v15105_v54 = vld [vmem:[%s13820_s14 + $0x88] sm:$0xff] }
 0x564   : > { %5744 = vmatprep.mubr.bf16.mxu0 %v18871_v16  ;;  %19062 = vst [vmem:[#allocation217_spill] sm:$0xff] %v15064_v53  ;;  %v15067_v47 = vmul.f32 %v15052_v18, %v5359_v0  ;;  %v11616_v53 = vld [vmem:[%s17735_s4 + $0x30] sm:$0xff]  }
 0x565   : > { %19061 = vst [vmem:[#allocation216_spill] sm:$0xff] %v15055_v42  ;;  %10691 = vmatmul.mubr.msk.bf16.gmra.mrb[200].mxu1 %vm4446_vm1, %v13438_v10 }
 0x566   : > { %19063 = vst [vmem:[#allocation218_spill] sm:$0xff] %v15067_v47  ;;  %10694 = vmatprep.mubr.msk.bf16.mxu1 %vm4446_vm1, %v13446_v27  ;;  %v4930_v20 = vpop.f32.mrb[192].mxu0  ;;  %7670 = vmatpush1.bf16.msra.mxu1 %v11614_v32  ;;  %v15097_v47 = vld [vmem:[%s13820_s14 + $0x80] sm:$0xff] }
 0x567   : > { %v4932_v41 = vpop.f32.mrb[193].mxu0  ;;  %7671 = vmatprep.subr.bf16.mxu1 %v18871_v16  ;;  %v15082_v10 = vmul.f32 %v14715_v2, %v4930_v20 }
 0x568   : > { %v5363_v38 = vpop.f32.mrb[96].mxu1  ;;  %v4934_v48 = vpop.f32.mrb[194].mxu0  ;;  %v15088_v42 = vmul.f32 %v14715_v2, %v4932_v41 }
 0x569   : > { %19064 = vst [vmem:[#allocation219_spill] sm:$0xff] %v15082_v10  ;;  %v5365_v27 = vpop.f32.mrb[97].mxu1  ;;  %v15085_v32 = vmul.f32 %v14723_v49, %v4934_v48  ;;  %v4936_v36 = vpop.f32.mrb[195].mxu0  ;;  %v15100_v20 = vmul.f32 %v15097_v47, %v5363_v38 }
 0x56a   : > { %v5367_v52 = vpop.f32.mrb[98].mxu1  ;;  %v15091_v0 = vmul.f32 %v14723_v49, %v4936_v36  ;;  %7672 = vmatpush1.bf16.msra.mxu1 %v11615_v8  ;;  %v15117_v41 = vmul.f32 %v15097_v47, %v5365_v27  ;;  %v11617_v27 = vld [vmem:[%s17735_s4 + $0x38] sm:$0xff]  }
 0x56b   : > { %19065 = vst [vmem:[#allocation220_spill] sm:$0xff] %v15085_v32  ;;  %19066 = vst [vmem:[#allocation221_spill] sm:$0xff] %v15100_v20  ;;  %v15108_v2 = vmul.f32 %v15105_v54, %v5367_v52  ;;  %v5369_v49 = vpop.f32.mrb[99].mxu1  ;;  %9457 = vmatmul.mubr.msk.bf16.gmra.mrb[44].mxu0 %vm4446_vm1, %v13506_v24  ;;  %7673 = vmatprep.subr.bf16.mxu1 %v18871_v16  ;;  %v15158_v32 = vld [vmem:[%s13820_s14 + $0x98] sm:$0xff] }
 0x56c   : > { %5754 = vmatprep.mubr.bf16.mxu0 %v18871_v16  ;;  %19068 = vst [vmem:[#allocation223_spill] sm:$0xff] %v15117_v41  ;;  %v15120_v38 = vmul.f32 %v15105_v54, %v5369_v49  ;;  %v11618_v41 = vld [vmem:[%s17735_s4 + $0x40] sm:$0xff]  }
 0x56d   : > { %19067 = vst [vmem:[#allocation222_spill] sm:$0xff] %v15108_v2  ;;  %10695 = vmatmul.mubr.msk.bf16.gmra.mrb[204].mxu1 %vm4446_vm1, %v13460_v45 }
 0x56e   : > { %19069 = vst [vmem:[#allocation224_spill] sm:$0xff] %v15120_v38  ;;  %10698 = vmatprep.mubr.msk.bf16.mxu1 %vm4446_vm1, %v13470_v7  ;;  %v4940_v8 = vpop.f32.mrb[196].mxu0  ;;  %7674 = vmatpush1.bf16.msra.mxu1 %v11616_v53  ;;  %v15150_v38 = vld [vmem:[%s13820_s14 + $0x90] sm:$0xff] }
 0x56f   : > { %v4942_v48 = vpop.f32.mrb[197].mxu0  ;;  %7675 = vmatprep.subr.bf16.mxu1 %v18871_v16  ;;  %v15135_v45 = vmul.f32 %v14759_v21, %v4940_v8 }
 0x570   : > { %v5373_v52 = vpop.f32.mrb[100].mxu1  ;;  %v4944_v36 = vpop.f32.mrb[198].mxu0  ;;  %v15141_v2 = vmul.f32 %v14759_v21, %v4942_v48 }
 0x571   : > { %19070 = vst [vmem:[#allocation225_spill] sm:$0xff] %v15135_v45  ;;  %v5375_v7 = vpop.f32.mrb[101].mxu1  ;;  %v15138_v53 = vmul.f32 %v14767_v9, %v4944_v36  ;;  %v4946_v20 = vpop.f32.mrb[199].mxu0  ;;  %v15153_v8 = vmul.f32 %v15150_v38, %v5373_v52 }
 0x572   : > { %v5377_v10 = vpop.f32.mrb[102].mxu1  ;;  %v15144_v49 = vmul.f32 %v14767_v9, %v4946_v20  ;;  %7676 = vmatpush1.bf16.msra.mxu1 %v11617_v27  ;;  %v15170_v48 = vmul.f32 %v15150_v38, %v5375_v7  ;;  %v11619_v7 = vld [vmem:[%s17735_s4 + $0x48] sm:$0xff]  }
 0x573   : > { %19071 = vst [vmem:[#allocation226_spill] sm:$0xff] %v15138_v53  ;;  %19072 = vst [vmem:[#allocation227_spill] sm:$0xff] %v15153_v8  ;;  %v15161_v21 = vmul.f32 %v15158_v32, %v5377_v10  ;;  %v5379_v9 = vpop.f32.mrb[103].mxu1  ;;  %9458 = vmatmul.mubr.msk.bf16.gmra.mrb[48].mxu0 %vm4446_vm1, %v13516_v46  ;;  %7677 = vmatprep.subr.bf16.mxu1 %v18871_v16  ;;  %v15211_v53 = vld [vmem:[%s13820_s14 + $0xa8] sm:$0xff] }
 0x574   : > { %5764 = vmatprep.mubr.bf16.mxu0 %v18871_v16  ;;  %19074 = vst [vmem:[#allocation229_spill] sm:$0xff] %v15170_v48  ;;  %v15173_v52 = vmul.f32 %v15158_v32, %v5379_v9  ;;  %v11620_v48 = vld [vmem:[%s17735_s4 + $0x50] sm:$0xff]  }
 0x575   : > { %19073 = vst [vmem:[#allocation228_spill] sm:$0xff] %v15161_v21  ;;  %10699 = vmatmul.mubr.msk.bf16.gmra.mrb[208].mxu1 %vm4446_vm1, %v13486_v59 }
 0x576   : > { %19075 = vst [vmem:[#allocation230_spill] sm:$0xff] %v15173_v52  ;;  %10702 = vmatprep.mubr.msk.bf16.mxu1 %vm4446_vm1, %v13493_v62  ;;  %v4950_v27 = vpop.f32.mrb[200].mxu0  ;;  %7678 = vmatpush1.bf16.msra.mxu1 %v11618_v41  ;;  %v15203_v52 = vld [vmem:[%s13820_s14 + $0xa0] sm:$0xff] }
 0x577   : > { %v4952_v36 = vpop.f32.mrb[201].mxu0  ;;  %7679 = vmatprep.subr.bf16.mxu1 %v18871_v16  ;;  %v15188_v59 = vmul.f32 %v14803_v43, %v4950_v27 }
 0x578   : > { %v5383_v10 = vpop.f32.mrb[104].mxu1  ;;  %v4954_v20 = vpop.f32.mrb[202].mxu0  ;;  %v15194_v21 = vmul.f32 %v14803_v43, %v4952_v36 }
 0x579   : > { %19076 = vst [vmem:[#allocation231_spill] sm:$0xff] %v15188_v59  ;;  %v5385_v62 = vpop.f32.mrb[105].mxu1  ;;  %v15191_v41 = vmul.f32 %v14811_v30, %v4954_v20  ;;  %v4956_v8 = vpop.f32.mrb[203].mxu0  ;;  %v15206_v27 = vmul.f32 %v15203_v52, %v5383_v10 }
 0x57a   : > { %v5387_v45 = vpop.f32.mrb[106].mxu1  ;;  %v15197_v9 = vmul.f32 %v14811_v30, %v4956_v8  ;;  %7680 = vmatpush1.bf16.msra.mxu1 %v11619_v7  ;;  %v15223_v36 = vmul.f32 %v15203_v52, %v5385_v62  ;;  %v11621_v62 = vld [vmem:[%s17735_s4 + $0x58] sm:$0xff]  }
 0x57b   : > { %19077 = vst [vmem:[#allocation232_spill] sm:$0xff] %v15191_v41  ;;  %19078 = vst [vmem:[#allocation233_spill] sm:$0xff] %v15206_v27  ;;  %v15214_v43 = vmul.f32 %v15211_v53, %v5387_v45  ;;  %v5389_v30 = vpop.f32.mrb[107].mxu1  ;;  %9459 = vmatmul.mubr.msk.bf16.gmra.mrb[52].mxu0 %vm4446_vm1, %v13532_v37  ;;  %7681 = vmatprep.subr.bf16.mxu1 %v18871_v16  ;;  %v15264_v41 = vld [vmem:[%s13820_s14 + $0xb8] sm:$0xff] }
 0x57c   : > { %5774 = vmatprep.mubr.bf16.mxu0 %v18871_v16  ;;  %19080 = vst [vmem:[#allocation235_spill] sm:$0xff] %v15223_v36  ;;  %v15226_v10 = vmul.f32 %v15211_v53, %v5389_v30  ;;  %v11622_v36 = vld [vmem:[%s17735_s4 + $0x60] sm:$0xff]  }
 0x57d   : > { %19079 = vst [vmem:[#allocation234_spill] sm:$0xff] %v15214_v43  ;;  %10703 = vmatmul.mubr.msk.bf16.gmra.mrb[212].mxu1 %vm4446_vm1, %v13506_v24 }
 0x57e   : > { %19081 = vst [vmem:[#allocation236_spill] sm:$0xff] %v15226_v10  ;;  %10706 = vmatprep.mubr.msk.bf16.mxu1 %vm4446_vm1, %v13516_v46  ;;  %v4960_v7 = vpop.f32.mrb[204].mxu0  ;;  %7682 = vmatpush1.bf16.msra.mxu1 %v11620_v48  ;;  %v15256_v10 = vld [vmem:[%s13820_s14 + $0xb0] sm:$0xff] }
 0x57f   : > { %v4962_v20 = vpop.f32.mrb[205].mxu0  ;;  %7683 = vmatprep.subr.bf16.mxu1 %v18871_v16  ;;  %v15241_v24 = vmul.f32 %v14847_v29, %v4960_v7 }
 0x580   : > { %v5393_v45 = vpop.f32.mrb[108].mxu1  ;;  %v4964_v8 = vpop.f32.mrb[206].mxu0  ;;  %v15247_v43 = vmul.f32 %v14847_v29, %v4962_v20 }
 0x581   : > { %19082 = vst [vmem:[#allocation237_spill] sm:$0xff] %v15241_v24  ;;  %v5395_v46 = vpop.f32.mrb[109].mxu1  ;;  %v15244_v48 = vmul.f32 %v14855_v6, %v4964_v8  ;;  %v4966_v27 = vpop.f32.mrb[207].mxu0  ;;  %v15259_v7 = vmul.f32 %v15256_v10, %v5393_v45 }
 0x582   : > { %v5397_v59 = vpop.f32.mrb[110].mxu1  ;;  %v15250_v30 = vmul.f32 %v14855_v6, %v4966_v27  ;;  %7684 = vmatpush1.bf16.msra.mxu1 %v11621_v62  ;;  %v15276_v20 = vmul.f32 %v15256_v10, %v5395_v46  ;;  %v11623_v46 = vld [vmem:[%s17735_s4 + $0x68] sm:$0xff]  }
 0x583   : > { %19083 = vst [vmem:[#allocation238_spill] sm:$0xff] %v15244_v48  ;;  %19084 = vst [vmem:[#allocation239_spill] sm:$0xff] %v15259_v7  ;;  %v15267_v29 = vmul.f32 %v15264_v41, %v5397_v59  ;;  %v5399_v6 = vpop.f32.mrb[111].mxu1  ;;  %9460 = vmatmul.mubr.msk.bf16.gmra.mrb[56].mxu0 %vm4446_vm1, %v13544_v17  ;;  %7685 = vmatprep.subr.bf16.mxu1 %v18871_v16  ;;  %v15317_v48 = vld [vmem:[%s13820_s14 + $0xc8] sm:$0xff] }
 0x584   : > { %5784 = vmatprep.mubr.bf16.mxu0 %v18871_v16  ;;  %19086 = vst [vmem:[#allocation241_spill] sm:$0xff] %v15276_v20  ;;  %v15279_v45 = vmul.f32 %v15264_v41, %v5399_v6  ;;  %v11624_v20 = vld [vmem:[%s17735_s4 + $0x70] sm:$0xff]  }
 0x585   : > { %19085 = vst [vmem:[#allocation240_spill] sm:$0xff] %v15267_v29  ;;  %10707 = vmatmul.mubr.msk.bf16.gmra.mrb[216].mxu1 %vm4446_vm1, %v13532_v37 }
 0x586   : > { %19087 = vst [vmem:[#allocation242_spill] sm:$0xff] %v15279_v45  ;;  %10710 = vmatprep.mubr.msk.bf16.mxu1 %vm4446_vm1, %v13544_v17  ;;  %v4970_v62 = vpop.f32.mrb[208].mxu0  ;;  %7686 = vmatpush1.bf16.msra.mxu1 %v11622_v36  ;;  %v15309_v45 = vld [vmem:[%s13820_s14 + $0xc0] sm:$0xff] }
 0x587   : > { %v4972_v8 = vpop.f32.mrb[209].mxu0  ;;  %7687 = vmatprep.subr.bf16.mxu1 %v18871_v16  ;;  %v15294_v37 = vmul.f32 %v14891_v51, %v4970_v62 }
 0x588   : > { %v5403_v59 = vpop.f32.mrb[112].mxu1  ;;  %v4974_v27 = vpop.f32.mrb[210].mxu0  ;;  %v15300_v29 = vmul.f32 %v14891_v51, %v4972_v8 }
 0x589   : > { %19088 = vst [vmem:[#allocation243_spill] sm:$0xff] %v15294_v37  ;;  %v5405_v17 = vpop.f32.mrb[113].mxu1  ;;  %v15297_v36 = vmul.f32 %v14899_v61, %v4974_v27  ;;  %v4976_v7 = vpop.f32.mrb[211].mxu0  ;;  %v15312_v62 = vmul.f32 %v15309_v45, %v5403_v59 }
 0x58a   : > { %19090 = vst [vmem:[#allocation245_spill] sm:$0xff] %v15300_v29  ;;  %v5407_v24 = vpop.f32.mrb[114].mxu1  ;;  %v15303_v6 = vmul.f32 %v14899_v61, %v4976_v7  ;;  %7688 = vmatpush1.bf16.msra.mxu1 %v11623_v46  ;;  %v15329_v8 = vmul.f32 %v15309_v45, %v5405_v17  ;;  %v11625_v17 = vld [vmem:[%s17735_s4 + $0x78] sm:$0xff]  }
 0x58b   : > { %19089 = vst [vmem:[#allocation244_spill] sm:$0xff] %v15297_v36  ;;  %19091 = vst [vmem:[#allocation246_spill] sm:$0xff] %v15312_v62  ;;  %v15320_v51 = vmul.f32 %v15317_v48, %v5407_v24  ;;  %v5409_v61 = vpop.f32.mrb[115].mxu1  ;;  %9461 = vmatmul.mubr.msk.bf16.gmra.mrb[60].mxu0 %vm4446_vm1, %v13554_v3  ;;  %7689 = vmatprep.subr.bf16.mxu1 %v18871_v16  ;;  %v15367_v29 = vld [vmem:[%s13820_s14 + $0xd8] sm:$0xff] }
 0x58c   : > { %5794 = vmatprep.mubr.bf16.mxu0 %v18871_v16  ;;  %19093 = vst [vmem:[#allocation248_spill] sm:$0xff] %v15329_v8  ;;  %v15332_v59 = vmul.f32 %v15317_v48, %v5409_v61  ;;  %v15359_v8 = vld [vmem:[%s13820_s14 + $0xd0] sm:$0xff] }
 0x58d   : > { %19092 = vst [vmem:[#allocation247_spill] sm:$0xff] %v15320_v51  ;;  %10711 = vmatmul.mubr.msk.bf16.gmra.mrb[220].mxu1 %vm4446_vm1, %v13554_v3 }
 0x58e   : > { %19094 = vst [vmem:[#allocation249_spill] sm:$0xff] %v15332_v59  ;;  %10714 = vmatprep.mubr.msk.bf16.mxu1 %vm4446_vm1, %v13565_v44  ;;  %v4980_v46 = vpop.f32.mrb[212].mxu0  ;;  %7690 = vmatpush1.bf16.msra.mxu1 %v11624_v20 }
 0x58f   : > { %v4982_v27 = vpop.f32.mrb[213].mxu0  ;;  %7691 = vmatprep.subr.bf16.mxu1 %v18871_v16  ;;  %v15347_v3 = vmul.f32 %v14939_v58, %v4980_v46 }
 0x590   : > { %v5413_v24 = vpop.f32.mrb[116].mxu1  ;;  %v4984_v7 = vpop.f32.mrb[214].mxu0  ;;  %v15353_v37 = vmul.f32 %v14939_v58, %v4982_v27 }
 0x591   : > { %19095 = vst [vmem:[#allocation250_spill] sm:$0xff] %v15347_v3  ;;  %v5415_v62 = vpop.f32.mrb[117].mxu1  ;;  %v15350_v51 = vmul.f32 %v14947_v14, %v4984_v7  ;;  %v4986_v20 = vpop.f32.mrb[215].mxu0  ;;  %v15362_v59 = vmul.f32 %v15359_v8, %v5413_v24 }
 0x592   : > { %19097 = vst [vmem:[#allocation252_spill] sm:$0xff] %v15353_v37  ;;  %v5417_v36 = vpop.f32.mrb[118].mxu1  ;;  %v15356_v61 = vmul.f32 %v14947_v14, %v4986_v20  ;;  %7692 = vmatpush1.bf16.msra.mxu1 %v11625_v17  ;;  %v15379_v27 = vmul.f32 %v15359_v8, %v5415_v62  ;;  %v19103_v17 = vld [vmem:[#allocation5_spill] sm:$0xff] }
 0x593   : > { %19096 = vst [vmem:[#allocation251_spill] sm:$0xff] %v15350_v51  ;;  %19099 = vst [vmem:[#allocation254_spill] sm:$0xff] %v15362_v59  ;;  %v15370_v7 = vmul.f32 %v15367_v29, %v5417_v36  ;;  %v5419_v58 = vpop.f32.mrb[119].mxu1  ;;  %9462 = vmatmul.mubr.msk.bf16.gmra.mrb[64].mxu0 %vm4446_vm1, %v13565_v44  ;;  %7950 = vmatprep.subr.bf16.mxu1 %v18871_v16 }
 0x594   : > { %19098 = vst [vmem:[#allocation253_spill] sm:$0xff] %v15356_v61  ;;  %5804 = vmatprep.mubr.bf16.mxu0 %v18871_v16  ;;  %19101 = vst [vmem:[#allocation256_spill] sm:$0xff] %v15379_v27  ;;  %v15382_v24 = vmul.f32 %v15367_v29, %v5419_v58  ;;  %v15405_v61 = vld [vmem:[%s13820_s14 + $0xe0] sm:$0xff]  ;;  %v15413_v27 = vld [vmem:[%s13820_s14 + $0xe8] sm:$0xff] }
 0x595   : > { %19100 = vst [vmem:[#allocation255_spill] sm:$0xff] %v15370_v7  ;;  %10715 = vmatmul.mubr.msk.bf16.gmra.mrb[224].mxu1 %vm4446_vm1, %v19103_v17 }
 0x596   : > { %19102 = vst [vmem:[#allocation257_spill] sm:$0xff] %v15382_v24  ;;  %10718 = vmatprep.mubr.msk.bf16.mxu1 %vm4446_vm1, %v13604_v11  ;;  %v4990_v44 = vpop.f32.mrb[216].mxu0 }
 0x597   : > { %v4992_v62 = vpop.f32.mrb[217].mxu0  ;;  %v15393_v58 = vmul.f32 %v14991_v26, %v4990_v44 }
 0x598   : > { %v5423_v46 = vpop.f32.mrb[120].mxu1  ;;  %v4994_v14 = vpop.f32.mrb[218].mxu0  ;;  %v15399_v7 = vmul.f32 %v14991_v26, %v4992_v62 }
 0x599   : > { %19104 = vst [vmem:[#allocation5_spill] sm:$0xff] %v15393_v58  ;;  %v5425_v3 = vpop.f32.mrb[121].mxu1  ;;  %v15396_v36 = vmul.f32 %v14999_v57, %v4994_v14  ;;  %v4996_v59 = vpop.f32.mrb[219].mxu0  ;;  %v15408_v20 = vmul.f32 %v15405_v61, %v5423_v46 }
 0x59a   : > { %19106 = vst [vmem:[#allocation259_spill] sm:$0xff] %v15399_v7  ;;  %v5427_v51 = vpop.f32.mrb[122].mxu1  ;;  %v15402_v37 = vmul.f32 %v14999_v57, %v4996_v59  ;;  %v15424_v26 = vmul.f32 %v15405_v61, %v5425_v3  ;;  %v15450_v7 = vld [vmem:[%s13820_s14 + $0xf0] sm:$0xff] }
 0x59b   : > { %19105 = vst [vmem:[#allocation258_spill] sm:$0xff] %v15396_v36  ;;  %19107 = vst [vmem:[#allocation260_spill] sm:$0xff] %v15408_v20  ;;  %v15416_v14 = vmul.f32 %v15413_v27, %v5427_v51  ;;  %v5429_v24 = vpop.f32.mrb[123].mxu1  ;;  %9463 = vmatmul.mubr.msk.bf16.gmra.mrb[68].mxu0 %vm4446_vm1, %v19103_v17 }
 0x59c   : > { %5814 = vmatprep.mubr.bf16.mxu0 %v18871_v16  ;;  %19109 = vst [vmem:[#allocation262_spill] sm:$0xff] %v15424_v26  ;;  %v15427_v59 = vmul.f32 %v15413_v27, %v5429_v24  ;;  %v15458_v26 = vld [vmem:[%s13820_s14 + $0xf8] sm:$0xff] }
 0x59d   : > { %19108 = vst [vmem:[#allocation261_spill] sm:$0xff] %v15416_v14  ;;  %10719 = vmatmul.mubr.msk.bf16.gmra.mrb[228].mxu1 %vm4446_vm1, %v13620_v4 }
 0x59e   : > { %19110 = vst [vmem:[#allocation263_spill] sm:$0xff] %v15427_v59  ;;  %10722 = vmatprep.mubr.msk.bf16.mxu1 %vm4446_vm1, %v13640_v5  ;;  %v5000_v46 = vpop.f32.mrb[220].mxu0 }
 0x59f   : > { %v5002_v3 = vpop.f32.mrb[221].mxu0  ;;  %v15438_v24 = vmul.f32 %v15044_v19, %v5000_v46 }
 0x5a0   : > { %v5433_v62 = vpop.f32.mrb[124].mxu1  ;;  %v5004_v44 = vpop.f32.mrb[222].mxu0  ;;  %v15444_v14 = vmul.f32 %v15044_v19, %v5002_v3 }
 0x5a1   : > { %19111 = vst [vmem:[#allocation264_spill] sm:$0xff] %v15438_v24  ;;  %v5435_v57 = vpop.f32.mrb[125].mxu1  ;;  %v15441_v51 = vmul.f32 %v15052_v18, %v5004_v44  ;;  %v5006_v20 = vpop.f32.mrb[223].mxu0  ;;  %v15453_v17 = vmul.f32 %v15450_v7, %v5433_v62 }
 0x5a2   : > { %19113 = vst [vmem:[#allocation266_spill] sm:$0xff] %v15444_v14  ;;  %v5437_v58 = vpop.f32.mrb[126].mxu1  ;;  %v15447_v36 = vmul.f32 %v15052_v18, %v5006_v20  ;;  %v15469_v19 = vmul.f32 %v15450_v7, %v5435_v57 }
 0x5a3   : > { %19112 = vst [vmem:[#allocation265_spill] sm:$0xff] %v15441_v51  ;;  %19115 = vst [vmem:[#allocation268_spill] sm:$0xff] %v15453_v17  ;;  %v15461_v44 = vmul.f32 %v15458_v26, %v5437_v58  ;;  %v5439_v59 = vpop.f32.mrb[127].mxu1  ;;  %9464 = vmatmul.mubr.msk.bf16.gmra.mrb[72].mxu0 %vm4446_vm1, %v13604_v11  ;;  %v11632_v58 = vld [vmem:[%s17735_s4 + $0x200] ss:$0 sps:$4 sm:$0xff]  }
 0x5a4   : > { %19114 = vst [vmem:[#allocation267_spill] sm:$0xff] %v15447_v36  ;;  %5824 = vmatprep.mubr.bf16.mxu0 %v18871_v16  ;;  %19117 = vst [vmem:[#allocation270_spill] sm:$0xff] %v15469_v19  ;;  %v15472_v20 = vmul.f32 %v15458_v26, %v5439_v59  ;;  %v11963_v19 = vld [vmem:[%s13820_s14 + $0x100] sm:$0xff]  ;;  %11548 = vmatprep.subr.msk.bf16.mxu0 %vm7657_vm2, %v11632_v58 }
 0x5a5   : > { %19116 = vst [vmem:[#allocation269_spill] sm:$0xff] %v15461_v44  ;;  %10723 = vmatmul.mubr.msk.bf16.gmra.mrb[232].mxu1 %vm4446_vm1, %v13657_v40 }
 0x5a6   : > { %19118 = vst [vmem:[#allocation271_spill] sm:$0xff] %v15472_v20  ;;  %10726 = vmatprep.mubr.msk.bf16.mxu1 %vm4446_vm1, %v13672_v39  ;;  %v5010_v11 = vpop.f32.mrb[224].mxu0 }
 0x5a7   : > { %v5012_v57 = vpop.f32.mrb[225].mxu0  ;;  %v15483_v59 = vmul.f32 %v15097_v47, %v5010_v11 }
 0x5a8   : > { %v5443_v62 = vpop.f32.mrb[128].mxu1  ;;  %v5014_v46 = vpop.f32.mrb[226].mxu0  ;;  %v15489_v44 = vmul.f32 %v15097_v47, %v5012_v57  ;;  %v7659_v57 = vsel %vm7657_vm2, %v11632_v58, 0 }
 0x5a9   : > { %19119 = vst [vmem:[#allocation272_spill] sm:$0xff] %v15483_v59  ;;  %v5445_v18 = vpop.f32.mrb[129].mxu1  ;;  %v15486_v3 = vmul.f32 %v15105_v54, %v5014_v46  ;;  %v5016_v17 = vpop.f32.mrb[227].mxu0  ;;  %v15498_v20 = vmul.f32 %v11963_v19, %v5443_v62  ;;  %v11964_v46 = vld [vmem:[%s13820_s14 + $0x108] sm:$0xff]  ;;  %10747 = vmatpush3.bf16.msra.mxu0 %v7659_v57 }
 0x5aa   : > { %v5447_v24 = vpop.f32.mrb[130].mxu1  ;;  %v15492_v51 = vmul.f32 %v15105_v54, %v5016_v17  ;;  %v15507_v54 = vmul.f32 %v11963_v19, %v5445_v18 }
 0x5ab   : > { %19120 = vst [vmem:[#allocation273_spill] sm:$0xff] %v15498_v20  ;;  %v15503_v14 = vmul.f32 %v11964_v46, %v5447_v24  ;;  %v5449_v36 = vpop.f32.mrb[131].mxu1  ;;  %9465 = vmatmul.mubr.msk.bf16.gmra.mrb[76].mxu0 %vm4446_vm1, %v13620_v4  ;;  %v11965_v20 = vld [vmem:[%s13820_s14 + $0x110] sm:$0xff] }
 0x5ac   : > { %19122 = vst [vmem:[#allocation275_spill] sm:$0xff] %v15507_v54  ;;  %v15511_v17 = vmul.f32 %v11964_v46, %v5449_v36  ;;  %5834 = vmatprep.mubr.bf16.mxu0 %v18871_v16 }
 0x5ad   : > { %19121 = vst [vmem:[#allocation274_spill] sm:$0xff] %v15503_v14  ;;  %10727 = vmatmul.mubr.msk.bf16.gmra.mrb[236].mxu1 %vm4446_vm1, %v13682_v23 }
 0x5ae   : > { %19123 = vst [vmem:[#allocation276_spill] sm:$0xff] %v15511_v17  ;;  %10730 = vmatprep.mubr.msk.bf16.mxu1 %vm4446_vm1, %v13693_v55  ;;  %v5020_v36 = vpop.f32.mrb[228].mxu0 }
 0x5af   : > { %v5022_v18 = vpop.f32.mrb[229].mxu0  ;;  %v15523_v58 = vmul.f32 %v15150_v38, %v5020_v36  ;;  %v11966_v36 = vld [vmem:[%s13820_s14 + $0x118] sm:$0xff] }
 0x5b0   : > { %v5453_v19 = vpop.f32.mrb[132].mxu1  ;;  %v5024_v62 = vpop.f32.mrb[230].mxu0  ;;  %v15529_v57 = vmul.f32 %v15150_v38, %v5022_v18 }
 0x5b1   : > { %19124 = vst [vmem:[#allocation277_spill] sm:$0xff] %v15523_v58  ;;  %v5455_v46 = vpop.f32.mrb[133].mxu1  ;;  %v15526_v24 = vmul.f32 %v15158_v32, %v5024_v62  ;;  %v5026_v11 = vpop.f32.mrb[231].mxu0  ;;  %v15535_v14 = vmul.f32 %v11965_v20, %v5453_v19 }
 0x5b2   : > { %v5457_v4 = vpop.f32.mrb[134].mxu1  ;;  %v15532_v47 = vmul.f32 %v15158_v32, %v5026_v11  ;;  %v15544_v62 = vmul.f32 %v11965_v20, %v5455_v46 }
 0x5b3   : > { %19125 = vst [vmem:[#allocation278_spill] sm:$0xff] %v15535_v14  ;;  %v15540_v17 = vmul.f32 %v11966_v36, %v5457_v4  ;;  %v5459_v59 = vpop.f32.mrb[135].mxu1  ;;  %9466 = vmatmul.mubr.msk.bf16.gmra.mrb[80].mxu0 %vm4446_vm1, %v13640_v5  ;;  %v11967_v14 = vld [vmem:[%s13820_s14 + $0x120] sm:$0xff] }
 0x5b4   : > { %19127 = vst [vmem:[#allocation280_spill] sm:$0xff] %v15544_v62  ;;  %v15548_v32 = vmul.f32 %v11966_v36, %v5459_v59  ;;  %5844 = vmatprep.mubr.bf16.mxu0 %v18871_v16 }
 0x5b5   : > { %19126 = vst [vmem:[#allocation279_spill] sm:$0xff] %v15540_v17  ;;  %10731 = vmatmul.mubr.msk.bf16.gmra.mrb[240].mxu1 %vm4446_vm1, %v13702_v22 }
 0x5b6   : > { %19128 = vst [vmem:[#allocation281_spill] sm:$0xff] %v15548_v32  ;;  %10734 = vmatprep.mubr.msk.bf16.mxu1 %vm4446_vm1, %v13709_v34  ;;  %v5030_v5 = vpop.f32.mrb[232].mxu0 }
 0x5b7   : > { %v5032_v20 = vpop.f32.mrb[233].mxu0  ;;  %v15560_v19 = vmul.f32 %v15203_v52, %v5030_v5  ;;  %v11968_v5 = vld [vmem:[%s13820_s14 + $0x128] sm:$0xff] }
 0x5b8   : > { %v5463_v59 = vpop.f32.mrb[136].mxu1  ;;  %v5034_v18 = vpop.f32.mrb[234].mxu0  ;;  %v15566_v54 = vmul.f32 %v15203_v52, %v5032_v20 }
 0x5b9   : > { %19129 = vst [vmem:[#allocation282_spill] sm:$0xff] %v15560_v19  ;;  %v5465_v46 = vpop.f32.mrb[137].mxu1  ;;  %v15563_v36 = vmul.f32 %v15211_v53, %v5034_v18  ;;  %v5036_v11 = vpop.f32.mrb[235].mxu0  ;;  %v15572_v17 = vmul.f32 %v11967_v14, %v5463_v59 }
 0x5ba   : > { %v5467_v4 = vpop.f32.mrb[138].mxu1  ;;  %v15569_v38 = vmul.f32 %v15211_v53, %v5036_v11  ;;  %v15581_v18 = vmul.f32 %v11967_v14, %v5465_v46 }
 0x5bb   : > { %19130 = vst [vmem:[#allocation283_spill] sm:$0xff] %v15572_v17  ;;  %v15577_v32 = vmul.f32 %v11968_v5, %v5467_v4  ;;  %v5469_v58 = vpop.f32.mrb[139].mxu1  ;;  %9467 = vmatmul.mubr.msk.bf16.gmra.mrb[84].mxu0 %vm4446_vm1, %v13657_v40  ;;  %v11969_v17 = vld [vmem:[%s13820_s14 + $0x130] sm:$0xff] }
 0x5bc   : > { %19132 = vst [vmem:[#allocation285_spill] sm:$0xff] %v15581_v18  ;;  %v15585_v53 = vmul.f32 %v11968_v5, %v5469_v58  ;;  %5854 = vmatprep.mubr.bf16.mxu0 %v18871_v16 }
 0x5bd   : > { %19131 = vst [vmem:[#allocation284_spill] sm:$0xff] %v15577_v32  ;;  %10735 = vmatmul.mubr.msk.bf16.gmra.mrb[244].mxu1 %vm4446_vm1, %v13717_v1 }
 0x5be   : > { %19133 = vst [vmem:[#allocation286_spill] sm:$0xff] %v15585_v53  ;;  %10738 = vmatprep.mubr.msk.bf16.mxu1 %vm4446_vm1, %v13723_v35  ;;  %v5040_v40 = vpop.f32.mrb[236].mxu0 }
 0x5bf   : > { %v5042_v14 = vpop.f32.mrb[237].mxu0  ;;  %v15597_v59 = vmul.f32 %v15256_v10, %v5040_v40  ;;  %v11970_v40 = vld [vmem:[%s13820_s14 + $0x138] sm:$0xff] }
 0x5c0   : > { %v5473_v58 = vpop.f32.mrb[140].mxu1  ;;  %v5044_v20 = vpop.f32.mrb[238].mxu0  ;;  %v15603_v62 = vmul.f32 %v15256_v10, %v5042_v14 }
 0x5c1   : > { %19134 = vst [vmem:[#allocation287_spill] sm:$0xff] %v15597_v59  ;;  %v5475_v46 = vpop.f32.mrb[141].mxu1  ;;  %v15600_v5 = vmul.f32 %v15264_v41, %v5044_v20  ;;  %v5046_v11 = vpop.f32.mrb[239].mxu0  ;;  %v15609_v32 = vmul.f32 %v11969_v17, %v5473_v58 }
 0x5c2   : > { %v5477_v4 = vpop.f32.mrb[142].mxu1  ;;  %v15606_v52 = vmul.f32 %v15264_v41, %v5046_v11  ;;  %v15618_v20 = vmul.f32 %v11969_v17, %v5475_v46 }
 0x5c3   : > { %19135 = vst [vmem:[#allocation288_spill] sm:$0xff] %v15600_v5  ;;  %19136 = vst [vmem:[#allocation289_spill] sm:$0xff] %v15609_v32  ;;  %v15614_v53 = vmul.f32 %v11970_v40, %v5477_v4  ;;  %v5479_v19 = vpop.f32.mrb[143].mxu1  ;;  %9468 = vmatmul.mubr.msk.bf16.gmra.mrb[88].mxu0 %vm4446_vm1, %v13672_v39  ;;  %v11971_v32 = vld [vmem:[%s13820_s14 + $0x140] sm:$0xff] }
 0x5c4   : > { %19138 = vst [vmem:[#allocation291_spill] sm:$0xff] %v15618_v20  ;;  %v15622_v41 = vmul.f32 %v11970_v40, %v5479_v19  ;;  %5864 = vmatprep.mubr.bf16.mxu0 %v18871_v16 }
 0x5c5   : > { %19137 = vst [vmem:[#allocation290_spill] sm:$0xff] %v15614_v53  ;;  %10739 = vmatmul.mubr.msk.bf16.gmra.mrb[248].mxu1 %vm4446_vm1, %v13731_v31 }
 0x5c6   : > { %19139 = vst [vmem:[#allocation292_spill] sm:$0xff] %v15622_v41  ;;  %10742 = vmatprep.mubr.msk.bf16.mxu1 %vm4446_vm1, %v13735_v12  ;;  %v5050_v39 = vpop.f32.mrb[240].mxu0 }
 0x5c7   : > { %v5052_v17 = vpop.f32.mrb[241].mxu0  ;;  %v15634_v58 = vmul.f32 %v15309_v45, %v5050_v39  ;;  %v11972_v39 = vld [vmem:[%s13820_s14 + $0x148] sm:$0xff] }
 0x5c8   : > { %v5483_v19 = vpop.f32.mrb[144].mxu1  ;;  %v5054_v14 = vpop.f32.mrb[242].mxu0  ;;  %v15640_v18 = vmul.f32 %v15309_v45, %v5052_v17 }
 0x5c9   : > { %19140 = vst [vmem:[#allocation293_spill] sm:$0xff] %v15634_v58  ;;  %v5485_v46 = vpop.f32.mrb[145].mxu1  ;;  %v15637_v40 = vmul.f32 %v15317_v48, %v5054_v14  ;;  %v5056_v11 = vpop.f32.mrb[243].mxu0  ;;  %v15646_v53 = vmul.f32 %v11971_v32, %v5483_v19 }
 0x5ca   : > { %19142 = vst [vmem:[#allocation295_spill] sm:$0xff] %v15640_v18  ;;  %v5487_v4 = vpop.f32.mrb[146].mxu1  ;;  %v15643_v10 = vmul.f32 %v15317_v48, %v5056_v11  ;;  %v15655_v14 = vmul.f32 %v11971_v32, %v5485_v46  ;;  %v19149_v32 = vld [vmem:[#allocation11_spill] sm:$0xff] }
 0x5cb   : > { %19141 = vst [vmem:[#allocation294_spill] sm:$0xff] %v15637_v40  ;;  %19144 = vst [vmem:[#allocation297_spill] sm:$0xff] %v15646_v53  ;;  %v15651_v41 = vmul.f32 %v11972_v39, %v5487_v4  ;;  %v5489_v59 = vpop.f32.mrb[147].mxu1  ;;  %9469 = vmatmul.mubr.msk.bf16.gmra.mrb[92].mxu0 %vm4446_vm1, %v13682_v23  ;;  %v19148_v23 = vld [vmem:[#allocation13_spill] sm:$0xff]  ;;  %v19310_v18 = vld [vmem:[#allocation119_spill] sm:$0xff] }
 0x5cc   : > { %19143 = vst [vmem:[#allocation296_spill] sm:$0xff] %v15643_v10  ;;  %19146 = vst [vmem:[#allocation299_spill] sm:$0xff] %v15655_v14  ;;  %v15659_v48 = vmul.f32 %v11972_v39, %v5489_v59  ;;  %5874 = vmatprep.mubr.bf16.mxu0 %v18871_v16  ;;  %v19150_v17 = vpack.c.bf16 %v19148_v23, %v19149_v32  ;;  %v11626_v32 = vld [vmem:[%s17735_s4 + $0x80] sm:$0xff]  }
 0x5cd   : > { %19145 = vst [vmem:[#allocation298_spill] sm:$0xff] %v15651_v41  ;;  %10743 = vmatmul.mubr.msk.bf16.gmra.mrb[252].mxu1 %vm4446_vm1, %v13745_v56 }
 0x5ce   : > { %19147 = vst [vmem:[#allocation300_spill] sm:$0xff] %v15659_v48  ;;  %7693 = vmatprep.mubr.bf16.mxu1 %v19150_v17  ;;  %v5060_v19 = vpop.f32.mrb[244].mxu0  ;;  %v11973_v17 = vld [vmem:[%s13820_s14 + $0x150] sm:$0xff] }
 0x5cf   : > { %v5062_v59 = vpop.f32.mrb[245].mxu0  ;;  %v15672_v20 = vmul.f32 %v15359_v8, %v5060_v19  ;;  %v19160_v19 = vld [vmem:[#allocation6_spill] sm:$0xff] }
 0x5d0   : > { %v5493_v46 = vpop.f32.mrb[148].mxu1  ;;  %v5064_v39 = vpop.f32.mrb[246].mxu0  ;;  %v15678_v41 = vmul.f32 %v15359_v8, %v5062_v59 }
 0x5d1   : > { %19151 = vst [vmem:[#allocation13_spill] sm:$0xff] %v15672_v20  ;;  %v5495_v11 = vpop.f32.mrb[149].mxu1  ;;  %v15675_v45 = vmul.f32 %v15367_v29, %v5064_v39  ;;  %v5066_v53 = vpop.f32.mrb[247].mxu0  ;;  %v15687_v14 = vmul.f32 %v11973_v17, %v5493_v46  ;;  %v11974_v39 = vld [vmem:[%s13820_s14 + $0x158] sm:$0xff]  ;;  %v19159_v46 = vld [vmem:[#allocation8_spill] sm:$0xff] }
 0x5d2   : > { %19153 = vst [vmem:[#allocation301_spill] sm:$0xff] %v15678_v41  ;;  %v5497_v4 = vpop.f32.mrb[150].mxu1  ;;  %v15681_v23 = vmul.f32 %v15367_v29, %v5066_v53  ;;  %v15696_v8 = vmul.f32 %v11973_v17, %v5495_v11  ;;  %v19163_v11 = vld [vmem:[#allocation17_spill] sm:$0xff] }
 0x5d3   : > { %19152 = vst [vmem:[#allocation11_spill] sm:$0xff] %v15675_v45  ;;  %19155 = vst [vmem:[#allocation303_spill] sm:$0xff] %v15687_v14  ;;  %v15692_v48 = vmul.f32 %v11974_v39, %v5497_v4  ;;  %v5499_v58 = vpop.f32.mrb[151].mxu1  ;;  %9470 = vmatmul.mubr.msk.bf16.gmra.mrb[96].mxu0 %vm4446_vm1, %v13693_v55  ;;  %v19161_v4 = vpack.c.bf16 %v19159_v46, %v19160_v19  ;;  %v19162_v55 = vld [vmem:[#allocation20_spill] sm:$0xff] }
 0x5d4   : > { %19154 = vst [vmem:[#allocation302_spill] sm:$0xff] %v15681_v23  ;;  %19157 = vst [vmem:[#allocation305_spill] sm:$0xff] %v15696_v8  ;;  %v15700_v53 = vmul.f32 %v11974_v39, %v5499_v58  ;;  %5884 = vmatprep.mubr.bf16.mxu0 %v18871_v16  ;;  %v19164_v17 = vpack.c.bf16 %v19162_v55, %v19163_v11  ;;  %v11627_v39 = vld [vmem:[%s17735_s4 + $0x88] sm:$0xff]   ;;  %v11628_v14 = vld [vmem:[%s17735_s4 + $0x90] sm:$0xff]  }
 0x5d5   : > { %19156 = vst [vmem:[#allocation304_spill] sm:$0xff] %v15692_v48  ;;  %7694 = vmatmul.mubr.bf16.vlgmr.msra.gmra.mrb[0].mxu1 %v19161_v4  ;;  %v11975_v48 = vld [vmem:[%s13820_s14 + $0x160] sm:$0xff]  ;;  %v11976_v8 = vld [vmem:[%s13820_s14 + $0x168] sm:$0xff] }
 0x5d6   : > { %19158 = vst [vmem:[#allocation306_spill] sm:$0xff] %v15700_v53  ;;  %7951 = vmatpush1.bf16.msra.mxu1 %v11626_v32  ;;  %7701 = vmatprep.mubr.bf16.mxu1 %v19164_v17  ;;  %v5070_v58 = vpop.f32.mrb[248].mxu0 }
 0x5d7   : > { %v5072_v29 = vpop.f32.mrb[249].mxu0  ;;  %7952 = vmatprep.subr.bf16.mxu1 %v18871_v16  ;;  %v15718_v4 = vmul.f32 %v15405_v61, %v5070_v58 }
 0x5d8   : > { %v5503_v19 = vpop.f32.mrb[152].mxu1  ;;  %v5074_v46 = vpop.f32.mrb[250].mxu0  ;;  %v15724_v11 = vmul.f32 %v15405_v61, %v5072_v29  ;;  %v11630_v29 = vld [vmem:[%s17735_s4 + $0xa0] sm:$0xff]  }
 0x5d9   : > { %19165 = vst [vmem:[#allocation8_spill] sm:$0xff] %v15718_v4  ;;  %v5505_v32 = vpop.f32.mrb[153].mxu1  ;;  %v15721_v59 = vmul.f32 %v15413_v27, %v5074_v46  ;;  %v5076_v55 = vpop.f32.mrb[251].mxu0  ;;  %v15733_v58 = vmul.f32 %v11975_v48, %v5503_v19  ;;  %v19176_v4 = vld [vmem:[#allocation29_spill] sm:$0xff] }
 0x5da   : > { %19167 = vst [vmem:[#allocation20_spill] sm:$0xff] %v15724_v11  ;;  %v5507_v17 = vpop.f32.mrb[154].mxu1  ;;  %v15727_v20 = vmul.f32 %v15413_v27, %v5076_v55  ;;  %7953 = vmatpush1.bf16.msra.mxu1 %v11627_v39  ;;  %v15743_v27 = vmul.f32 %v11975_v48, %v5505_v32  ;;  %v19173_v55 = vld [vmem:[#allocation15_spill] sm:$0xff]  ;;  %v19177_v48 = vld [vmem:[#allocation25_spill] sm:$0xff] }
 0x5db   : > { %19166 = vst [vmem:[#allocation6_spill] sm:$0xff] %v15721_v59  ;;  %19169 = vst [vmem:[#allocation307_spill] sm:$0xff] %v15733_v58  ;;  %v15738_v53 = vmul.f32 %v11976_v8, %v5507_v17  ;;  %v5509_v61 = vpop.f32.mrb[155].mxu1  ;;  %9471 = vmatmul.mubr.msk.bf16.gmra.mrb[100].mxu0 %vm4446_vm1, %v13702_v22  ;;  %7954 = vmatprep.subr.bf16.mxu1 %v18871_v16  ;;  %v19174_v17 = vld [vmem:[#allocation14_spill] sm:$0xff]  ;;  %v19178_v32 = vpack.c.bf16 %v19176_v4, %v19177_v48  ;;  %v11977_v58 = vld [vmem:[%s13820_s14 + $0x170] sm:$0xff] }
 0x5dc   : > { %19168 = vst [vmem:[#allocation17_spill] sm:$0xff] %v15727_v20  ;;  %19171 = vst [vmem:[#allocation309_spill] sm:$0xff] %v15743_v27  ;;  %v15747_v39 = vmul.f32 %v11976_v8, %v5509_v61  ;;  %5894 = vmatprep.mubr.bf16.mxu0 %v18871_v16  ;;  %v19175_v46 = vpack.c.bf16 %v19173_v55, %v19174_v17  ;;  %v11629_v8 = vld [vmem:[%s17735_s4 + $0x98] sm:$0xff]  }
 0x5dd   : > { %19170 = vst [vmem:[#allocation308_spill] sm:$0xff] %v15738_v53  ;;  %v11978_v53 = vld [vmem:[%s13820_s14 + $0x178] sm:$0xff] }
 0x5de   : > { %19172 = vst [vmem:[#allocation310_spill] sm:$0xff] %v15747_v39  ;;  %7702 = vmatmul.mubr.bf16.gmra.mrb[4].mxu1 %v19175_v46  ;;  %v5080_v59 = vpop.f32.mrb[252].mxu0  ;;  %v19285_v20 = vld [vmem:[#allocation93_spill] sm:$0xff] }
 0x5df   : > { %7709 = vmatprep.mubr.bf16.mxu1 %v19178_v32  ;;  %7955 = vmatpush1.bf16.msra.mxu1 %v11628_v14  ;;  %v5082_v61 = vpop.f32.mrb[253].mxu0  ;;  %v15765_v17 = vmul.f32 %v15450_v7, %v5080_v59 }
 0x5e0   : > { %7956 = vmatprep.subr.bf16.mxu1 %v18871_v16  ;;  %v5513_v55 = vpop.f32.mrb[156].mxu1  ;;  %v5084_v46 = vpop.f32.mrb[254].mxu0  ;;  %v15771_v14 = vmul.f32 %v15450_v7, %v5082_v61 }
 0x5e1   : > { %19179 = vst [vmem:[#allocation15_spill] sm:$0xff] %v15765_v17  ;;  %v5515_v19 = vpop.f32.mrb[157].mxu1  ;;  %v15768_v4 = vmul.f32 %v15458_v26, %v5084_v46  ;;  %v5086_v48 = vpop.f32.mrb[255].mxu0  ;;  %v15780_v59 = vmul.f32 %v11977_v58, %v5513_v55 }
 0x5e2   : > { %19181 = vst [vmem:[#allocation29_spill] sm:$0xff] %v15771_v14  ;;  %v5517_v32 = vpop.f32.mrb[158].mxu1  ;;  %v15774_v22 = vmul.f32 %v15458_v26, %v5086_v48  ;;  %v15790_v26 = vmul.f32 %v11977_v58, %v5515_v19  ;;  %v19187_v48 = vld [vmem:[#allocation24_spill] sm:$0xff]  ;;  %v19190_v58 = vld [vmem:[#allocation35_spill] sm:$0xff]  ;;  %v19191_v19 = vld [vmem:[#allocation33_spill] sm:$0xff] }
 0x5e3   : > { %19180 = vst [vmem:[#allocation14_spill] sm:$0xff] %v15768_v4  ;;  %7957 = vmatpush1.bf16.msra.mxu1 %v11629_v8  ;;  %19183 = vst [vmem:[#allocation311_spill] sm:$0xff] %v15780_v59  ;;  %v15785_v27 = vmul.f32 %v11978_v53, %v5517_v32  ;;  %v5519_v7 = vpop.f32.mrb[159].mxu1  ;;  %9472 = vmatmul.mubr.msk.bf16.gmra.mrb[104].mxu0 %vm4446_vm1, %v13709_v34  ;;  %v19188_v32 = vld [vmem:[#allocation23_spill] sm:$0xff]  ;;  %v19192_v39 = vpack.c.bf16 %v19190_v58, %v19191_v19 }
 0x5e4   : > { %19182 = vst [vmem:[#allocation25_spill] sm:$0xff] %v15774_v22  ;;  %7958 = vmatprep.subr.bf16.mxu1 %v18871_v16  ;;  %19185 = vst [vmem:[#allocation313_spill] sm:$0xff] %v15790_v26  ;;  %v15794_v61 = vmul.f32 %v11978_v53, %v5519_v7  ;;  %5904 = vmatprep.mubr.bf16.mxu0 %v18871_v16  ;;  %v19189_v46 = vpack.c.bf16 %v19187_v48, %v19188_v32  ;;  %v11631_v53 = vld [vmem:[%s17735_s4 + $0xa8] sm:$0xff]   ;;  %v11979_v32 = vld [vmem:[%s13820_s14] sm:$0xff] }
 0x5e5   : > { %19184 = vst [vmem:[#allocation312_spill] sm:$0xff] %v15785_v27  ;;  %v11980_v59 = vld [vmem:[%s13820_s14 + $0x8] sm:$0xff]  ;;  %v11633_v26 = vld [vmem:[%s17735_s4 + $0xb0] sm:$0xff]  }
 0x5e6   : > { %19186 = vst [vmem:[#allocation314_spill] sm:$0xff] %v15794_v61  ;;  %7710 = vmatmul.mubr.bf16.gmra.mrb[8].mxu1 %v19189_v46  ;;  %v5636_v8 = vpop.f32.mrb[0].mxu0  ;;  %v11981_v61 = vld [vmem:[%s13820_s14 + $0x180] sm:$0xff] }
 0x5e7   : > { %7717 = vmatprep.mubr.bf16.mxu1 %v19192_v39  ;;  %7959 = vmatpush1.bf16.msra.mxu1 %v11630_v29  ;;  %v5638_v7 = vpop.f32.mrb[1].mxu0  ;;  %v15812_v55 = vmul.f32 %v11979_v32, %v5636_v8  ;;  %v11982_v8 = vld [vmem:[%s13820_s14 + $0x188] sm:$0xff] }
 0x5e8   : > { %7960 = vmatprep.subr.bf16.mxu1 %v18871_v16  ;;  %v5523_v48 = vpop.f32.mrb[160].mxu1  ;;  %v5640_v46 = vpop.f32.mrb[2].mxu0  ;;  %v15817_v29 = vmul.f32 %v11979_v32, %v5638_v7  ;;  %v19201_v32 = vld [vmem:[#allocation31_spill] sm:$0xff] }
 0x5e9   : > { %19193 = vst [vmem:[#allocation24_spill] sm:$0xff] %v15812_v55  ;;  %v5525_v34 = vpop.f32.mrb[161].mxu1  ;;  %v15815_v58 = vmul.f32 %v11980_v59, %v5640_v46  ;;  %v5642_v39 = vpop.f32.mrb[3].mxu0  ;;  %v15825_v17 = vmul.f32 %v11981_v61, %v5523_v48  ;;  %v11634_v46 = vld [vmem:[%s17735_s4 + $0xb8] sm:$0xff]  }
 0x5ea   : > { %19195 = vst [vmem:[#allocation35_spill] sm:$0xff] %v15817_v29  ;;  %v5527_v19 = vpop.f32.mrb[162].mxu1  ;;  %v15819_v27 = vmul.f32 %v11980_v59, %v5642_v39  ;;  %v15835_v59 = vmul.f32 %v11981_v61, %v5525_v34  ;;  %v19202_v39 = vld [vmem:[#allocation30_spill] sm:$0xff]  ;;  %v19204_v61 = vld [vmem:[#allocation45_spill] sm:$0xff]  ;;  %v19205_v34 = vld [vmem:[#allocation44_spill] sm:$0xff] }
 0x5eb   : > { %19194 = vst [vmem:[#allocation23_spill] sm:$0xff] %v15815_v58  ;;  %7961 = vmatpush1.bf16.msra.mxu1 %v11631_v53  ;;  %19197 = vst [vmem:[#allocation315_spill] sm:$0xff] %v15825_v17  ;;  %v15828_v4 = vmul.f32 %v11982_v8, %v5527_v19  ;;  %v5529_v14 = vpop.f32.mrb[163].mxu1  ;;  %9473 = vmatmul.mubr.msk.bf16.gmra.mrb[108].mxu0 %vm4446_vm1, %v13717_v1  ;;  %v19203_v19 = vpack.c.bf16 %v19201_v32, %v19202_v39  ;;  %v11984_v55 = vld [vmem:[%s13820_s14 + $0x18] sm:$0xff]  ;;  %v11635_v29 = vld [vmem:[%s17735_s4 + $0xc0] sm:$0xff]  }
 0x5ec   : > { %19196 = vst [vmem:[#allocation33_spill] sm:$0xff] %v15819_v27  ;;  %7962 = vmatprep.subr.bf16.mxu1 %v18871_v16  ;;  %19199 = vst [vmem:[#allocation317_spill] sm:$0xff] %v15835_v59  ;;  %v15837_v53 = vmul.f32 %v11982_v8, %v5529_v14  ;;  %5914 = vmatprep.mubr.bf16.mxu0 %v18871_v16  ;;  %v19206_v14 = vpack.c.bf16 %v19204_v61, %v19205_v34  ;;  %v15870_v27 = vld [vmem:[%s13820_s14 + $0x190] sm:$0xff]  ;;  %v15876_v17 = vld [vmem:[%s13820_s14 + $0x198] sm:$0xff] }
 0x5ed   : > { %19198 = vst [vmem:[#allocation316_spill] sm:$0xff] %v15828_v4 }
 0x5ee   : > { %19200 = vst [vmem:[#allocation318_spill] sm:$0xff] %v15837_v53  ;;  %7718 = vmatmul.mubr.bf16.gmra.mrb[12].mxu1 %v19203_v19  ;;  %v5646_v8 = vpop.f32.mrb[4].mxu0  ;;  %v11983_v19 = vld [vmem:[%s13820_s14 + $0x10] sm:$0xff] }
 0x5ef   : > { %7725 = vmatprep.mubr.bf16.mxu1 %v19206_v14  ;;  %7963 = vmatpush1.bf16.msra.mxu1 %v11633_v26  ;;  %v5648_v7 = vpop.f32.mrb[5].mxu0  ;;  %v15857_v48 = vmul.f32 %v11983_v19, %v5646_v8 }
 0x5f0   : > { %7964 = vmatprep.subr.bf16.mxu1 %v18871_v16  ;;  %v5533_v32 = vpop.f32.mrb[164].mxu1  ;;  %v5650_v39 = vpop.f32.mrb[6].mxu0  ;;  %v15862_v26 = vmul.f32 %v11983_v19, %v5648_v7  ;;  %v11636_v19 = vld [vmem:[%s17735_s4 + $0xc8] sm:$0xff]  }
 0x5f1   : > { %19207 = vst [vmem:[#allocation31_spill] sm:$0xff] %v15857_v48  ;;  %v5535_v1 = vpop.f32.mrb[165].mxu1  ;;  %v15860_v61 = vmul.f32 %v11984_v55, %v5650_v39  ;;  %v5652_v34 = vpop.f32.mrb[7].mxu0  ;;  %v15873_v8 = vmul.f32 %v15870_v27, %v5533_v32  ;;  %v19218_v48 = vld [vmem:[#allocation51_spill] sm:$0xff] }
 0x5f2   : > { %19209 = vst [vmem:[#allocation45_spill] sm:$0xff] %v15862_v26  ;;  %v5537_v14 = vpop.f32.mrb[166].mxu1  ;;  %v15864_v58 = vmul.f32 %v11984_v55, %v5652_v34 }
 0x5f3   : > { %19208 = vst [vmem:[#allocation30_spill] sm:$0xff] %v15860_v61  ;;  %7965 = vmatpush1.bf16.msra.mxu1 %v11634_v46  ;;  %19211 = vst [vmem:[#allocation319_spill] sm:$0xff] %v15873_v8  ;;  %v15879_v39 = vmul.f32 %v15876_v17, %v5537_v14  ;;  %v5539_v55 = vpop.f32.mrb[167].mxu1  ;;  %9474 = vmatmul.mubr.msk.bf16.gmra.mrb[112].mxu0 %vm4446_vm1, %v13723_v35  ;;  %v15887_v46 = vmul.f32 %v15870_v27, %v5535_v1  ;;  %v19215_v14 = vld [vmem:[#allocation40_spill] sm:$0xff]  ;;  %v19216_v35 = vld [vmem:[#allocation39_spill] sm:$0xff] }
 0x5f4   : > { %19210 = vst [vmem:[#allocation44_spill] sm:$0xff] %v15864_v58  ;;  %7966 = vmatprep.subr.bf16.mxu1 %v18871_v16  ;;  %v15890_v32 = vmul.f32 %v15876_v17, %v5539_v55  ;;  %5924 = vmatprep.mubr.bf16.mxu0 %v18871_v16  ;;  %v19217_v7 = vpack.c.bf16 %v19215_v14, %v19216_v35  ;;  %v19219_v61 = vld [vmem:[#allocation50_spill] sm:$0xff]  ;;  %v11988_v58 = vld [vmem:[%s13820_s14 + $0x28] sm:$0xff] }
 0x5f5   : > { %19212 = vst [vmem:[#allocation320_spill] sm:$0xff] %v15879_v39  ;;  %19213 = vst [vmem:[#allocation321_spill] sm:$0xff] %v15887_v46  ;;  %v19220_v55 = vpack.c.bf16 %v19218_v48, %v19219_v61  ;;  %v11987_v35 = vld [vmem:[%s13820_s14 + $0x20] sm:$0xff]  ;;  %v11637_v39 = vld [vmem:[%s17735_s4 + $0xd0] sm:$0xff]  }
 0x5f6   : > { %19214 = vst [vmem:[#allocation322_spill] sm:$0xff] %v15890_v32  ;;  %7726 = vmatmul.mubr.bf16.gmra.mrb[16].mxu1 %v19217_v7  ;;  %v5656_v4 = vpop.f32.mrb[8].mxu0  ;;  %v15923_v46 = vld [vmem:[%s13820_s14 + $0x1a0] sm:$0xff]  ;;  %v15929_v32 = vld [vmem:[%s13820_s14 + $0x1a8] sm:$0xff] }
 0x5f7   : > { %7733 = vmatprep.mubr.bf16.mxu1 %v19220_v55  ;;  %7967 = vmatpush1.bf16.msra.mxu1 %v11635_v29  ;;  %v5658_v26 = vpop.f32.mrb[9].mxu0  ;;  %v15910_v34 = vmul.f32 %v11987_v35, %v5656_v4 }
 0x5f8   : > { %7968 = vmatprep.subr.bf16.mxu1 %v18871_v16  ;;  %v5543_v14 = vpop.f32.mrb[168].mxu1  ;;  %v5660_v7 = vpop.f32.mrb[10].mxu0  ;;  %v15915_v29 = vmul.f32 %v11987_v35, %v5658_v26 }
 0x5f9   : > { %19221 = vst [vmem:[#allocation40_spill] sm:$0xff] %v15910_v34  ;;  %v5545_v1 = vpop.f32.mrb[169].mxu1  ;;  %v15913_v48 = vmul.f32 %v11988_v58, %v5660_v7  ;;  %v5662_v61 = vpop.f32.mrb[11].mxu0  ;;  %v15926_v4 = vmul.f32 %v15923_v46, %v5543_v14  ;;  %v19232_v34 = vld [vmem:[#allocation61_spill] sm:$0xff] }
 0x5fa   : > { %19223 = vst [vmem:[#allocation51_spill] sm:$0xff] %v15915_v29  ;;  %v5547_v55 = vpop.f32.mrb[170].mxu1  ;;  %v15917_v8 = vmul.f32 %v11988_v58, %v5662_v61 }
 0x5fb   : > { %19222 = vst [vmem:[#allocation39_spill] sm:$0xff] %v15913_v48  ;;  %7969 = vmatpush1.bf16.msra.mxu1 %v11636_v19  ;;  %19225 = vst [vmem:[#allocation323_spill] sm:$0xff] %v15926_v4  ;;  %v15932_v7 = vmul.f32 %v15929_v32, %v5547_v55  ;;  %v5549_v58 = vpop.f32.mrb[171].mxu1  ;;  %9475 = vmatmul.mubr.msk.bf16.gmra.mrb[116].mxu0 %vm4446_vm1, %v13731_v31  ;;  %v15940_v19 = vmul.f32 %v15923_v46, %v5545_v1  ;;  %v19229_v55 = vld [vmem:[#allocation47_spill] sm:$0xff]  ;;  %v19230_v31 = vld [vmem:[#allocation46_spill] sm:$0xff] }
 0x5fc   : > { %19224 = vst [vmem:[#allocation50_spill] sm:$0xff] %v15917_v8  ;;  %7970 = vmatprep.subr.bf16.mxu1 %v18871_v16  ;;  %v15943_v14 = vmul.f32 %v15929_v32, %v5549_v58  ;;  %5934 = vmatprep.mubr.bf16.mxu0 %v18871_v16  ;;  %v19231_v26 = vpack.c.bf16 %v19229_v55, %v19230_v31  ;;  %v19233_v48 = vld [vmem:[#allocation60_spill] sm:$0xff]  ;;  %v11992_v55 = vld [vmem:[%s13820_s14 + $0x38] sm:$0xff] }
 0x5fd   : > { %19226 = vst [vmem:[#allocation324_spill] sm:$0xff] %v15932_v7  ;;  %19227 = vst [vmem:[#allocation325_spill] sm:$0xff] %v15940_v19  ;;  %v19234_v58 = vpack.c.bf16 %v19232_v34, %v19233_v48  ;;  %v11991_v8 = vld [vmem:[%s13820_s14 + $0x30] sm:$0xff]  ;;  %v15976_v19 = vld [vmem:[%s13820_s14 + $0x1b8] sm:$0xff] }
 0x5fe   : > { %19228 = vst [vmem:[#allocation326_spill] sm:$0xff] %v15943_v14  ;;  %7734 = vmatmul.mubr.bf16.gmra.mrb[20].mxu1 %v19231_v26  ;;  %v5666_v59 = vpop.f32.mrb[12].mxu0 }
 0x5ff   : > { %7741 = vmatprep.mubr.bf16.mxu1 %v19234_v58  ;;  %7971 = vmatpush1.bf16.msra.mxu1 %v11637_v39  ;;  %v5668_v35 = vpop.f32.mrb[13].mxu0  ;;  %v15960_v4 = vmul.f32 %v11991_v8, %v5666_v59  ;;  %v15970_v39 = vld [vmem:[%s13820_s14 + $0x1b0] sm:$0xff] }
 0x600   : > { %7972 = vmatprep.subr.bf16.mxu1 %v18871_v16  ;;  %v5553_v29 = vpop.f32.mrb[172].mxu1  ;;  %v5670_v61 = vpop.f32.mrb[14].mxu0  ;;  %v15965_v7 = vmul.f32 %v11991_v8, %v5668_v35 }
 0x601   : > { %19235 = vst [vmem:[#allocation47_spill] sm:$0xff] %v15960_v4  ;;  %v5555_v26 = vpop.f32.mrb[173].mxu1  ;;  %v15963_v31 = vmul.f32 %v11992_v55, %v5670_v61  ;;  %v5672_v1 = vpop.f32.mrb[15].mxu0  ;;  %v15973_v58 = vmul.f32 %v15970_v39, %v5553_v29  ;;  %v19247_v4 = vld [vmem:[#allocation69_spill] sm:$0xff] }
 0x602   : > { %19237 = vst [vmem:[#allocation61_spill] sm:$0xff] %v15965_v7  ;;  %v5557_v34 = vpop.f32.mrb[174].mxu1  ;;  %v15967_v48 = vmul.f32 %v11992_v55, %v5672_v1  ;;  %v15986_v8 = vmul.f32 %v15970_v39, %v5555_v26  ;;  %v19243_v55 = vld [vmem:[#allocation57_spill] sm:$0xff]  ;;  %v19246_v26 = vld [vmem:[#allocation70_spill] sm:$0xff] }
 0x603   : > { %19236 = vst [vmem:[#allocation46_spill] sm:$0xff] %v15963_v31  ;;  %19239 = vst [vmem:[#allocation327_spill] sm:$0xff] %v15973_v58  ;;  %v15979_v59 = vmul.f32 %v15976_v19, %v5557_v34  ;;  %v5559_v14 = vpop.f32.mrb[175].mxu1  ;;  %9476 = vmatmul.mubr.msk.bf16.gmra.mrb[120].mxu0 %vm4446_vm1, %v13735_v12  ;;  %v19244_v34 = vld [vmem:[#allocation56_spill] sm:$0xff]  ;;  %v11638_v12 = vld [vmem:[%s17735_s4 + $0xd8] sm:$0xff]   ;;  %v19248_v29 = vpack.c.bf16 %v19246_v26, %v19247_v4 }
 0x604   : > { %19238 = vst [vmem:[#allocation60_spill] sm:$0xff] %v15967_v48  ;;  %19241 = vst [vmem:[#allocation329_spill] sm:$0xff] %v15986_v8  ;;  %v15989_v35 = vmul.f32 %v15976_v19, %v5559_v14  ;;  %5944 = vmatprep.mubr.bf16.mxu0 %v18871_v16  ;;  %v19245_v61 = vpack.c.bf16 %v19243_v55, %v19244_v34  ;;  %7973 = vmatpush1.bf16.msra.mxu1 %v11638_v12  ;;  %v11996_v58 = vld [vmem:[%s13820_s14 + $0x48] sm:$0xff]  ;;  %v16019_v26 = vld [vmem:[%s13820_s14 + $0x1c0] sm:$0xff] }
 0x605   : > { %19240 = vst [vmem:[#allocation328_spill] sm:$0xff] %v15979_v59  ;;  %7974 = vmatprep.subr.bf16.mxu1 %v18871_v16 }
 0x606   : > { %19242 = vst [vmem:[#allocation330_spill] sm:$0xff] %v15989_v35  ;;  %7742 = vmatmul.mubr.bf16.gmra.mrb[24].mxu1 %v19245_v61  ;;  %v5676_v31 = vpop.f32.mrb[16].mxu0  ;;  %v11995_v61 = vld [vmem:[%s13820_s14 + $0x40] sm:$0xff]  ;;  %v16025_v35 = vld [vmem:[%s13820_s14 + $0x1c8] sm:$0xff] }
 0x607   : > { %7749 = vmatprep.mubr.bf16.mxu1 %v19248_v29  ;;  %v5678_v7 = vpop.f32.mrb[17].mxu0  ;;  %v16009_v55 = vmul.f32 %v11995_v61, %v5676_v31 }
 0x608   : > { %v5563_v1 = vpop.f32.mrb[176].mxu1  ;;  %v5680_v48 = vpop.f32.mrb[18].mxu0  ;;  %v16014_v8 = vmul.f32 %v11995_v61, %v5678_v7  ;;  %v19257_v61 = vld [vmem:[#allocation63_spill] sm:$0xff] }
 0x609   : > { %19249 = vst [vmem:[#allocation57_spill] sm:$0xff] %v16009_v55  ;;  %v5565_v34 = vpop.f32.mrb[177].mxu1  ;;  %v16012_v59 = vmul.f32 %v11996_v58, %v5680_v48  ;;  %v5682_v14 = vpop.f32.mrb[19].mxu0  ;;  %v16022_v12 = vmul.f32 %v16019_v26, %v5563_v1  ;;  %v19260_v55 = vld [vmem:[#allocation78_spill] sm:$0xff] }
 0x60a   : > { %19251 = vst [vmem:[#allocation70_spill] sm:$0xff] %v16014_v8  ;;  %v5567_v4 = vpop.f32.mrb[178].mxu1  ;;  %v16016_v29 = vmul.f32 %v11996_v58, %v5682_v14  ;;  %v16035_v7 = vmul.f32 %v16019_v26, %v5565_v34  ;;  %v19261_v34 = vld [vmem:[#allocation74_spill] sm:$0xff]  ;;  %v11999_v8 = vld [vmem:[%s13820_s14 + $0x50] sm:$0xff] }
 0x60b   : > { %19250 = vst [vmem:[#allocation56_spill] sm:$0xff] %v16012_v59  ;;  %19253 = vst [vmem:[#allocation331_spill] sm:$0xff] %v16022_v12  ;;  %v16028_v31 = vmul.f32 %v16025_v35, %v5567_v4  ;;  %v5569_v53 = vpop.f32.mrb[179].mxu1  ;;  %9477 = vmatmul.mubr.msk.bf16.gmra.mrb[124].mxu0 %vm4446_vm1, %v13745_v56  ;;  %v19258_v4 = vld [vmem:[#allocation62_spill] sm:$0xff]  ;;  %v19262_v59 = vpack.c.bf16 %v19260_v55, %v19261_v34  ;;  %v12000_v12 = vld [vmem:[%s13820_s14 + $0x58] sm:$0xff] }
 0x60c   : > { %19252 = vst [vmem:[#allocation69_spill] sm:$0xff] %v16016_v29  ;;  %19255 = vst [vmem:[#allocation333_spill] sm:$0xff] %v16035_v7  ;;  %v16038_v58 = vmul.f32 %v16025_v35, %v5569_v53  ;;  %v19259_v48 = vpack.c.bf16 %v19257_v61, %v19258_v4  ;;  %v16063_v55 = vld [vmem:[%s13820_s14 + $0x1d0] sm:$0xff]  ;;  %v16069_v34 = vld [vmem:[%s13820_s14 + $0x1d8] sm:$0xff] }
 0x60d   : > { %19254 = vst [vmem:[#allocation332_spill] sm:$0xff] %v16028_v31 }
 0x60e   : > { %19256 = vst [vmem:[#allocation334_spill] sm:$0xff] %v16038_v58  ;;  %7750 = vmatmul.mubr.bf16.gmra.mrb[28].mxu1 %v19259_v48  ;;  %v5686_v53 = vpop.f32.mrb[20].mxu0 }
 0x60f   : > { %7757 = vmatprep.mubr.bf16.mxu1 %v19262_v59  ;;  %v5688_v22 = vpop.f32.mrb[21].mxu0  ;;  %v16053_v29 = vmul.f32 %v11999_v8, %v5686_v53 }
 0x610   : > { %v5573_v11 = vpop.f32.mrb[180].mxu1  ;;  %v5690_v1 = vpop.f32.mrb[22].mxu0  ;;  %v16058_v4 = vmul.f32 %v11999_v8, %v5688_v22 }
 0x611   : > { %19263 = vst [vmem:[#allocation63_spill] sm:$0xff] %v16053_v29  ;;  %v5575_v14 = vpop.f32.mrb[181].mxu1  ;;  %v16056_v61 = vmul.f32 %v12000_v12, %v5690_v1  ;;  %v5692_v48 = vpop.f32.mrb[23].mxu0  ;;  %v16066_v59 = vmul.f32 %v16063_v55, %v5573_v11  ;;  %v11639_v1 = vld [vmem:[%s17735_s4 + $0xe0] sm:$0xff]  }
 0x612   : > { %19265 = vst [vmem:[#allocation78_spill] sm:$0xff] %v16058_v4  ;;  %v5577_v56 = vpop.f32.mrb[182].mxu1  ;;  %v16060_v31 = vmul.f32 %v12000_v12, %v5692_v48  ;;  %v16077_v22 = vmul.f32 %v16063_v55, %v5575_v14  ;;  %v19272_v48 = vld [vmem:[#allocation71_spill] sm:$0xff]  ;;  %v19275_v29 = vld [vmem:[#allocation94_spill] sm:$0xff]  ;;  %7975 = vmatpush1.bf16.msra.mxu1 %v11639_v1 }
 0x613   : > { %19264 = vst [vmem:[#allocation62_spill] sm:$0xff] %v16056_v61  ;;  %19267 = vst [vmem:[#allocation335_spill] sm:$0xff] %v16066_v59  ;;  %v16072_v53 = vmul.f32 %v16069_v34, %v5577_v56  ;;  %v5579_v7 = vpop.f32.mrb[183].mxu1  ;;  %v19271_v56 = vld [vmem:[#allocation72_spill] sm:$0xff]  ;;  %7976 = vmatprep.subr.bf16.mxu1 %v18871_v16  ;;  %v12004_v59 = vld [vmem:[%s13820_s14 + $0x68] sm:$0xff] }
 0x614   : > { %19266 = vst [vmem:[#allocation74_spill] sm:$0xff] %v16060_v31  ;;  %19269 = vst [vmem:[#allocation337_spill] sm:$0xff] %v16077_v22  ;;  %v16080_v8 = vmul.f32 %v16069_v34, %v5579_v7  ;;  %v19273_v58 = vpack.c.bf16 %v19271_v56, %v19272_v48  ;;  %v19274_v7 = vld [vmem:[#allocation95_spill] sm:$0xff] }
 0x615   : > { %19268 = vst [vmem:[#allocation336_spill] sm:$0xff] %v16072_v53  ;;  %v19276_v61 = vpack.c.bf16 %v19274_v7, %v19275_v29  ;;  %v16109_v7 = vld [vmem:[%s13820_s14 + $0x1e0] sm:$0xff] }
 0x616   : > { %19270 = vst [vmem:[#allocation338_spill] sm:$0xff] %v16080_v8  ;;  %7758 = vmatmul.mubr.bf16.gmra.mrb[32].mxu1 %v19273_v58  ;;  %v5696_v11 = vpop.f32.mrb[24].mxu0  ;;  %v12003_v58 = vld [vmem:[%s13820_s14 + $0x60] sm:$0xff]  ;;  %v16115_v8 = vld [vmem:[%s13820_s14 + $0x1e8] sm:$0xff] }
 0x617   : > { %7765 = vmatprep.mubr.bf16.mxu1 %v19276_v61  ;;  %v5698_v4 = vpop.f32.mrb[25].mxu0  ;;  %v16099_v56 = vmul.f32 %v12003_v58, %v5696_v11 }
 0x618   : > { %v5583_v12 = vpop.f32.mrb[184].mxu1  ;;  %v5700_v31 = vpop.f32.mrb[26].mxu0  ;;  %v16104_v22 = vmul.f32 %v12003_v58, %v5698_v4 }
 0x619   : > { %19277 = vst [vmem:[#allocation72_spill] sm:$0xff] %v16099_v56  ;;  %v5585_v48 = vpop.f32.mrb[185].mxu1  ;;  %v16102_v53 = vmul.f32 %v12004_v59, %v5700_v31  ;;  %v5702_v14 = vpop.f32.mrb[27].mxu0  ;;  %v16112_v1 = vmul.f32 %v16109_v7, %v5583_v12  ;;  %v19288_v56 = vld [vmem:[#allocation120_spill] sm:$0xff] }
 0x61a   : > { %19279 = vst [vmem:[#allocation95_spill] sm:$0xff] %v16104_v22  ;;  %v5587_v29 = vpop.f32.mrb[186].mxu1  ;;  %v16106_v61 = vmul.f32 %v12004_v59, %v5702_v14  ;;  %v16123_v58 = vmul.f32 %v16109_v7, %v5585_v48  ;;  %v19289_v48 = vld [vmem:[#allocation114_spill] sm:$0xff]  ;;  %v12007_v22 = vld [vmem:[%s13820_s14 + $0x70] sm:$0xff] }
 0x61b   : > { %19278 = vst [vmem:[#allocation71_spill] sm:$0xff] %v16102_v53  ;;  %19281 = vst [vmem:[#allocation339_spill] sm:$0xff] %v16112_v1  ;;  %v16118_v11 = vmul.f32 %v16115_v8, %v5587_v29  ;;  %v5589_v4 = vpop.f32.mrb[187].mxu1  ;;  %v19286_v29 = vld [vmem:[#allocation92_spill] sm:$0xff]  ;;  %v19290_v53 = vpack.c.bf16 %v19288_v56, %v19289_v48  ;;  %v12008_v1 = vld [vmem:[%s13820_s14 + $0x78] sm:$0xff] }
 0x61c   : > { %19280 = vst [vmem:[#allocation94_spill] sm:$0xff] %v16106_v61  ;;  %19283 = vst [vmem:[#allocation341_spill] sm:$0xff] %v16123_v58  ;;  %v16126_v59 = vmul.f32 %v16115_v8, %v5589_v4  ;;  %v19287_v45 = vpack.c.bf16 %v19285_v20, %v19286_v29  ;;  %v16151_v56 = vld [vmem:[%s13820_s14 + $0x1f0] sm:$0xff]  ;;  %v16157_v48 = vld [vmem:[%s13820_s14 + $0x1f8] sm:$0xff] }
 0x61d   : > { %19282 = vst [vmem:[#allocation340_spill] sm:$0xff] %v16118_v11 }
 0x61e   : > { %19284 = vst [vmem:[#allocation342_spill] sm:$0xff] %v16126_v59  ;;  %7766 = vmatmul.mubr.bf16.gmra.mrb[36].mxu1 %v19287_v45  ;;  %v5706_v4 = vpop.f32.mrb[28].mxu0 }
 0x61f   : > { %7773 = vmatprep.mubr.bf16.mxu1 %v19290_v53  ;;  %v5708_v41 = vpop.f32.mrb[29].mxu0  ;;  %v16141_v61 = vmul.f32 %v12007_v22, %v5706_v4 }
 0x620   : > { %v5593_v23 = vpop.f32.mrb[188].mxu1  ;;  %v5710_v12 = vpop.f32.mrb[30].mxu0  ;;  %v16146_v29 = vmul.f32 %v12007_v22, %v5708_v41 }
 0x621   : > { %19291 = vst [vmem:[#allocation93_spill] sm:$0xff] %v16141_v61  ;;  %v5595_v14 = vpop.f32.mrb[189].mxu1  ;;  %v16144_v20 = vmul.f32 %v12008_v1, %v5710_v12  ;;  %v5712_v45 = vpop.f32.mrb[31].mxu0  ;;  %v16154_v53 = vmul.f32 %v16151_v56, %v5593_v23  ;;  %v11640_v12 = vld [vmem:[%s17735_s4 + $0xe8] sm:$0xff]   ;;  %v19303_v61 = vld [vmem:[#allocation125_spill] sm:$0xff] }
 0x622   : > { %19293 = vst [vmem:[#allocation120_spill] sm:$0xff] %v16146_v29  ;;  %v5597_v31 = vpop.f32.mrb[190].mxu1  ;;  %v16148_v11 = vmul.f32 %v12008_v1, %v5712_v45  ;;  %v16165_v41 = vmul.f32 %v16151_v56, %v5595_v14  ;;  %v19300_v45 = vld [vmem:[#allocation106_spill] sm:$0xff]  ;;  %7977 = vmatpush1.bf16.msra.mxu1 %v11640_v12 }
 0x623   : > { %19292 = vst [vmem:[#allocation92_spill] sm:$0xff] %v16144_v20  ;;  %19295 = vst [vmem:[#allocation343_spill] sm:$0xff] %v16154_v53  ;;  %v16160_v4 = vmul.f32 %v16157_v48, %v5597_v31  ;;  %v5599_v58 = vpop.f32.mrb[191].mxu1  ;;  %v19299_v31 = vld [vmem:[#allocation107_spill] sm:$0xff]  ;;  %7978 = vmatprep.subr.bf16.mxu1 %v18871_v16 }
 0x624   : > { %19294 = vst [vmem:[#allocation114_spill] sm:$0xff] %v16148_v11  ;;  %19297 = vst [vmem:[#allocation345_spill] sm:$0xff] %v16165_v41  ;;  %v16168_v22 = vmul.f32 %v16157_v48, %v5599_v58  ;;  %v19301_v59 = vpack.c.bf16 %v19299_v31, %v19300_v45  ;;  %v19302_v58 = vld [vmem:[#allocation126_spill] sm:$0xff]  ;;  %v12012_v11 = vld [vmem:[%s13820_s14 + $0x88] sm:$0xff] }
 0x625   : > { %19296 = vst [vmem:[#allocation344_spill] sm:$0xff] %v16160_v4  ;;  %v19304_v20 = vpack.c.bf16 %v19302_v58, %v19303_v61  ;;  %v12011_v31 = vld [vmem:[%s13820_s14 + $0x80] sm:$0xff] }
 0x626   : > { %19298 = vst [vmem:[#allocation346_spill] sm:$0xff] %v16168_v22  ;;  %7774 = vmatmul.mubr.bf16.gmra.mrb[40].mxu1 %v19301_v59  ;;  %v5716_v40 = vpop.f32.mrb[32].mxu0 }
 0x627   : > { %7781 = vmatprep.mubr.bf16.mxu1 %v19304_v20  ;;  %v5718_v23 = vpop.f32.mrb[33].mxu0  ;;  %v16187_v59 = vmul.f32 %v12011_v31, %v5716_v40  ;;  %v12013_v20 = vld [vmem:[%s13820_s14 + $0x90] sm:$0xff] }
 0x628   : > { %v10684_v29 = vpop.f32.mrb[192].mxu1  ;;  %v5720_v1 = vpop.f32.mrb[34].mxu0  ;;  %v16192_v14 = vmul.f32 %v12011_v31, %v5718_v23  ;;  %v19312_v23 = vld [vmem:[#allocation16_spill] sm:$0xff] }
 0x629   : > { %19305 = vst [vmem:[#allocation107_spill] sm:$0xff] %v16187_v59  ;;  %v5989_v45 = vpop.f32.mrb[193].mxu1  ;;  %v16190_v53 = vmul.f32 %v12012_v11, %v5720_v1  ;;  %v5722_v4 = vpop.f32.mrb[35].mxu0  ;;  %v19309_v1 = vld [vmem:[#allocation122_spill] sm:$0xff]  ;;  %v19313_v31 = vld [vmem:[#allocation12_spill] sm:$0xff] }
 0x62a   : > { %19307 = vst [vmem:[#allocation126_spill] sm:$0xff] %v16192_v14  ;;  %v10685_v41 = vpop.f32.mrb[194].mxu1  ;;  %v16194_v61 = vmul.f32 %v12012_v11, %v5722_v4  ;;  %v19311_v10 = vpack.c.bf16 %v19309_v1, %v19310_v18  ;;  %v19314_v5 = vpack.c.bf16 %v19312_v23, %v19313_v31 }
 0x62b   : > { %19306 = vst [vmem:[#allocation106_spill] sm:$0xff] %v16190_v53  ;;  %v6773_v12 = vpack.c.bf16 %v10685_v41, %v10684_v29  ;;  %v5992_v58 = vpop.f32.mrb[195].mxu1  ;;  %v19319_v53 = vld [vmem:[#allocation10_spill] sm:$0xff] }
 0x62c   : > { %19308 = vst [vmem:[#allocation125_spill] sm:$0xff] %v16194_v61  ;;  %v6764_v22 = vpack.c.bf16 %v5992_v58, %v5989_v45  ;;  %v12014_v58 = vld [vmem:[%s13820_s14 + $0x98] sm:$0xff] }
 0x62e   : > { %7782 = vmatmul.mubr.bf16.gmra.mrb[44].mxu1 %v19311_v10  ;;  %10748 = vmatprep.mubr.msk.bf16.mxu0 %vm7560_vm3, %v6764_v22  ;;  %v5726_v11 = vpop.f32.mrb[36].mxu0  ;;  %v12016_v22 = vld [vmem:[%s13820_s14 + $0xa8] sm:$0xff] }
 0x62f   : > { %7789 = vmatprep.mubr.bf16.mxu1 %v19314_v5  ;;  %10749 = vmatmul.mubr.msk.bf16.vlgmr.msra.gmra.mrb[128].mxu0 %vm7560_vm3, %v6773_v12  ;;  %v5728_v29 = vpop.f32.mrb[37].mxu0  ;;  %v16209_v59 = vmul.f32 %v12013_v20, %v5726_v11 }
 0x630   : > { %v10688_v4 = vpop.f32.mrb[196].mxu1  ;;  %v5730_v41 = vpop.f32.mrb[38].mxu0  ;;  %v16214_v10 = vmul.f32 %v12013_v20, %v5728_v29  ;;  %v11641_v20 = vld [vmem:[%s17735_s4 + $0xf0] sm:$0xff]  }
 0x631   : > { %19315 = vst [vmem:[#allocation122_spill] sm:$0xff] %v16209_v59  ;;  %v6005_v45 = vpop.f32.mrb[197].mxu1  ;;  %v16212_v40 = vmul.f32 %v12014_v58, %v5730_v41  ;;  %v5732_v18 = vpop.f32.mrb[39].mxu0  ;;  %v19320_v41 = vld [vmem:[#allocation9_spill] sm:$0xff]  ;;  %v19322_v29 = vld [vmem:[#allocation32_spill] sm:$0xff]  ;;  %7979 = vmatpush1.bf16.msra.mxu1 %v11641_v20 }
 0x632   : > { %19317 = vst [vmem:[#allocation16_spill] sm:$0xff] %v16214_v10  ;;  %v10689_v1 = vpop.f32.mrb[198].mxu1  ;;  %v16216_v5 = vmul.f32 %v12014_v58, %v5732_v18  ;;  %v19321_v14 = vpack.c.bf16 %v19319_v53, %v19320_v41  ;;  %v19323_v58 = vld [vmem:[#allocation28_spill] sm:$0xff]  ;;  %7980 = vmatprep.subr.bf16.mxu1 %v18871_v16  ;;  %v12015_v53 = vld [vmem:[%s13820_s14 + $0xa0] sm:$0xff]  ;;  %v19329_v10 = vld [vmem:[#allocation27_spill] sm:$0xff] }
 0x633   : > { %19316 = vst [vmem:[#allocation119_spill] sm:$0xff] %v16212_v40  ;;  %v6791_v12 = vpack.c.bf16 %v10689_v1, %v10688_v4  ;;  %v6008_v23 = vpop.f32.mrb[199].mxu1  ;;  %v19324_v18 = vpack.c.bf16 %v19322_v29, %v19323_v58 }
 0x634   : > { %19318 = vst [vmem:[#allocation12_spill] sm:$0xff] %v16216_v5  ;;  %v6782_v11 = vpack.c.bf16 %v6008_v23, %v6005_v45 }
 0x636   : > { %7790 = vmatmul.mubr.bf16.gmra.mrb[48].mxu1 %v19321_v14  ;;  %10752 = vmatprep.mubr.msk.bf16.mxu0 %vm7560_vm3, %v6782_v11  ;;  %v5736_v4 = vpop.f32.mrb[40].mxu0 }
 0x637   : > { %7797 = vmatprep.mubr.bf16.mxu1 %v19324_v18  ;;  %10753 = vmatmul.mubr.msk.bf16.gmra.mrb[132].mxu0 %vm7560_vm3, %v6791_v12  ;;  %v5738_v1 = vpop.f32.mrb[41].mxu0  ;;  %v16235_v14 = vmul.f32 %v12015_v53, %v5736_v4  ;;  %v12017_v12 = vld [vmem:[%s13820_s14 + $0xb0] sm:$0xff] }
 0x638   : > { %v10692_v45 = vpop.f32.mrb[200].mxu1  ;;  %v5740_v23 = vpop.f32.mrb[42].mxu0  ;;  %v16240_v58 = vmul.f32 %v12015_v53, %v5738_v1  ;;  %v19332_v1 = vld [vmem:[#allocation48_spill] sm:$0xff]  ;;  %v19333_v53 = vld [vmem:[#allocation43_spill] sm:$0xff] }
 0x639   : > { %19325 = vst [vmem:[#allocation10_spill] sm:$0xff] %v16235_v14  ;;  %v6021_v41 = vpop.f32.mrb[201].mxu1  ;;  %v16238_v31 = vmul.f32 %v12016_v22, %v5740_v23  ;;  %v5742_v29 = vpop.f32.mrb[43].mxu0  ;;  %v19330_v23 = vld [vmem:[#allocation26_spill] sm:$0xff]  ;;  %v19334_v61 = vpack.c.bf16 %v19332_v1, %v19333_v53 }
 0x63a   : > { %19327 = vst [vmem:[#allocation32_spill] sm:$0xff] %v16240_v58  ;;  %v10693_v11 = vpop.f32.mrb[202].mxu1  ;;  %v16242_v18 = vmul.f32 %v12016_v22, %v5742_v29  ;;  %v19331_v5 = vpack.c.bf16 %v19329_v10, %v19330_v23 }
 0x63b   : > { %19326 = vst [vmem:[#allocation9_spill] sm:$0xff] %v16238_v31  ;;  %v6809_v20 = vpack.c.bf16 %v10693_v11, %v10692_v45  ;;  %v6024_v59 = vpop.f32.mrb[203].mxu1  ;;  %v19339_v31 = vld [vmem:[#allocation42_spill] sm:$0xff] }
 0x63c   : > { %19328 = vst [vmem:[#allocation28_spill] sm:$0xff] %v16242_v18  ;;  %v6800_v40 = vpack.c.bf16 %v6024_v59, %v6021_v41  ;;  %v12018_v41 = vld [vmem:[%s13820_s14 + $0xb8] sm:$0xff] }
 0x63e   : > { %7798 = vmatmul.mubr.bf16.gmra.mrb[52].mxu1 %v19331_v5  ;;  %10756 = vmatprep.mubr.msk.bf16.mxu0 %vm7560_vm3, %v6800_v40  ;;  %v5746_v22 = vpop.f32.mrb[44].mxu0  ;;  %v12020_v40 = vld [vmem:[%s13820_s14 + $0xc8] sm:$0xff] }
 0x63f   : > { %7805 = vmatprep.mubr.bf16.mxu1 %v19334_v61  ;;  %10757 = vmatmul.mubr.msk.bf16.gmra.mrb[136].mxu0 %vm7560_vm3, %v6809_v20  ;;  %v5748_v29 = vpop.f32.mrb[45].mxu0  ;;  %v16257_v14 = vmul.f32 %v12017_v12, %v5746_v22 }
 0x640   : > { %v10696_v45 = vpop.f32.mrb[204].mxu1  ;;  %v5750_v11 = vpop.f32.mrb[46].mxu0  ;;  %v16262_v5 = vmul.f32 %v12017_v12, %v5748_v29  ;;  %v11642_v12 = vld [vmem:[%s17735_s4 + $0xf8] sm:$0xff]   ;;  %v19342_v29 = vld [vmem:[#allocation64_spill] sm:$0xff] }
 0x641   : > { %19335 = vst [vmem:[#allocation27_spill] sm:$0xff] %v16257_v14  ;;  %v6037_v59 = vpop.f32.mrb[205].mxu1  ;;  %v16260_v4 = vmul.f32 %v12018_v41, %v5750_v11  ;;  %v5752_v10 = vpop.f32.mrb[47].mxu0  ;;  %v19340_v11 = vld [vmem:[#allocation41_spill] sm:$0xff]  ;;  %7981 = vmatpush1.bf16.msra.mxu1 %v11642_v12 }
 0x642   : > { %19337 = vst [vmem:[#allocation48_spill] sm:$0xff] %v16262_v5  ;;  %v10697_v23 = vpop.f32.mrb[206].mxu1  ;;  %v16264_v61 = vmul.f32 %v12018_v41, %v5752_v10  ;;  %v19341_v58 = vpack.c.bf16 %v19339_v31, %v19340_v11  ;;  %v19343_v41 = vld [vmem:[#allocation59_spill] sm:$0xff]  ;;  %8239 = vmatprep.subr.bf16.mxu1 %v18871_v16  ;;  %v12019_v31 = vld [vmem:[%s13820_s14 + $0xc0] sm:$0xff] }
 0x643   : > { %19336 = vst [vmem:[#allocation26_spill] sm:$0xff] %v16260_v4  ;;  %v6827_v20 = vpack.c.bf16 %v10697_v23, %v10696_v45  ;;  %v6040_v1 = vpop.f32.mrb[207].mxu1  ;;  %v19344_v10 = vpack.c.bf16 %v19342_v29, %v19343_v41  ;;  %v19349_v5 = vld [vmem:[#allocation58_spill] sm:$0xff] }
 0x644   : > { %19338 = vst [vmem:[#allocation43_spill] sm:$0xff] %v16264_v61  ;;  %v6818_v22 = vpack.c.bf16 %v6040_v1, %v6037_v59 }
 0x646   : > { %7806 = vmatmul.mubr.bf16.gmra.mrb[56].mxu1 %v19341_v58  ;;  %10760 = vmatprep.mubr.msk.bf16.mxu0 %vm7560_vm3, %v6818_v22  ;;  %v5756_v45 = vpop.f32.mrb[48].mxu0 }
 0x647   : > { %7813 = vmatprep.mubr.bf16.mxu1 %v19344_v10  ;;  %10761 = vmatmul.mubr.msk.bf16.gmra.mrb[140].mxu0 %vm7560_vm3, %v6827_v20  ;;  %v5758_v23 = vpop.f32.mrb[49].mxu0  ;;  %v16283_v58 = vmul.f32 %v12019_v31, %v5756_v45  ;;  %v12021_v20 = vld [vmem:[%s13820_s14 + $0xd0] sm:$0xff] }
 0x648   : > { %v10700_v59 = vpop.f32.mrb[208].mxu1  ;;  %v5760_v1 = vpop.f32.mrb[50].mxu0  ;;  %v16288_v41 = vmul.f32 %v12019_v31, %v5758_v23  ;;  %v19352_v23 = vld [vmem:[#allocation77_spill] sm:$0xff]  ;;  %v19353_v31 = vld [vmem:[#allocation76_spill] sm:$0xff] }
 0x649   : > { %19345 = vst [vmem:[#allocation42_spill] sm:$0xff] %v16283_v58  ;;  %v6053_v11 = vpop.f32.mrb[209].mxu1  ;;  %v16286_v53 = vmul.f32 %v12020_v40, %v5760_v1  ;;  %v5762_v29 = vpop.f32.mrb[51].mxu0  ;;  %v19350_v1 = vld [vmem:[#allocation55_spill] sm:$0xff]  ;;  %v19354_v18 = vpack.c.bf16 %v19352_v23, %v19353_v31 }
 0x64a   : > { %19347 = vst [vmem:[#allocation64_spill] sm:$0xff] %v16288_v41  ;;  %v10701_v22 = vpop.f32.mrb[210].mxu1  ;;  %v16290_v10 = vmul.f32 %v12020_v40, %v5762_v29  ;;  %v19351_v61 = vpack.c.bf16 %v19349_v5, %v19350_v1 }
 0x64b   : > { %19346 = vst [vmem:[#allocation41_spill] sm:$0xff] %v16286_v53  ;;  %v6845_v12 = vpack.c.bf16 %v10701_v22, %v10700_v59  ;;  %v6056_v14 = vpop.f32.mrb[211].mxu1  ;;  %v19359_v53 = vld [vmem:[#allocation75_spill] sm:$0xff] }
 0x64c   : > { %19348 = vst [vmem:[#allocation59_spill] sm:$0xff] %v16290_v10  ;;  %v6836_v4 = vpack.c.bf16 %v6056_v14, %v6053_v11  ;;  %v12022_v11 = vld [vmem:[%s13820_s14 + $0xd8] sm:$0xff] }
 0x64e   : > { %7814 = vmatmul.mubr.bf16.gmra.mrb[60].mxu1 %v19351_v61  ;;  %10764 = vmatprep.mubr.msk.bf16.mxu0 %vm7560_vm3, %v6836_v4  ;;  %v5766_v40 = vpop.f32.mrb[52].mxu0  ;;  %v12023_v4 = vld [vmem:[%s13820_s14 + $0xe0] sm:$0xff] }
 0x64f   : > { %7821 = vmatprep.mubr.bf16.mxu1 %v19354_v18  ;;  %10765 = vmatmul.mubr.msk.bf16.gmra.mrb[144].mxu0 %vm7560_vm3, %v6845_v12  ;;  %v5768_v29 = vpop.f32.mrb[53].mxu0  ;;  %v16305_v58 = vmul.f32 %v12021_v20, %v5766_v40 }
 0x650   : > { %v10704_v59 = vpop.f32.mrb[212].mxu1  ;;  %v5770_v22 = vpop.f32.mrb[54].mxu0  ;;  %v16310_v61 = vmul.f32 %v12021_v20, %v5768_v29  ;;  %v19362_v20 = vld [vmem:[#allocation90_spill] sm:$0xff]  ;;  %v19363_v29 = vld [vmem:[#allocation89_spill] sm:$0xff] }
 0x651   : > { %19355 = vst [vmem:[#allocation58_spill] sm:$0xff] %v16305_v58  ;;  %v6069_v14 = vpop.f32.mrb[213].mxu1  ;;  %v16308_v45 = vmul.f32 %v12022_v11, %v5770_v22  ;;  %v5772_v5 = vpop.f32.mrb[55].mxu0  ;;  %v19360_v22 = vld [vmem:[#allocation73_spill] sm:$0xff]  ;;  %v19364_v10 = vpack.c.bf16 %v19362_v20, %v19363_v29 }
 0x652   : > { %19357 = vst [vmem:[#allocation77_spill] sm:$0xff] %v16310_v61  ;;  %v10705_v18 = vpop.f32.mrb[214].mxu1  ;;  %v16312_v1 = vmul.f32 %v12022_v11, %v5772_v5  ;;  %v19361_v41 = vpack.c.bf16 %v19359_v53, %v19360_v22 }
 0x653   : > { %19356 = vst [vmem:[#allocation55_spill] sm:$0xff] %v16308_v45  ;;  %v6863_v12 = vpack.c.bf16 %v10705_v18, %v10704_v59  ;;  %v6072_v23 = vpop.f32.mrb[215].mxu1  ;;  %v19369_v45 = vld [vmem:[#allocation88_spill] sm:$0xff] }
 0x654   : > { %19358 = vst [vmem:[#allocation76_spill] sm:$0xff] %v16312_v1  ;;  %v6854_v40 = vpack.c.bf16 %v6072_v23, %v6069_v14  ;;  %v12024_v23 = vld [vmem:[%s13820_s14 + $0xe8] sm:$0xff] }
 0x656   : > { %7822 = vmatmul.mubr.bf16.gmra.mrb[64].mxu1 %v19361_v41  ;;  %10768 = vmatprep.mubr.msk.bf16.mxu0 %vm7560_vm3, %v6854_v40  ;;  %v5776_v11 = vpop.f32.mrb[56].mxu0 }
 0x657   : > { %7829 = vmatprep.mubr.bf16.mxu1 %v19364_v10  ;;  %10769 = vmatmul.mubr.msk.bf16.gmra.mrb[148].mxu0 %vm7560_vm3, %v6863_v12  ;;  %v5778_v5 = vpop.f32.mrb[57].mxu0  ;;  %v16327_v58 = vmul.f32 %v12023_v4, %v5776_v11  ;;  %v12025_v12 = vld [vmem:[%s13820_s14 + $0xf0] sm:$0xff] }
 0x658   : > { %v10708_v59 = vpop.f32.mrb[216].mxu1  ;;  %v5780_v18 = vpop.f32.mrb[58].mxu0  ;;  %v16332_v41 = vmul.f32 %v12023_v4, %v5778_v5  ;;  %v19372_v4 = vld [vmem:[#allocation110_spill] sm:$0xff]  ;;  %v19373_v5 = vld [vmem:[#allocation109_spill] sm:$0xff] }
 0x659   : > { %19365 = vst [vmem:[#allocation75_spill] sm:$0xff] %v16327_v58  ;;  %v6085_v14 = vpop.f32.mrb[217].mxu1  ;;  %v16330_v31 = vmul.f32 %v12024_v23, %v5780_v18  ;;  %v5782_v53 = vpop.f32.mrb[59].mxu0  ;;  %v19370_v18 = vld [vmem:[#allocation87_spill] sm:$0xff]  ;;  %v19374_v1 = vpack.c.bf16 %v19372_v4, %v19373_v5 }
 0x65a   : > { %19367 = vst [vmem:[#allocation90_spill] sm:$0xff] %v16332_v41  ;;  %v10709_v10 = vpop.f32.mrb[218].mxu1  ;;  %v16334_v22 = vmul.f32 %v12024_v23, %v5782_v53  ;;  %v19371_v61 = vpack.c.bf16 %v19369_v45, %v19370_v18 }
 0x65b   : > { %19366 = vst [vmem:[#allocation73_spill] sm:$0xff] %v16330_v31  ;;  %v6881_v40 = vpack.c.bf16 %v10709_v10, %v10708_v59  ;;  %v6088_v20 = vpop.f32.mrb[219].mxu1  ;;  %v19379_v31 = vld [vmem:[#allocation108_spill] sm:$0xff] }
 0x65c   : > { %19368 = vst [vmem:[#allocation89_spill] sm:$0xff] %v16334_v22  ;;  %v6872_v11 = vpack.c.bf16 %v6088_v20, %v6085_v14  ;;  %v12026_v20 = vld [vmem:[%s13820_s14 + $0xf8] sm:$0xff] }
 0x65e   : > { %7830 = vmatmul.mubr.bf16.gmra.mrb[68].mxu1 %v19371_v61  ;;  %10772 = vmatprep.mubr.msk.bf16.mxu0 %vm7560_vm3, %v6872_v11  ;;  %v5786_v23 = vpop.f32.mrb[60].mxu0 }
 0x65f   : > { %7837 = vmatprep.mubr.bf16.mxu1 %v19374_v1  ;;  %10773 = vmatmul.mubr.msk.bf16.gmra.mrb[152].mxu0 %vm7560_vm3, %v6881_v40  ;;  %v5788_v53 = vpop.f32.mrb[61].mxu0  ;;  %v16349_v58 = vmul.f32 %v12025_v12, %v5786_v23  ;;  %v12027_v40 = vld [vmem:[%s13820_s14 + $0x100] sm:$0xff] }
 0x660   : > { %v10712_v59 = vpop.f32.mrb[220].mxu1  ;;  %v5790_v10 = vpop.f32.mrb[62].mxu0  ;;  %v16354_v61 = vmul.f32 %v12025_v12, %v5788_v53  ;;  %v19382_v12 = vld [vmem:[#allocation124_spill] sm:$0xff]  ;;  %v19383_v53 = vld [vmem:[#allocation123_spill] sm:$0xff] }
 0x661   : > { %19375 = vst [vmem:[#allocation88_spill] sm:$0xff] %v16349_v58  ;;  %v6101_v14 = vpop.f32.mrb[221].mxu1  ;;  %v16352_v29 = vmul.f32 %v12026_v20, %v5790_v10  ;;  %v5792_v45 = vpop.f32.mrb[63].mxu0  ;;  %v19380_v10 = vld [vmem:[#allocation103_spill] sm:$0xff]  ;;  %v19384_v22 = vpack.c.bf16 %v19382_v12, %v19383_v53 }
 0x662   : > { %19377 = vst [vmem:[#allocation110_spill] sm:$0xff] %v16354_v61  ;;  %v10713_v1 = vpop.f32.mrb[222].mxu1  ;;  %v16356_v18 = vmul.f32 %v12026_v20, %v5792_v45  ;;  %v19381_v41 = vpack.c.bf16 %v19379_v31, %v19380_v10 }
 0x663   : > { %19376 = vst [vmem:[#allocation87_spill] sm:$0xff] %v16352_v29  ;;  %v6899_v11 = vpack.c.bf16 %v10713_v1, %v10712_v59  ;;  %v6104_v4 = vpop.f32.mrb[223].mxu1  ;;  %v19389_v29 = vld [vmem:[#allocation121_spill] sm:$0xff] }
 0x664   : > { %19378 = vst [vmem:[#allocation109_spill] sm:$0xff] %v16356_v18  ;;  %v6890_v23 = vpack.c.bf16 %v6104_v4, %v6101_v14  ;;  %v12028_v4 = vld [vmem:[%s13820_s14 + $0x108] sm:$0xff] }
 0x666   : > { %7838 = vmatmul.mubr.bf16.gmra.mrb[72].mxu1 %v19381_v41  ;;  %10776 = vmatprep.mubr.msk.bf16.mxu0 %vm7560_vm3, %v6890_v23  ;;  %v5796_v20 = vpop.f32.mrb[64].mxu0 }
 0x667   : > { %7845 = vmatprep.mubr.bf16.mxu1 %v19384_v22  ;;  %10777 = vmatmul.mubr.msk.bf16.gmra.mrb[156].mxu0 %vm7560_vm3, %v6899_v11  ;;  %v5798_v45 = vpop.f32.mrb[65].mxu0  ;;  %v16371_v58 = vmul.f32 %v12027_v40, %v5796_v20  ;;  %v12029_v11 = vld [vmem:[%s13820_s14 + $0x110] sm:$0xff] }
 0x668   : > { %v10716_v59 = vpop.f32.mrb[224].mxu1  ;;  %v5800_v1 = vpop.f32.mrb[66].mxu0  ;;  %v16376_v41 = vmul.f32 %v12027_v40, %v5798_v45  ;;  %v19392_v40 = vld [vmem:[#allocation134_spill] sm:$0xff]  ;;  %v19393_v45 = vld [vmem:[#allocation133_spill] sm:$0xff] }
 0x669   : > { %19385 = vst [vmem:[#allocation108_spill] sm:$0xff] %v16371_v58  ;;  %v6117_v14 = vpop.f32.mrb[225].mxu1  ;;  %v16374_v5 = vmul.f32 %v12028_v4, %v5800_v1  ;;  %v5802_v31 = vpop.f32.mrb[67].mxu0  ;;  %v19390_v1 = vld [vmem:[#allocation118_spill] sm:$0xff]  ;;  %v19394_v18 = vpack.c.bf16 %v19392_v40, %v19393_v45 }
 0x66a   : > { %19387 = vst [vmem:[#allocation124_spill] sm:$0xff] %v16376_v41  ;;  %v10717_v22 = vpop.f32.mrb[226].mxu1  ;;  %v16378_v10 = vmul.f32 %v12028_v4, %v5802_v31  ;;  %v19391_v61 = vpack.c.bf16 %v19389_v29, %v19390_v1 }
 0x66b   : > { %19386 = vst [vmem:[#allocation103_spill] sm:$0xff] %v16374_v5  ;;  %v6917_v23 = vpack.c.bf16 %v10717_v22, %v10716_v59  ;;  %v6120_v12 = vpop.f32.mrb[227].mxu1  ;;  %v19399_v5 = vld [vmem:[#allocation132_spill] sm:$0xff] }
 0x66c   : > { %19388 = vst [vmem:[#allocation123_spill] sm:$0xff] %v16378_v10  ;;  %v6908_v20 = vpack.c.bf16 %v6120_v12, %v6117_v14  ;;  %v12030_v12 = vld [vmem:[%s13820_s14 + $0x118] sm:$0xff] }
 0x66e   : > { %7846 = vmatmul.mubr.bf16.gmra.mrb[76].mxu1 %v19391_v61  ;;  %10780 = vmatprep.mubr.msk.bf16.mxu0 %vm7560_vm3, %v6908_v20  ;;  %v5806_v4 = vpop.f32.mrb[68].mxu0 }
 0x66f   : > { %7853 = vmatprep.mubr.bf16.mxu1 %v19394_v18  ;;  %10781 = vmatmul.mubr.msk.bf16.gmra.mrb[160].mxu0 %vm7560_vm3, %v6917_v23  ;;  %v5808_v31 = vpop.f32.mrb[69].mxu0  ;;  %v16393_v58 = vmul.f32 %v12029_v11, %v5806_v4  ;;  %v12031_v23 = vld [vmem:[%s13820_s14 + $0x120] sm:$0xff] }
 0x670   : > { %v10720_v59 = vpop.f32.mrb[228].mxu1  ;;  %v5810_v22 = vpop.f32.mrb[70].mxu0  ;;  %v16398_v61 = vmul.f32 %v12029_v11, %v5808_v31  ;;  %v19402_v11 = vld [vmem:[#allocation142_spill] sm:$0xff]  ;;  %v19403_v31 = vld [vmem:[#allocation141_spill] sm:$0xff] }
 0x671   : > { %19395 = vst [vmem:[#allocation121_spill] sm:$0xff] %v16393_v58  ;;  %v6133_v14 = vpop.f32.mrb[229].mxu1  ;;  %v16396_v53 = vmul.f32 %v12030_v12, %v5810_v22  ;;  %v5812_v29 = vpop.f32.mrb[71].mxu0  ;;  %v19400_v22 = vld [vmem:[#allocation131_spill] sm:$0xff]  ;;  %v19404_v10 = vpack.c.bf16 %v19402_v11, %v19403_v31 }
 0x672   : > { %19397 = vst [vmem:[#allocation134_spill] sm:$0xff] %v16398_v61  ;;  %v10721_v18 = vpop.f32.mrb[230].mxu1  ;;  %v16400_v1 = vmul.f32 %v12030_v12, %v5812_v29  ;;  %v19401_v41 = vpack.c.bf16 %v19399_v5, %v19400_v22 }
 0x673   : > { %19396 = vst [vmem:[#allocation118_spill] sm:$0xff] %v16396_v53  ;;  %v6935_v20 = vpack.c.bf16 %v10721_v18, %v10720_v59  ;;  %v6136_v40 = vpop.f32.mrb[231].mxu1  ;;  %v19408_v53 = vld [vmem:[#allocation140_spill] sm:$0xff] }
 0x674   : > { %19398 = vst [vmem:[#allocation133_spill] sm:$0xff] %v16400_v1  ;;  %v6926_v4 = vpack.c.bf16 %v6136_v40, %v6133_v14  ;;  %v12032_v40 = vld [vmem:[%s13820_s14 + $0x128] sm:$0xff] }
 0x676   : > { %7854 = vmatmul.mubr.bf16.gmra.mrb[80].mxu1 %v19401_v41  ;;  %10784 = vmatprep.mubr.msk.bf16.mxu0 %vm7560_vm3, %v6926_v4  ;;  %v5816_v12 = vpop.f32.mrb[72].mxu0 }
 0x677   : > { %7861 = vmatprep.mubr.bf16.mxu1 %v19404_v10  ;;  %10785 = vmatmul.mubr.msk.bf16.gmra.mrb[164].mxu0 %vm7560_vm3, %v6935_v20  ;;  %v5818_v29 = vpop.f32.mrb[73].mxu0  ;;  %v16415_v58 = vmul.f32 %v12031_v23, %v5816_v12  ;;  %v12033_v20 = vld [vmem:[%s13820_s14 + $0x130] sm:$0xff] }
 0x678   : > { %v10724_v59 = vpop.f32.mrb[232].mxu1  ;;  %v5820_v18 = vpop.f32.mrb[74].mxu0  ;;  %v16420_v41 = vmul.f32 %v12031_v23, %v5818_v29  ;;  %v19411_v23 = vld [vmem:[#allocation150_spill] sm:$0xff]  ;;  %v19412_v29 = vld [vmem:[#allocation149_spill] sm:$0xff] }
 0x679   : > { %19405 = vst [vmem:[#allocation132_spill] sm:$0xff] %v16415_v58  ;;  %v6149_v14 = vpop.f32.mrb[233].mxu1  ;;  %v16418_v45 = vmul.f32 %v12032_v40, %v5820_v18  ;;  %v5822_v5 = vpop.f32.mrb[75].mxu0  ;;  %v19409_v18 = vld [vmem:[#allocation139_spill] sm:$0xff]  ;;  %v19413_v1 = vpack.c.bf16 %v19411_v23, %v19412_v29 }
 0x67a   : > { %19407 = vst [vmem:[#allocation142_spill] sm:$0xff] %v16420_v41  ;;  %v10725_v10 = vpop.f32.mrb[234].mxu1  ;;  %v16422_v22 = vmul.f32 %v12032_v40, %v5822_v5  ;;  %v19410_v61 = vpack.c.bf16 %v19408_v53, %v19409_v18 }
 0x67b   : > { %19406 = vst [vmem:[#allocation131_spill] sm:$0xff] %v16418_v45  ;;  %v6953_v4 = vpack.c.bf16 %v10725_v10, %v10724_v59  ;;  %v6152_v11 = vpop.f32.mrb[235].mxu1  ;;  %v19418_v45 = vld [vmem:[#allocation148_spill] sm:$0xff] }
 0x67c   : > { %v6944_v12 = vpack.c.bf16 %v6152_v11, %v6149_v14  ;;  %v12034_v11 = vld [vmem:[%s13820_s14 + $0x138] sm:$0xff] }
 0x67e   : > { %7862 = vmatmul.mubr.bf16.gmra.mrb[84].mxu1 %v19410_v61  ;;  %10788 = vmatprep.mubr.msk.bf16.mxu0 %vm7560_vm3, %v6944_v12  ;;  %v5826_v40 = vpop.f32.mrb[76].mxu0 }
 0x67f   : > { %7869 = vmatprep.mubr.bf16.mxu1 %v19413_v1  ;;  %10789 = vmatmul.mubr.msk.bf16.gmra.mrb[168].mxu0 %vm7560_vm3, %v6953_v4  ;;  %v5828_v5 = vpop.f32.mrb[77].mxu0  ;;  %v16437_v58 = vmul.f32 %v12033_v20, %v5826_v40  ;;  %v12035_v4 = vld [vmem:[%s13820_s14 + $0x140] sm:$0xff] }
 0x680   : > { %v10728_v59 = vpop.f32.mrb[236].mxu1  ;;  %v5830_v10 = vpop.f32.mrb[78].mxu0  ;;  %v16442_v61 = vmul.f32 %v12033_v20, %v5828_v5  ;;  %v19421_v20 = vld [vmem:[#allocation157_spill] sm:$0xff] }
 0x681   : > { %19414 = vst [vmem:[#allocation141_spill] sm:$0xff] %v16437_v58  ;;  %v6165_v14 = vpop.f32.mrb[237].mxu1  ;;  %v16440_v31 = vmul.f32 %v12034_v11, %v5830_v10  ;;  %v5832_v53 = vpop.f32.mrb[79].mxu0  ;;  %v19419_v10 = vld [vmem:[#allocation147_spill] sm:$0xff]  ;;  %v19422_v5 = vpack.c.bf16 %v14674_v63, %v19421_v20 }
 0x682   : > { %19416 = vst [vmem:[#allocation139_spill] sm:$0xff] %v16442_v61  ;;  %v10729_v1 = vpop.f32.mrb[238].mxu1  ;;  %v16444_v18 = vmul.f32 %v12034_v11, %v5832_v53  ;;  %v19420_v41 = vpack.c.bf16 %v19418_v45, %v19419_v10 }
 0x683   : > { %19415 = vst [vmem:[#allocation140_spill] sm:$0xff] %v16440_v31  ;;  %v6971_v12 = vpack.c.bf16 %v10729_v1, %v10728_v59  ;;  %v6168_v23 = vpop.f32.mrb[239].mxu1  ;;  %v19427_v31 = vld [vmem:[#allocation156_spill] sm:$0xff] }
 0x684   : > { %19417 = vst [vmem:[#allocation150_spill] sm:$0xff] %v16444_v18  ;;  %v6962_v40 = vpack.c.bf16 %v6168_v23, %v6165_v14  ;;  %v12036_v23 = vld [vmem:[%s13820_s14 + $0x148] sm:$0xff] }
 0x686   : > { %7870 = vmatmul.mubr.bf16.gmra.mrb[88].mxu1 %v19420_v41  ;;  %10792 = vmatprep.mubr.msk.bf16.mxu0 %vm7560_vm3, %v6962_v40  ;;  %v5836_v11 = vpop.f32.mrb[80].mxu0 }
 0x687   : > { %7877 = vmatprep.mubr.bf16.mxu1 %v19422_v5  ;;  %10793 = vmatmul.mubr.msk.bf16.gmra.mrb[172].mxu0 %vm7560_vm3, %v6971_v12  ;;  %v5838_v53 = vpop.f32.mrb[81].mxu0  ;;  %v16459_v58 = vmul.f32 %v12035_v4, %v5836_v11  ;;  %v12037_v12 = vld [vmem:[%s13820_s14 + $0x150] sm:$0xff] }
 0x688   : > { %v10732_v59 = vpop.f32.mrb[240].mxu1  ;;  %v5840_v1 = vpop.f32.mrb[82].mxu0  ;;  %v16464_v41 = vmul.f32 %v12035_v4, %v5838_v53  ;;  %v19430_v4 = vld [vmem:[#allocation165_spill] sm:$0xff]  ;;  %v19431_v53 = vld [vmem:[#allocation164_spill] sm:$0xff] }
 0x689   : > { %19423 = vst [vmem:[#allocation149_spill] sm:$0xff] %v16459_v58  ;;  %v6181_v14 = vpop.f32.mrb[241].mxu1  ;;  %v16462_v29 = vmul.f32 %v12036_v23, %v5840_v1  ;;  %v5842_v45 = vpop.f32.mrb[83].mxu0  ;;  %v19428_v1 = vld [vmem:[#allocation155_spill] sm:$0xff]  ;;  %v19432_v18 = vpack.c.bf16 %v19430_v4, %v19431_v53 }
 0x68a   : > { %19425 = vst [vmem:[#allocation147_spill] sm:$0xff] %v16464_v41  ;;  %v10733_v63 = vpop.f32.mrb[242].mxu1  ;;  %v16466_v10 = vmul.f32 %v12036_v23, %v5842_v45  ;;  %v19429_v61 = vpack.c.bf16 %v19427_v31, %v19428_v1 }
 0x68b   : > { %19424 = vst [vmem:[#allocation148_spill] sm:$0xff] %v16462_v29  ;;  %v6989_v40 = vpack.c.bf16 %v10733_v63, %v10732_v59  ;;  %v6184_v20 = vpop.f32.mrb[243].mxu1  ;;  %v19437_v29 = vld [vmem:[#allocation163_spill] sm:$0xff] }
 0x68c   : > { %19426 = vst [vmem:[#allocation157_spill] sm:$0xff] %v16466_v10  ;;  %v6980_v11 = vpack.c.bf16 %v6184_v20, %v6181_v14  ;;  %v12038_v20 = vld [vmem:[%s13820_s14 + $0x158] sm:$0xff] }
 0x68e   : > { %7878 = vmatmul.mubr.bf16.gmra.mrb[92].mxu1 %v19429_v61  ;;  %10796 = vmatprep.mubr.msk.bf16.mxu0 %vm7560_vm3, %v6980_v11  ;;  %v5846_v23 = vpop.f32.mrb[84].mxu0 }
 0x68f   : > { %7885 = vmatprep.mubr.bf16.mxu1 %v19432_v18  ;;  %10797 = vmatmul.mubr.msk.bf16.gmra.mrb[176].mxu0 %vm7560_vm3, %v6989_v40  ;;  %v5848_v45 = vpop.f32.mrb[85].mxu0  ;;  %v16481_v58 = vmul.f32 %v12037_v12, %v5846_v23  ;;  %v12039_v40 = vld [vmem:[%s13820_s14 + $0x160] sm:$0xff] }
 0x690   : > { %v10736_v59 = vpop.f32.mrb[244].mxu1  ;;  %v5850_v63 = vpop.f32.mrb[86].mxu0  ;;  %v16486_v61 = vmul.f32 %v12037_v12, %v5848_v45  ;;  %v19440_v12 = vld [vmem:[#allocation173_spill] sm:$0xff]  ;;  %v19441_v45 = vld [vmem:[#allocation172_spill] sm:$0xff] }
 0x691   : > { %19433 = vst [vmem:[#allocation156_spill] sm:$0xff] %v16481_v58  ;;  %v6197_v14 = vpop.f32.mrb[245].mxu1  ;;  %v16484_v5 = vmul.f32 %v12038_v20, %v5850_v63  ;;  %v5852_v31 = vpop.f32.mrb[87].mxu0  ;;  %v19438_v63 = vld [vmem:[#allocation162_spill] sm:$0xff]  ;;  %v19442_v10 = vpack.c.bf16 %v19440_v12, %v19441_v45 }
 0x692   : > { %19435 = vst [vmem:[#allocation165_spill] sm:$0xff] %v16486_v61  ;;  %v10737_v18 = vpop.f32.mrb[246].mxu1  ;;  %v16488_v1 = vmul.f32 %v12038_v20, %v5852_v31  ;;  %v19439_v41 = vpack.c.bf16 %v19437_v29, %v19438_v63 }
 0x693   : > { %19434 = vst [vmem:[#allocation155_spill] sm:$0xff] %v16484_v5  ;;  %v7007_v11 = vpack.c.bf16 %v10737_v18, %v10736_v59  ;;  %v6200_v4 = vpop.f32.mrb[247].mxu1  ;;  %v19447_v5 = vld [vmem:[#allocation171_spill] sm:$0xff] }
 0x694   : > { %19436 = vst [vmem:[#allocation164_spill] sm:$0xff] %v16488_v1  ;;  %v6998_v23 = vpack.c.bf16 %v6200_v4, %v6197_v14  ;;  %v12040_v4 = vld [vmem:[%s13820_s14 + $0x168] sm:$0xff] }
 0x696   : > { %7886 = vmatmul.mubr.bf16.gmra.mrb[96].mxu1 %v19439_v41  ;;  %10800 = vmatprep.mubr.msk.bf16.mxu0 %vm7560_vm3, %v6998_v23  ;;  %v5856_v20 = vpop.f32.mrb[88].mxu0 }
 0x697   : > { %7893 = vmatprep.mubr.bf16.mxu1 %v19442_v10  ;;  %10801 = vmatmul.mubr.msk.bf16.gmra.mrb[180].mxu0 %vm7560_vm3, %v7007_v11  ;;  %v5858_v31 = vpop.f32.mrb[89].mxu0  ;;  %v16503_v58 = vmul.f32 %v12039_v40, %v5856_v20  ;;  %v12041_v11 = vld [vmem:[%s13820_s14 + $0x170] sm:$0xff] }
 0x698   : > { %v10740_v59 = vpop.f32.mrb[248].mxu1  ;;  %v5860_v18 = vpop.f32.mrb[90].mxu0  ;;  %v16508_v41 = vmul.f32 %v12039_v40, %v5858_v31  ;;  %v19450_v40 = vld [vmem:[#allocation181_spill] sm:$0xff]  ;;  %v19451_v31 = vld [vmem:[#allocation180_spill] sm:$0xff] }
 0x699   : > { %19443 = vst [vmem:[#allocation163_spill] sm:$0xff] %v16503_v58  ;;  %v6213_v14 = vpop.f32.mrb[249].mxu1  ;;  %v16506_v53 = vmul.f32 %v12040_v4, %v5860_v18  ;;  %v5862_v29 = vpop.f32.mrb[91].mxu0  ;;  %v19448_v18 = vld [vmem:[#allocation170_spill] sm:$0xff]  ;;  %v19452_v1 = vpack.c.bf16 %v19450_v40, %v19451_v31 }
 0x69a   : > { %19445 = vst [vmem:[#allocation173_spill] sm:$0xff] %v16508_v41  ;;  %v10741_v10 = vpop.f32.mrb[250].mxu1  ;;  %v16510_v63 = vmul.f32 %v12040_v4, %v5862_v29  ;;  %v19449_v61 = vpack.c.bf16 %v19447_v5, %v19448_v18 }
 0x69b   : > { %19444 = vst [vmem:[#allocation162_spill] sm:$0xff] %v16506_v53  ;;  %v7025_v23 = vpack.c.bf16 %v10741_v10, %v10740_v59  ;;  %v6216_v12 = vpop.f32.mrb[251].mxu1  ;;  %v19453_v53 = vld [vmem:[#allocation179_spill] sm:$0xff] }
 0x69c   : > { %19446 = vst [vmem:[#allocation172_spill] sm:$0xff] %v16510_v63  ;;  %v7016_v20 = vpack.c.bf16 %v6216_v12, %v6213_v14  ;;  %v12042_v12 = vld [vmem:[%s13820_s14 + $0x178] sm:$0xff] }
 0x69d   : > { %v19456_v63 = vld [vmem:[#allocation189_spill] sm:$0xff] }
 0x69e   : > { %7894 = vmatmul.mubr.bf16.gmra.mrb[100].mxu1 %v19449_v61  ;;  %10804 = vmatprep.mubr.msk.bf16.mxu0 %vm7560_vm3, %v7016_v20  ;;  %v5866_v4 = vpop.f32.mrb[92].mxu0 }
 0x69f   : > { %7901 = vmatprep.mubr.bf16.mxu1 %v19452_v1  ;;  %10805 = vmatmul.mubr.msk.bf16.gmra.mrb[184].mxu0 %vm7560_vm3, %v7025_v23  ;;  %v5868_v29 = vpop.f32.mrb[93].mxu0  ;;  %v16525_v58 = vmul.f32 %v12041_v11, %v5866_v4 }
 0x6a0   : > { %v10744_v59 = vpop.f32.mrb[252].mxu1  ;;  %v5870_v10 = vpop.f32.mrb[94].mxu0  ;;  %v16530_v61 = vmul.f32 %v12041_v11, %v5868_v29  ;;  %v19457_v11 = vld [vmem:[#allocation188_spill] sm:$0xff] }
 0x6a1   : > { %v6229_v14 = vpop.f32.mrb[253].mxu1  ;;  %v16528_v45 = vmul.f32 %v12042_v12, %v5870_v10  ;;  %v5872_v5 = vpop.f32.mrb[95].mxu0  ;;  %v19454_v10 = vld [vmem:[#allocation178_spill] sm:$0xff]  ;;  %v19458_v29 = vpack.c.bf16 %v19456_v63, %v19457_v11 }
 0x6a2   : > { %v10745_v1 = vpop.f32.mrb[254].mxu1  ;;  %v16532_v20 = vmul.f32 %v12042_v12, %v5872_v5  ;;  %v19455_v41 = vpack.c.bf16 %v19453_v53, %v19454_v10  ;;  %v19460_v10 = vld [vmem:[#allocation187_spill] sm:$0xff]  ;;  %v19461_v11 = vld [vmem:[#allocation186_spill] sm:$0xff] }
 0x6a3   : > { %v7043_v18 = vpack.c.bf16 %v10745_v1, %v10744_v59  ;;  %v6232_v40 = vpop.f32.mrb[255].mxu1  ;;  %v12043_v1 = vld [vmem:[%s13820_s14 + $0x180] sm:$0xff] }
 0x6a4   : > { %v7034_v4 = vpack.c.bf16 %v6232_v40, %v6229_v14  ;;  %v12044_v14 = vld [vmem:[%s13820_s14 + $0x188] sm:$0xff] }
 0x6a6   : > { %7902 = vmatmul.mubr.bf16.gmra.mrb[104].mxu1 %v19455_v41  ;;  %10808 = vmatprep.mubr.msk.bf16.mxu0 %vm7560_vm3, %v7034_v4  ;;  %v5876_v12 = vpop.f32.mrb[96].mxu0  ;;  %v12045_v4 = vld [vmem:[%s13820_s14 + $0x190] sm:$0xff] }
 0x6a7   : > { %7909 = vmatprep.mubr.bf16.mxu1 %v19458_v29  ;;  %10809 = vmatmul.mubr.msk.bf16.gmra.mrb[188].mxu0 %vm7560_vm3, %v7043_v18  ;;  %v5878_v5 = vpop.f32.mrb[97].mxu0  ;;  %v16547_v23 = vmul.f32 %v12043_v1, %v5876_v12  ;;  %v19462_v29 = vpack.c.bf16 %v19460_v10, %v19461_v11  ;;  %v19463_v12 = vpack.c.bf16 %v14888_v13, %v14885_v33  ;;  %v19464_v11 = vld [vmem:[#allocation195_spill] sm:$0xff] }
 0x6a8   : > { %v5880_v59 = vpop.f32.mrb[98].mxu0  ;;  %v16552_v41 = vmul.f32 %v12043_v1, %v5878_v5  ;;  %v19520_v33 = vpack.c.bf16 %v15492_v51, %v15489_v44  ;;  %v19523_v51 = vpack.c.bf16 %v15532_v47, %v15529_v57 }
 0x6a9   : > { %19459 = vst [vmem:[#allocation171_spill] sm:$0xff] %v16547_v23  ;;  %v16550_v40 = vmul.f32 %v12044_v14, %v5880_v59  ;;  %v5882_v53 = vpop.f32.mrb[99].mxu0  ;;  %v12046_v23 = vld [vmem:[%s13820_s14 + $0x198] sm:$0xff] }
 0x6aa   : > { %v16554_v63 = vmul.f32 %v12044_v14, %v5882_v53 }
 0x6ae   : > { %7910 = vmatmul.mubr.bf16.gmra.mrb[108].mxu1 %v19462_v29  ;;  %v5886_v59 = vpop.f32.mrb[100].mxu0  ;;  %v19465_v29 = vld [vmem:[#allocation194_spill] sm:$0xff] }
 0x6af   : > { %7917 = vmatprep.mubr.bf16.mxu1 %v19463_v12  ;;  %v5888_v31 = vpop.f32.mrb[101].mxu0  ;;  %v16567_v1 = vmul.f32 %v15870_v27, %v5886_v59  ;;  %v19466_v27 = vpack.c.bf16 %v19464_v11, %v19465_v29 }
 0x6b0   : > { %v5890_v5 = vpop.f32.mrb[102].mxu0  ;;  %v16573_v18 = vmul.f32 %v12045_v4, %v5888_v31 }
 0x6b1   : > { %v16570_v14 = vmul.f32 %v15876_v17, %v5890_v5  ;;  %v5892_v53 = vpop.f32.mrb[103].mxu0  ;;  %v19467_v17 = vld [vmem:[#allocation202_spill] sm:$0xff] }
 0x6b2   : > { %v16576_v10 = vmul.f32 %v12046_v23, %v5892_v53  ;;  %v19468_v12 = vpack.c.bf16 %v14933_v15, %v19467_v17  ;;  %v19470_v17 = vld [vmem:[#allocation200_spill] sm:$0xff] }
 0x6b6   : > { %7918 = vmatmul.mubr.bf16.gmra.mrb[112].mxu1 %v19466_v27  ;;  %v5896_v59 = vpop.f32.mrb[104].mxu0  ;;  %v19469_v27 = vld [vmem:[#allocation201_spill] sm:$0xff] }
 0x6b7   : > { %7925 = vmatprep.mubr.bf16.mxu1 %v19468_v12  ;;  %v5898_v31 = vpop.f32.mrb[105].mxu0  ;;  %v16589_v23 = vmul.f32 %v15923_v46, %v5896_v59  ;;  %v19471_v12 = vpack.c.bf16 %v19469_v27, %v19470_v17  ;;  %v19472_v59 = vpack.c.bf16 %v14985_v25, %v14982_v50  ;;  %v19473_v17 = vld [vmem:[#allocation208_spill] sm:$0xff] }
 0x6b8   : > { %v5900_v4 = vpop.f32.mrb[106].mxu0  ;;  %v16595_v13 = vmul.f32 %v15923_v46, %v5898_v31 }
 0x6b9   : > { %v16592_v5 = vmul.f32 %v15929_v32, %v5900_v4  ;;  %v5902_v53 = vpop.f32.mrb[107].mxu0 }
 0x6ba   : > { %v16598_v11 = vmul.f32 %v15929_v32, %v5902_v53 }
 0x6be   : > { %7926 = vmatmul.mubr.bf16.gmra.mrb[116].mxu1 %v19471_v12  ;;  %v5906_v4 = vpop.f32.mrb[108].mxu0  ;;  %v19474_v12 = vld [vmem:[#allocation207_spill] sm:$0xff] }
 0x6bf   : > { %7933 = vmatprep.mubr.bf16.mxu1 %v19472_v59  ;;  %v5908_v46 = vpop.f32.mrb[109].mxu0  ;;  %v16611_v32 = vmul.f32 %v15970_v39, %v5906_v4  ;;  %v19475_v59 = vpack.c.bf16 %v19473_v17, %v19474_v12  ;;  %v19476_v4 = vpack.c.bf16 %v15038_v60, %v15035_v28  ;;  %v19477_v12 = vld [vmem:[#allocation214_spill] sm:$0xff] }
 0x6c0   : > { %v5910_v31 = vpop.f32.mrb[110].mxu0  ;;  %v16617_v29 = vmul.f32 %v15970_v39, %v5908_v46 }
 0x6c1   : > { %v16614_v53 = vmul.f32 %v15976_v19, %v5910_v31  ;;  %v5912_v15 = vpop.f32.mrb[111].mxu0 }
 0x6c2   : > { %v16620_v27 = vmul.f32 %v15976_v19, %v5912_v15 }
 0x6c6   : > { %7934 = vmatmul.mubr.bf16.gmra.mrb[120].mxu1 %v19475_v59  ;;  %v5916_v31 = vpop.f32.mrb[112].mxu0  ;;  %v19478_v59 = vld [vmem:[#allocation213_spill] sm:$0xff] }
 0x6c7   : > { %7941 = vmatprep.mubr.bf16.mxu1 %v19476_v4  ;;  %v5918_v39 = vpop.f32.mrb[113].mxu0  ;;  %v16633_v19 = vmul.f32 %v16019_v26, %v5916_v31  ;;  %v19479_v4 = vpack.c.bf16 %v19477_v12, %v19478_v59  ;;  %v19480_v31 = vpack.c.bf16 %v15091_v0, %v15088_v42  ;;  %v11643_v42 = vld [vmem:[%s17735_s4 + $0x100] sm:$0xff]  }
 0x6c8   : > { %v5920_v46 = vpop.f32.mrb[114].mxu0  ;;  %v16639_v25 = vmul.f32 %v16019_v26, %v5918_v39 }
 0x6c9   : > { %v16636_v15 = vmul.f32 %v16025_v35, %v5920_v46  ;;  %v5922_v50 = vpop.f32.mrb[115].mxu0 }
 0x6ca   : > { %v16642_v17 = vmul.f32 %v16025_v35, %v5922_v50 }
 0x6ce   : > { %7942 = vmatmul.mubr.bf16.gmra.mrb[124].mxu1 %v19479_v4  ;;  %v5926_v46 = vpop.f32.mrb[116].mxu0  ;;  %v19481_v4 = vld [vmem:[#allocation220_spill] sm:$0xff] }
 0x6cf   : > { %7982 = vmatprep.mubr.bf16.mxu1 %v19480_v31  ;;  %v5928_v26 = vpop.f32.mrb[117].mxu0  ;;  %v16655_v35 = vmul.f32 %v16063_v55, %v5926_v46  ;;  %v19482_v31 = vld [vmem:[#allocation219_spill] sm:$0xff] }
 0x6d0   : > { %v5930_v39 = vpop.f32.mrb[118].mxu0  ;;  %v16661_v60 = vmul.f32 %v16063_v55, %v5928_v26  ;;  %v19483_v46 = vpack.c.bf16 %v19481_v4, %v19482_v31  ;;  %v19484_v55 = vpack.c.bf16 %v15144_v49, %v15141_v2  ;;  %v11645_v49 = vld [vmem:[%s17735_s4 + $0x110] sm:$0xff]  }
 0x6d1   : > { %v16658_v50 = vmul.f32 %v16069_v34, %v5930_v39  ;;  %v5932_v28 = vpop.f32.mrb[119].mxu0 }
 0x6d2   : > { %v16664_v12 = vmul.f32 %v16069_v34, %v5932_v28  ;;  %v11644_v28 = vld [vmem:[%s17735_s4 + $0x108] sm:$0xff]  }
 0x6d6   : > { %7983 = vmatmul.mubr.bf16.vlgmr.msra.gmra.mrb[0].mxu1 %v19483_v46  ;;  %v5936_v34 = vpop.f32.mrb[120].mxu0 }
 0x6d7   : > { %8240 = vmatpush1.bf16.msra.mxu1 %v11643_v42  ;;  %7990 = vmatprep.mubr.bf16.mxu1 %v19484_v55  ;;  %v5938_v26 = vpop.f32.mrb[121].mxu0  ;;  %v16684_v0 = vmul.f32 %v16109_v7, %v5936_v34  ;;  %v19485_v34 = vld [vmem:[#allocation226_spill] sm:$0xff] }
 0x6d8   : > { %8241 = vmatprep.subr.bf16.mxu1 %v18871_v16  ;;  %v5940_v39 = vpop.f32.mrb[122].mxu0  ;;  %v16690_v31 = vmul.f32 %v16109_v7, %v5938_v26  ;;  %v11646_v26 = vld [vmem:[%s17735_s4 + $0x118] sm:$0xff]  }
 0x6d9   : > { %v16687_v4 = vmul.f32 %v16115_v8, %v5940_v39  ;;  %v5942_v42 = vpop.f32.mrb[123].mxu0  ;;  %v19486_v39 = vld [vmem:[#allocation225_spill] sm:$0xff] }
 0x6da   : > { %v16693_v2 = vmul.f32 %v16115_v8, %v5942_v42  ;;  %v19487_v7 = vpack.c.bf16 %v19485_v34, %v19486_v39  ;;  %v19488_v8 = vpack.c.bf16 %v15197_v9, %v15194_v21 }
 0x6db   : > { %8242 = vmatpush1.bf16.msra.mxu1 %v11644_v28 }
 0x6dc   : > { %8243 = vmatprep.subr.bf16.mxu1 %v18871_v16 }
 0x6de   : > { %7991 = vmatmul.mubr.bf16.gmra.mrb[4].mxu1 %v19487_v7  ;;  %v5946_v28 = vpop.f32.mrb[124].mxu0 }
 0x6df   : > { %7998 = vmatprep.mubr.bf16.mxu1 %v19488_v8  ;;  %8244 = vmatpush1.bf16.msra.mxu1 %v11645_v49  ;;  %v5948_v42 = vpop.f32.mrb[125].mxu0  ;;  %v16714_v55 = vmul.f32 %v16151_v56, %v5946_v28  ;;  %v11647_v49 = vld [vmem:[%s17735_s4 + $0x120] sm:$0xff]   ;;  %v19491_v8 = vld [vmem:[#allocation232_spill] sm:$0xff]  ;;  %v19492_v28 = vld [vmem:[#allocation231_spill] sm:$0xff] }
 0x6e0   : > { %8245 = vmatprep.subr.bf16.mxu1 %v18871_v16  ;;  %v5950_v46 = vpop.f32.mrb[126].mxu0  ;;  %v16720_v21 = vmul.f32 %v16151_v56, %v5948_v42  ;;  %v19493_v56 = vpack.c.bf16 %v19491_v8, %v19492_v28  ;;  %v11649_v42 = vld [vmem:[%s17735_s4 + $0x130] sm:$0xff]   ;;  %v19496_v8 = vld [vmem:[#allocation237_spill] sm:$0xff] }
 0x6e1   : > { %19489 = vst [vmem:[#allocation170_spill] sm:$0xff] %v16714_v55  ;;  %v16717_v34 = vmul.f32 %v16157_v48, %v5950_v46  ;;  %v5952_v39 = vpop.f32.mrb[127].mxu0 }
 0x6e2   : > { %v16723_v9 = vmul.f32 %v16157_v48, %v5952_v39  ;;  %v19494_v48 = vpack.c.bf16 %v15250_v30, %v15247_v43  ;;  %v19495_v39 = vld [vmem:[#allocation238_spill] sm:$0xff]  ;;  %v19498_v43 = vld [vmem:[#allocation245_spill] sm:$0xff] }
 0x6e3   : > { %19490 = vst [vmem:[#allocation181_spill] sm:$0xff] %v16717_v34  ;;  %8246 = vmatpush1.bf16.msra.mxu1 %v11646_v26  ;;  %v11648_v26 = vld [vmem:[%s17735_s4 + $0x128] sm:$0xff]   ;;  %v19497_v28 = vpack.c.bf16 %v19495_v39, %v19496_v8  ;;  %v19499_v30 = vpack.c.bf16 %v15303_v6, %v19498_v43  ;;  %v19503_v6 = vld [vmem:[#allocation253_spill] sm:$0xff]  ;;  %v19504_v8 = vld [vmem:[#allocation252_spill] sm:$0xff] }
 0x6e4   : > { %8247 = vmatprep.subr.bf16.mxu1 %v18871_v16  ;;  %v11653_v43 = vld [vmem:[%s17735_s4 + $0x150] sm:$0xff]  }
 0x6e6   : > { %7999 = vmatmul.mubr.bf16.gmra.mrb[8].mxu1 %v19493_v56  ;;  %v11651_v56 = vld [vmem:[%s17735_s4 + $0x140] sm:$0xff]  }
 0x6e7   : > { %8006 = vmatprep.mubr.bf16.mxu1 %v19494_v48  ;;  %8248 = vmatpush1.bf16.msra.mxu1 %v11647_v49  ;;  %v11650_v49 = vld [vmem:[%s17735_s4 + $0x138] sm:$0xff]   ;;  %v19500_v48 = vld [vmem:[#allocation244_spill] sm:$0xff] }
 0x6e8   : > { %8249 = vmatprep.subr.bf16.mxu1 %v18871_v16 }
 0x6eb   : > { %8250 = vmatpush1.bf16.msra.mxu1 %v11648_v26  ;;  %v19501_v26 = vld [vmem:[#allocation243_spill] sm:$0xff] }
 0x6ec   : > { %8251 = vmatprep.subr.bf16.mxu1 %v18871_v16  ;;  %v19502_v39 = vpack.c.bf16 %v19500_v48, %v19501_v26  ;;  %v19509_v26 = vld [vmem:[#allocation259_spill] sm:$0xff] }
 0x6ee   : > { %8007 = vmatmul.mubr.bf16.gmra.mrb[12].mxu1 %v19497_v28  ;;  %v11652_v28 = vld [vmem:[%s17735_s4 + $0x148] sm:$0xff]  }
 0x6ef   : > { %8014 = vmatprep.mubr.bf16.mxu1 %v19499_v30  ;;  %8252 = vmatpush1.bf16.msra.mxu1 %v11649_v42  ;;  %v19505_v42 = vpack.c.bf16 %v19503_v6, %v19504_v8  ;;  %v19506_v30 = vld [vmem:[#allocation251_spill] sm:$0xff] }
 0x6f0   : > { %8253 = vmatprep.subr.bf16.mxu1 %v18871_v16 }
 0x6f3   : > { %8254 = vmatpush1.bf16.msra.mxu1 %v11650_v49  ;;  %v19507_v49 = vld [vmem:[#allocation250_spill] sm:$0xff] }
 0x6f4   : > { %8255 = vmatprep.subr.bf16.mxu1 %v18871_v16  ;;  %v19508_v48 = vpack.c.bf16 %v19506_v30, %v19507_v49  ;;  %v19514_v30 = vld [vmem:[#allocation267_spill] sm:$0xff] }
 0x6f6   : > { %8015 = vmatmul.mubr.bf16.gmra.mrb[16].mxu1 %v19502_v39 }
 0x6f7   : > { %8022 = vmatprep.mubr.bf16.mxu1 %v19505_v42  ;;  %8256 = vmatpush1.bf16.msra.mxu1 %v11651_v56  ;;  %v19510_v56 = vpack.c.bf16 %v15402_v37, %v19509_v26  ;;  %v19511_v42 = vld [vmem:[#allocation258_spill] sm:$0xff]  ;;  %v11654_v37 = vld [vmem:[%s17735_s4 + $0x158] sm:$0xff]  }
 0x6f8   : > { %8257 = vmatprep.subr.bf16.mxu1 %v18871_v16 }
 0x6fb   : > { %8258 = vmatpush1.bf16.msra.mxu1 %v11652_v28  ;;  %v19512_v28 = vld [vmem:[#allocation5_spill] sm:$0xff] }
 0x6fc   : > { %8259 = vmatprep.subr.bf16.mxu1 %v18871_v16  ;;  %v19513_v7 = vpack.c.bf16 %v19511_v42, %v19512_v28  ;;  %v19518_v42 = vld [vmem:[#allocation264_spill] sm:$0xff] }
 0x6fe   : > { %8023 = vmatmul.mubr.bf16.gmra.mrb[20].mxu1 %v19508_v48 }
 0x6ff   : > { %8030 = vmatprep.mubr.bf16.mxu1 %v19510_v56  ;;  %8260 = vmatpush1.bf16.msra.mxu1 %v11653_v43  ;;  %v19515_v43 = vld [vmem:[#allocation266_spill] sm:$0xff] }
 0x700   : > { %8261 = vmatprep.subr.bf16.mxu1 %v18871_v16  ;;  %v19516_v49 = vpack.c.bf16 %v19514_v30, %v19515_v43 }
 0x702   : > { %v16782_v39 = vpop.f32.mrb[128].mxu0 }
 0x703   : > { %v16784_v6 = vpop.f32.mrb[129].mxu0  ;;  %8262 = vmatpush1.bf16.msra.mxu1 %v11654_v37 }
 0x704   : > { %v16786_v8 = vpop.f32.mrb[130].mxu0  ;;  %8263 = vmatprep.subr.bf16.mxu1 %v18871_v16 }
 0x705   : > { %v16791_v46 = vpop.f32.mrb[131].mxu0 }
 0x706   : > { %8031 = vmatmul.mubr.bf16.gmra.mrb[24].mxu1 %v19513_v7  ;;  %v19517_v7 = vld [vmem:[#allocation265_spill] sm:$0xff] }
 0x707   : > { %8038 = vmatprep.mubr.bf16.mxu1 %v19516_v49  ;;  %v19519_v28 = vpack.c.bf16 %v19517_v7, %v19518_v42  ;;  %v19521_v49 = vld [vmem:[#allocation272_spill] sm:$0xff]  ;;  %v11655_v7 = vld [vmem:[%s17735_s4 + $0x160] sm:$0xff]  }
 0x708   : > { %v19522_v55 = vpack.c.bf16 %v15486_v3, %v19521_v49  ;;  %8264 = vmatpush1.bf16.msra.mxu1 %v11655_v7  ;;  %v19527_v3 = vld [vmem:[#allocation277_spill] sm:$0xff]  ;;  %v19530_v49 = vpack.c.bf16 %v15569_v38, %v15566_v54  ;;  %v19537_v54 = vpack.c.bf16 %v15606_v52, %v15603_v62 }
 0x709   : > { %8265 = vmatprep.subr.bf16.mxu1 %v18871_v16 }
 0x70a   : > { %v16800_v48 = vpop.f32.mrb[132].mxu0 }
 0x70b   : > { %v16802_v26 = vpop.f32.mrb[133].mxu0 }
 0x70c   : > { %v16804_v56 = vpop.f32.mrb[134].mxu0 }
 0x70d   : > { %v16809_v59 = vpop.f32.mrb[135].mxu0 }
 0x70e   : > { %8039 = vmatmul.mubr.bf16.gmra.mrb[28].mxu1 %v19519_v28 }
 0x70f   : > { %8046 = vmatprep.mubr.bf16.mxu1 %v19520_v33 }
 0x712   : > { %v16814_v30 = vpop.f32.mrb[136].mxu0 }
 0x713   : > { %v16816_v37 = vpop.f32.mrb[137].mxu0 }
 0x714   : > { %v16818_v43 = vpop.f32.mrb[138].mxu0 }
 0x715   : > { %v16823_v34 = vpop.f32.mrb[139].mxu0 }
 0x716   : > { %8047 = vmatmul.mubr.bf16.gmra.mrb[32].mxu1 %v19522_v55  ;;  %v19528_v55 = vpack.c.bf16 %v15526_v24, %v19527_v3  ;;  %v11656_v24 = vld [vmem:[%s17735_s4 + $0x168] sm:$0xff]  }
 0x717   : > { %8054 = vmatprep.mubr.bf16.mxu1 %v19523_v51  ;;  %v19534_v51 = vld [vmem:[#allocation282_spill] sm:$0xff]  ;;  %8266 = vmatpush1.bf16.msra.mxu1 %v11656_v24 }
 0x718   : > { %8267 = vmatprep.subr.bf16.mxu1 %v18871_v16 }
 0x71a   : > { %v16832_v44 = vpop.f32.mrb[140].mxu0 }
 0x71b   : > { %19524 = vst [vmem:[#allocation180_spill] sm:$0xff] %v16832_v44  ;;  %v16834_v33 = vpop.f32.mrb[141].mxu0  ;;  %v19535_v44 = vpack.c.bf16 %v15563_v36, %v19534_v51  ;;  %v19541_v36 = vld [vmem:[#allocation288_spill] sm:$0xff] }
 0x71c   : > { %19525 = vst [vmem:[#allocation179_spill] sm:$0xff] %v16834_v33  ;;  %v16836_v42 = vpop.f32.mrb[142].mxu0  ;;  %v19661_v33 = vld [vmem:[#allocation82_spill] sm:$0xff] }
 0x71d   : > { %19526 = vst [vmem:[#allocation178_spill] sm:$0xff] %v16836_v42  ;;  %v16841_v28 = vpop.f32.mrb[143].mxu0 }
 0x71e   : > { %8055 = vmatmul.mubr.bf16.gmra.mrb[36].mxu1 %v19528_v55  ;;  %19529 = vst [vmem:[#allocation189_spill] sm:$0xff] %v16841_v28 }
 0x71f   : > { %8062 = vmatprep.mubr.bf16.mxu1 %v19530_v49 }
 0x722   : > { %v16846_v47 = vpop.f32.mrb[144].mxu0 }
 0x723   : > { %19531 = vst [vmem:[#allocation188_spill] sm:$0xff] %v16846_v47  ;;  %v16848_v57 = vpop.f32.mrb[145].mxu0  ;;  %v19546_v47 = vld [vmem:[#allocation295_spill] sm:$0xff] }
 0x724   : > { %19532 = vst [vmem:[#allocation187_spill] sm:$0xff] %v16848_v57  ;;  %v16850_v7 = vpop.f32.mrb[146].mxu0  ;;  %v19649_v57 = vld [vmem:[#allocation49_spill] sm:$0xff] }
 0x725   : > { %19533 = vst [vmem:[#allocation186_spill] sm:$0xff] %v16850_v7  ;;  %v16855_v42 = vpop.f32.mrb[147].mxu0  ;;  %v19545_v7 = vld [vmem:[#allocation296_spill] sm:$0xff] }
 0x726   : > { %8063 = vmatmul.mubr.bf16.gmra.mrb[40].mxu1 %v19535_v44  ;;  %19536 = vst [vmem:[#allocation195_spill] sm:$0xff] %v16855_v42  ;;  %v19542_v44 = vld [vmem:[#allocation287_spill] sm:$0xff]  ;;  %v19547_v42 = vpack.c.bf16 %v19545_v7, %v19546_v47 }
 0x727   : > { %8070 = vmatprep.mubr.bf16.mxu1 %v19537_v54  ;;  %v19543_v49 = vpack.c.bf16 %v19541_v36, %v19542_v44  ;;  %v19551_v54 = vld [vmem:[#allocation294_spill] sm:$0xff]  ;;  %v11657_v36 = vld [vmem:[%s17735_s4 + $0x170] sm:$0xff]  }
 0x728   : > { %v19555_v44 = vld [vmem:[#allocation302_spill] sm:$0xff]  ;;  %8268 = vmatpush1.bf16.msra.mxu1 %v11657_v36 }
 0x729   : > { %8269 = vmatprep.subr.bf16.mxu1 %v18871_v16 }
 0x72a   : > { %v16864_v38 = vpop.f32.mrb[148].mxu0 }
 0x72b   : > { %19538 = vst [vmem:[#allocation194_spill] sm:$0xff] %v16864_v38  ;;  %v16866_v3 = vpop.f32.mrb[149].mxu0  ;;  %v19552_v38 = vld [vmem:[#allocation293_spill] sm:$0xff] }
 0x72c   : > { %19539 = vst [vmem:[#allocation202_spill] sm:$0xff] %v16866_v3  ;;  %v16868_v55 = vpop.f32.mrb[150].mxu0  ;;  %v19553_v3 = vpack.c.bf16 %v19551_v54, %v19552_v38  ;;  %v19561_v38 = vld [vmem:[#allocation11_spill] sm:$0xff] }
 0x72d   : > { %19540 = vst [vmem:[#allocation201_spill] sm:$0xff] %v16868_v55  ;;  %v16873_v51 = vpop.f32.mrb[151].mxu0 }
 0x72e   : > { %8071 = vmatmul.mubr.bf16.gmra.mrb[44].mxu1 %v19543_v49  ;;  %19544 = vst [vmem:[#allocation200_spill] sm:$0xff] %v16873_v51  ;;  %v19556_v49 = vld [vmem:[#allocation301_spill] sm:$0xff] }
 0x72f   : > { %8078 = vmatprep.mubr.bf16.mxu1 %v19547_v42  ;;  %v19557_v47 = vpack.c.bf16 %v19555_v44, %v19556_v49 }
 0x732   : > { %v16878_v62 = vpop.f32.mrb[152].mxu0 }
 0x733   : > { %19548 = vst [vmem:[#allocation208_spill] sm:$0xff] %v16878_v62  ;;  %v16880_v52 = vpop.f32.mrb[153].mxu0 }
 0x734   : > { %19549 = vst [vmem:[#allocation207_spill] sm:$0xff] %v16880_v52  ;;  %v16882_v24 = vpop.f32.mrb[154].mxu0  ;;  %v19566_v52 = vld [vmem:[#allocation20_spill] sm:$0xff] }
 0x735   : > { %19550 = vst [vmem:[#allocation214_spill] sm:$0xff] %v16882_v24  ;;  %v16887_v55 = vpop.f32.mrb[155].mxu0 }
 0x736   : > { %8079 = vmatmul.mubr.bf16.gmra.mrb[48].mxu1 %v19553_v3  ;;  %19554 = vst [vmem:[#allocation213_spill] sm:$0xff] %v16887_v55  ;;  %v19562_v3 = vld [vmem:[#allocation13_spill] sm:$0xff] }
 0x737   : > { %8086 = vmatprep.mubr.bf16.mxu1 %v19557_v47  ;;  %v19563_v54 = vpack.c.bf16 %v19561_v38, %v19562_v3  ;;  %v19565_v55 = vld [vmem:[#allocation17_spill] sm:$0xff]  ;;  %v19571_v47 = vld [vmem:[#allocation6_spill] sm:$0xff] }
 0x738   : > { %v19567_v51 = vpack.c.bf16 %v19565_v55, %v19566_v52  ;;  %v11658_v38 = vld [vmem:[%s17735_s4 + $0x178] sm:$0xff]  }
 0x739   : > { %v19575_v3 = vld [vmem:[#allocation25_spill] sm:$0xff]  ;;  %8270 = vmatpush1.bf16.msra.mxu1 %v11658_v38 }
 0x73a   : > { %v16896_v42 = vpop.f32.mrb[156].mxu0  ;;  %8528 = vmatprep.subr.bf16.mxu1 %v18871_v16 }
 0x73b   : > { %19558 = vst [vmem:[#allocation220_spill] sm:$0xff] %v16896_v42  ;;  %v16898_v7 = vpop.f32.mrb[157].mxu0  ;;  %v19572_v42 = vld [vmem:[#allocation8_spill] sm:$0xff] }
 0x73c   : > { %19559 = vst [vmem:[#allocation219_spill] sm:$0xff] %v16898_v7  ;;  %v16900_v24 = vpop.f32.mrb[158].mxu0  ;;  %v19573_v7 = vpack.c.bf16 %v19571_v47, %v19572_v42  ;;  %v19581_v42 = vld [vmem:[#allocation14_spill] sm:$0xff] }
 0x73d   : > { %19560 = vst [vmem:[#allocation226_spill] sm:$0xff] %v16900_v24  ;;  %v16905_v62 = vpop.f32.mrb[159].mxu0 }
 0x73e   : > { %8087 = vmatmul.mubr.bf16.gmra.mrb[52].mxu1 %v19563_v54  ;;  %19564 = vst [vmem:[#allocation225_spill] sm:$0xff] %v16905_v62  ;;  %v19576_v54 = vld [vmem:[#allocation29_spill] sm:$0xff] }
 0x73f   : > { %8094 = vmatprep.mubr.bf16.mxu1 %v19567_v51  ;;  %v19577_v55 = vpack.c.bf16 %v19575_v3, %v19576_v54 }
 0x742   : > { %v16910_v44 = vpop.f32.mrb[160].mxu0 }
 0x743   : > { %19568 = vst [vmem:[#allocation232_spill] sm:$0xff] %v16910_v44  ;;  %v16912_v36 = vpop.f32.mrb[161].mxu0 }
 0x744   : > { %19569 = vst [vmem:[#allocation231_spill] sm:$0xff] %v16912_v36  ;;  %v16914_v49 = vpop.f32.mrb[162].mxu0  ;;  %v19586_v36 = vld [vmem:[#allocation81_spill] sm:$0xff] }
 0x745   : > { %19570 = vst [vmem:[#allocation238_spill] sm:$0xff] %v16914_v49  ;;  %v16919_v24 = vpop.f32.mrb[163].mxu0 }
 0x746   : > { %8095 = vmatmul.mubr.bf16.gmra.mrb[56].mxu1 %v19573_v7  ;;  %19574 = vst [vmem:[#allocation237_spill] sm:$0xff] %v16919_v24  ;;  %v19582_v7 = vld [vmem:[#allocation15_spill] sm:$0xff] }
 0x747   : > { %8102 = vmatprep.mubr.bf16.mxu1 %v19577_v55  ;;  %v19583_v47 = vpack.c.bf16 %v19581_v42, %v19582_v7  ;;  %v19585_v24 = vld [vmem:[#allocation83_spill] sm:$0xff]  ;;  %v19591_v55 = vld [vmem:[#allocation80_spill] sm:$0xff]  ;;  %v19595_v42 = vld [vmem:[#allocation105_spill] sm:$0xff] }
 0x748   : > { %v19587_v62 = vpack.c.bf16 %v19585_v24, %v19586_v36  ;;  %v19596_v7 = vld [vmem:[#allocation104_spill] sm:$0xff] }
 0x749   : > { %v19601_v36 = vld [vmem:[#allocation100_spill] sm:$0xff] }
 0x74a   : > { %v16928_v51 = vpop.f32.mrb[164].mxu0 }
 0x74b   : > { %19578 = vst [vmem:[#allocation245_spill] sm:$0xff] %v16928_v51  ;;  %v16930_v52 = vpop.f32.mrb[165].mxu0  ;;  %v19592_v51 = vld [vmem:[#allocation79_spill] sm:$0xff] }
 0x74c   : > { %19579 = vst [vmem:[#allocation244_spill] sm:$0xff] %v16930_v52  ;;  %v16932_v49 = vpop.f32.mrb[166].mxu0  ;;  %v19593_v52 = vpack.c.bf16 %v19591_v55, %v19592_v51  ;;  %v19605_v51 = vld [vmem:[#allocation113_spill] sm:$0xff] }
 0x74d   : > { %19580 = vst [vmem:[#allocation243_spill] sm:$0xff] %v16932_v49  ;;  %v16937_v44 = vpop.f32.mrb[167].mxu0 }
 0x74e   : > { %8103 = vmatmul.mubr.bf16.gmra.mrb[60].mxu1 %v19583_v47  ;;  %19584 = vst [vmem:[#allocation253_spill] sm:$0xff] %v16937_v44  ;;  %v19597_v47 = vpack.c.bf16 %v19595_v42, %v19596_v7 }
 0x74f   : > { %8110 = vmatprep.mubr.bf16.mxu1 %v19587_v62 }
 0x752   : > { %v16942_v3 = vpop.f32.mrb[168].mxu0 }
 0x753   : > { %19588 = vst [vmem:[#allocation252_spill] sm:$0xff] %v16942_v3  ;;  %v16944_v38 = vpop.f32.mrb[169].mxu0  ;;  %v19602_v3 = vld [vmem:[#allocation99_spill] sm:$0xff] }
 0x754   : > { %19589 = vst [vmem:[#allocation251_spill] sm:$0xff] %v16944_v38  ;;  %v16946_v54 = vpop.f32.mrb[170].mxu0  ;;  %v19603_v38 = vpack.c.bf16 %v19601_v36, %v19602_v3  ;;  %v19615_v3 = vld [vmem:[#allocation7_spill] sm:$0xff] }
 0x755   : > { %19590 = vst [vmem:[#allocation250_spill] sm:$0xff] %v16946_v54  ;;  %v16951_v49 = vpop.f32.mrb[171].mxu0 }
 0x756   : > { %8111 = vmatmul.mubr.bf16.gmra.mrb[64].mxu1 %v19593_v52  ;;  %19594 = vst [vmem:[#allocation259_spill] sm:$0xff] %v16951_v49  ;;  %v19606_v52 = vld [vmem:[#allocation111_spill] sm:$0xff] }
 0x757   : > { %8118 = vmatprep.mubr.bf16.mxu1 %v19597_v47  ;;  %v19607_v55 = vpack.c.bf16 %v19605_v51, %v19606_v52  ;;  %v19611_v47 = vld [vmem:[#allocation101_spill] sm:$0xff] }
 0x75a   : > { %v16956_v44 = vpop.f32.mrb[172].mxu0 }
 0x75b   : > { %19598 = vst [vmem:[#allocation258_spill] sm:$0xff] %v16956_v44  ;;  %v16958_v24 = vpop.f32.mrb[173].mxu0  ;;  %v19612_v44 = vld [vmem:[#allocation98_spill] sm:$0xff] }
 0x75c   : > { %19599 = vst [vmem:[#allocation5_spill] sm:$0xff] %v16958_v24  ;;  %v16960_v62 = vpop.f32.mrb[174].mxu0  ;;  %v19613_v24 = vpack.c.bf16 %v19611_v47, %v19612_v44  ;;  %v19625_v44 = vld [vmem:[#allocation22_spill] sm:$0xff] }
 0x75d   : > { %19600 = vst [vmem:[#allocation267_spill] sm:$0xff] %v16960_v62  ;;  %v16965_v54 = vpop.f32.mrb[175].mxu0 }
 0x75e   : > { %8119 = vmatmul.mubr.bf16.gmra.mrb[68].mxu1 %v19603_v38  ;;  %19604 = vst [vmem:[#allocation266_spill] sm:$0xff] %v16965_v54  ;;  %v19616_v38 = vld [vmem:[#allocation4_spill] sm:$0xff] }
 0x75f   : > { %8126 = vmatprep.mubr.bf16.mxu1 %v19607_v55  ;;  %v19617_v36 = vpack.c.bf16 %v19615_v3, %v19616_v38  ;;  %v19621_v55 = vld [vmem:[#allocation3_spill] sm:$0xff] }
 0x762   : > { %v16970_v49 = vpop.f32.mrb[176].mxu0 }
 0x763   : > { %19608 = vst [vmem:[#allocation265_spill] sm:$0xff] %v16970_v49  ;;  %v16972_v42 = vpop.f32.mrb[177].mxu0  ;;  %v19622_v49 = vld [vmem:[#allocation2_spill] sm:$0xff] }
 0x764   : > { %19609 = vst [vmem:[#allocation264_spill] sm:$0xff] %v16972_v42  ;;  %v16974_v7 = vpop.f32.mrb[178].mxu0  ;;  %v19623_v42 = vpack.c.bf16 %v19621_v55, %v19622_v49  ;;  %v19635_v49 = vld [vmem:[#allocation38_spill] sm:$0xff] }
 0x765   : > { %19610 = vst [vmem:[#allocation272_spill] sm:$0xff] %v16974_v7  ;;  %v16979_v62 = vpop.f32.mrb[179].mxu0 }
 0x766   : > { %8127 = vmatmul.mubr.bf16.gmra.mrb[72].mxu1 %v19613_v24  ;;  %19614 = vst [vmem:[#allocation277_spill] sm:$0xff] %v16979_v62  ;;  %v19626_v24 = vld [vmem:[#allocation21_spill] sm:$0xff] }
 0x767   : > { %8134 = vmatprep.mubr.bf16.mxu1 %v19617_v36  ;;  %v19627_v47 = vpack.c.bf16 %v19625_v44, %v19626_v24  ;;  %v19631_v36 = vld [vmem:[#allocation19_spill] sm:$0xff] }
 0x76a   : > { %v16984_v54 = vpop.f32.mrb[180].mxu0 }
 0x76b   : > { %19618 = vst [vmem:[#allocation282_spill] sm:$0xff] %v16984_v54  ;;  %v16986_v51 = vpop.f32.mrb[181].mxu0  ;;  %v19632_v54 = vld [vmem:[#allocation18_spill] sm:$0xff] }
 0x76c   : > { %19619 = vst [vmem:[#allocation288_spill] sm:$0xff] %v16986_v51  ;;  %v16988_v52 = vpop.f32.mrb[182].mxu0  ;;  %v19633_v51 = vpack.c.bf16 %v19631_v36, %v19632_v54  ;;  %v19645_v54 = vld [vmem:[#allocation54_spill] sm:$0xff] }
 0x76d   : > { %19620 = vst [vmem:[#allocation287_spill] sm:$0xff] %v16988_v52  ;;  %v16993_v7 = vpop.f32.mrb[183].mxu0 }
 0x76e   : > { %8135 = vmatmul.mubr.bf16.gmra.mrb[76].mxu1 %v19623_v42  ;;  %19624 = vst [vmem:[#allocation296_spill] sm:$0xff] %v16993_v7  ;;  %v19636_v42 = vld [vmem:[#allocation37_spill] sm:$0xff] }
 0x76f   : > { %8142 = vmatprep.mubr.bf16.mxu1 %v19627_v47  ;;  %v19637_v55 = vpack.c.bf16 %v19635_v49, %v19636_v42  ;;  %v19641_v47 = vld [vmem:[#allocation36_spill] sm:$0xff] }
 0x770   : > { %v19651_v42 = vld [vmem:[#allocation68_spill] sm:$0xff] }
 0x772   : > { %v16998_v62 = vpop.f32.mrb[184].mxu0 }
 0x773   : > { %19628 = vst [vmem:[#allocation295_spill] sm:$0xff] %v16998_v62  ;;  %v17000_v3 = vpop.f32.mrb[185].mxu0  ;;  %v19642_v62 = vld [vmem:[#allocation34_spill] sm:$0xff] }
 0x774   : > { %19629 = vst [vmem:[#allocation294_spill] sm:$0xff] %v17000_v3  ;;  %v17002_v38 = vpop.f32.mrb[186].mxu0  ;;  %v19643_v3 = vpack.c.bf16 %v19641_v47, %v19642_v62  ;;  %v19657_v62 = vld [vmem:[#allocation86_spill] sm:$0xff] }
 0x775   : > { %19630 = vst [vmem:[#allocation293_spill] sm:$0xff] %v17002_v38  ;;  %v17007_v52 = vpop.f32.mrb[187].mxu0 }
 0x776   : > { %8143 = vmatmul.mubr.bf16.gmra.mrb[80].mxu1 %v19633_v51  ;;  %19634 = vst [vmem:[#allocation302_spill] sm:$0xff] %v17007_v52  ;;  %v19646_v51 = vld [vmem:[#allocation53_spill] sm:$0xff]  ;;  %v19648_v52 = vld [vmem:[#allocation52_spill] sm:$0xff] }
 0x777   : > { %8150 = vmatprep.mubr.bf16.mxu1 %v19637_v55  ;;  %v19647_v36 = vpack.c.bf16 %v19645_v54, %v19646_v51  ;;  %v19650_v49 = vpack.c.bf16 %v19648_v52, %v19649_v57  ;;  %v19652_v55 = vld [vmem:[#allocation67_spill] sm:$0xff]  ;;  %v19663_v51 = vld [vmem:[#allocation102_spill] sm:$0xff]  ;;  %v19666_v52 = vld [vmem:[#allocation96_spill] sm:$0xff] }
 0x77a   : > { %v17012_v7 = vpop.f32.mrb[188].mxu0 }
 0x77b   : > { %19638 = vst [vmem:[#allocation301_spill] sm:$0xff] %v17012_v7  ;;  %v17014_v44 = vpop.f32.mrb[189].mxu0  ;;  %v19653_v7 = vpack.c.bf16 %v19651_v42, %v19652_v55  ;;  %v19670_v55 = vld [vmem:[#allocation116_spill] sm:$0xff] }
 0x77c   : > { %19639 = vst [vmem:[#allocation11_spill] sm:$0xff] %v17014_v44  ;;  %v17016_v24 = vpop.f32.mrb[190].mxu0  ;;  %v19654_v44 = vld [vmem:[#allocation66_spill] sm:$0xff] }
 0x77d   : > { %19640 = vst [vmem:[#allocation13_spill] sm:$0xff] %v17016_v24  ;;  %v17021_v38 = vpop.f32.mrb[191].mxu0  ;;  %v19655_v24 = vld [vmem:[#allocation65_spill] sm:$0xff] }
 0x77e   : > { %8151 = vmatmul.mubr.bf16.gmra.mrb[84].mxu1 %v19643_v3  ;;  %19644 = vst [vmem:[#allocation17_spill] sm:$0xff] %v17021_v38  ;;  %v19656_v28 = vpack.c.bf16 %v19654_v44, %v19655_v24  ;;  %v19658_v3 = vld [vmem:[#allocation85_spill] sm:$0xff]  ;;  %v19660_v38 = vld [vmem:[#allocation84_spill] sm:$0xff] }
 0x77f   : > { %8158 = vmatprep.mubr.bf16.mxu1 %v19647_v36  ;;  %v19659_v47 = vpack.c.bf16 %v19657_v62, %v19658_v3  ;;  %v19662_v54 = vpack.c.bf16 %v19660_v38, %v19661_v33  ;;  %v19664_v36 = vld [vmem:[#allocation97_spill] sm:$0xff]  ;;  %v19673_v24 = vld [vmem:[#allocation112_spill] sm:$0xff]  ;;  %v19675_v3 = vld [vmem:[#allocation130_spill] sm:$0xff] }
 0x780   : > { %v19665_v57 = vpack.c.bf16 %v19663_v51, %v19664_v36  ;;  %v19678_v38 = vld [vmem:[#allocation128_spill] sm:$0xff]  ;;  %v19681_v36 = vld [vmem:[#allocation138_spill] sm:$0xff] }
 0x786   : > { %8159 = vmatmul.mubr.bf16.gmra.mrb[88].mxu1 %v19650_v49  ;;  %v19667_v49 = vld [vmem:[#allocation91_spill] sm:$0xff] }
 0x787   : > { %8166 = vmatprep.mubr.bf16.mxu1 %v19653_v7  ;;  %v19668_v42 = vpack.c.bf16 %v19666_v52, %v19667_v49  ;;  %v19669_v7 = vld [vmem:[#allocation117_spill] sm:$0xff]  ;;  %v19684_v49 = vld [vmem:[#allocation136_spill] sm:$0xff] }
 0x788   : > { %v19671_v44 = vpack.c.bf16 %v19669_v7, %v19670_v55  ;;  %v19687_v55 = vld [vmem:[#allocation146_spill] sm:$0xff] }
 0x78e   : > { %8167 = vmatmul.mubr.bf16.gmra.mrb[92].mxu1 %v19656_v28  ;;  %v19672_v28 = vld [vmem:[#allocation115_spill] sm:$0xff] }
 0x78f   : > { %8174 = vmatprep.mubr.bf16.mxu1 %v19659_v47  ;;  %v19674_v62 = vpack.c.bf16 %v19672_v28, %v19673_v24  ;;  %v19676_v47 = vld [vmem:[#allocation129_spill] sm:$0xff]  ;;  %v19690_v24 = vld [vmem:[#allocation144_spill] sm:$0xff] }
 0x790   : > { %v19677_v33 = vpack.c.bf16 %v19675_v3, %v19676_v47  ;;  %v19693_v47 = vld [vmem:[#allocation154_spill] sm:$0xff] }
 0x796   : > { %8175 = vmatmul.mubr.bf16.gmra.mrb[96].mxu1 %v19662_v54  ;;  %v19679_v54 = vld [vmem:[#allocation127_spill] sm:$0xff] }
 0x797   : > { %8182 = vmatprep.mubr.bf16.mxu1 %v19665_v57  ;;  %v19680_v51 = vpack.c.bf16 %v19678_v38, %v19679_v54  ;;  %v19682_v57 = vld [vmem:[#allocation137_spill] sm:$0xff]  ;;  %v19696_v54 = vld [vmem:[#allocation152_spill] sm:$0xff] }
 0x798   : > { %v19683_v52 = vpack.c.bf16 %v19681_v36, %v19682_v57  ;;  %v19699_v57 = vld [vmem:[#allocation161_spill] sm:$0xff] }
 0x79e   : > { %8183 = vmatmul.mubr.bf16.gmra.mrb[100].mxu1 %v19668_v42  ;;  %v19685_v42 = vld [vmem:[#allocation135_spill] sm:$0xff] }
 0x79f   : > { %8190 = vmatprep.mubr.bf16.mxu1 %v19671_v44  ;;  %v19686_v7 = vpack.c.bf16 %v19684_v49, %v19685_v42  ;;  %v19688_v44 = vld [vmem:[#allocation145_spill] sm:$0xff]  ;;  %v19702_v42 = vld [vmem:[#allocation159_spill] sm:$0xff] }
 0x7a0   : > { %v19689_v28 = vpack.c.bf16 %v19687_v55, %v19688_v44  ;;  %v19705_v44 = vld [vmem:[#allocation169_spill] sm:$0xff] }
 0x7a6   : > { %8191 = vmatmul.mubr.bf16.gmra.mrb[104].mxu1 %v19674_v62  ;;  %v19691_v62 = vld [vmem:[#allocation143_spill] sm:$0xff] }
 0x7a7   : > { %8198 = vmatprep.mubr.bf16.mxu1 %v19677_v33  ;;  %v19692_v3 = vpack.c.bf16 %v19690_v24, %v19691_v62  ;;  %v19694_v33 = vld [vmem:[#allocation153_spill] sm:$0xff]  ;;  %v11659_v62 = vld [vmem:[%s17735_s4 + $0x180] sm:$0xff]  }
 0x7a8   : > { %v19695_v38 = vpack.c.bf16 %v19693_v47, %v19694_v33  ;;  %v19709_v47 = vld [vmem:[#allocation166_spill] sm:$0xff] }
 0x7ae   : > { %8199 = vmatmul.mubr.bf16.gmra.mrb[108].mxu1 %v19680_v51  ;;  %v19697_v51 = vld [vmem:[#allocation151_spill] sm:$0xff] }
 0x7af   : > { %8206 = vmatprep.mubr.bf16.mxu1 %v19683_v52  ;;  %v19698_v36 = vpack.c.bf16 %v19696_v54, %v19697_v51  ;;  %v19700_v52 = vld [vmem:[#allocation160_spill] sm:$0xff] }
 0x7b0   : > { %v19701_v49 = vpack.c.bf16 %v19699_v57, %v19700_v52  ;;  %v19712_v54 = vld [vmem:[#allocation176_spill] sm:$0xff]  ;;  %v19714_v52 = vld [vmem:[#allocation175_spill] sm:$0xff] }
 0x7b1   : > { %v11661_v57 = vld [vmem:[%s17735_s4 + $0x190] sm:$0xff]  }
 0x7b6   : > { %8207 = vmatmul.mubr.bf16.gmra.mrb[112].mxu1 %v19686_v7  ;;  %v19703_v7 = vld [vmem:[#allocation158_spill] sm:$0xff] }
 0x7b7   : > { %8214 = vmatprep.mubr.bf16.mxu1 %v19689_v28  ;;  %v19704_v55 = vpack.c.bf16 %v19702_v42, %v19703_v7  ;;  %v19706_v28 = vld [vmem:[#allocation168_spill] sm:$0xff]  ;;  %v19717_v7 = vld [vmem:[#allocation185_spill] sm:$0xff] }
 0x7b8   : > { %v19707_v24 = vpack.c.bf16 %v19705_v44, %v19706_v28  ;;  %v11662_v28 = vld [vmem:[%s17735_s4 + $0x198] sm:$0xff]  }
 0x7be   : > { %8215 = vmatmul.mubr.bf16.gmra.mrb[116].mxu1 %v19692_v3  ;;  %v19708_v3 = vld [vmem:[#allocation167_spill] sm:$0xff] }
 0x7bf   : > { %8222 = vmatprep.mubr.bf16.mxu1 %v19695_v38  ;;  %v19710_v33 = vpack.c.bf16 %v19708_v3, %v19709_v47  ;;  %v19711_v38 = vld [vmem:[#allocation177_spill] sm:$0xff]  ;;  %v19721_v3 = vld [vmem:[#allocation182_spill] sm:$0xff] }
 0x7c0   : > { %v19713_v51 = vpack.c.bf16 %v19711_v38, %v19712_v54  ;;  %v19724_v38 = vld [vmem:[#allocation192_spill] sm:$0xff] }
 0x7c6   : > { %8223 = vmatmul.mubr.bf16.gmra.mrb[120].mxu1 %v19698_v36  ;;  %v11660_v36 = vld [vmem:[%s17735_s4 + $0x188] sm:$0xff]  }
 0x7c7   : > { %8230 = vmatprep.mubr.bf16.mxu1 %v19701_v49  ;;  %v19715_v49 = vld [vmem:[#allocation174_spill] sm:$0xff] }
 0x7c8   : > { %v19716_v42 = vpack.c.bf16 %v19714_v52, %v19715_v49  ;;  %v19727_v52 = vld [vmem:[#allocation190_spill] sm:$0xff] }
 0x7ce   : > { %8231 = vmatmul.mubr.bf16.gmra.mrb[124].mxu1 %v19704_v55  ;;  %v19718_v55 = vld [vmem:[#allocation184_spill] sm:$0xff] }
 0x7cf   : > { %8271 = vmatprep.mubr.bf16.mxu1 %v19707_v24  ;;  %v19719_v44 = vpack.c.bf16 %v19717_v7, %v19718_v55  ;;  %v11663_v24 = vld [vmem:[%s17735_s4 + $0x1a0] sm:$0xff]  }
 0x7d0   : > { %v19730_v7 = vld [vmem:[#allocation198_spill] sm:$0xff] }
 0x7d6   : > { %8272 = vmatmul.mubr.bf16.vlgmr.msra.gmra.mrb[0].mxu1 %v19710_v33  ;;  %v19723_v33 = vld [vmem:[#allocation193_spill] sm:$0xff] }
 0x7d7   : > { %8529 = vmatpush1.bf16.msra.mxu1 %v11659_v62  ;;  %8279 = vmatprep.mubr.bf16.mxu1 %v19713_v51  ;;  %v19720_v62 = vld [vmem:[#allocation183_spill] sm:$0xff]  ;;  %v19725_v54 = vpack.c.bf16 %v19723_v33, %v19724_v38  ;;  %v19736_v33 = vld [vmem:[#allocation205_spill] sm:$0xff] }
 0x7d8   : > { %8530 = vmatprep.subr.bf16.mxu1 %v18871_v16  ;;  %v19722_v47 = vpack.c.bf16 %v19720_v62, %v19721_v3  ;;  %v11664_v51 = vld [vmem:[%s17735_s4 + $0x1a8] sm:$0xff]   ;;  %v19733_v62 = vld [vmem:[#allocation196_spill] sm:$0xff] }
 0x7db   : > { %8531 = vmatpush1.bf16.msra.mxu1 %v11660_v36  ;;  %v11665_v36 = vld [vmem:[%s17735_s4 + $0x1b0] sm:$0xff]  }
 0x7dc   : > { %8532 = vmatprep.subr.bf16.mxu1 %v18871_v16 }
 0x7de   : > { %8280 = vmatmul.mubr.bf16.gmra.mrb[4].mxu1 %v19716_v42  ;;  %v19729_v42 = vld [vmem:[#allocation199_spill] sm:$0xff] }
 0x7df   : > { %8287 = vmatprep.mubr.bf16.mxu1 %v19719_v44  ;;  %8533 = vmatpush1.bf16.msra.mxu1 %v11661_v57  ;;  %v19726_v57 = vld [vmem:[#allocation191_spill] sm:$0xff]  ;;  %v19731_v55 = vpack.c.bf16 %v19729_v42, %v19730_v7  ;;  %v11666_v44 = vld [vmem:[%s17735_s4 + $0x1b8] sm:$0xff]  }
 0x7e0   : > { %8534 = vmatprep.subr.bf16.mxu1 %v18871_v16  ;;  %v19728_v49 = vpack.c.bf16 %v19726_v57, %v19727_v52  ;;  %v19739_v57 = vld [vmem:[#allocation203_spill] sm:$0xff] }
 0x7e1   : > { %v19742_v42 = vld [vmem:[#allocation211_spill] sm:$0xff] }
 0x7e3   : > { %8535 = vmatpush1.bf16.msra.mxu1 %v11662_v28  ;;  %v11667_v28 = vld [vmem:[%s17735_s4 + $0x1c0] sm:$0xff]  }
 0x7e4   : > { %8536 = vmatprep.subr.bf16.mxu1 %v18871_v16 }
 0x7e6   : > { %8288 = vmatmul.mubr.bf16.gmra.mrb[8].mxu1 %v19722_v47  ;;  %v19735_v47 = vld [vmem:[#allocation206_spill] sm:$0xff] }
 0x7e7   : > { %8295 = vmatprep.mubr.bf16.mxu1 %v19725_v54  ;;  %8537 = vmatpush1.bf16.msra.mxu1 %v11663_v24  ;;  %v19732_v24 = vld [vmem:[#allocation197_spill] sm:$0xff]  ;;  %v19737_v38 = vpack.c.bf16 %v19735_v47, %v19736_v33  ;;  %v11668_v54 = vld [vmem:[%s17735_s4 + $0x1c8] sm:$0xff]   ;;  %v19750_v33 = vld [vmem:[#allocation216_spill] sm:$0xff] }
 0x7e8   : > { %8538 = vmatprep.subr.bf16.mxu1 %v18871_v16  ;;  %v19734_v3 = vpack.c.bf16 %v19732_v24, %v19733_v62  ;;  %v11670_v24 = vld [vmem:[%s17735_s4 + $0x1d8] sm:$0xff]   ;;  %v19747_v62 = vld [vmem:[#allocation218_spill] sm:$0xff] }
 0x7eb   : > { %8539 = vmatpush1.bf16.msra.mxu1 %v11664_v51  ;;  %v11669_v51 = vld [vmem:[%s17735_s4 + $0x1d0] sm:$0xff]  }
 0x7ec   : > { %8540 = vmatprep.subr.bf16.mxu1 %v18871_v16 }
 0x7ee   : > { %8296 = vmatmul.mubr.bf16.gmra.mrb[12].mxu1 %v19728_v49  ;;  %v19741_v49 = vld [vmem:[#allocation212_spill] sm:$0xff] }
 0x7ef   : > { %8303 = vmatprep.mubr.bf16.mxu1 %v19731_v55  ;;  %8541 = vmatpush1.bf16.msra.mxu1 %v11665_v36  ;;  %v19738_v36 = vld [vmem:[#allocation204_spill] sm:$0xff]  ;;  %v19743_v7 = vpack.c.bf16 %v19741_v49, %v19742_v42  ;;  %v19744_v55 = vld [vmem:[#allocation210_spill] sm:$0xff]  ;;  %v19757_v49 = vld [vmem:[#allocation221_spill] sm:$0xff] }
 0x7f0   : > { %8542 = vmatprep.subr.bf16.mxu1 %v18871_v16  ;;  %v19740_v52 = vpack.c.bf16 %v19738_v36, %v19739_v57  ;;  %v19754_v36 = vld [vmem:[#allocation223_spill] sm:$0xff] }
 0x7f3   : > { %8543 = vmatpush1.bf16.msra.mxu1 %v11666_v44  ;;  %v19745_v44 = vld [vmem:[#allocation209_spill] sm:$0xff] }
 0x7f4   : > { %8544 = vmatprep.subr.bf16.mxu1 %v18871_v16 }
 0x7f6   : > { %8304 = vmatmul.mubr.bf16.gmra.mrb[16].mxu1 %v19734_v3  ;;  %v19748_v3 = vld [vmem:[#allocation217_spill] sm:$0xff] }
 0x7f7   : > { %8311 = vmatprep.mubr.bf16.mxu1 %v19737_v38  ;;  %8545 = vmatpush1.bf16.msra.mxu1 %v11667_v28  ;;  %v19746_v28 = vpack.c.bf16 %v19744_v55, %v19745_v44  ;;  %v19749_v47 = vpack.c.bf16 %v19747_v62, %v19748_v3  ;;  %v19751_v38 = vld [vmem:[#allocation215_spill] sm:$0xff]  ;;  %v19759_v55 = vld [vmem:[#allocation230_spill] sm:$0xff]  ;;  %v19760_v44 = vld [vmem:[#allocation229_spill] sm:$0xff] }
 0x7f8   : > { %8546 = vmatprep.subr.bf16.mxu1 %v18871_v16  ;;  %v19763_v62 = vld [vmem:[#allocation227_spill] sm:$0xff] }
 0x7fb   : > { %8547 = vmatpush1.bf16.msra.mxu1 %v11668_v54  ;;  %v19752_v54 = vpack.c.bf16 %v19750_v33, %v19751_v38  ;;  %v19766_v33 = vld [vmem:[#allocation235_spill] sm:$0xff] }
 0x7fc   : > { %8548 = vmatprep.subr.bf16.mxu1 %v18871_v16 }
 0x7fe   : > { %8312 = vmatmul.mubr.bf16.gmra.mrb[20].mxu1 %v19740_v52  ;;  %v19756_v52 = vld [vmem:[#allocation222_spill] sm:$0xff] }
 0x7ff   : > { %8319 = vmatprep.mubr.bf16.mxu1 %v19743_v7  ;;  %8549 = vmatpush1.bf16.msra.mxu1 %v11669_v51  ;;  %v19753_v51 = vld [vmem:[#allocation224_spill] sm:$0xff]  ;;  %v19758_v42 = vpack.c.bf16 %v19756_v52, %v19757_v49  ;;  %v11671_v7 = vld [vmem:[%s17735_s4 + $0x1e0] sm:$0xff]   ;;  %v19772_v49 = vld [vmem:[#allocation241_spill] sm:$0xff] }
 0x800   : > { %8550 = vmatprep.subr.bf16.mxu1 %v18871_v16  ;;  %v19755_v57 = vpack.c.bf16 %v19753_v51, %v19754_v36  ;;  %v19769_v51 = vld [vmem:[#allocation233_spill] sm:$0xff]  ;;  %v19771_v52 = vld [vmem:[#allocation242_spill] sm:$0xff] }
 0x803   : > { %8551 = vmatpush1.bf16.msra.mxu1 %v11670_v24  ;;  %v19762_v24 = vld [vmem:[#allocation228_spill] sm:$0xff] }
 0x804   : > { %8552 = vmatprep.subr.bf16.mxu1 %v18871_v16  ;;  %v19764_v3 = vpack.c.bf16 %v19762_v24, %v19763_v62  ;;  %v19778_v24 = vld [vmem:[#allocation248_spill] sm:$0xff] }
 0x806   : > { %8320 = vmatmul.mubr.bf16.gmra.mrb[24].mxu1 %v19746_v28  ;;  %v19761_v28 = vpack.c.bf16 %v19759_v55, %v19760_v44  ;;  %v19775_v55 = vld [vmem:[#allocation239_spill] sm:$0xff] }
 0x807   : > { %8327 = vmatprep.mubr.bf16.mxu1 %v19749_v47  ;;  %8553 = vmatpush1.bf16.msra.mxu1 %v11671_v7  ;;  %v19765_v47 = vld [vmem:[#allocation236_spill] sm:$0xff] }
 0x808   : > { %8554 = vmatprep.subr.bf16.mxu1 %v18871_v16  ;;  %v19767_v38 = vpack.c.bf16 %v19765_v47, %v19766_v33  ;;  %v19774_v7 = vld [vmem:[#allocation240_spill] sm:$0xff]  ;;  %v19781_v47 = vld [vmem:[#allocation246_spill] sm:$0xff] }
 0x809   : > { %v19776_v44 = vpack.c.bf16 %v19774_v7, %v19775_v55  ;;  %v19790_v7 = vld [vmem:[#allocation262_spill] sm:$0xff] }
 0x80e   : > { %8328 = vmatmul.mubr.bf16.gmra.mrb[28].mxu1 %v19752_v54  ;;  %v19768_v54 = vld [vmem:[#allocation234_spill] sm:$0xff] }
 0x80f   : > { %8335 = vmatprep.mubr.bf16.mxu1 %v19755_v57  ;;  %v19770_v36 = vpack.c.bf16 %v19768_v54, %v19769_v51  ;;  %v11672_v57 = vld [vmem:[%s17735_s4 + $0x1e8] sm:$0xff]   ;;  %v19783_v54 = vld [vmem:[#allocation257_spill] sm:$0xff]  ;;  %v19784_v51 = vld [vmem:[#allocation256_spill] sm:$0xff] }
 0x810   : > { %8555 = vmatpush1.bf16.msra.mxu1 %v11672_v57  ;;  %v19786_v57 = vld [vmem:[#allocation255_spill] sm:$0xff] }
 0x811   : > { %8556 = vmatprep.subr.bf16.mxu1 %v18871_v16 }
 0x816   : > { %8336 = vmatmul.mubr.bf16.gmra.mrb[32].mxu1 %v19758_v42  ;;  %v19773_v42 = vpack.c.bf16 %v19771_v52, %v19772_v49  ;;  %v19787_v52 = vld [vmem:[#allocation254_spill] sm:$0xff] }
 0x817   : > { %8343 = vmatprep.mubr.bf16.mxu1 %v19761_v28  ;;  %v19777_v28 = vld [vmem:[#allocation249_spill] sm:$0xff]  ;;  %v19788_v49 = vpack.c.bf16 %v19786_v57, %v19787_v52  ;;  %v19804_v52 = vld [vmem:[#allocation274_spill] sm:$0xff] }
 0x818   : > { %v19779_v62 = vpack.c.bf16 %v19777_v28, %v19778_v24  ;;  %v19793_v28 = vld [vmem:[#allocation260_spill] sm:$0xff] }
 0x81e   : > { %8344 = vmatmul.mubr.bf16.gmra.mrb[36].mxu1 %v19764_v3  ;;  %v19780_v3 = vld [vmem:[#allocation247_spill] sm:$0xff] }
 0x81f   : > { %8351 = vmatprep.mubr.bf16.mxu1 %v19767_v38  ;;  %v19782_v33 = vpack.c.bf16 %v19780_v3, %v19781_v47  ;;  %v11673_v38 = vld [vmem:[%s17735_s4 + $0x1f0] sm:$0xff]   ;;  %v19795_v3 = vld [vmem:[#allocation271_spill] sm:$0xff]  ;;  %v19796_v47 = vld [vmem:[#allocation270_spill] sm:$0xff] }
 0x820   : > { %8557 = vmatpush1.bf16.msra.mxu1 %v11673_v38  ;;  %v19799_v38 = vld [vmem:[#allocation268_spill] sm:$0xff] }
 0x821   : > { %8558 = vmatprep.subr.bf16.mxu1 %v18871_v16  ;;  %v19798_v16 = vld [vmem:[#allocation269_spill] sm:$0xff] }
 0x826   : > { %8352 = vmatmul.mubr.bf16.gmra.mrb[40].mxu1 %v19770_v36  ;;  %v19785_v36 = vpack.c.bf16 %v19783_v54, %v19784_v51  ;;  %v19800_v54 = vpack.c.bf16 %v19798_v16, %v19799_v38  ;;  %v19801_v51 = vld [vmem:[#allocation276_spill] sm:$0xff]  ;;  %v19817_v38 = vld [vmem:[#allocation283_spill] sm:$0xff] }
 0x827   : > { %8359 = vmatprep.mubr.bf16.mxu1 %v19773_v42  ;;  %v19789_v42 = vld [vmem:[#allocation263_spill] sm:$0xff]  ;;  %v19816_v16 = vld [vmem:[#allocation284_spill] sm:$0xff] }
 0x828   : > { %v19791_v55 = vpack.c.bf16 %v19789_v42, %v19790_v7  ;;  %v19807_v7 = vld [vmem:[#allocation281_spill] sm:$0xff] }
 0x82e   : > { %8360 = vmatmul.mubr.bf16.gmra.mrb[44].mxu1 %v19776_v44  ;;  %v19792_v44 = vld [vmem:[#allocation261_spill] sm:$0xff] }
 0x82f   : > { %8367 = vmatprep.mubr.bf16.mxu1 %v19779_v62  ;;  %v19794_v24 = vpack.c.bf16 %v19792_v44, %v19793_v28  ;;  %v11674_v62 = vld [vmem:[%s17735_s4 + $0x1f8] sm:$0xff]   ;;  %v19810_v28 = vld [vmem:[#allocation279_spill] sm:$0xff] }
 0x830   : > { %8559 = vmatpush1.bf16.msra.mxu1 %v11674_v62  ;;  %v19813_v62 = vld [vmem:[#allocation286_spill] sm:$0xff] }
 0x836   : > { %8368 = vmatmul.mubr.bf16.gmra.mrb[48].mxu1 %v19782_v33  ;;  %v19797_v33 = vpack.c.bf16 %v19795_v3, %v19796_v47  ;;  %v19814_v47 = vld [vmem:[#allocation285_spill] sm:$0xff] }
 0x837   : > { %8375 = vmatprep.mubr.bf16.mxu1 %v19785_v36  ;;  %v19802_v36 = vld [vmem:[#allocation275_spill] sm:$0xff] }
 0x838   : > { %v19803_v57 = vpack.c.bf16 %v19801_v51, %v19802_v36  ;;  %v19819_v51 = vld [vmem:[#allocation292_spill] sm:$0xff]  ;;  %v19820_v36 = vld [vmem:[#allocation291_spill] sm:$0xff] }
 0x83e   : > { %8376 = vmatmul.mubr.bf16.gmra.mrb[52].mxu1 %v19788_v49  ;;  %v19805_v49 = vld [vmem:[#allocation273_spill] sm:$0xff] }
 0x83f   : > { %8383 = vmatprep.mubr.bf16.mxu1 %v19791_v55  ;;  %v19806_v42 = vpack.c.bf16 %v19804_v52, %v19805_v49  ;;  %v19808_v55 = vld [vmem:[#allocation280_spill] sm:$0xff]  ;;  %v19822_v52 = vld [vmem:[#allocation290_spill] sm:$0xff]  ;;  %v19823_v49 = vld [vmem:[#allocation289_spill] sm:$0xff] }
 0x840   : > { %v19809_v44 = vpack.c.bf16 %v19807_v7, %v19808_v55  ;;  %v19825_v7 = vld [vmem:[#allocation300_spill] sm:$0xff]  ;;  %v19826_v55 = vld [vmem:[#allocation299_spill] sm:$0xff] }
 0x846   : > { %8384 = vmatmul.mubr.bf16.gmra.mrb[56].mxu1 %v19794_v24  ;;  %v19811_v24 = vld [vmem:[#allocation278_spill] sm:$0xff] }
 0x847   : > { %8391 = vmatprep.mubr.bf16.mxu1 %v19797_v33  ;;  %v19812_v3 = vpack.c.bf16 %v19810_v28, %v19811_v24  ;;  %v19815_v33 = vpack.c.bf16 %v19813_v62, %v19814_v47  ;;  %v19828_v28 = vld [vmem:[#allocation298_spill] sm:$0xff]  ;;  %v19829_v24 = vld [vmem:[#allocation297_spill] sm:$0xff] }
 0x848   : > { %v19831_v62 = vld [vmem:[#allocation306_spill] sm:$0xff]  ;;  %v19832_v47 = vld [vmem:[#allocation305_spill] sm:$0xff] }
 0x84e   : > { %8392 = vmatmul.mubr.bf16.gmra.mrb[60].mxu1 %v19800_v54  ;;  %v19818_v54 = vpack.c.bf16 %v19816_v16, %v19817_v38  ;;  %v19834_v16 = vld [vmem:[#allocation304_spill] sm:$0xff]  ;;  %v19835_v38 = vld [vmem:[#allocation303_spill] sm:$0xff] }
 0x84f   : > { %8399 = vmatprep.mubr.bf16.mxu1 %v19803_v57  ;;  %v19821_v57 = vpack.c.bf16 %v19819_v51, %v19820_v36  ;;  %v19837_v51 = vld [vmem:[#allocation310_spill] sm:$0xff]  ;;  %v19838_v36 = vld [vmem:[#allocation309_spill] sm:$0xff] }
 0x856   : > { %8400 = vmatmul.mubr.bf16.gmra.mrb[64].mxu1 %v19806_v42  ;;  %v19824_v42 = vpack.c.bf16 %v19822_v52, %v19823_v49  ;;  %v19840_v52 = vld [vmem:[#allocation308_spill] sm:$0xff]  ;;  %v19841_v49 = vld [vmem:[#allocation307_spill] sm:$0xff] }
 0x857   : > { %8407 = vmatprep.mubr.bf16.mxu1 %v19809_v44  ;;  %v19827_v44 = vpack.c.bf16 %v19825_v7, %v19826_v55  ;;  %v19843_v7 = vld [vmem:[#allocation314_spill] sm:$0xff]  ;;  %v19844_v55 = vld [vmem:[#allocation313_spill] sm:$0xff] }
 0x85e   : > { %8408 = vmatmul.mubr.bf16.gmra.mrb[68].mxu1 %v19812_v3  ;;  %v19830_v3 = vpack.c.bf16 %v19828_v28, %v19829_v24  ;;  %v19846_v28 = vld [vmem:[#allocation312_spill] sm:$0xff]  ;;  %v19847_v24 = vld [vmem:[#allocation311_spill] sm:$0xff] }
 0x85f   : > { %8415 = vmatprep.mubr.bf16.mxu1 %v19815_v33  ;;  %v19833_v33 = vpack.c.bf16 %v19831_v62, %v19832_v47  ;;  %v19849_v62 = vld [vmem:[#allocation318_spill] sm:$0xff]  ;;  %v19850_v47 = vld [vmem:[#allocation317_spill] sm:$0xff] }
 0x866   : > { %8416 = vmatmul.mubr.bf16.gmra.mrb[72].mxu1 %v19818_v54  ;;  %v19836_v54 = vpack.c.bf16 %v19834_v16, %v19835_v38  ;;  %v19852_v16 = vld [vmem:[#allocation316_spill] sm:$0xff]  ;;  %v19853_v38 = vld [vmem:[#allocation315_spill] sm:$0xff] }
 0x867   : > { %8423 = vmatprep.mubr.bf16.mxu1 %v19821_v57  ;;  %v19839_v57 = vpack.c.bf16 %v19837_v51, %v19838_v36  ;;  %v19855_v51 = vld [vmem:[#allocation322_spill] sm:$0xff]  ;;  %v19856_v36 = vld [vmem:[#allocation321_spill] sm:$0xff] }
 0x86e   : > { %8424 = vmatmul.mubr.bf16.gmra.mrb[76].mxu1 %v19824_v42  ;;  %v19842_v42 = vpack.c.bf16 %v19840_v52, %v19841_v49  ;;  %v19858_v52 = vld [vmem:[#allocation320_spill] sm:$0xff]  ;;  %v19859_v49 = vld [vmem:[#allocation319_spill] sm:$0xff] }
 0x86f   : > { %8431 = vmatprep.mubr.bf16.mxu1 %v19827_v44  ;;  %v19845_v44 = vpack.c.bf16 %v19843_v7, %v19844_v55  ;;  %v19861_v7 = vld [vmem:[#allocation326_spill] sm:$0xff]  ;;  %v19862_v55 = vld [vmem:[#allocation325_spill] sm:$0xff] }
 0x876   : > { %8432 = vmatmul.mubr.bf16.gmra.mrb[80].mxu1 %v19830_v3  ;;  %v19848_v3 = vpack.c.bf16 %v19846_v28, %v19847_v24  ;;  %v19864_v28 = vld [vmem:[#allocation324_spill] sm:$0xff]  ;;  %v19865_v24 = vld [vmem:[#allocation323_spill] sm:$0xff] }
 0x877   : > { %8439 = vmatprep.mubr.bf16.mxu1 %v19833_v33  ;;  %v19851_v33 = vpack.c.bf16 %v19849_v62, %v19850_v47  ;;  %v19867_v62 = vld [vmem:[#allocation330_spill] sm:$0xff]  ;;  %v19868_v47 = vld [vmem:[#allocation329_spill] sm:$0xff] }
 0x87e   : > { %8440 = vmatmul.mubr.bf16.gmra.mrb[84].mxu1 %v19836_v54  ;;  %v19854_v54 = vpack.c.bf16 %v19852_v16, %v19853_v38  ;;  %v19870_v16 = vld [vmem:[#allocation328_spill] sm:$0xff]  ;;  %v19871_v38 = vld [vmem:[#allocation327_spill] sm:$0xff] }
 0x87f   : > { %8447 = vmatprep.mubr.bf16.mxu1 %v19839_v57  ;;  %v19857_v57 = vpack.c.bf16 %v19855_v51, %v19856_v36  ;;  %v19873_v51 = vld [vmem:[#allocation334_spill] sm:$0xff]  ;;  %v19874_v36 = vld [vmem:[#allocation333_spill] sm:$0xff] }
 0x886   : > { %8448 = vmatmul.mubr.bf16.gmra.mrb[88].mxu1 %v19842_v42  ;;  %v19860_v42 = vpack.c.bf16 %v19858_v52, %v19859_v49  ;;  %v19876_v52 = vld [vmem:[#allocation332_spill] sm:$0xff]  ;;  %v19877_v49 = vld [vmem:[#allocation331_spill] sm:$0xff] }
 0x887   : > { %8455 = vmatprep.mubr.bf16.mxu1 %v19845_v44  ;;  %v19863_v44 = vpack.c.bf16 %v19861_v7, %v19862_v55  ;;  %v19879_v7 = vld [vmem:[#allocation338_spill] sm:$0xff]  ;;  %v19880_v55 = vld [vmem:[#allocation337_spill] sm:$0xff] }
 0x88e   : > { %8456 = vmatmul.mubr.bf16.gmra.mrb[92].mxu1 %v19848_v3  ;;  %v19866_v3 = vpack.c.bf16 %v19864_v28, %v19865_v24  ;;  %v19882_v28 = vld [vmem:[#allocation336_spill] sm:$0xff]  ;;  %v19883_v24 = vld [vmem:[#allocation335_spill] sm:$0xff] }
 0x88f   : > { %8463 = vmatprep.mubr.bf16.mxu1 %v19851_v33  ;;  %v19869_v33 = vpack.c.bf16 %v19867_v62, %v19868_v47  ;;  %v19885_v62 = vld [vmem:[#allocation342_spill] sm:$0xff]  ;;  %v19886_v47 = vld [vmem:[#allocation341_spill] sm:$0xff] }
 0x896   : > { %8464 = vmatmul.mubr.bf16.gmra.mrb[96].mxu1 %v19854_v54  ;;  %v19872_v54 = vpack.c.bf16 %v19870_v16, %v19871_v38  ;;  %v19888_v16 = vld [vmem:[#allocation340_spill] sm:$0xff]  ;;  %v19889_v38 = vld [vmem:[#allocation339_spill] sm:$0xff] }
 0x897   : > { %8471 = vmatprep.mubr.bf16.mxu1 %v19857_v57  ;;  %v19875_v57 = vpack.c.bf16 %v19873_v51, %v19874_v36  ;;  %v19891_v51 = vld [vmem:[#allocation346_spill] sm:$0xff]  ;;  %v19892_v36 = vld [vmem:[#allocation345_spill] sm:$0xff] }
 0x89e   : > { %8472 = vmatmul.mubr.bf16.gmra.mrb[100].mxu1 %v19860_v42  ;;  %v19878_v42 = vpack.c.bf16 %v19876_v52, %v19877_v49  ;;  %v19894_v52 = vld [vmem:[#allocation344_spill] sm:$0xff]  ;;  %v19895_v49 = vld [vmem:[#allocation343_spill] sm:$0xff] }
 0x89f   : > { %8479 = vmatprep.mubr.bf16.mxu1 %v19863_v44  ;;  %v19881_v44 = vpack.c.bf16 %v19879_v7, %v19880_v55  ;;  %v19897_v7 = vld [vmem:[#allocation33_spill] sm:$0xff]  ;;  %v19898_v55 = vld [vmem:[#allocation35_spill] sm:$0xff] }
 0x8a6   : > { %8480 = vmatmul.mubr.bf16.gmra.mrb[104].mxu1 %v19866_v3  ;;  %v19884_v3 = vpack.c.bf16 %v19882_v28, %v19883_v24  ;;  %v19900_v28 = vld [vmem:[#allocation23_spill] sm:$0xff]  ;;  %v19901_v24 = vld [vmem:[#allocation24_spill] sm:$0xff] }
 0x8a7   : > { %8487 = vmatprep.mubr.bf16.mxu1 %v19869_v33  ;;  %v19887_v33 = vpack.c.bf16 %v19885_v62, %v19886_v47  ;;  %v19903_v62 = vld [vmem:[#allocation44_spill] sm:$0xff]  ;;  %v19904_v47 = vld [vmem:[#allocation45_spill] sm:$0xff] }
 0x8ae   : > { %8488 = vmatmul.mubr.bf16.gmra.mrb[108].mxu1 %v19872_v54  ;;  %v19890_v54 = vpack.c.bf16 %v19888_v16, %v19889_v38  ;;  %v19906_v16 = vld [vmem:[#allocation30_spill] sm:$0xff]  ;;  %v19907_v38 = vld [vmem:[#allocation31_spill] sm:$0xff] }
 0x8af   : > { %8495 = vmatprep.mubr.bf16.mxu1 %v19875_v57  ;;  %v19893_v57 = vpack.c.bf16 %v19891_v51, %v19892_v36  ;;  %v19909_v51 = vld [vmem:[#allocation50_spill] sm:$0xff]  ;;  %v19910_v36 = vld [vmem:[#allocation51_spill] sm:$0xff] }
 0x8b6   : > { %8496 = vmatmul.mubr.bf16.gmra.mrb[112].mxu1 %v19878_v42  ;;  %v19896_v42 = vpack.c.bf16 %v19894_v52, %v19895_v49  ;;  %v19912_v52 = vld [vmem:[#allocation39_spill] sm:$0xff]  ;;  %v19913_v49 = vld [vmem:[#allocation40_spill] sm:$0xff] }
 0x8b7   : > { %8503 = vmatprep.mubr.bf16.mxu1 %v19881_v44  ;;  %v19899_v44 = vpack.c.bf16 %v19897_v7, %v19898_v55  ;;  %v19915_v7 = vld [vmem:[#allocation60_spill] sm:$0xff]  ;;  %v19916_v55 = vld [vmem:[#allocation61_spill] sm:$0xff] }
 0x8be   : > { %8504 = vmatmul.mubr.bf16.gmra.mrb[116].mxu1 %v19884_v3  ;;  %v19902_v3 = vpack.c.bf16 %v19900_v28, %v19901_v24  ;;  %v19918_v28 = vld [vmem:[#allocation46_spill] sm:$0xff]  ;;  %v19919_v24 = vld [vmem:[#allocation47_spill] sm:$0xff] }
 0x8bf   : > { %8511 = vmatprep.mubr.bf16.mxu1 %v19887_v33  ;;  %v19905_v33 = vpack.c.bf16 %v19903_v62, %v19904_v47  ;;  %v19921_v62 = vld [vmem:[#allocation69_spill] sm:$0xff]  ;;  %v19922_v47 = vld [vmem:[#allocation70_spill] sm:$0xff] }
 0x8c6   : > { %8512 = vmatmul.mubr.bf16.gmra.mrb[120].mxu1 %v19890_v54  ;;  %v19908_v54 = vpack.c.bf16 %v19906_v16, %v19907_v38  ;;  %v19924_v16 = vld [vmem:[#allocation56_spill] sm:$0xff]  ;;  %v19925_v38 = vld [vmem:[#allocation57_spill] sm:$0xff] }
 0x8c7   : > { %8519 = vmatprep.mubr.bf16.mxu1 %v19893_v57  ;;  %v19911_v57 = vpack.c.bf16 %v19909_v51, %v19910_v36  ;;  %v19927_v51 = vld [vmem:[#allocation74_spill] sm:$0xff] }
 0x8c8   : > { %v19928_v36 = vld [vmem:[#allocation78_spill] sm:$0xff] }
 0x8ce   : > { %8520 = vmatmul.mubr.bf16.gmra.mrb[124].mxu1 %v19896_v42  ;;  %v19914_v42 = vpack.c.bf16 %v19912_v52, %v19913_v49  ;;  %v19930_v52 = vld [vmem:[#allocation62_spill] sm:$0xff]  ;;  %v19931_v49 = vld [vmem:[#allocation63_spill] sm:$0xff] }
 0x8cf   : > { %8560 = vmatprep.mubr.bf16.mxu1 %v19899_v44  ;;  %v19917_v44 = vpack.c.bf16 %v19915_v7, %v19916_v55  ;;  %v19933_v7 = vld [vmem:[#allocation94_spill] sm:$0xff]  ;;  %v19934_v55 = vld [vmem:[#allocation95_spill] sm:$0xff] }
 0x8d6   : > { %8561 = vmatmul.mubr.bf16.vlgmr.msra.gmra.mrb[0].mxu1 %v19902_v3  ;;  %v19920_v3 = vpack.c.bf16 %v19918_v28, %v19919_v24  ;;  %v19936_v28 = vld [vmem:[#allocation71_spill] sm:$0xff]  ;;  %v19937_v24 = vld [vmem:[#allocation72_spill] sm:$0xff] }
 0x8d7   : > { %8568 = vmatprep.mubr.bf16.mxu1 %v19905_v33  ;;  %v19923_v33 = vpack.c.bf16 %v19921_v62, %v19922_v47  ;;  %v19939_v62 = vld [vmem:[#allocation114_spill] sm:$0xff]  ;;  %v19940_v47 = vld [vmem:[#allocation120_spill] sm:$0xff] }
 0x8de   : > { %8569 = vmatmul.mubr.bf16.gmra.mrb[4].mxu1 %v19908_v54  ;;  %v19926_v54 = vpack.c.bf16 %v19924_v16, %v19925_v38  ;;  %v19942_v16 = vld [vmem:[#allocation92_spill] sm:$0xff]  ;;  %v19943_v38 = vld [vmem:[#allocation93_spill] sm:$0xff] }
 0x8df   : > { %8576 = vmatprep.mubr.bf16.mxu1 %v19911_v57  ;;  %v19929_v57 = vpack.c.bf16 %v19927_v51, %v19928_v36  ;;  %v19945_v51 = vld [vmem:[#allocation125_spill] sm:$0xff]  ;;  %v19946_v36 = vld [vmem:[#allocation126_spill] sm:$0xff] }
 0x8e6   : > { %8577 = vmatmul.mubr.bf16.gmra.mrb[8].mxu1 %v19914_v42  ;;  %v19932_v42 = vpack.c.bf16 %v19930_v52, %v19931_v49  ;;  %v19948_v52 = vld [vmem:[#allocation106_spill] sm:$0xff]  ;;  %v19949_v49 = vld [vmem:[#allocation107_spill] sm:$0xff] }
 0x8e7   : > { %8584 = vmatprep.mubr.bf16.mxu1 %v19917_v44  ;;  %v19935_v44 = vpack.c.bf16 %v19933_v7, %v19934_v55  ;;  %v19951_v7 = vld [vmem:[#allocation12_spill] sm:$0xff] }
 0x8e8   : > { %v19952_v55 = vld [vmem:[#allocation16_spill] sm:$0xff] }
 0x8ee   : > { %8585 = vmatmul.mubr.bf16.gmra.mrb[12].mxu1 %v19920_v3  ;;  %v19938_v3 = vpack.c.bf16 %v19936_v28, %v19937_v24  ;;  %v19954_v28 = vld [vmem:[#allocation119_spill] sm:$0xff]  ;;  %v19955_v24 = vld [vmem:[#allocation122_spill] sm:$0xff] }
 0x8ef   : > { %8592 = vmatprep.mubr.bf16.mxu1 %v19923_v33  ;;  %v19941_v33 = vpack.c.bf16 %v19939_v62, %v19940_v47  ;;  %v19957_v62 = vld [vmem:[#allocation28_spill] sm:$0xff] }
 0x8f0   : > { %v19958_v47 = vld [vmem:[#allocation32_spill] sm:$0xff] }
 0x8f6   : > { %8593 = vmatmul.mubr.bf16.gmra.mrb[16].mxu1 %v19926_v54  ;;  %v19944_v54 = vpack.c.bf16 %v19942_v16, %v19943_v38  ;;  %v19960_v16 = vld [vmem:[#allocation9_spill] sm:$0xff]  ;;  %v19961_v38 = vld [vmem:[#allocation10_spill] sm:$0xff] }
 0x8f7   : > { %8600 = vmatprep.mubr.bf16.mxu1 %v19929_v57  ;;  %v19947_v57 = vpack.c.bf16 %v19945_v51, %v19946_v36  ;;  %v19963_v51 = vld [vmem:[#allocation43_spill] sm:$0xff]  ;;  %v19964_v36 = vld [vmem:[#allocation48_spill] sm:$0xff] }
 0x8fe   : > { %8601 = vmatmul.mubr.bf16.gmra.mrb[20].mxu1 %v19932_v42  ;;  %v19950_v42 = vpack.c.bf16 %v19948_v52, %v19949_v49  ;;  %v19966_v52 = vld [vmem:[#allocation26_spill] sm:$0xff]  ;;  %v19967_v49 = vld [vmem:[#allocation27_spill] sm:$0xff] }
 0x8ff   : > { %8608 = vmatprep.mubr.bf16.mxu1 %v19935_v44  ;;  %v19953_v44 = vpack.c.bf16 %v19951_v7, %v19952_v55  ;;  %v19969_v7 = vld [vmem:[#allocation59_spill] sm:$0xff]  ;;  %v19970_v55 = vld [vmem:[#allocation64_spill] sm:$0xff] }
 0x906   : > { %8609 = vmatmul.mubr.bf16.gmra.mrb[24].mxu1 %v19938_v3  ;;  %v19956_v3 = vpack.c.bf16 %v19954_v28, %v19955_v24  ;;  %v19972_v28 = vld [vmem:[#allocation41_spill] sm:$0xff]  ;;  %v19973_v24 = vld [vmem:[#allocation42_spill] sm:$0xff] }
 0x907   : > { %8616 = vmatprep.mubr.bf16.mxu1 %v19941_v33  ;;  %v19959_v33 = vpack.c.bf16 %v19957_v62, %v19958_v47  ;;  %v19975_v62 = vld [vmem:[#allocation76_spill] sm:$0xff]  ;;  %v19976_v47 = vld [vmem:[#allocation77_spill] sm:$0xff] }
 0x90e   : > { %8617 = vmatmul.mubr.bf16.gmra.mrb[28].mxu1 %v19944_v54  ;;  %v19962_v54 = vpack.c.bf16 %v19960_v16, %v19961_v38  ;;  %v19978_v16 = vld [vmem:[#allocation55_spill] sm:$0xff]  ;;  %v19979_v38 = vld [vmem:[#allocation58_spill] sm:$0xff] }
 0x90f   : > { %8624 = vmatprep.mubr.bf16.mxu1 %v19947_v57  ;;  %v19965_v57 = vpack.c.bf16 %v19963_v51, %v19964_v36  ;;  %v19981_v51 = vld [vmem:[#allocation89_spill] sm:$0xff]  ;;  %v19982_v36 = vld [vmem:[#allocation90_spill] sm:$0xff] }
 0x916   : > { %8625 = vmatmul.mubr.bf16.gmra.mrb[32].mxu1 %v19950_v42  ;;  %v19968_v42 = vpack.c.bf16 %v19966_v52, %v19967_v49  ;;  %v19984_v52 = vld [vmem:[#allocation73_spill] sm:$0xff]  ;;  %v19985_v49 = vld [vmem:[#allocation75_spill] sm:$0xff] }
 0x917   : > { %8632 = vmatprep.mubr.bf16.mxu1 %v19953_v44  ;;  %v19971_v44 = vpack.c.bf16 %v19969_v7, %v19970_v55  ;;  %v19987_v7 = vld [vmem:[#allocation109_spill] sm:$0xff]  ;;  %v19988_v55 = vld [vmem:[#allocation110_spill] sm:$0xff] }
 0x91e   : > { %8633 = vmatmul.mubr.bf16.gmra.mrb[36].mxu1 %v19956_v3  ;;  %v19974_v3 = vpack.c.bf16 %v19972_v28, %v19973_v24  ;;  %v19990_v28 = vld [vmem:[#allocation87_spill] sm:$0xff]  ;;  %v19991_v24 = vld [vmem:[#allocation88_spill] sm:$0xff] }
 0x91f   : > { %8640 = vmatprep.mubr.bf16.mxu1 %v19959_v33  ;;  %v19977_v33 = vpack.c.bf16 %v19975_v62, %v19976_v47  ;;  %v19993_v62 = vld [vmem:[#allocation123_spill] sm:$0xff]  ;;  %v19994_v47 = vld [vmem:[#allocation124_spill] sm:$0xff] }
 0x926   : > { %8641 = vmatmul.mubr.bf16.gmra.mrb[40].mxu1 %v19962_v54  ;;  %v19980_v54 = vpack.c.bf16 %v19978_v16, %v19979_v38  ;;  %v19996_v16 = vld [vmem:[#allocation103_spill] sm:$0xff]  ;;  %v19997_v38 = vld [vmem:[#allocation108_spill] sm:$0xff] }
 0x927   : > { %8648 = vmatprep.mubr.bf16.mxu1 %v19965_v57  ;;  %v19983_v57 = vpack.c.bf16 %v19981_v51, %v19982_v36  ;;  %v19999_v51 = vld [vmem:[#allocation133_spill] sm:$0xff]  ;;  %v20000_v36 = vld [vmem:[#allocation134_spill] sm:$0xff] }
 0x92e   : > { %8649 = vmatmul.mubr.bf16.gmra.mrb[44].mxu1 %v19968_v42  ;;  %v19986_v42 = vpack.c.bf16 %v19984_v52, %v19985_v49  ;;  %v20002_v52 = vld [vmem:[#allocation118_spill] sm:$0xff]  ;;  %v20003_v49 = vld [vmem:[#allocation121_spill] sm:$0xff] }
 0x92f   : > { %8656 = vmatprep.mubr.bf16.mxu1 %v19971_v44  ;;  %v19989_v44 = vpack.c.bf16 %v19987_v7, %v19988_v55  ;;  %v20005_v7 = vld [vmem:[#allocation142_spill] sm:$0xff] }
 0x930   : > { %v20006_v55 = vpack.c.bf16 %v16422_v22, %v20005_v7  ;;  %v20020_v22 = vld [vmem:[#allocation149_spill] sm:$0xff] }
 0x936   : > { %8657 = vmatmul.mubr.bf16.gmra.mrb[48].mxu1 %v19974_v3  ;;  %v19992_v3 = vpack.c.bf16 %v19990_v28, %v19991_v24  ;;  %v20008_v28 = vld [vmem:[#allocation132_spill] sm:$0xff] }
 0x937   : > { %8664 = vmatprep.mubr.bf16.mxu1 %v19977_v33  ;;  %v19995_v33 = vpack.c.bf16 %v19993_v62, %v19994_v47  ;;  %v20011_v62 = vld [vmem:[#allocation139_spill] sm:$0xff] }
 0x93e   : > { %8665 = vmatmul.mubr.bf16.gmra.mrb[52].mxu1 %v19980_v54  ;;  %v19998_v54 = vpack.c.bf16 %v19996_v16, %v19997_v38  ;;  %v20014_v16 = vld [vmem:[#allocation141_spill] sm:$0xff] }
 0x93f   : > { %8672 = vmatprep.mubr.bf16.mxu1 %v19983_v57  ;;  %v20001_v57 = vpack.c.bf16 %v19999_v51, %v20000_v36  ;;  %v20017_v51 = vld [vmem:[#allocation147_spill] sm:$0xff] }
 0x946   : > { %8673 = vmatmul.mubr.bf16.gmra.mrb[56].mxu1 %v19986_v42  ;;  %v20004_v42 = vpack.c.bf16 %v20002_v52, %v20003_v49  ;;  %v20022_v49 = vld [vmem:[#allocation164_spill] sm:$0xff] }
 0x947   : > { %8680 = vmatprep.mubr.bf16.mxu1 %v19989_v44  ;;  %v20007_v44 = vld [vmem:[#allocation131_spill] sm:$0xff] }
 0x948   : > { %v20009_v24 = vpack.c.bf16 %v20007_v44, %v20008_v28  ;;  %v20026_v44 = vld [vmem:[#allocation156_spill] sm:$0xff] }
 0x94e   : > { %8681 = vmatmul.mubr.bf16.gmra.mrb[60].mxu1 %v19992_v3  ;;  %v20010_v3 = vld [vmem:[#allocation150_spill] sm:$0xff] }
 0x94f   : > { %8688 = vmatprep.mubr.bf16.mxu1 %v19995_v33  ;;  %v20012_v47 = vpack.c.bf16 %v20010_v3, %v20011_v62  ;;  %v20013_v33 = vld [vmem:[#allocation140_spill] sm:$0xff]  ;;  %v20029_v3 = vld [vmem:[#allocation173_spill] sm:$0xff] }
 0x950   : > { %v20015_v38 = vpack.c.bf16 %v20013_v33, %v20014_v16  ;;  %v20032_v33 = vld [vmem:[#allocation163_spill] sm:$0xff] }
 0x956   : > { %8689 = vmatmul.mubr.bf16.gmra.mrb[64].mxu1 %v19998_v54  ;;  %v20016_v54 = vld [vmem:[#allocation157_spill] sm:$0xff] }
 0x957   : > { %8696 = vmatprep.mubr.bf16.mxu1 %v20001_v57  ;;  %v20018_v36 = vpack.c.bf16 %v20016_v54, %v20017_v51  ;;  %v20019_v57 = vld [vmem:[#allocation148_spill] sm:$0xff]  ;;  %v20035_v54 = vpack.c.bf16 %v16528_v45, %v16525_v58  ;;  %v20036_v51 = vpack.c.bf16 %v16554_v63, %v16552_v41  ;;  %v20041_v58 = vpack.c.bf16 %v16598_v11, %v16595_v13 }
 0x958   : > { %v20021_v52 = vpack.c.bf16 %v20019_v57, %v20020_v22  ;;  %v20039_v22 = vpack.c.bf16 %v16576_v10, %v16573_v18  ;;  %v20042_v45 = vpack.c.bf16 %v16592_v5, %v16589_v23  ;;  %v20044_v10 = vpack.c.bf16 %v16614_v53, %v16611_v32 }
 0x959   : > { %v20045_v13 = vpack.c.bf16 %v16642_v17, %v16639_v25  ;;  %v20046_v32 = vpack.c.bf16 %v16636_v15, %v16633_v19  ;;  %v20047_v53 = vpack.c.bf16 %v16664_v12, %v16661_v60  ;;  %v20048_v19 = vpack.c.bf16 %v16658_v50, %v16655_v35 }
 0x95a   : > { %v20049_v15 = vpack.c.bf16 %v16693_v2, %v16690_v31  ;;  %v20050_v35 = vpack.c.bf16 %v16687_v4, %v16684_v0  ;;  %v20051_v50 = vpack.c.bf16 %v16723_v9, %v16720_v21  ;;  %v20052_v0 = vld [vmem:[#allocation181_spill] sm:$0xff]  ;;  %v20053_v4 = vld [vmem:[#allocation170_spill] sm:$0xff] }
 0x95e   : > { %8697 = vmatmul.mubr.bf16.gmra.mrb[68].mxu1 %v20004_v42  ;;  %v20023_v42 = vld [vmem:[#allocation165_spill] sm:$0xff] }
 0x95f   : > { %8704 = vmatprep.mubr.bf16.mxu1 %v20006_v55  ;;  %v20024_v7 = vpack.c.bf16 %v20022_v49, %v20023_v42  ;;  %v20025_v55 = vld [vmem:[#allocation155_spill] sm:$0xff] }
 0x960   : > { %v20027_v28 = vpack.c.bf16 %v20025_v55, %v20026_v44  ;;  %v20054_v44 = vpack.c.bf16 %v20052_v0, %v20053_v4 }
 0x966   : > { %8705 = vmatmul.mubr.bf16.gmra.mrb[72].mxu1 %v20009_v24  ;;  %v20028_v24 = vld [vmem:[#allocation172_spill] sm:$0xff] }
 0x967   : > { %8712 = vmatprep.mubr.bf16.mxu1 %v20012_v47  ;;  %v20030_v62 = vpack.c.bf16 %v20028_v24, %v20029_v3  ;;  %v20031_v47 = vld [vmem:[#allocation162_spill] sm:$0xff] }
 0x968   : > { %v20033_v16 = vpack.c.bf16 %v20031_v47, %v20032_v33 }
 0x96e   : > { %8713 = vmatmul.mubr.bf16.gmra.mrb[76].mxu1 %v20015_v38  ;;  %v20034_v38 = vpack.c.bf16 %v16532_v20, %v16530_v61  ;;  %v20040_v61 = vpack.c.bf16 %v16570_v14, %v16567_v1  ;;  %v20043_v20 = vpack.c.bf16 %v16620_v27, %v16617_v29 }
 0x96f   : > { %8720 = vmatprep.mubr.bf16.mxu1 %v20018_v36  ;;  %v20037_v36 = vld [vmem:[#allocation171_spill] sm:$0xff] }
 0x970   : > { %v20038_v57 = vpack.c.bf16 %v16550_v40, %v20037_v36 }
 0x976   : > { %8721 = vmatmul.mubr.bf16.gmra.mrb[80].mxu1 %v20021_v52 }
 0x977   : > { %8728 = vmatprep.mubr.bf16.mxu1 %v20024_v7 }
 0x97e   : > { %8729 = vmatmul.mubr.bf16.gmra.mrb[84].mxu1 %v20027_v28 }
 0x97f   : > { %8736 = vmatprep.mubr.bf16.mxu1 %v20030_v62  ;;  %v20055_v62 = vld [vmem:[#allocation179_spill] sm:$0xff] }
 0x986   : > { %8737 = vmatmul.mubr.bf16.gmra.mrb[88].mxu1 %v20033_v16 }
 0x987   : > { %8744 = vmatprep.mubr.bf16.mxu1 %v20034_v38  ;;  %v20056_v38 = vld [vmem:[#allocation189_spill] sm:$0xff] }
 0x98e   : > { %8745 = vmatmul.mubr.bf16.gmra.mrb[92].mxu1 %v20035_v54 }
 0x98f   : > { %8752 = vmatprep.mubr.bf16.mxu1 %v20036_v51 }
 0x996   : > { %8753 = vmatmul.mubr.bf16.gmra.mrb[96].mxu1 %v20038_v57 }
 0x997   : > { %8760 = vmatprep.mubr.bf16.mxu1 %v20039_v22 }
 0x99e   : > { %8761 = vmatmul.mubr.bf16.gmra.mrb[100].mxu1 %v20040_v61  ;;  %v20058_v61 = vld [vmem:[#allocation178_spill] sm:$0xff] }
 0x99f   : > { %8768 = vmatprep.mubr.bf16.mxu1 %v20041_v58 }
 0x9a6   : > { %8769 = vmatmul.mubr.bf16.gmra.mrb[104].mxu1 %v20042_v45 }
 0x9a7   : > { %8776 = vmatprep.mubr.bf16.mxu1 %v20043_v20 }
 0x9a9   : > { %v8562_v40 = vpop.f32.mrb[0].mxu1 }
 0x9aa   : > { %v8852_v41 = vadd.f32 %v16784_v6, %v8562_v40  ;;  %v8564_v63 = vpop.f32.mrb[1].mxu1  ;;  %v20059_v40 = vld [vmem:[#allocation187_spill] sm:$0xff] }
 0x9ab   : > { %v8565_v18 = vpop.f32.mrb[2].mxu1 }
 0x9ac   : > { %9107 = vst.msk [vmem:[%s17507_s7] sm:$0xff] %vm9106_vm4, %v8852_v41  ;;  %v8855_v1 = vadd.f32 %v16791_v46, %v8565_v18  ;;  %v8567_v14 = vpop.f32.mrb[3].mxu1 }
 0x9ae   : > { %9108 = vst.msk [vmem:[%s17507_s7 + $0x8] sm:$0xff] %vm9106_vm4, %v8855_v1  ;;  %8777 = vmatmul.mubr.bf16.gmra.mrb[108].mxu1 %v20044_v10  ;;  %v20060_v1 = vld [vmem:[#allocation195_spill] sm:$0xff] }
 0x9af   : > { %8784 = vmatprep.mubr.bf16.mxu1 %v20045_v13 }
 0x9b1   : > { %v8570_v23 = vpop.f32.mrb[4].mxu1 }
 0x9b2   : > { %v8860_v5 = vadd.f32 %v16782_v39, %v8570_v23  ;;  %v8572_v11 = vpop.f32.mrb[5].mxu1  ;;  %v20061_v23 = vld [vmem:[#allocation188_spill] sm:$0xff] }
 0x9b3   : > { %v8573_v29 = vpop.f32.mrb[6].mxu1 }
 0x9b4   : > { %9109 = vst.msk [vmem:[%s17507_s7 + $0x10] sm:$0xff] %vm9106_vm4, %v8860_v5  ;;  %v8863_v27 = vadd.f32 %v16786_v8, %v8573_v29  ;;  %v8575_v46 = vpop.f32.mrb[7].mxu1 }
 0x9b6   : > { %9110 = vst.msk [vmem:[%s17507_s7 + $0x18] sm:$0xff] %vm9106_vm4, %v8863_v27  ;;  %8785 = vmatmul.mubr.bf16.gmra.mrb[112].mxu1 %v20046_v32  ;;  %v20062_v27 = vld [vmem:[#allocation186_spill] sm:$0xff] }
 0x9b7   : > { %8792 = vmatprep.mubr.bf16.mxu1 %v20047_v53 }
 0x9b9   : > { %v8578_v25 = vpop.f32.mrb[8].mxu1 }
 0x9ba   : > { %v8868_v17 = vadd.f32 %v16802_v26, %v8578_v25  ;;  %v8580_v39 = vpop.f32.mrb[9].mxu1  ;;  %v20063_v25 = vld [vmem:[#allocation202_spill] sm:$0xff] }
 0x9bb   : > { %v8581_v6 = vpop.f32.mrb[10].mxu1 }
 0x9bc   : > { %9111 = vst.msk [vmem:[%s17507_s7 + $0x20] sm:$0xff] %vm9106_vm4, %v8868_v17  ;;  %v8871_v8 = vadd.f32 %v16809_v59, %v8581_v6  ;;  %v8583_v52 = vpop.f32.mrb[11].mxu1 }
 0x9be   : > { %9112 = vst.msk [vmem:[%s17507_s7 + $0x28] sm:$0xff] %vm9106_vm4, %v8871_v8  ;;  %8793 = vmatmul.mubr.bf16.gmra.mrb[116].mxu1 %v20048_v19  ;;  %v20064_v8 = vld [vmem:[#allocation200_spill] sm:$0xff] }
 0x9bf   : > { %8800 = vmatprep.mubr.bf16.mxu1 %v20049_v15 }
 0x9c1   : > { %v8586_v60 = vpop.f32.mrb[12].mxu1 }
 0x9c2   : > { %v8876_v12 = vadd.f32 %v16800_v48, %v8586_v60  ;;  %v8588_v26 = vpop.f32.mrb[13].mxu1  ;;  %v20065_v60 = vld [vmem:[#allocation194_spill] sm:$0xff] }
 0x9c3   : > { %v8589_v49 = vpop.f32.mrb[14].mxu1 }
 0x9c4   : > { %9113 = vst.msk [vmem:[%s17507_s7 + $0x30] sm:$0xff] %vm9106_vm4, %v8876_v12  ;;  %v8879_v59 = vadd.f32 %v16804_v56, %v8589_v49  ;;  %v8591_v42 = vpop.f32.mrb[15].mxu1 }
 0x9c6   : > { %9114 = vst.msk [vmem:[%s17507_s7 + $0x38] sm:$0xff] %vm9106_vm4, %v8879_v59  ;;  %8801 = vmatmul.mubr.bf16.gmra.mrb[120].mxu1 %v20050_v35  ;;  %v20066_v59 = vld [vmem:[#allocation201_spill] sm:$0xff] }
 0x9c7   : > { %8808 = vmatprep.mubr.bf16.mxu1 %v20051_v50 }
 0x9c9   : > { %v8594_v31 = vpop.f32.mrb[16].mxu1 }
 0x9ca   : > { %v8884_v2 = vadd.f32 %v16816_v37, %v8594_v31  ;;  %v8596_v48 = vpop.f32.mrb[17].mxu1  ;;  %v20067_v31 = vld [vmem:[#allocation207_spill] sm:$0xff] }
 0x9cb   : > { %v8597_v7 = vpop.f32.mrb[18].mxu1 }
 0x9cc   : > { %9115 = vst.msk [vmem:[%s17507_s7 + $0x40] sm:$0xff] %vm9106_vm4, %v8884_v2  ;;  %v8887_v56 = vadd.f32 %v16823_v34, %v8597_v7  ;;  %v8599_v55 = vpop.f32.mrb[19].mxu1 }
 0x9ce   : > { %9116 = vst.msk [vmem:[%s17507_s7 + $0x48] sm:$0xff] %vm9106_vm4, %v8887_v56  ;;  %8809 = vmatmul.mubr.bf16.gmra.mrb[124].mxu1 %v20054_v44  ;;  %v20068_v56 = vld [vmem:[#allocation213_spill] sm:$0xff]  ;;  %v20069_v44 = vld [vmem:[#allocation208_spill] sm:$0xff] }
 0x9d1   : > { %v8602_v21 = vpop.f32.mrb[20].mxu1 }
 0x9d2   : > { %v8892_v9 = vadd.f32 %v16814_v30, %v8602_v21  ;;  %v8604_v28 = vpop.f32.mrb[21].mxu1 }
 0x9d3   : > { %v8605_v37 = vpop.f32.mrb[22].mxu1 }
 0x9d4   : > { %9117 = vst.msk [vmem:[%s17507_s7 + $0x50] sm:$0xff] %vm9106_vm4, %v8892_v9  ;;  %v8895_v24 = vadd.f32 %v16818_v43, %v8605_v37  ;;  %v8607_v34 = vpop.f32.mrb[23].mxu1  ;;  %v20057_v43 = vld [vmem:[#allocation180_spill] sm:$0xff]  ;;  %v20070_v37 = vld [vmem:[#allocation214_spill] sm:$0xff] }
 0x9d6   : > { %9118 = vst.msk [vmem:[%s17507_s7 + $0x58] sm:$0xff] %vm9106_vm4, %v8895_v24 }
 0x9d9   : > { %v8610_v3 = vpop.f32.mrb[24].mxu1 }
 0x9da   : > { %v8900_v47 = vadd.f32 %v20055_v62, %v8610_v3  ;;  %v8612_v33 = vpop.f32.mrb[25].mxu1  ;;  %v20071_v62 = vld [vmem:[#allocation219_spill] sm:$0xff] }
 0x9db   : > { %v8613_v16 = vpop.f32.mrb[26].mxu1 }
 0x9dc   : > { %9119 = vst.msk [vmem:[%s17507_s7 + $0x60] sm:$0xff] %vm9106_vm4, %v8900_v47  ;;  %v8903_v30 = vadd.f32 %v20056_v38, %v8613_v16  ;;  %v8615_v54 = vpop.f32.mrb[27].mxu1  ;;  %v20072_v38 = vld [vmem:[#allocation225_spill] sm:$0xff] }
 0x9de   : > { %9120 = vst.msk [vmem:[%s17507_s7 + $0x68] sm:$0xff] %vm9106_vm4, %v8903_v30 }
 0x9e1   : > { %v8618_v51 = vpop.f32.mrb[28].mxu1 }
 0x9e2   : > { %v8908_v36 = vadd.f32 %v20057_v43, %v8618_v51  ;;  %v8620_v57 = vpop.f32.mrb[29].mxu1  ;;  %v20073_v43 = vld [vmem:[#allocation220_spill] sm:$0xff] }
 0x9e3   : > { %v8621_v22 = vpop.f32.mrb[30].mxu1 }
 0x9e4   : > { %9121 = vst.msk [vmem:[%s17507_s7 + $0x70] sm:$0xff] %vm9106_vm4, %v8908_v36  ;;  %v8911_v58 = vadd.f32 %v20058_v61, %v8621_v22  ;;  %v8623_v45 = vpop.f32.mrb[31].mxu1  ;;  %v20074_v61 = vld [vmem:[#allocation226_spill] sm:$0xff] }
 0x9e6   : > { %9122 = vst.msk [vmem:[%s17507_s7 + $0x78] sm:$0xff] %vm9106_vm4, %v8911_v58 }
 0x9e9   : > { %v8626_v20 = vpop.f32.mrb[32].mxu1 }
 0x9ea   : > { %v8916_v41 = vadd.f32 %v20059_v40, %v8626_v20  ;;  %v8628_v63 = vpop.f32.mrb[33].mxu1  ;;  %v20075_v40 = vld [vmem:[#allocation231_spill] sm:$0xff] }
 0x9eb   : > { %v8629_v18 = vpop.f32.mrb[34].mxu1 }
 0x9ec   : > { %9123 = vst.msk [vmem:[%s17507_s7 + $0x80] sm:$0xff] %vm9106_vm4, %v8916_v41  ;;  %v8919_v14 = vadd.f32 %v20060_v1, %v8629_v18  ;;  %v8631_v10 = vpop.f32.mrb[35].mxu1  ;;  %v20076_v1 = vld [vmem:[#allocation237_spill] sm:$0xff] }
 0x9ee   : > { %9124 = vst.msk [vmem:[%s17507_s7 + $0x88] sm:$0xff] %vm9106_vm4, %v8919_v14 }
 0x9f1   : > { %v8634_v13 = vpop.f32.mrb[36].mxu1 }
 0x9f2   : > { %v8924_v5 = vadd.f32 %v20061_v23, %v8634_v13  ;;  %v8636_v11 = vpop.f32.mrb[37].mxu1  ;;  %v20077_v23 = vld [vmem:[#allocation232_spill] sm:$0xff] }
 0x9f3   : > { %v8637_v29 = vpop.f32.mrb[38].mxu1 }
 0x9f4   : > { %9125 = vst.msk [vmem:[%s17507_s7 + $0x90] sm:$0xff] %vm9106_vm4, %v8924_v5  ;;  %v8927_v46 = vadd.f32 %v20062_v27, %v8637_v29  ;;  %v8639_v32 = vpop.f32.mrb[39].mxu1  ;;  %v20078_v27 = vld [vmem:[#allocation238_spill] sm:$0xff] }
 0x9f6   : > { %9126 = vst.msk [vmem:[%s17507_s7 + $0x98] sm:$0xff] %vm9106_vm4, %v8927_v46 }
 0x9f9   : > { %v8642_v53 = vpop.f32.mrb[40].mxu1 }
 0x9fa   : > { %v8932_v17 = vadd.f32 %v20063_v25, %v8642_v53  ;;  %v8644_v39 = vpop.f32.mrb[41].mxu1  ;;  %v20079_v25 = vld [vmem:[#allocation244_spill] sm:$0xff] }
 0x9fb   : > { %v8645_v6 = vpop.f32.mrb[42].mxu1 }
 0x9fc   : > { %9127 = vst.msk [vmem:[%s17507_s7 + $0xa0] sm:$0xff] %vm9106_vm4, %v8932_v17  ;;  %v8935_v52 = vadd.f32 %v20064_v8, %v8645_v6  ;;  %v8647_v19 = vpop.f32.mrb[43].mxu1  ;;  %v20080_v8 = vld [vmem:[#allocation253_spill] sm:$0xff] }
 0x9fe   : > { %9128 = vst.msk [vmem:[%s17507_s7 + $0xa8] sm:$0xff] %vm9106_vm4, %v8935_v52 }
 0xa01   : > { %v8650_v15 = vpop.f32.mrb[44].mxu1 }
 0xa02   : > { %v8940_v12 = vadd.f32 %v20065_v60, %v8650_v15  ;;  %v8652_v26 = vpop.f32.mrb[45].mxu1  ;;  %v20081_v60 = vld [vmem:[#allocation245_spill] sm:$0xff] }
 0xa03   : > { %v8653_v49 = vpop.f32.mrb[46].mxu1 }
 0xa04   : > { %9129 = vst.msk [vmem:[%s17507_s7 + $0xb0] sm:$0xff] %vm9106_vm4, %v8940_v12  ;;  %v8943_v42 = vadd.f32 %v20066_v59, %v8653_v49  ;;  %v8655_v35 = vpop.f32.mrb[47].mxu1  ;;  %v20082_v59 = vld [vmem:[#allocation243_spill] sm:$0xff] }
 0xa06   : > { %9130 = vst.msk [vmem:[%s17507_s7 + $0xb8] sm:$0xff] %vm9106_vm4, %v8943_v42 }
 0xa09   : > { %v8658_v50 = vpop.f32.mrb[48].mxu1 }
 0xa0a   : > { %v8948_v2 = vadd.f32 %v20067_v31, %v8658_v50  ;;  %v8660_v48 = vpop.f32.mrb[49].mxu1  ;;  %v20083_v31 = vld [vmem:[#allocation251_spill] sm:$0xff] }
 0xa0b   : > { %v8661_v7 = vpop.f32.mrb[50].mxu1 }
 0xa0c   : > { %9131 = vst.msk [vmem:[%s17507_s7 + $0xc0] sm:$0xff] %vm9106_vm4, %v8948_v2  ;;  %v8951_v55 = vadd.f32 %v20068_v56, %v8661_v7  ;;  %v8663_v0 = vpop.f32.mrb[51].mxu1  ;;  %v20084_v56 = vld [vmem:[#allocation259_spill] sm:$0xff] }
 0xa0e   : > { %9132 = vst.msk [vmem:[%s17507_s7 + $0xc8] sm:$0xff] %vm9106_vm4, %v8951_v55 }
 0xa11   : > { %v8666_v4 = vpop.f32.mrb[52].mxu1 }
 0xa12   : > { %v8956_v21 = vadd.f32 %v20069_v44, %v8666_v4  ;;  %v8668_v9 = vpop.f32.mrb[53].mxu1  ;;  %v20085_v44 = vld [vmem:[#allocation252_spill] sm:$0xff] }
 0xa13   : > { %v8669_v28 = vpop.f32.mrb[54].mxu1 }
 0xa14   : > { %9133 = vst.msk [vmem:[%s17507_s7 + $0xd0] sm:$0xff] %vm9106_vm4, %v8956_v21  ;;  %v8959_v24 = vadd.f32 %v20070_v37, %v8669_v28  ;;  %v8671_v34 = vpop.f32.mrb[55].mxu1  ;;  %v20086_v37 = vld [vmem:[#allocation250_spill] sm:$0xff] }
 0xa16   : > { %9134 = vst.msk [vmem:[%s17507_s7 + $0xd8] sm:$0xff] %vm9106_vm4, %v8959_v24 }
 0xa19   : > { %v8674_v3 = vpop.f32.mrb[56].mxu1 }
 0xa1a   : > { %v8964_v47 = vadd.f32 %v20071_v62, %v8674_v3  ;;  %v8676_v33 = vpop.f32.mrb[57].mxu1  ;;  %v20087_v62 = vld [vmem:[#allocation5_spill] sm:$0xff] }
 0xa1b   : > { %v8677_v16 = vpop.f32.mrb[58].mxu1 }
 0xa1c   : > { %9135 = vst.msk [vmem:[%s17507_s7 + $0xe0] sm:$0xff] %vm9106_vm4, %v8964_v47  ;;  %v8967_v30 = vadd.f32 %v20072_v38, %v8677_v16  ;;  %v8679_v54 = vpop.f32.mrb[59].mxu1  ;;  %v20088_v38 = vld [vmem:[#allocation266_spill] sm:$0xff] }
 0xa1e   : > { %9136 = vst.msk [vmem:[%s17507_s7 + $0xe8] sm:$0xff] %vm9106_vm4, %v8967_v30 }
 0xa21   : > { %v8682_v51 = vpop.f32.mrb[60].mxu1 }
 0xa22   : > { %v8972_v36 = vadd.f32 %v20073_v43, %v8682_v51  ;;  %v8684_v57 = vpop.f32.mrb[61].mxu1  ;;  %v20089_v43 = vld [vmem:[#allocation258_spill] sm:$0xff] }
 0xa23   : > { %v8685_v22 = vpop.f32.mrb[62].mxu1 }
 0xa24   : > { %9137 = vst.msk [vmem:[%s17507_s7 + $0xf0] sm:$0xff] %vm9106_vm4, %v8972_v36  ;;  %v8975_v58 = vadd.f32 %v20074_v61, %v8685_v22  ;;  %v8687_v45 = vpop.f32.mrb[63].mxu1  ;;  %v20090_v61 = vld [vmem:[#allocation267_spill] sm:$0xff] }
 0xa26   : > { %9138 = vst.msk [vmem:[%s17507_s7 + $0xf8] sm:$0xff] %vm9106_vm4, %v8975_v58 }
 0xa29   : > { %v8690_v20 = vpop.f32.mrb[64].mxu1 }
 0xa2a   : > { %v8980_v41 = vadd.f32 %v20075_v40, %v8690_v20  ;;  %v8692_v63 = vpop.f32.mrb[65].mxu1  ;;  %v20091_v40 = vld [vmem:[#allocation264_spill] sm:$0xff] }
 0xa2b   : > { %v8693_v18 = vpop.f32.mrb[66].mxu1 }
 0xa2c   : > { %9139 = vst.msk [vmem:[%s17507_s7 + $0x100] sm:$0xff] %vm9106_vm4, %v8980_v41  ;;  %v8983_v14 = vadd.f32 %v20076_v1, %v8693_v18  ;;  %v8695_v10 = vpop.f32.mrb[67].mxu1  ;;  %v20092_v1 = vld [vmem:[#allocation277_spill] sm:$0xff] }
 0xa2e   : > { %9140 = vst.msk [vmem:[%s17507_s7 + $0x108] sm:$0xff] %vm9106_vm4, %v8983_v14 }
 0xa31   : > { %v8698_v13 = vpop.f32.mrb[68].mxu1 }
 0xa32   : > { %v8988_v5 = vadd.f32 %v20077_v23, %v8698_v13  ;;  %v8700_v11 = vpop.f32.mrb[69].mxu1  ;;  %v20093_v23 = vld [vmem:[#allocation265_spill] sm:$0xff] }
 0xa33   : > { %v8701_v29 = vpop.f32.mrb[70].mxu1 }
 0xa34   : > { %9141 = vst.msk [vmem:[%s17507_s7 + $0x110] sm:$0xff] %vm9106_vm4, %v8988_v5  ;;  %v8991_v46 = vadd.f32 %v20078_v27, %v8701_v29  ;;  %v8703_v32 = vpop.f32.mrb[71].mxu1  ;;  %v20094_v27 = vld [vmem:[#allocation272_spill] sm:$0xff] }
 0xa36   : > { %9142 = vst.msk [vmem:[%s17507_s7 + $0x118] sm:$0xff] %vm9106_vm4, %v8991_v46 }
 0xa39   : > { %v8706_v53 = vpop.f32.mrb[72].mxu1 }
 0xa3a   : > { %v8996_v17 = vadd.f32 %v20079_v25, %v8706_v53  ;;  %v8708_v39 = vpop.f32.mrb[73].mxu1  ;;  %v20095_v25 = vld [vmem:[#allocation288_spill] sm:$0xff] }
 0xa3b   : > { %v8709_v6 = vpop.f32.mrb[74].mxu1 }
 0xa3c   : > { %9143 = vst.msk [vmem:[%s17507_s7 + $0x120] sm:$0xff] %vm9106_vm4, %v8996_v17  ;;  %v8999_v52 = vadd.f32 %v20080_v8, %v8709_v6  ;;  %v8711_v19 = vpop.f32.mrb[75].mxu1  ;;  %v20096_v8 = vld [vmem:[#allocation296_spill] sm:$0xff] }
 0xa3e   : > { %9144 = vst.msk [vmem:[%s17507_s7 + $0x128] sm:$0xff] %vm9106_vm4, %v8999_v52 }
 0xa41   : > { %v8714_v15 = vpop.f32.mrb[76].mxu1 }
 0xa42   : > { %v9004_v12 = vadd.f32 %v20081_v60, %v8714_v15  ;;  %v8716_v26 = vpop.f32.mrb[77].mxu1  ;;  %v20097_v60 = vld [vmem:[#allocation282_spill] sm:$0xff] }
 0xa43   : > { %v8717_v49 = vpop.f32.mrb[78].mxu1 }
 0xa44   : > { %9145 = vst.msk [vmem:[%s17507_s7 + $0x130] sm:$0xff] %vm9106_vm4, %v9004_v12  ;;  %v9007_v42 = vadd.f32 %v20082_v59, %v8717_v49  ;;  %v8719_v35 = vpop.f32.mrb[79].mxu1  ;;  %v20098_v59 = vld [vmem:[#allocation287_spill] sm:$0xff] }
 0xa46   : > { %9146 = vst.msk [vmem:[%s17507_s7 + $0x138] sm:$0xff] %vm9106_vm4, %v9007_v42 }
 0xa49   : > { %v8722_v50 = vpop.f32.mrb[80].mxu1 }
 0xa4a   : > { %v9012_v2 = vadd.f32 %v20083_v31, %v8722_v50  ;;  %v8724_v48 = vpop.f32.mrb[81].mxu1  ;;  %v20099_v31 = vld [vmem:[#allocation294_spill] sm:$0xff] }
 0xa4b   : > { %v8725_v7 = vpop.f32.mrb[82].mxu1 }
 0xa4c   : > { %9147 = vst.msk [vmem:[%s17507_s7 + $0x140] sm:$0xff] %vm9106_vm4, %v9012_v2  ;;  %v9015_v55 = vadd.f32 %v20084_v56, %v8725_v7  ;;  %v8727_v0 = vpop.f32.mrb[83].mxu1  ;;  %v20100_v56 = vld [vmem:[#allocation302_spill] sm:$0xff] }
 0xa4e   : > { %9148 = vst.msk [vmem:[%s17507_s7 + $0x148] sm:$0xff] %vm9106_vm4, %v9015_v55 }
 0xa51   : > { %v8730_v4 = vpop.f32.mrb[84].mxu1 }
 0xa52   : > { %v9020_v21 = vadd.f32 %v20085_v44, %v8730_v4  ;;  %v8732_v9 = vpop.f32.mrb[85].mxu1  ;;  %v20101_v44 = vld [vmem:[#allocation295_spill] sm:$0xff] }
 0xa53   : > { %v8733_v28 = vpop.f32.mrb[86].mxu1 }
 0xa54   : > { %9149 = vst.msk [vmem:[%s17507_s7 + $0x150] sm:$0xff] %vm9106_vm4, %v9020_v21  ;;  %v9023_v24 = vadd.f32 %v20086_v37, %v8733_v28  ;;  %v8735_v34 = vpop.f32.mrb[87].mxu1  ;;  %v20102_v37 = vld [vmem:[#allocation293_spill] sm:$0xff] }
 0xa56   : > { %9150 = vst.msk [vmem:[%s17507_s7 + $0x158] sm:$0xff] %vm9106_vm4, %v9023_v24 }
 0xa59   : > { %v8738_v3 = vpop.f32.mrb[88].mxu1 }
 0xa5a   : > { %v9028_v47 = vadd.f32 %v20087_v62, %v8738_v3  ;;  %v8740_v33 = vpop.f32.mrb[89].mxu1  ;;  %v20103_v62 = vld [vmem:[#allocation11_spill] sm:$0xff] }
 0xa5b   : > { %v8741_v16 = vpop.f32.mrb[90].mxu1 }
 0xa5c   : > { %9151 = vst.msk [vmem:[%s17507_s7 + $0x160] sm:$0xff] %vm9106_vm4, %v9028_v47  ;;  %v9031_v30 = vadd.f32 %v20088_v38, %v8741_v16  ;;  %v8743_v54 = vpop.f32.mrb[91].mxu1  ;;  %v20104_v38 = vld [vmem:[#allocation17_spill] sm:$0xff] }
 0xa5e   : > { %9152 = vst.msk [vmem:[%s17507_s7 + $0x168] sm:$0xff] %vm9106_vm4, %v9031_v30 }
 0xa61   : > { %v8746_v51 = vpop.f32.mrb[92].mxu1 }
 0xa62   : > { %v9036_v36 = vadd.f32 %v20089_v43, %v8746_v51  ;;  %v8748_v57 = vpop.f32.mrb[93].mxu1  ;;  %v20105_v43 = vld [vmem:[#allocation301_spill] sm:$0xff] }
 0xa63   : > { %v8749_v22 = vpop.f32.mrb[94].mxu1 }
 0xa64   : > { %9153 = vst.msk [vmem:[%s17507_s7 + $0x170] sm:$0xff] %vm9106_vm4, %v9036_v36  ;;  %v9039_v58 = vadd.f32 %v20090_v61, %v8749_v22  ;;  %v8751_v45 = vpop.f32.mrb[95].mxu1  ;;  %v20106_v61 = vld [vmem:[#allocation13_spill] sm:$0xff] }
 0xa66   : > { %9154 = vst.msk [vmem:[%s17507_s7 + $0x178] sm:$0xff] %vm9106_vm4, %v9039_v58 }
 0xa69   : > { %v8754_v20 = vpop.f32.mrb[96].mxu1 }
 0xa6a   : > { %v9044_v41 = vadd.f32 %v20091_v40, %v8754_v20  ;;  %v8756_v63 = vpop.f32.mrb[97].mxu1 }
 0xa6b   : > { %v8757_v18 = vpop.f32.mrb[98].mxu1 }
 0xa6c   : > { %9155 = vst.msk [vmem:[%s17507_s7 + $0x180] sm:$0xff] %vm9106_vm4, %v9044_v41  ;;  %v9047_v14 = vadd.f32 %v20092_v1, %v8757_v18  ;;  %v8759_v10 = vpop.f32.mrb[99].mxu1 }
 0xa6e   : > { %9156 = vst.msk [vmem:[%s17507_s7 + $0x188] sm:$0xff] %vm9106_vm4, %v9047_v14 }
 0xa71   : > { %v8762_v13 = vpop.f32.mrb[100].mxu1 }
 0xa72   : > { %v9052_v5 = vadd.f32 %v20093_v23, %v8762_v13  ;;  %v8764_v11 = vpop.f32.mrb[101].mxu1 }
 0xa73   : > { %v8765_v29 = vpop.f32.mrb[102].mxu1 }
 0xa74   : > { %9157 = vst.msk [vmem:[%s17507_s7 + $0x190] sm:$0xff] %vm9106_vm4, %v9052_v5  ;;  %v9055_v46 = vadd.f32 %v20094_v27, %v8765_v29  ;;  %v8767_v32 = vpop.f32.mrb[103].mxu1 }
 0xa76   : > { %9158 = vst.msk [vmem:[%s17507_s7 + $0x198] sm:$0xff] %vm9106_vm4, %v9055_v46 }
 0xa79   : > { %v8770_v53 = vpop.f32.mrb[104].mxu1 }
 0xa7a   : > { %v9060_v17 = vadd.f32 %v20095_v25, %v8770_v53  ;;  %v8772_v39 = vpop.f32.mrb[105].mxu1 }
 0xa7b   : > { %v8773_v6 = vpop.f32.mrb[106].mxu1 }
 0xa7c   : > { %9159 = vst.msk [vmem:[%s17507_s7 + $0x1a0] sm:$0xff] %vm9106_vm4, %v9060_v17  ;;  %v9063_v52 = vadd.f32 %v20096_v8, %v8773_v6  ;;  %v8775_v19 = vpop.f32.mrb[107].mxu1 }
 0xa7e   : > { %9160 = vst.msk [vmem:[%s17507_s7 + $0x1a8] sm:$0xff] %vm9106_vm4, %v9063_v52 }
 0xa81   : > { %v8778_v15 = vpop.f32.mrb[108].mxu1 }
 0xa82   : > { %v9068_v12 = vadd.f32 %v20097_v60, %v8778_v15  ;;  %v8780_v26 = vpop.f32.mrb[109].mxu1 }
 0xa83   : > { %v8781_v49 = vpop.f32.mrb[110].mxu1 }
 0xa84   : > { %9161 = vst.msk [vmem:[%s17507_s7 + $0x1b0] sm:$0xff] %vm9106_vm4, %v9068_v12  ;;  %v9071_v42 = vadd.f32 %v20098_v59, %v8781_v49  ;;  %v8783_v35 = vpop.f32.mrb[111].mxu1 }
 0xa86   : > { %9162 = vst.msk [vmem:[%s17507_s7 + $0x1b8] sm:$0xff] %vm9106_vm4, %v9071_v42 }
 0xa89   : > { %v8786_v50 = vpop.f32.mrb[112].mxu1 }
 0xa8a   : > { %v9076_v2 = vadd.f32 %v20099_v31, %v8786_v50  ;;  %v8788_v48 = vpop.f32.mrb[113].mxu1 }
 0xa8b   : > { %v8789_v7 = vpop.f32.mrb[114].mxu1 }
 0xa8c   : > { %9163 = vst.msk [vmem:[%s17507_s7 + $0x1c0] sm:$0xff] %vm9106_vm4, %v9076_v2  ;;  %v9079_v55 = vadd.f32 %v20100_v56, %v8789_v7  ;;  %v8791_v0 = vpop.f32.mrb[115].mxu1 }
 0xa8e   : > { %9164 = vst.msk [vmem:[%s17507_s7 + $0x1c8] sm:$0xff] %vm9106_vm4, %v9079_v55 }
 0xa91   : > { %v8794_v4 = vpop.f32.mrb[116].mxu1 }
 0xa92   : > { %v9084_v21 = vadd.f32 %v20101_v44, %v8794_v4  ;;  %v8796_v9 = vpop.f32.mrb[117].mxu1 }
 0xa93   : > { %v8797_v28 = vpop.f32.mrb[118].mxu1 }
 0xa94   : > { %9165 = vst.msk [vmem:[%s17507_s7 + $0x1d0] sm:$0xff] %vm9106_vm4, %v9084_v21  ;;  %v9087_v24 = vadd.f32 %v20102_v37, %v8797_v28  ;;  %v8799_v34 = vpop.f32.mrb[119].mxu1 }
 0xa96   : > { %9166 = vst.msk [vmem:[%s17507_s7 + $0x1d8] sm:$0xff] %vm9106_vm4, %v9087_v24 }
 0xa99   : > { %v8802_v3 = vpop.f32.mrb[120].mxu1 }
 0xa9a   : > { %v9092_v47 = vadd.f32 %v20103_v62, %v8802_v3  ;;  %v8804_v33 = vpop.f32.mrb[121].mxu1 }
 0xa9b   : > { %v8805_v16 = vpop.f32.mrb[122].mxu1 }
 0xa9c   : > { %9167 = vst.msk [vmem:[%s17507_s7 + $0x1e0] sm:$0xff] %vm9106_vm4, %v9092_v47  ;;  %v9095_v30 = vadd.f32 %v20104_v38, %v8805_v16  ;;  %v8807_v54 = vpop.f32.mrb[123].mxu1 }
 0xa9e   : > { %9168 = vst.msk [vmem:[%s17507_s7 + $0x1e8] sm:$0xff] %vm9106_vm4, %v9095_v30 }
 0xaa1   : > { %v8810_v51 = vpop.f32.mrb[124].mxu1 }
 0xaa2   : > { %v9100_v36 = vadd.f32 %v20105_v43, %v8810_v51  ;;  %v8812_v57 = vpop.f32.mrb[125].mxu1 }
 0xaa3   : > { %v8813_v22 = vpop.f32.mrb[126].mxu1 }
 0xaa4   : > { %9169 = vst.msk [vmem:[%s17507_s7 + $0x1f0] sm:$0xff] %vm9106_vm4, %v9100_v36  ;;  %v9103_v58 = vadd.f32 %v20106_v61, %v8813_v22  ;;  %v8815_v45 = vpop.f32.mrb[127].mxu1 }
 0xaa6   : > { %9170 = vst.msk [vmem:[%s17507_s7 + $0x1f8] sm:$0xff] %vm9106_vm4, %v9103_v58 }
 0xaa7 PF: > { %s15_s18 = sadd.s32 1, %s12053_s18  }
 0xaa8   : > { %p12_p4 = scmp.ge.s32.totalorder %s15_s18, 4  }
 0xaaa   :  { %14 = sbr.rel (!%p12_p4) target bundleno = 1 (0x1), region = 73 }

</bundles_post_ra>
